<compile_context>
chip_gen: v7x
topology: tpu7x:2x2x1
jax: 0.10.0
libtpu: 0.0.40
codegen_flags: <defaults>
</compile_context>

<pallas_src>
import functools
import math

import jax
import jax.numpy as jnp
from jax import lax
from jax.experimental import pallas as pl
from jax.experimental.pallas import tpu as pltpu

BN_EPS = 1e-5
LANES = 128


def _round_up(x, m):
    return (x + m - 1) // m * m


def _vmem_budgets():
    """Generation-aware VMEM budgets (physical VMEM differs: 128 MiB v5e/v6e, 64 MiB v7x)."""
    try:
        phys = int(pltpu.get_tpu_info().vmem_capacity_bytes)
    except Exception:
        phys = 64 * 1024 * 1024                      # conservative (v7x per-TC)
    tile_budget = min(phys // 6, 16 * 1024 * 1024)   # per-grid-step working set
    vmem_limit = (phys * 3) // 4                     # scoped limit for the kernels
    return tile_budget, vmem_limit


def _pick_row_tile(N, H, W, Cp, itemsize, tile_budget):
    """Largest H-divisor row tile whose working set fits the budget.

    th must be a multiple of 8 (sublane alignment) or equal to H.  th is only
    shrunk below H when the grid would otherwise have < 2 steps (megacore)."""
    dt = itemsize
    weight_bytes = 2 * 9 * Cp * Cp * dt

    def est(th):
        b = 2 * (th + 2) * W * Cp * (dt + dt)        # pipelined y/x input blocks (x2 buf)
        b += 2 * th * W * Cp * dt                    # output block (x2 buf)
        b += (th + 2) * (W + 2) * Cp * dt            # zbuf scratch
        b += th * W * Cp * (3 * dt + 4)              # strip + f32 accumulator
        b += th * W * Cp * 8                         # f32 transform temporaries
        return b + weight_bytes

    cands = [d for d in range(1, H + 1) if H % d == 0 and (d % 8 == 0 or d == H)]
    fits = [d for d in cands if est(d) <= tile_budget]
    if not fits:
        return min(cands)
    th = max(fits)
    if N * (H // th) < 2:                            # expose >=2 grid steps only if needed
        alt = [d for d in fits if N * (H // d) >= 2]
        if alt:
            th = max(alt)
    return th


def _conv3x3_kernel(*refs, fused, gh):
    """One (batch, row-tile) grid step.

    fused=False : conv input z = x                     (first application)
    fused=True  : conv input z = x + relu(y*scale+shift)   (recurrent steps)

    Emits the conv+bias output tile (storage dtype) and per-tile centered BN
    statistics [mean, M2] for a Chan/Welford merge outside the kernel.
    """
    if fused:
        (y_mid, y_up, y_dn, x_mid, x_up, x_dn, sc_ref, sh_ref,
         w_ref, b_ref, y_out, stats_out, zbuf) = refs
    else:
        (x_mid, x_up, x_dn, w_ref, b_ref, y_out, stats_out, zbuf) = refs

    i = pl.program_id(1)
    _, th, W, Cp = y_out.shape
    M = th * W
    mdt = w_ref.dtype
    f32 = jnp.float32

    if fused:
        sc = sc_ref[...].reshape(1, 1, Cp)
        sh = sh_ref[...].reshape(1, 1, Cp)

        def conv_in(y_r, x_r):
            return x_r[0].astype(f32) + jnp.maximum(
                y_r[0].astype(f32) * sc + sh, 0.0)

        z_mid = conv_in(y_mid, x_mid)                # (th, W, Cp)
        z_up = conv_in(y_up, x_up)                   # (1, W, Cp)
        z_dn = conv_in(y_dn, x_dn)                   # (1, W, Cp)
    else:
        z_mid = x_mid[0].astype(f32)
        z_up = x_up[0].astype(f32)
        z_dn = x_dn[0].astype(f32)

    # Out-of-image halo rows are zero (SAME padding applies AFTER the transform).
    z_up = z_up * (i > 0).astype(f32)
    z_dn = z_dn * (i < gh - 1).astype(f32)

    # Assemble the column-padded conv-input slab in VMEM (matmul dtype).
    zbuf[0:1, 1:W + 1, :] = z_up.astype(mdt)
    zbuf[1:th + 1, 1:W + 1, :] = z_mid.astype(mdt)
    zbuf[th + 1:th + 2, 1:W + 1, :] = z_dn.astype(mdt)
    zcol = jnp.zeros((th + 2, 1, Cp), mdt)
    zbuf[:, 0:1, :] = zcol
    zbuf[:, W + 1:W + 2, :] = zcol

    # 3x3 conv = 3 MXU matmuls, one per kernel row, K = 3*Cp (dx folded into K).
    acc = jnp.broadcast_to(b_ref[...], (M, Cp)).astype(f32)
    for dy in range(3):
        rows = zbuf[dy:dy + th, :, :]                              # (th, W+2, Cp)
        strip = jnp.concatenate(
            [rows[:, 0:W, :], rows[:, 1:W + 1, :], rows[:, 2:W + 2, :]],
            axis=-1).reshape(M, 3 * Cp)
        acc = acc + jnp.dot(strip, w_ref[dy], preferred_element_type=f32)

    y_out[...] = acc.reshape(1, th, W, Cp).astype(y_out.dtype)

    # Per-tile centered statistics (numerically robust; merged outside).
    mean_t = jnp.sum(acc, axis=0, keepdims=True) * (1.0 / M)       # (1, Cp)
    d = acc - mean_t
    m2_t = jnp.sum(d * d, axis=0, keepdims=True)                   # (1, Cp)
    stats_out[...] = jnp.concatenate([mean_t, m2_t], axis=0).reshape(1, 1, 2, Cp)


def _conv_pass(x_in, y_prev, scale, shift, w9, b_p, th, fused, vmem_limit):
    N, H, W, Cp = x_in.shape
    GH = H // th
    mdt = w9.dtype

    mid = pl.BlockSpec((1, th, W, Cp), lambda n, i: (n, i, 0, 0))
    up = pl.BlockSpec((1, 1, W, Cp),
                      lambda n, i: (n, jnp.maximum(i * th - 1, 0), 0, 0))
    dn = pl.BlockSpec((1, 1, W, Cp),
                      lambda n, i: (n, jnp.minimum(i * th + th, H - 1), 0, 0))
    vec = pl.BlockSpec((1, Cp), lambda n, i: (0, 0))
    wsp = pl.BlockSpec((3, 3 * Cp, Cp), lambda n, i: (0, 0, 0))

    if fused:
        in_specs = [mid, up, dn, mid, up, dn, vec, vec, wsp, vec]
        operands = (y_prev, y_prev, y_prev, x_in, x_in, x_in, scale, shift, w9, b_p)
    else:
        in_specs = [mid, up, dn, wsp, vec]
        operands = (x_in, x_in, x_in, w9, b_p)

    return pl.pallas_call(
        functools.partial(_conv3x3_kernel, fused=fused, gh=GH),
        out_shape=(
            jax.ShapeDtypeStruct((N, H, W, Cp), mdt),              # conv+bias output
            jax.ShapeDtypeStruct((N, GH, 2, Cp), jnp.float32),     # [mean, M2] per tile
        ),
        grid_spec=pltpu.PrefetchScalarGridSpec(
            num_scalar_prefetch=0,
            grid=(N, GH),
            in_specs=in_specs,
            out_specs=(
                mid,
                pl.BlockSpec((1, 1, 2, Cp), lambda n, i: (n, i, 0, 0)),
            ),
            scratch_shapes=[pltpu.VMEM((th + 2, W + 2, Cp), mdt)],
        ),
        compiler_params=pltpu.CompilerParams(
            dimension_semantics=("parallel", "parallel"),
            vmem_limit_bytes=vmem_limit),
    )(*operands)


def _bn_affine(stats, gamma_p, beta_p, tile_count, total_count):
    """Chan/Welford merge of per-tile (mean, M2) -> BN scale/shift (f32)."""
    tm = stats[:, :, 0, :]                                         # (N, GH, Cp)
    m2 = stats[:, :, 1, :]
    gmean = jnp.mean(tm, axis=(0, 1))                              # equal tile counts
    diff = tm - gmean
    gm2 = jnp.sum(m2, axis=(0, 1)) + tile_count * jnp.sum(diff * diff, axis=(0, 1))
    var = gm2 / total_count                                        # biased variance
    inv = lax.rsqrt(var + BN_EPS)
    scale = gamma_p * inv
    shift = beta_p - gmean * scale
    return scale.reshape(1, -1), shift.reshape(1, -1)


def _bn_relu_kernel(y_ref, scale_ref, shift_ref, o_ref):
    Cp = o_ref.shape[-1]
    sc = scale_ref[...].reshape(1, 1, 1, Cp)
    sh = shift_ref[...].reshape(1, 1, 1, Cp)
    o_ref[...] = jnp.maximum(y_ref[...].astype(jnp.float32) * sc + sh, 0.0)


def _bn_relu_apply(y, scale, shift, th, vmem_limit):
    N, H, W, Cp = y.shape
    GH = H // th
    mid = pl.BlockSpec((1, th, W, Cp), lambda n, i: (n, i, 0, 0))
    vec = pl.BlockSpec((1, Cp), lambda n, i: (0, 0))
    return pl.pallas_call(
        _bn_relu_kernel,
        out_shape=jax.ShapeDtypeStruct((N, H, W, Cp), jnp.float32),
        grid_spec=pltpu.PrefetchScalarGridSpec(
            num_scalar_prefetch=0,
            grid=(N, GH),
            in_specs=[mid, vec, vec],
            out_specs=mid,
        ),
        compiler_params=pltpu.CompilerParams(
            dimension_semantics=("parallel", "parallel"),
            vmem_limit_bytes=vmem_limit),
    )(y, scale, shift)


@functools.partial(jax.jit, static_argnames=("t", "matmul_dtype"))
def recurrent_block_forward(x_nchw, params, t=2, matmul_dtype=jnp.bfloat16):
    """Pallas implementation of Recurrent_block.forward (NCHW in, NCHW out)."""
    x = jnp.transpose(x_nchw, (0, 2, 3, 1)).astype(jnp.float32)    # NHWC
    N, H, W, C = x.shape
    Cp = _round_up(C, LANES)
    itemsize = jnp.dtype(matmul_dtype).itemsize
    tile_budget, vmem_limit = _vmem_budgets()
    th = _pick_row_tile(N, H, W, Cp, itemsize, tile_budget)

    # Lane-dense channel padding; operand dtypes fixed once (no per-step casts).
    x_in = jnp.pad(x, ((0, 0), (0, 0), (0, 0), (0, Cp - C))).astype(matmul_dtype)
    w = jnp.pad(params["w"], ((0, 0), (0, 0), (0, Cp - C), (0, Cp - C)))
    w9 = w.reshape(3, 3 * Cp, Cp).astype(matmul_dtype)   # [dy, dx*Cp + cin, cout]
    b_p = jnp.pad(params["b"], (0, Cp - C)).reshape(1, Cp).astype(jnp.float32)
    gamma_p = jnp.pad(params["gamma"], (0, Cp - C))
    beta_p = jnp.pad(params["beta"], (0, Cp - C))

    tile_count = float(th * W)
    total_count = float(N * H * W)

    # Pass 0: y0 = conv(x);  pass k>0: yk = conv(x + relu(BN(y_{k-1})))   (fused)
    # Final: out = relu(BN(y_t)).
    y = scale = shift = None
    for k in range(t + 1):
        y, stats = _conv_pass(x_in, y, scale, shift, w9, b_p, th,
                              fused=(k > 0), vmem_limit=vmem_limit)
        scale, shift = _bn_affine(stats, gamma_p, beta_p, tile_count, total_count)
    out = _bn_relu_apply(y, scale, shift, th, vmem_limit)
    return jnp.transpose(out[..., :C], (0, 3, 1, 2))               # NCHW


def init_params(key, ch):
    """Matches nn.Conv2d(ch, ch, 3) + fresh nn.BatchNorm2d(ch) initialization."""
    k1, k2 = jax.random.split(key)
    bound = 1.0 / math.sqrt(ch * 9)
    w_oihw = jax.random.uniform(k1, (ch, ch, 3, 3), jnp.float32, -bound, bound)
    return {
        "w": jnp.transpose(w_oihw, (2, 3, 1, 0)),   # HWIO
        "b": jax.random.uniform(k2, (ch,), jnp.float32, -bound, bound),
        "gamma": jnp.ones((ch,), jnp.float32),
        "beta": jnp.zeros((ch,), jnp.float32),
    }


def _reference(x_nchw, params, t=2):
    """Pure-JAX reference (XLA conv) mirroring the PyTorch loop exactly."""
    w, b, g, beta = params["w"], params["b"], params["gamma"], params["beta"]

    def cbr(z):
        y = jax.lax.conv_general_dilated(
            z, w, (1, 1), ((1, 1), (1, 1)),
            dimension_numbers=("NHWC", "HWIO", "NHWC")) + b
        m = jnp.mean(y, axis=(0, 1, 2), keepdims=True)
        v = jnp.mean(jnp.square(y - m), axis=(0, 1, 2), keepdims=True)
        return jnp.maximum((y - m) * jax.lax.rsqrt(v + BN_EPS) * g + beta, 0.0)

    z = jnp.transpose(x_nchw, (0, 2, 3, 1))
    for i in range(t):
        if i == 0:
            x1 = cbr(z)
        x1 = cbr(z + x1)
    return jnp.transpose(x1, (0, 3, 1, 2))


if __name__ == "__main__":
    key = jax.random.PRNGKey(0)
    kx, kp = jax.random.split(key)

    N, CH, H, W, T = 2, 8, 16, 16, 2
    x = jax.random.normal(kx, (N, CH, H, W), jnp.float32)   # NCHW like PyTorch
    params = init_params(kp, CH)

    ref = jax.block_until_ready(_reference(x, params, t=T))

    # Strict correctness check on the f32 MXU path.
    out32 = jax.block_until_ready(
        recurrent_block_forward(x, params, t=T, matmul_dtype=jnp.float32))
    assert out32.shape == (N, CH, H, W), out32.shape
    err32 = float(jnp.max(jnp.abs(out32 - ref)))
    assert err32 < 2e-3, f"f32 path max abs err {err32}"

    # Default fast path: bf16 MXU operands / bf16 intermediate storage, f32 accum.
    out16 = jax.block_until_ready(recurrent_block_forward(x, params, t=T))
    assert out16.shape == (N, CH, H, W), out16.shape
    err16 = float(jnp.max(jnp.abs(out16 - ref)))
    assert err16 < 8e-2, f"bf16 path max abs err {err16}"

    print("KERNEL_OK")
</pallas_src>

<mosaic_0001>
module attributes {stable_mosaic.version = 11 : i64} {
  func.func @_conv3x3_kernel(%arg0: i32, %arg1: i32, %arg2: memref<1x16x16x128xf32, #tpu.memory_space<vmem>>, %arg3: memref<1x1x16x128xf32, #tpu.memory_space<vmem>>, %arg4: memref<1x1x16x128xf32, #tpu.memory_space<vmem>>, %arg5: memref<3x384x128xf32, #tpu.memory_space<vmem>>, %arg6: memref<1x128xf32, #tpu.memory_space<vmem>>, %arg7: memref<1x16x16x128xf32, #tpu.memory_space<vmem>>, %arg8: memref<1x1x2x128xf32, #tpu.memory_space<vmem>>, %arg9: memref<18x18x128xf32, #tpu.memory_space<vmem>>) attributes {dimension_semantics = [#tpu.dimension_semantics<parallel>, #tpu.dimension_semantics<parallel>], iteration_bounds = array<i64: 2, 1>, scalar_prefetch = 0 : i64, scratch_operands = 1 : i64, tpu.core_type = #tpu.core_type<tc>, window_params = [{transform_indices = @transform_0, window_bounds = array<i64: 1, 16, 16, 128>}, {transform_indices = @transform_1, window_bounds = array<i64: 1, 1, 16, 128>}, {transform_indices = @transform_2, window_bounds = array<i64: 1, 1, 16, 128>}, {pipeline_mode = #tpu.pipeline_mode<synchronous>, transform_indices = @transform_3, window_bounds = array<i64: 3, 384, 128>}, {pipeline_mode = #tpu.pipeline_mode<synchronous>, transform_indices = @transform_4, window_bounds = array<i64: 1, 128>}, {transform_indices = @transform_5, window_bounds = array<i64: 1, 16, 16, 128>}, {transform_indices = @transform_6, window_bounds = array<i64: 1, 1, 2, 128>}]} {
    %c0 = arith.constant 0 : index
    %c0_0 = arith.constant 0 : index
    %c0_1 = arith.constant 0 : index
    %c0_2 = arith.constant 0 : index
    %0 = vector.load %arg2[%c0, %c0_0, %c0_1, %c0_2] : memref<1x16x16x128xf32, #tpu.memory_space<vmem>>, vector<1x16x16x128xf32>
    %1 = vector.shape_cast %0 : vector<1x16x16x128xf32> to vector<16x16x128xf32>
    %c0_3 = arith.constant 0 : index
    %c0_4 = arith.constant 0 : index
    %c0_5 = arith.constant 0 : index
    %c0_6 = arith.constant 0 : index
    %2 = vector.load %arg3[%c0_3, %c0_4, %c0_5, %c0_6] : memref<1x1x16x128xf32, #tpu.memory_space<vmem>>, vector<1x1x16x128xf32>
    %3 = vector.shape_cast %2 : vector<1x1x16x128xf32> to vector<1x16x128xf32>
    %c0_7 = arith.constant 0 : index
    %c0_8 = arith.constant 0 : index
    %c0_9 = arith.constant 0 : index
    %c0_10 = arith.constant 0 : index
    %4 = vector.load %arg4[%c0_7, %c0_8, %c0_9, %c0_10] : memref<1x1x16x128xf32, #tpu.memory_space<vmem>>, vector<1x1x16x128xf32>
    %5 = vector.shape_cast %4 : vector<1x1x16x128xf32> to vector<1x16x128xf32>
    %c0_i32 = arith.constant 0 : i32
    %6 = arith.cmpi sgt, %arg1, %c0_i32 : i32
    %7 = arith.extui %6 : i1 to i32
    %8 = arith.sitofp %7 : i32 to f32
    %9 = vector.broadcast %8 : f32 to vector<1x16x128xf32>
    %10 = arith.mulf %3, %9 : vector<1x16x128xf32>
    %c0_i32_11 = arith.constant 0 : i32
    %11 = arith.cmpi slt, %arg1, %c0_i32_11 : i32
    %12 = arith.extui %11 : i1 to i32
    %13 = arith.sitofp %12 : i32 to f32
    %14 = vector.broadcast %13 : f32 to vector<1x16x128xf32>
    %15 = arith.mulf %5, %14 : vector<1x16x128xf32>
    %c0_12 = arith.constant 0 : index
    %c1 = arith.constant 1 : index
    %c0_13 = arith.constant 0 : index
    %16 = vector.load %arg9[%c0_12, %c1, %c0_13] : memref<18x18x128xf32, #tpu.memory_space<vmem>>, vector<1x16x128xf32>
    tpu.vector_store %arg9[%c0_12, %c1, %c0_13], %10 {strides = array<i32>} : memref<18x18x128xf32, #tpu.memory_space<vmem>>, vector<1x16x128xf32>,
    %c1_14 = arith.constant 1 : index
    %c1_15 = arith.constant 1 : index
    %c0_16 = arith.constant 0 : index
    %17 = vector.load %arg9[%c1_14, %c1_15, %c0_16] : memref<18x18x128xf32, #tpu.memory_space<vmem>>, vector<16x16x128xf32>
    tpu.vector_store %arg9[%c1_14, %c1_15, %c0_16], %1 {strides = array<i32>} : memref<18x18x128xf32, #tpu.memory_space<vmem>>, vector<16x16x128xf32>,
    %c17 = arith.constant 17 : index
    %c1_17 = arith.constant 1 : index
    %c0_18 = arith.constant 0 : index
    %18 = vector.load %arg9[%c17, %c1_17, %c0_18] : memref<18x18x128xf32, #tpu.memory_space<vmem>>, vector<1x16x128xf32>
    tpu.vector_store %arg9[%c17, %c1_17, %c0_18], %15 {strides = array<i32>} : memref<18x18x128xf32, #tpu.memory_space<vmem>>, vector<1x16x128xf32>,
    %cst = arith.constant 0.000000e+00 : f32
    %19 = vector.broadcast %cst : f32 to vector<18x1x128xf32>
    %c0_19 = arith.constant 0 : index
    %c0_20 = arith.constant 0 : index
    %c0_21 = arith.constant 0 : index
    %20 = vector.load %arg9[%c0_19, %c0_20, %c0_21] : memref<18x18x128xf32, #tpu.memory_space<vmem>>, vector<18x1x128xf32>
    tpu.vector_store %arg9[%c0_19, %c0_20, %c0_21], %19 {strides = array<i32>} : memref<18x18x128xf32, #tpu.memory_space<vmem>>, vector<18x1x128xf32>,
    %c0_22 = arith.constant 0 : index
    %c17_23 = arith.constant 17 : index
    %c0_24 = arith.constant 0 : index
    %21 = vector.load %arg9[%c0_22, %c17_23, %c0_24] : memref<18x18x128xf32, #tpu.memory_space<vmem>>, vector<18x1x128xf32>
    tpu.vector_store %arg9[%c0_22, %c17_23, %c0_24], %19 {strides = array<i32>} : memref<18x18x128xf32, #tpu.memory_space<vmem>>, vector<18x1x128xf32>,
    %c0_25 = arith.constant 0 : index
    %c0_26 = arith.constant 0 : index
    %22 = vector.load %arg6[%c0_25, %c0_26] : memref<1x128xf32, #tpu.memory_space<vmem>>, vector<1x128xf32>
    %23 = vector.shape_cast %22 : vector<1x128xf32> to vector<1x128xf32>
    %24 = vector.broadcast %23 : vector<1x128xf32> to vector<256x128xf32>
    %c0_27 = arith.constant 0 : index
    %c0_28 = arith.constant 0 : index
    %c0_29 = arith.constant 0 : index
    %25 = vector.load %arg9[%c0_27, %c0_28, %c0_29] : memref<18x18x128xf32, #tpu.memory_space<vmem>>, vector<16x18x128xf32>
    %26 = vector.extract_strided_slice %25 {offsets = [0, 0, 0], sizes = [16, 16, 128], strides = [1, 1, 1]} : vector<16x18x128xf32> to vector<16x16x128xf32>
    %27 = vector.extract_strided_slice %25 {offsets = [0, 1, 0], sizes = [16, 16, 128], strides = [1, 1, 1]} : vector<16x18x128xf32> to vector<16x16x128xf32>
    %28 = vector.extract_strided_slice %25 {offsets = [0, 2, 0], sizes = [16, 16, 128], strides = [1, 1, 1]} : vector<16x18x128xf32> to vector<16x16x128xf32>
    %29 = tpu.concatenate %26, %27, %28 in 2 : vector<16x16x128xf32>, vector<16x16x128xf32>, vector<16x16x128xf32> -> vector<16x16x384xf32>
    %30 = vector.shape_cast %29 : vector<16x16x384xf32> to vector<256x384xf32>
    %c0_30 = arith.constant 0 : index
    %c0_31 = arith.constant 0 : index
    %c0_32 = arith.constant 0 : index
    %31 = vector.load %arg5[%c0_30, %c0_31, %c0_32] : memref<3x384x128xf32, #tpu.memory_space<vmem>>, vector<1x384x128xf32>
    %32 = vector.shape_cast %31 : vector<1x384x128xf32> to vector<384x128xf32>
    %cst_33 = arith.constant dense<0.000000e+00> : vector<256x128xf32>
    %33 = tpu.matmul %30, %32, %cst_33 {dimension_numbers = #tpu.dot_dimension_numbers<[1], [0], [0], [1], [0, 0, 1, 1], [], []>} : vector<256x384xf32>, vector<384x128xf32>, vector<256x128xf32> -> vector<256x128xf32>
    %34 = arith.addf %24, %33 : vector<256x128xf32>
    %c1_34 = arith.constant 1 : index
    %c0_35 = arith.constant 0 : index
    %c0_36 = arith.constant 0 : index
    %35 = vector.load %arg9[%c1_34, %c0_35, %c0_36] : memref<18x18x128xf32, #tpu.memory_space<vmem>>, vector<16x18x128xf32>
    %36 = vector.extract_strided_slice %35 {offsets = [0, 0, 0], sizes = [16, 16, 128], strides = [1, 1, 1]} : vector<16x18x128xf32> to vector<16x16x128xf32>
    %37 = vector.extract_strided_slice %35 {offsets = [0, 1, 0], sizes = [16, 16, 128], strides = [1, 1, 1]} : vector<16x18x128xf32> to vector<16x16x128xf32>
    %38 = vector.extract_strided_slice %35 {offsets = [0, 2, 0], sizes = [16, 16, 128], strides = [1, 1, 1]} : vector<16x18x128xf32> to vector<16x16x128xf32>
    %39 = tpu.concatenate %36, %37, %38 in 2 : vector<16x16x128xf32>, vector<16x16x128xf32>, vector<16x16x128xf32> -> vector<16x16x384xf32>
    %40 = vector.shape_cast %39 : vector<16x16x384xf32> to vector<256x384xf32>
    %c1_37 = arith.constant 1 : index
    %c0_38 = arith.constant 0 : index
    %c0_39 = arith.constant 0 : index
    %41 = vector.load %arg5[%c1_37, %c0_38, %c0_39] : memref<3x384x128xf32, #tpu.memory_space<vmem>>, vector<1x384x128xf32>
    %42 = vector.shape_cast %41 : vector<1x384x128xf32> to vector<384x128xf32>
    %cst_40 = arith.constant dense<0.000000e+00> : vector<256x128xf32>
    %43 = tpu.matmul %40, %42, %cst_40 {dimension_numbers = #tpu.dot_dimension_numbers<[1], [0], [0], [1], [0, 0, 1, 1], [], []>} : vector<256x384xf32>, vector<384x128xf32>, vector<256x128xf32> -> vector<256x128xf32>
    %44 = arith.addf %34, %43 : vector<256x128xf32>
    %c2 = arith.constant 2 : index
    %c0_41 = arith.constant 0 : index
    %c0_42 = arith.constant 0 : index
    %45 = vector.load %arg9[%c2, %c0_41, %c0_42] : memref<18x18x128xf32, #tpu.memory_space<vmem>>, vector<16x18x128xf32>
    %46 = vector.extract_strided_slice %45 {offsets = [0, 0, 0], sizes = [16, 16, 128], strides = [1, 1, 1]} : vector<16x18x128xf32> to vector<16x16x128xf32>
    %47 = vector.extract_strided_slice %45 {offsets = [0, 1, 0], sizes = [16, 16, 128], strides = [1, 1, 1]} : vector<16x18x128xf32> to vector<16x16x128xf32>
    %48 = vector.extract_strided_slice %45 {offsets = [0, 2, 0], sizes = [16, 16, 128], strides = [1, 1, 1]} : vector<16x18x128xf32> to vector<16x16x128xf32>
    %49 = tpu.concatenate %46, %47, %48 in 2 : vector<16x16x128xf32>, vector<16x16x128xf32>, vector<16x16x128xf32> -> vector<16x16x384xf32>
    %50 = vector.shape_cast %49 : vector<16x16x384xf32> to vector<256x384xf32>
    %c2_43 = arith.constant 2 : index
    %c0_44 = arith.constant 0 : index
    %c0_45 = arith.constant 0 : index
    %51 = vector.load %arg5[%c2_43, %c0_44, %c0_45] : memref<3x384x128xf32, #tpu.memory_space<vmem>>, vector<1x384x128xf32>
    %52 = vector.shape_cast %51 : vector<1x384x128xf32> to vector<384x128xf32>
    %cst_46 = arith.constant dense<0.000000e+00> : vector<256x128xf32>
    %53 = tpu.matmul %50, %52, %cst_46 {dimension_numbers = #tpu.dot_dimension_numbers<[1], [0], [0], [1], [0, 0, 1, 1], [], []>} : vector<256x384xf32>, vector<384x128xf32>, vector<256x128xf32> -> vector<256x128xf32>
    %54 = arith.addf %44, %53 : vector<256x128xf32>
    %55 = vector.shape_cast %54 : vector<256x128xf32> to vector<1x16x16x128xf32>
    %c0_47 = arith.constant 0 : index
    %c0_48 = arith.constant 0 : index
    %c0_49 = arith.constant 0 : index
    %c0_50 = arith.constant 0 : index
    %56 = vector.load %arg7[%c0_47, %c0_48, %c0_49, %c0_50] : memref<1x16x16x128xf32, #tpu.memory_space<vmem>>, vector<1x16x16x128xf32>
    tpu.vector_store %arg7[%c0_47, %c0_48, %c0_49, %c0_50], %55 {strides = array<i32>} : memref<1x16x16x128xf32, #tpu.memory_space<vmem>>, vector<1x16x16x128xf32>,
    %cst_51 = arith.constant dense<0.000000e+00> : vector<128xf32>
    %57 = vector.multi_reduction <add>, %54, %cst_51 [0] : vector<256x128xf32> to vector<128xf32>
    %58 = vector.shape_cast %57 : vector<128xf32> to vector<1x128xf32>
    %cst_52 = arith.constant 3.906250e-03 : f32
    %59 = vector.broadcast %cst_52 : f32 to vector<1x128xf32>
    %60 = arith.mulf %58, %59 : vector<1x128xf32>
    %61 = vector.broadcast %60 : vector<1x128xf32> to vector<256x128xf32>
    %62 = arith.subf %54, %61 : vector<256x128xf32>
    %63 = arith.mulf %62, %62 : vector<256x128xf32>
    %cst_53 = arith.constant dense<0.000000e+00> : vector<128xf32>
    %64 = vector.multi_reduction <add>, %63, %cst_53 [0] : vector<256x128xf32> to vector<128xf32>
    %65 = vector.shape_cast %64 : vector<128xf32> to vector<1x128xf32>
    %66 = tpu.concatenate %60, %65 in 0 : vector<1x128xf32>, vector<1x128xf32> -> vector<2x128xf32>
    %67 = vector.shape_cast %66 : vector<2x128xf32> to vector<1x1x2x128xf32>
    %c0_54 = arith.constant 0 : index
    %c0_55 = arith.constant 0 : index
    %c0_56 = arith.constant 0 : index
    %c0_57 = arith.constant 0 : index
    %68 = vector.load %arg8[%c0_54, %c0_55, %c0_56, %c0_57] : memref<1x1x2x128xf32, #tpu.memory_space<vmem>>, vector<1x1x2x128xf32>
    tpu.vector_store %arg8[%c0_54, %c0_55, %c0_56, %c0_57], %67 {strides = array<i32>} : memref<1x1x2x128xf32, #tpu.memory_space<vmem>>, vector<1x1x2x128xf32>,
    return
  }
  func.func @transform_0(%arg0: i32, %arg1: i32) -> (i32, i32, i32, i32) {
    %c0_i32 = arith.constant 0 : i32
    %c0_i32_0 = arith.constant 0 : i32
    %c0_i32_1 = arith.constant 0 : i32
    return %arg0, %arg1, %c0_i32, %c0_i32_0 : i32, i32, i32, i32
  }
  func.func @transform_1(%arg0: i32, %arg1: i32) -> (i32, i32, i32, i32) {
    %c16_i32 = arith.constant 16 : i32
    %0 = arith.muli %arg1, %c16_i32 : i32
    %c1_i32 = arith.constant 1 : i32
    %1 = arith.subi %0, %c1_i32 : i32
    %c0_i32 = arith.constant 0 : i32
    %2 = arith.maxsi %1, %c0_i32 : i32
    %c0_i32_0 = arith.constant 0 : i32
    %c0_i32_1 = arith.constant 0 : i32
    %c0_i32_2 = arith.constant 0 : i32
    return %arg0, %2, %c0_i32_0, %c0_i32_1 : i32, i32, i32, i32
  }
  func.func @transform_2(%arg0: i32, %arg1: i32) -> (i32, i32, i32, i32) {
    %c16_i32 = arith.constant 16 : i32
    %0 = arith.muli %arg1, %c16_i32 : i32
    %c16_i32_0 = arith.constant 16 : i32
    %1 = arith.addi %0, %c16_i32_0 : i32
    %c15_i32 = arith.constant 15 : i32
    %2 = arith.minsi %1, %c15_i32 : i32
    %c0_i32 = arith.constant 0 : i32
    %c0_i32_1 = arith.constant 0 : i32
    %c0_i32_2 = arith.constant 0 : i32
    return %arg0, %2, %c0_i32, %c0_i32_1 : i32, i32, i32, i32
  }
  func.func @transform_3(%arg0: i32, %arg1: i32) -> (i32, i32, i32) {
    %c0_i32 = arith.constant 0 : i32
    %c0_i32_0 = arith.constant 0 : i32
    %c0_i32_1 = arith.constant 0 : i32
    %c0_i32_2 = arith.constant 0 : i32
    return %c0_i32, %c0_i32_0, %c0_i32_1 : i32, i32, i32
  }
  func.func @transform_4(%arg0: i32, %arg1: i32) -> (i32, i32) {
    %c0_i32 = arith.constant 0 : i32
    %c0_i32_0 = arith.constant 0 : i32
    %c0_i32_1 = arith.constant 0 : i32
    return %c0_i32, %c0_i32_0 : i32, i32
  }
  func.func @transform_5(%arg0: i32, %arg1: i32) -> (i32, i32, i32, i32) {
    %c0_i32 = arith.constant 0 : i32
    %c0_i32_0 = arith.constant 0 : i32
    %c0_i32_1 = arith.constant 0 : i32
    return %arg0, %arg1, %c0_i32, %c0_i32_0 : i32, i32, i32, i32
  }
  func.func @transform_6(%arg0: i32, %arg1: i32) -> (i32, i32, i32, i32) {
    %c0_i32 = arith.constant 0 : i32
    %c0_i32_0 = arith.constant 0 : i32
    %c0_i32_1 = arith.constant 0 : i32
    return %arg0, %arg1, %c0_i32, %c0_i32_0 : i32, i32, i32, i32
  }
}

module attributes {stable_mosaic.version = 11 : i64} {
  func.func @_bn_relu_kernel(%arg0: i32, %arg1: i32, %arg2: memref<1x16x16x128xf32, #tpu.memory_space<vmem>>, %arg3: memref<1x128xf32, #tpu.memory_space<vmem>>, %arg4: memref<1x128xf32, #tpu.memory_space<vmem>>, %arg5: memref<1x16x16x128xf32, #tpu.memory_space<vmem>>) attributes {dimension_semantics = [#tpu.dimension_semantics<parallel>, #tpu.dimension_semantics<parallel>], iteration_bounds = array<i64: 2, 1>, scalar_prefetch = 0 : i64, scratch_operands = 0 : i64, tpu.core_type = #tpu.core_type<tc>, window_params = [{transform_indices = @transform_0, window_bounds = array<i64: 1, 16, 16, 128>}, {pipeline_mode = #tpu.pipeline_mode<synchronous>, transform_indices = @transform_1, window_bounds = array<i64: 1, 128>}, {pipeline_mode = #tpu.pipeline_mode<synchronous>, transform_indices = @transform_2, window_bounds = array<i64: 1, 128>}, {transform_indices = @transform_3, window_bounds = array<i64: 1, 16, 16, 128>}]} {
    %c0 = arith.constant 0 : index
    %c0_0 = arith.constant 0 : index
    %0 = vector.load %arg3[%c0, %c0_0] : memref<1x128xf32, #tpu.memory_space<vmem>>, vector<1x128xf32>
    %1 = vector.shape_cast %0 : vector<1x128xf32> to vector<1x1x1x128xf32>
    %c0_1 = arith.constant 0 : index
    %c0_2 = arith.constant 0 : index
    %2 = vector.load %arg4[%c0_1, %c0_2] : memref<1x128xf32, #tpu.memory_space<vmem>>, vector<1x128xf32>
    %3 = vector.shape_cast %2 : vector<1x128xf32> to vector<1x1x1x128xf32>
    %c0_3 = arith.constant 0 : index
    %c0_4 = arith.constant 0 : index
    %c0_5 = arith.constant 0 : index
    %c0_6 = arith.constant 0 : index
    %4 = vector.load %arg2[%c0_3, %c0_4, %c0_5, %c0_6] : memref<1x16x16x128xf32, #tpu.memory_space<vmem>>, vector<1x16x16x128xf32>
    %5 = vector.broadcast %1 : vector<1x1x1x128xf32> to vector<1x16x16x128xf32>
    %6 = arith.mulf %4, %5 : vector<1x16x16x128xf32>
    %7 = vector.broadcast %3 : vector<1x1x1x128xf32> to vector<1x16x16x128xf32>
    %8 = arith.addf %6, %7 : vector<1x16x16x128xf32>
    %cst = arith.constant 0.000000e+00 : f32
    %9 = vector.broadcast %cst : f32 to vector<1x16x16x128xf32>
    %10 = arith.maximumf %8, %9 : vector<1x16x16x128xf32>
    %c0_7 = arith.constant 0 : index
    %c0_8 = arith.constant 0 : index
    %c0_9 = arith.constant 0 : index
    %c0_10 = arith.constant 0 : index
    %11 = vector.load %arg5[%c0_7, %c0_8, %c0_9, %c0_10] : memref<1x16x16x128xf32, #tpu.memory_space<vmem>>, vector<1x16x16x128xf32>
    tpu.vector_store %arg5[%c0_7, %c0_8, %c0_9, %c0_10], %10 {strides = array<i32>} : memref<1x16x16x128xf32, #tpu.memory_space<vmem>>, vector<1x16x16x128xf32>,
    return
  }
  func.func @transform_0(%arg0: i32, %arg1: i32) -> (i32, i32, i32, i32) {
    %c0_i32 = arith.constant 0 : i32
    %c0_i32_0 = arith.constant 0 : i32
    %c0_i32_1 = arith.constant 0 : i32
    return %arg0, %arg1, %c0_i32, %c0_i32_0 : i32, i32, i32, i32
  }
  func.func @transform_1(%arg0: i32, %arg1: i32) -> (i32, i32) {
    %c0_i32 = arith.constant 0 : i32
    %c0_i32_0 = arith.constant 0 : i32
    %c0_i32_1 = arith.constant 0 : i32
    return %c0_i32, %c0_i32_0 : i32, i32
  }
  func.func @transform_2(%arg0: i32, %arg1: i32) -> (i32, i32) {
    %c0_i32 = arith.constant 0 : i32
    %c0_i32_0 = arith.constant 0 : i32
    %c0_i32_1 = arith.constant 0 : i32
    return %c0_i32, %c0_i32_0 : i32, i32
  }
  func.func @transform_3(%arg0: i32, %arg1: i32) -> (i32, i32, i32, i32) {
    %c0_i32 = arith.constant 0 : i32
    %c0_i32_0 = arith.constant 0 : i32
    %c0_i32_1 = arith.constant 0 : i32
    return %arg0, %arg1, %c0_i32, %c0_i32_0 : i32, i32, i32, i32
  }
}

module attributes {stable_mosaic.version = 11 : i64} {
  func.func @_conv3x3_kernel(%arg0: i32, %arg1: i32, %arg2: memref<1x16x16x128xf32, #tpu.memory_space<vmem>>, %arg3: memref<1x1x16x128xf32, #tpu.memory_space<vmem>>, %arg4: memref<1x1x16x128xf32, #tpu.memory_space<vmem>>, %arg5: memref<1x16x16x128xf32, #tpu.memory_space<vmem>>, %arg6: memref<1x1x16x128xf32, #tpu.memory_space<vmem>>, %arg7: memref<1x1x16x128xf32, #tpu.memory_space<vmem>>, %arg8: memref<1x128xf32, #tpu.memory_space<vmem>>, %arg9: memref<1x128xf32, #tpu.memory_space<vmem>>, %arg10: memref<3x384x128xf32, #tpu.memory_space<vmem>>, %arg11: memref<1x128xf32, #tpu.memory_space<vmem>>, %arg12: memref<1x16x16x128xf32, #tpu.memory_space<vmem>>, %arg13: memref<1x1x2x128xf32, #tpu.memory_space<vmem>>, %arg14: memref<18x18x128xf32, #tpu.memory_space<vmem>>) attributes {dimension_semantics = [#tpu.dimension_semantics<parallel>, #tpu.dimension_semantics<parallel>], iteration_bounds = array<i64: 2, 1>, scalar_prefetch = 0 : i64, scratch_operands = 1 : i64, tpu.core_type = #tpu.core_type<tc>, window_params = [{transform_indices = @transform_0, window_bounds = array<i64: 1, 16, 16, 128>}, {transform_indices = @transform_1, window_bounds = array<i64: 1, 1, 16, 128>}, {transform_indices = @transform_2, window_bounds = array<i64: 1, 1, 16, 128>}, {transform_indices = @transform_3, window_bounds = array<i64: 1, 16, 16, 128>}, {transform_indices = @transform_4, window_bounds = array<i64: 1, 1, 16, 128>}, {transform_indices = @transform_5, window_bounds = array<i64: 1, 1, 16, 128>}, {pipeline_mode = #tpu.pipeline_mode<synchronous>, transform_indices = @transform_6, window_bounds = array<i64: 1, 128>}, {pipeline_mode = #tpu.pipeline_mode<synchronous>, transform_indices = @transform_7, window_bounds = array<i64: 1, 128>}, {pipeline_mode = #tpu.pipeline_mode<synchronous>, transform_indices = @transform_8, window_bounds = array<i64: 3, 384, 128>}, {pipeline_mode = #tpu.pipeline_mode<synchronous>, transform_indices = @transform_9, window_bounds = array<i64: 1, 128>}, {transform_indices = @transform_10, window_bounds = array<i64: 1, 16, 16, 128>}, {transform_indices = @transform_11, window_bounds = array<i64: 1, 1, 2, 128>}]} {
    %c0 = arith.constant 0 : index
    %c0_0 = arith.constant 0 : index
    %0 = vector.load %arg8[%c0, %c0_0] : memref<1x128xf32, #tpu.memory_space<vmem>>, vector<1x128xf32>
    %1 = vector.shape_cast %0 : vector<1x128xf32> to vector<1x1x128xf32>
    %c0_1 = arith.constant 0 : index
    %c0_2 = arith.constant 0 : index
    %2 = vector.load %arg9[%c0_1, %c0_2] : memref<1x128xf32, #tpu.memory_space<vmem>>, vector<1x128xf32>
    %3 = vector.shape_cast %2 : vector<1x128xf32> to vector<1x1x128xf32>
    %c0_3 = arith.constant 0 : index
    %c0_4 = arith.constant 0 : index
    %c0_5 = arith.constant 0 : index
    %c0_6 = arith.constant 0 : index
    %4 = vector.load %arg5[%c0_3, %c0_4, %c0_5, %c0_6] : memref<1x16x16x128xf32, #tpu.memory_space<vmem>>, vector<1x16x16x128xf32>
    %5 = vector.shape_cast %4 : vector<1x16x16x128xf32> to vector<16x16x128xf32>
    %c0_7 = arith.constant 0 : index
    %c0_8 = arith.constant 0 : index
    %c0_9 = arith.constant 0 : index
    %c0_10 = arith.constant 0 : index
    %6 = vector.load %arg2[%c0_7, %c0_8, %c0_9, %c0_10] : memref<1x16x16x128xf32, #tpu.memory_space<vmem>>, vector<1x16x16x128xf32>
    %7 = vector.shape_cast %6 : vector<1x16x16x128xf32> to vector<16x16x128xf32>
    %8 = vector.broadcast %1 : vector<1x1x128xf32> to vector<16x16x128xf32>
    %9 = arith.mulf %7, %8 : vector<16x16x128xf32>
    %10 = vector.broadcast %3 : vector<1x1x128xf32> to vector<16x16x128xf32>
    %11 = arith.addf %9, %10 : vector<16x16x128xf32>
    %cst = arith.constant 0.000000e+00 : f32
    %12 = vector.broadcast %cst : f32 to vector<16x16x128xf32>
    %13 = arith.maximumf %11, %12 : vector<16x16x128xf32>
    %14 = arith.addf %5, %13 : vector<16x16x128xf32>
    %c0_11 = arith.constant 0 : index
    %c0_12 = arith.constant 0 : index
    %c0_13 = arith.constant 0 : index
    %c0_14 = arith.constant 0 : index
    %15 = vector.load %arg6[%c0_11, %c0_12, %c0_13, %c0_14] : memref<1x1x16x128xf32, #tpu.memory_space<vmem>>, vector<1x1x16x128xf32>
    %16 = vector.shape_cast %15 : vector<1x1x16x128xf32> to vector<1x16x128xf32>
    %c0_15 = arith.constant 0 : index
    %c0_16 = arith.constant 0 : index
    %c0_17 = arith.constant 0 : index
    %c0_18 = arith.constant 0 : index
    %17 = vector.load %arg3[%c0_15, %c0_16, %c0_17, %c0_18] : memref<1x1x16x128xf32, #tpu.memory_space<vmem>>, vector<1x1x16x128xf32>
    %18 = vector.shape_cast %17 : vector<1x1x16x128xf32> to vector<1x16x128xf32>
    %19 = vector.broadcast %1 : vector<1x1x128xf32> to vector<1x16x128xf32>
    %20 = arith.mulf %18, %19 : vector<1x16x128xf32>
    %21 = vector.broadcast %3 : vector<1x1x128xf32> to vector<1x16x128xf32>
    %22 = arith.addf %20, %21 : vector<1x16x128xf32>
    %cst_19 = arith.constant 0.000000e+00 : f32
    %23 = vector.broadcast %cst_19 : f32 to vector<1x16x128xf32>
    %24 = arith.maximumf %22, %23 : vector<1x16x128xf32>
    %25 = arith.addf %16, %24 : vector<1x16x128xf32>
    %c0_20 = arith.constant 0 : index
    %c0_21 = arith.constant 0 : index
    %c0_22 = arith.constant 0 : index
    %c0_23 = arith.constant 0 : index
    %26 = vector.load %arg7[%c0_20, %c0_21, %c0_22, %c0_23] : memref<1x1x16x128xf32, #tpu.memory_space<vmem>>, vector<1x1x16x128xf32>
    %27 = vector.shape_cast %26 : vector<1x1x16x128xf32> to vector<1x16x128xf32>
    %c0_24 = arith.constant 0 : index
    %c0_25 = arith.constant 0 : index
    %c0_26 = arith.constant 0 : index
    %c0_27 = arith.constant 0 : index
    %28 = vector.load %arg4[%c0_24, %c0_25, %c0_26, %c0_27] : memref<1x1x16x128xf32, #tpu.memory_space<vmem>>, vector<1x1x16x128xf32>
    %29 = vector.shape_cast %28 : vector<1x1x16x128xf32> to vector<1x16x128xf32>
    %30 = vector.broadcast %1 : vector<1x1x128xf32> to vector<1x16x128xf32>
    %31 = arith.mulf %29, %30 : vector<1x16x128xf32>
    %32 = vector.broadcast %3 : vector<1x1x128xf32> to vector<1x16x128xf32>
    %33 = arith.addf %31, %32 : vector<1x16x128xf32>
    %cst_28 = arith.constant 0.000000e+00 : f32
    %34 = vector.broadcast %cst_28 : f32 to vector<1x16x128xf32>
    %35 = arith.maximumf %33, %34 : vector<1x16x128xf32>
    %36 = arith.addf %27, %35 : vector<1x16x128xf32>
    %c0_i32 = arith.constant 0 : i32
    %37 = arith.cmpi sgt, %arg1, %c0_i32 : i32
    %38 = arith.extui %37 : i1 to i32
    %39 = arith.sitofp %38 : i32 to f32
    %40 = vector.broadcast %39 : f32 to vector<1x16x128xf32>
    %41 = arith.mulf %25, %40 : vector<1x16x128xf32>
    %c0_i32_29 = arith.constant 0 : i32
    %42 = arith.cmpi slt, %arg1, %c0_i32_29 : i32
    %43 = arith.extui %42 : i1 to i32
    %44 = arith.sitofp %43 : i32 to f32
    %45 = vector.broadcast %44 : f32 to vector<1x16x128xf32>
    %46 = arith.mulf %36, %45 : vector<1x16x128xf32>
    %c0_30 = arith.constant 0 : index
    %c1 = arith.constant 1 : index
    %c0_31 = arith.constant 0 : index
    %47 = vector.load %arg14[%c0_30, %c1, %c0_31] : memref<18x18x128xf32, #tpu.memory_space<vmem>>, vector<1x16x128xf32>
    tpu.vector_store %arg14[%c0_30, %c1, %c0_31], %41 {strides = array<i32>} : memref<18x18x128xf32, #tpu.memory_space<vmem>>, vector<1x16x128xf32>,
    %c1_32 = arith.constant 1 : index
    %c1_33 = arith.constant 1 : index
    %c0_34 = arith.constant 0 : index
    %48 = vector.load %arg14[%c1_32, %c1_33, %c0_34] : memref<18x18x128xf32, #tpu.memory_space<vmem>>, vector<16x16x128xf32>
    tpu.vector_store %arg14[%c1_32, %c1_33, %c0_34], %14 {strides = array<i32>} : memref<18x18x128xf32, #tpu.memory_space<vmem>>, vector<16x16x128xf32>,
    %c17 = arith.constant 17 : index
    %c1_35 = arith.constant 1 : index
    %c0_36 = arith.constant 0 : index
    %49 = vector.load %arg14[%c17, %c1_35, %c0_36] : memref<18x18x128xf32, #tpu.memory_space<vmem>>, vector<1x16x128xf32>
    tpu.vector_store %arg14[%c17, %c1_35, %c0_36], %46 {strides = array<i32>} : memref<18x18x128xf32, #tpu.memory_space<vmem>>, vector<1x16x128xf32>,
    %cst_37 = arith.constant 0.000000e+00 : f32
    %50 = vector.broadcast %cst_37 : f32 to vector<18x1x128xf32>
    %c0_38 = arith.constant 0 : index
    %c0_39 = arith.constant 0 : index
    %c0_40 = arith.constant 0 : index
    %51 = vector.load %arg14[%c0_38, %c0_39, %c0_40] : memref<18x18x128xf32, #tpu.memory_space<vmem>>, vector<18x1x128xf32>
    tpu.vector_store %arg14[%c0_38, %c0_39, %c0_40], %50 {strides = array<i32>} : memref<18x18x128xf32, #tpu.memory_space<vmem>>, vector<18x1x128xf32>,
    %c0_41 = arith.constant 0 : index
    %c17_42 = arith.constant 17 : index
    %c0_43 = arith.constant 0 : index
    %52 = vector.load %arg14[%c0_41, %c17_42, %c0_43] : memref<18x18x128xf32, #tpu.memory_space<vmem>>, vector<18x1x128xf32>
    tpu.vector_store %arg14[%c0_41, %c17_42, %c0_43], %50 {strides = array<i32>} : memref<18x18x128xf32, #tpu.memory_space<vmem>>, vector<18x1x128xf32>,
    %c0_44 = arith.constant 0 : index
    %c0_45 = arith.constant 0 : index
    %53 = vector.load %arg11[%c0_44, %c0_45] : memref<1x128xf32, #tpu.memory_space<vmem>>, vector<1x128xf32>
    %54 = vector.shape_cast %53 : vector<1x128xf32> to vector<1x128xf32>
    %55 = vector.broadcast %54 : vector<1x128xf32> to vector<256x128xf32>
    %c0_46 = arith.constant 0 : index
    %c0_47 = arith.constant 0 : index
    %c0_48 = arith.constant 0 : index
    %56 = vector.load %arg14[%c0_46, %c0_47, %c0_48] : memref<18x18x128xf32, #tpu.memory_space<vmem>>, vector<16x18x128xf32>
    %57 = vector.extract_strided_slice %56 {offsets = [0, 0, 0], sizes = [16, 16, 128], strides = [1, 1, 1]} : vector<16x18x128xf32> to vector<16x16x128xf32>
    %58 = vector.extract_strided_slice %56 {offsets = [0, 1, 0], sizes = [16, 16, 128], strides = [1, 1, 1]} : vector<16x18x128xf32> to vector<16x16x128xf32>
    %59 = vector.extract_strided_slice %56 {offsets = [0, 2, 0], sizes = [16, 16, 128], strides = [1, 1, 1]} : vector<16x18x128xf32> to vector<16x16x128xf32>
    %60 = tpu.concatenate %57, %58, %59 in 2 : vector<16x16x128xf32>, vector<16x16x128xf32>, vector<16x16x128xf32> -> vector<16x16x384xf32>
    %61 = vector.shape_cast %60 : vector<16x16x384xf32> to vector<256x384xf32>
    %c0_49 = arith.constant 0 : index
    %c0_50 = arith.constant 0 : index
    %c0_51 = arith.constant 0 : index
    %62 = vector.load %arg10[%c0_49, %c0_50, %c0_51] : memref<3x384x128xf32, #tpu.memory_space<vmem>>, vector<1x384x128xf32>
    %63 = vector.shape_cast %62 : vector<1x384x128xf32> to vector<384x128xf32>
    %cst_52 = arith.constant dense<0.000000e+00> : vector<256x128xf32>
    %64 = tpu.matmul %61, %63, %cst_52 {dimension_numbers = #tpu.dot_dimension_numbers<[1], [0], [0], [1], [0, 0, 1, 1], [], []>} : vector<256x384xf32>, vector<384x128xf32>, vector<256x128xf32> -> vector<256x128xf32>
    %65 = arith.addf %55, %64 : vector<256x128xf32>
    %c1_53 = arith.constant 1 : index
    %c0_54 = arith.constant 0 : index
    %c0_55 = arith.constant 0 : index
    %66 = vector.load %arg14[%c1_53, %c0_54, %c0_55] : memref<18x18x128xf32, #tpu.memory_space<vmem>>, vector<16x18x128xf32>
    %67 = vector.extract_strided_slice %66 {offsets = [0, 0, 0], sizes = [16, 16, 128], strides = [1, 1, 1]} : vector<16x18x128xf32> to vector<16x16x128xf32>
    %68 = vector.extract_strided_slice %66 {offsets = [0, 1, 0], sizes = [16, 16, 128], strides = [1, 1, 1]} : vector<16x18x128xf32> to vector<16x16x128xf32>
    %69 = vector.extract_strided_slice %66 {offsets = [0, 2, 0], sizes = [16, 16, 128], strides = [1, 1, 1]} : vector<16x18x128xf32> to vector<16x16x128xf32>
    %70 = tpu.concatenate %67, %68, %69 in 2 : vector<16x16x128xf32>, vector<16x16x128xf32>, vector<16x16x128xf32> -> vector<16x16x384xf32>
    %71 = vector.shape_cast %70 : vector<16x16x384xf32> to vector<256x384xf32>
    %c1_56 = arith.constant 1 : index
    %c0_57 = arith.constant 0 : index
    %c0_58 = arith.constant 0 : index
    %72 = vector.load %arg10[%c1_56, %c0_57, %c0_58] : memref<3x384x128xf32, #tpu.memory_space<vmem>>, vector<1x384x128xf32>
    %73 = vector.shape_cast %72 : vector<1x384x128xf32> to vector<384x128xf32>
    %cst_59 = arith.constant dense<0.000000e+00> : vector<256x128xf32>
    %74 = tpu.matmul %71, %73, %cst_59 {dimension_numbers = #tpu.dot_dimension_numbers<[1], [0], [0], [1], [0, 0, 1, 1], [], []>} : vector<256x384xf32>, vector<384x128xf32>, vector<256x128xf32> -> vector<256x128xf32>
    %75 = arith.addf %65, %74 : vector<256x128xf32>
    %c2 = arith.constant 2 : index
    %c0_60 = arith.constant 0 : index
    %c0_61 = arith.constant 0 : index
    %76 = vector.load %arg14[%c2, %c0_60, %c0_61] : memref<18x18x128xf32, #tpu.memory_space<vmem>>, vector<16x18x128xf32>
    %77 = vector.extract_strided_slice %76 {offsets = [0, 0, 0], sizes = [16, 16, 128], strides = [1, 1, 1]} : vector<16x18x128xf32> to vector<16x16x128xf32>
    %78 = vector.extract_strided_slice %76 {offsets = [0, 1, 0], sizes = [16, 16, 128], strides = [1, 1, 1]} : vector<16x18x128xf32> to vector<16x16x128xf32>
    %79 = vector.extract_strided_slice %76 {offsets = [0, 2, 0], sizes = [16, 16, 128], strides = [1, 1, 1]} : vector<16x18x128xf32> to vector<16x16x128xf32>
    %80 = tpu.concatenate %77, %78, %79 in 2 : vector<16x16x128xf32>, vector<16x16x128xf32>, vector<16x16x128xf32> -> vector<16x16x384xf32>
    %81 = vector.shape_cast %80 : vector<16x16x384xf32> to vector<256x384xf32>
    %c2_62 = arith.constant 2 : index
    %c0_63 = arith.constant 0 : index
    %c0_64 = arith.constant 0 : index
    %82 = vector.load %arg10[%c2_62, %c0_63, %c0_64] : memref<3x384x128xf32, #tpu.memory_space<vmem>>, vector<1x384x128xf32>
    %83 = vector.shape_cast %82 : vector<1x384x128xf32> to vector<384x128xf32>
    %cst_65 = arith.constant dense<0.000000e+00> : vector<256x128xf32>
    %84 = tpu.matmul %81, %83, %cst_65 {dimension_numbers = #tpu.dot_dimension_numbers<[1], [0], [0], [1], [0, 0, 1, 1], [], []>} : vector<256x384xf32>, vector<384x128xf32>, vector<256x128xf32> -> vector<256x128xf32>
    %85 = arith.addf %75, %84 : vector<256x128xf32>
    %86 = vector.shape_cast %85 : vector<256x128xf32> to vector<1x16x16x128xf32>
    %c0_66 = arith.constant 0 : index
    %c0_67 = arith.constant 0 : index
    %c0_68 = arith.constant 0 : index
    %c0_69 = arith.constant 0 : index
    %87 = vector.load %arg12[%c0_66, %c0_67, %c0_68, %c0_69] : memref<1x16x16x128xf32, #tpu.memory_space<vmem>>, vector<1x16x16x128xf32>
    tpu.vector_store %arg12[%c0_66, %c0_67, %c0_68, %c0_69], %86 {strides = array<i32>} : memref<1x16x16x128xf32, #tpu.memory_space<vmem>>, vector<1x16x16x128xf32>,
    %cst_70 = arith.constant dense<0.000000e+00> : vector<128xf32>
    %88 = vector.multi_reduction <add>, %85, %cst_70 [0] : vector<256x128xf32> to vector<128xf32>
    %89 = vector.shape_cast %88 : vector<128xf32> to vector<1x128xf32>
    %cst_71 = arith.constant 3.906250e-03 : f32
    %90 = vector.broadcast %cst_71 : f32 to vector<1x128xf32>
    %91 = arith.mulf %89, %90 : vector<1x128xf32>
    %92 = vector.broadcast %91 : vector<1x128xf32> to vector<256x128xf32>
    %93 = arith.subf %85, %92 : vector<256x128xf32>
    %94 = arith.mulf %93, %93 : vector<256x128xf32>
    %cst_72 = arith.constant dense<0.000000e+00> : vector<128xf32>
    %95 = vector.multi_reduction <add>, %94, %cst_72 [0] : vector<256x128xf32> to vector<128xf32>
    %96 = vector.shape_cast %95 : vector<128xf32> to vector<1x128xf32>
    %97 = tpu.concatenate %91, %96 in 0 : vector<1x128xf32>, vector<1x128xf32> -> vector<2x128xf32>
    %98 = vector.shape_cast %97 : vector<2x128xf32> to vector<1x1x2x128xf32>
    %c0_73 = arith.constant 0 : index
    %c0_74 = arith.constant 0 : index
    %c0_75 = arith.constant 0 : index
    %c0_76 = arith.constant 0 : index
    %99 = vector.load %arg13[%c0_73, %c0_74, %c0_75, %c0_76] : memref<1x1x2x128xf32, #tpu.memory_space<vmem>>, vector<1x1x2x128xf32>
    tpu.vector_store %arg13[%c0_73, %c0_74, %c0_75, %c0_76], %98 {strides = array<i32>} : memref<1x1x2x128xf32, #tpu.memory_space<vmem>>, vector<1x1x2x128xf32>,
    return
  }
  func.func @transform_0(%arg0: i32, %arg1: i32) -> (i32, i32, i32, i32) {
    %c0_i32 = arith.constant 0 : i32
    %c0_i32_0 = arith.constant 0 : i32
    %c0_i32_1 = arith.constant 0 : i32
    return %arg0, %arg1, %c0_i32, %c0_i32_0 : i32, i32, i32, i32
  }
  func.func @transform_1(%arg0: i32, %arg1: i32) -> (i32, i32, i32, i32) {
    %c16_i32 = arith.constant 16 : i32
    %0 = arith.muli %arg1, %c16_i32 : i32
    %c1_i32 = arith.constant 1 : i32
    %1 = arith.subi %0, %c1_i32 : i32
    %c0_i32 = arith.constant 0 : i32
    %2 = arith.maxsi %1, %c0_i32 : i32
    %c0_i32_0 = arith.constant 0 : i32
    %c0_i32_1 = arith.constant 0 : i32
    %c0_i32_2 = arith.constant 0 : i32
    return %arg0, %2, %c0_i32_0, %c0_i32_1 : i32, i32, i32, i32
  }
  func.func @transform_2(%arg0: i32, %arg1: i32) -> (i32, i32, i32, i32) {
    %c16_i32 = arith.constant 16 : i32
    %0 = arith.muli %arg1, %c16_i32 : i32
    %c16_i32_0 = arith.constant 16 : i32
    %1 = arith.addi %0, %c16_i32_0 : i32
    %c15_i32 = arith.constant 15 : i32
    %2 = arith.minsi %1, %c15_i32 : i32
    %c0_i32 = arith.constant 0 : i32
    %c0_i32_1 = arith.constant 0 : i32
    %c0_i32_2 = arith.constant 0 : i32
    return %arg0, %2, %c0_i32, %c0_i32_1 : i32, i32, i32, i32
  }
  func.func @transform_3(%arg0: i32, %arg1: i32) -> (i32, i32, i32, i32) {
    %c0_i32 = arith.constant 0 : i32
    %c0_i32_0 = arith.constant 0 : i32
    %c0_i32_1 = arith.constant 0 : i32
    return %arg0, %arg1, %c0_i32, %c0_i32_0 : i32, i32, i32, i32
  }
  func.func @transform_4(%arg0: i32, %arg1: i32) -> (i32, i32, i32, i32) {
    %c16_i32 = arith.constant 16 : i32
    %0 = arith.muli %arg1, %c16_i32 : i32
    %c1_i32 = arith.constant 1 : i32
    %1 = arith.subi %0, %c1_i32 : i32
    %c0_i32 = arith.constant 0 : i32
    %2 = arith.maxsi %1, %c0_i32 : i32
    %c0_i32_0 = arith.constant 0 : i32
    %c0_i32_1 = arith.constant 0 : i32
    %c0_i32_2 = arith.constant 0 : i32
    return %arg0, %2, %c0_i32_0, %c0_i32_1 : i32, i32, i32, i32
  }
  func.func @transform_5(%arg0: i32, %arg1: i32) -> (i32, i32, i32, i32) {
    %c16_i32 = arith.constant 16 : i32
    %0 = arith.muli %arg1, %c16_i32 : i32
    %c16_i32_0 = arith.constant 16 : i32
    %1 = arith.addi %0, %c16_i32_0 : i32
    %c15_i32 = arith.constant 15 : i32
    %2 = arith.minsi %1, %c15_i32 : i32
    %c0_i32 = arith.constant 0 : i32
    %c0_i32_1 = arith.constant 0 : i32
    %c0_i32_2 = arith.constant 0 : i32
    return %arg0, %2, %c0_i32, %c0_i32_1 : i32, i32, i32, i32
  }
  func.func @transform_6(%arg0: i32, %arg1: i32) -> (i32, i32) {
    %c0_i32 = arith.constant 0 : i32
    %c0_i32_0 = arith.constant 0 : i32
    %c0_i32_1 = arith.constant 0 : i32
    return %c0_i32, %c0_i32_0 : i32, i32
  }
  func.func @transform_7(%arg0: i32, %arg1: i32) -> (i32, i32) {
    %c0_i32 = arith.constant 0 : i32
    %c0_i32_0 = arith.constant 0 : i32
    %c0_i32_1 = arith.constant 0 : i32
    return %c0_i32, %c0_i32_0 : i32, i32
  }
  func.func @transform_8(%arg0: i32, %arg1: i32) -> (i32, i32, i32) {
    %c0_i32 = arith.constant 0 : i32
    %c0_i32_0 = arith.constant 0 : i32
    %c0_i32_1 = arith.constant 0 : i32
    %c0_i32_2 = arith.constant 0 : i32
    return %c0_i32, %c0_i32_0, %c0_i32_1 : i32, i32, i32
  }
  func.func @transform_9(%arg0: i32, %arg1: i32) -> (i32, i32) {
    %c0_i32 = arith.constant 0 : i32
    %c0_i32_0 = arith.constant 0 : i32
    %c0_i32_1 = arith.constant 0 : i32
    return %c0_i32, %c0_i32_0 : i32, i32
  }
  func.func @transform_10(%arg0: i32, %arg1: i32) -> (i32, i32, i32, i32) {
    %c0_i32 = arith.constant 0 : i32
    %c0_i32_0 = arith.constant 0 : i32
    %c0_i32_1 = arith.constant 0 : i32
    return %arg0, %arg1, %c0_i32, %c0_i32_0 : i32, i32, i32, i32
  }
  func.func @transform_11(%arg0: i32, %arg1: i32) -> (i32, i32, i32, i32) {
    %c0_i32 = arith.constant 0 : i32
    %c0_i32_0 = arith.constant 0 : i32
    %c0_i32_1 = arith.constant 0 : i32
    return %arg0, %arg1, %c0_i32, %c0_i32_0 : i32, i32, i32, i32
  }
}

</mosaic_0001>

<bundles_post_ra>
// kernel: recurrent_block_forward.7
= control target key start
LH: loop header
LB: loop body
LE: loop exit
PB: predicated region body
PF: predicated region fallthrough
CT: control target
= control target key end

     0   :  { %s568_s12 = smov 0   ;;  %s570_s13 = smov 0   ;;  %s743_s0 = inlined_call_operand.vmem [shape: f32[2,16,16,128], index: 0, kind: input, shape index: {}]   ;;  %s744_s1 = inlined_call_operand.vmem [shape: f32[1,128], index: 1, kind: input, shape index: {}]   ;;  %s745_s2 = inlined_call_operand.vmem [shape: f32[1,128], index: 2, kind: input, shape index: {}]   ;;  %s746_s3 = inlined_call_operand.vmem [shape: f32[2,16,16,128], index: 3, kind: output, shape index: {}]  }
   0x1   :  { %s572_s14 = smov 0  }
   0x2 LB: > { %s25_s15 = sadd.s32 1, %s542_s13  ;;  %p489_p0 = scmp.ge.s32.totalorder %s546_s14, 1  ;;  %s546_s14 = sphi %s572_s14, %s13_s14   ;;  %s542_s13 = sphi %s570_s13, %s748_s13   ;;  %s538_s12 = sphi %s568_s12, %s747_s12  }
   0x3   : > { %p27_p1 = scmp.ge.s32.totalorder %s25_s15, 2  ;;  %p159_p2 = scmp.lt.s32.totalorder %s546_s14, 3 }
   0x5   : > { %s750_s15 = smov (%p27_p1, %s25_s15), 0  ;;  %p160_p3 = pnand %p489_p0, %p159_p2 }
   0x6   : > { %p194_p4 = scmp.lt.s32.totalorder (!%p160_p3), %s538_s12, 1  ;;  %v589_v0 = vld [vmem:[%s744_s1] ss:$0 sm:$0xff] (!%p160_p3) }
   0x7   : > { %163 = sbr.rel (%p160_p3) target bundleno = 47 (0x2f), region = 32  ;;  %v599_v1 = vld [vmem:[%s745_s2] ss:$0 sm:$0xff] (!%p160_p3) }
   0xe   : > { %s752_s12 = smov (!%p194_p4, %s538_s12), 1 }
   0xf   : > { %s498_s16 = sshll.u32 %s752_s12, 8 }
  0x10   : > { %s594_s21 = scalar_lea.vmem %s743_s0, %s498_s16  ;;  %s622_s26 = scalar_lea.vmem %s746_s3, %s498_s16 }
  0x11   : > { %v217_v2 = vld [vmem:[%s594_s21] sm:$0xff]  ;;  %v218_v3 = vld [vmem:[%s594_s21 + $0x8] sm:$0xff]  ;;  %v219_v4 = vld [vmem:[%s594_s21 + $0x10] sm:$0xff] }
  0x12   : > { %v255_v5 = vmul.f32 %v589_v0, %v217_v2  ;;  %v256_v6 = vmul.f32 %v589_v0, %v218_v3  ;;  %v257_v7 = vmul.f32 %v589_v0, %v219_v4  ;;  %v220_v8 = vld [vmem:[%s594_s21 + $0x18] sm:$0xff]  ;;  %v221_v9 = vld [vmem:[%s594_s21 + $0x20] sm:$0xff]  ;;  %v222_v10 = vld [vmem:[%s594_s21 + $0x28] sm:$0xff] }
  0x13   : > { %v258_v11 = vmul.f32 %v589_v0, %v220_v8  ;;  %v259_v12 = vmul.f32 %v589_v0, %v221_v9  ;;  %v260_v13 = vmul.f32 %v589_v0, %v222_v10  ;;  %v223_v14 = vld [vmem:[%s594_s21 + $0x30] sm:$0xff]  ;;  %v224_v15 = vld [vmem:[%s594_s21 + $0x38] sm:$0xff]  ;;  %v225_v24 = vld [vmem:[%s594_s21 + $0x40] sm:$0xff] }
  0x14   : > { %v293_v16 = vadd.f32 %v599_v1, %v255_v5  ;;  %v294_v17 = vadd.f32 %v599_v1, %v256_v6  ;;  %v295_v18 = vadd.f32 %v599_v1, %v257_v7  ;;  %v261_v19 = vmul.f32 %v589_v0, %v223_v14  ;;  %v226_v25 = vld [vmem:[%s594_s21 + $0x48] sm:$0xff]  ;;  %v227_v26 = vld [vmem:[%s594_s21 + $0x50] sm:$0xff]  ;;  %v228_v31 = vld [vmem:[%s594_s21 + $0x58] sm:$0xff] }
  0x15   : > { %v296_v20 = vadd.f32 %v599_v1, %v258_v11  ;;  %v297_v21 = vadd.f32 %v599_v1, %v259_v12  ;;  %v298_v22 = vadd.f32 %v599_v1, %v260_v13  ;;  %v262_v23 = vmul.f32 %v589_v0, %v224_v15  ;;  %v229_v32 = vld [vmem:[%s594_s21 + $0x60] sm:$0xff]  ;;  %v230_v33 = vld [vmem:[%s594_s21 + $0x68] sm:$0xff]  ;;  %v231_v38 = vld [vmem:[%s594_s21 + $0x70] sm:$0xff] }
  0x16   : > { %v325_v27 = vmax.f32 %v293_v16, 0.0  ;;  %v326_v28 = vmax.f32 %v294_v17, 0.0  ;;  %v327_v29 = vmax.f32 %v295_v18, 0.0  ;;  %v299_v30 = vadd.f32 %v599_v1, %v261_v19  ;;  %v232_v43 = vld [vmem:[%s594_s21 + $0x78] sm:$0xff]  ;;  %v233_v56 = vld [vmem:[%s594_s21 + $0x80] sm:$0xff]  ;;  %v234_v57 = vld [vmem:[%s594_s21 + $0x88] sm:$0xff] }
  0x17   : > { %v328_v34 = vmax.f32 %v296_v20, 0.0  ;;  %v329_v35 = vmax.f32 %v297_v21, 0.0  ;;  %v330_v36 = vmax.f32 %v298_v22, 0.0  ;;  %v300_v37 = vadd.f32 %v599_v1, %v262_v23  ;;  %v235_v58 = vld [vmem:[%s594_s21 + $0x90] sm:$0xff]  ;;  %v236_v63 = vld [vmem:[%s594_s21 + $0x98] sm:$0xff]  ;;  %v237_v2 = vld [vmem:[%s594_s21 + $0xa0] sm:$0xff] }
  0x18   : > { %357 = vst [vmem:[%s622_s26] sm:$0xff] %v325_v27  ;;  %358 = vst [vmem:[%s622_s26 + $0x8] sm:$0xff] %v326_v28  ;;  %v331_v39 = vmax.f32 %v299_v30, 0.0  ;;  %v263_v40 = vmul.f32 %v589_v0, %v225_v24  ;;  %v264_v41 = vmul.f32 %v589_v0, %v226_v25  ;;  %v265_v42 = vmul.f32 %v589_v0, %v227_v26  ;;  %v238_v3 = vld [vmem:[%s594_s21 + $0xa8] sm:$0xff]  ;;  %v239_v8 = vld [vmem:[%s594_s21 + $0xb0] sm:$0xff] }
  0x19   : > { %359 = vst [vmem:[%s622_s26 + $0x10] sm:$0xff] %v327_v29  ;;  %360 = vst [vmem:[%s622_s26 + $0x18] sm:$0xff] %v328_v34  ;;  %v332_v44 = vmax.f32 %v300_v37, 0.0  ;;  %v266_v45 = vmul.f32 %v589_v0, %v228_v31  ;;  %v267_v46 = vmul.f32 %v589_v0, %v229_v32  ;;  %v268_v47 = vmul.f32 %v589_v0, %v230_v33  ;;  %v240_v13 = vld [vmem:[%s594_s21 + $0xb8] sm:$0xff]  ;;  %v241_v26 = vld [vmem:[%s594_s21 + $0xc0] sm:$0xff] }
  0x1a   : > { %361 = vst [vmem:[%s622_s26 + $0x20] sm:$0xff] %v329_v35  ;;  %362 = vst [vmem:[%s622_s26 + $0x28] sm:$0xff] %v330_v36  ;;  %v301_v48 = vadd.f32 %v599_v1, %v263_v40  ;;  %v302_v49 = vadd.f32 %v599_v1, %v264_v41  ;;  %v303_v50 = vadd.f32 %v599_v1, %v265_v42  ;;  %v242_v27 = vld [vmem:[%s594_s21 + $0xc8] sm:$0xff]  ;;  %v243_v28 = vld [vmem:[%s594_s21 + $0xd0] sm:$0xff] }
  0x1b   : > { %363 = vst [vmem:[%s622_s26 + $0x30] sm:$0xff] %v331_v39  ;;  %v269_v51 = vmul.f32 %v589_v0, %v231_v38  ;;  %364 = vst [vmem:[%s622_s26 + $0x38] sm:$0xff] %v332_v44  ;;  %v304_v52 = vadd.f32 %v599_v1, %v266_v45  ;;  %v305_v53 = vadd.f32 %v599_v1, %v267_v46  ;;  %v244_v33 = vld [vmem:[%s594_s21 + $0xd8] sm:$0xff]  ;;  %v245_v34 = vld [vmem:[%s594_s21 + $0xe0] sm:$0xff] }
  0x1c   : > { %v306_v54 = vadd.f32 %v599_v1, %v268_v47  ;;  %v270_v55 = vmul.f32 %v589_v0, %v232_v43  ;;  %v333_v59 = vmax.f32 %v301_v48, 0.0  ;;  %v334_v60 = vmax.f32 %v302_v49, 0.0  ;;  %v246_v35 = vld [vmem:[%s594_s21 + $0xe8] sm:$0xff]  ;;  %v247_v40 = vld [vmem:[%s594_s21 + $0xf0] sm:$0xff]  ;;  %v248_v45 = vld [vmem:[%s594_s21 + $0xf8] sm:$0xff] }
  0x1d   : > { %v335_v61 = vmax.f32 %v303_v50, 0.0  ;;  %v307_v62 = vadd.f32 %v599_v1, %v269_v51  ;;  %v336_v4 = vmax.f32 %v304_v52, 0.0  ;;  %v337_v5 = vmax.f32 %v305_v53, 0.0 }
  0x1e   : > { %v338_v6 = vmax.f32 %v306_v54, 0.0  ;;  %v308_v7 = vadd.f32 %v599_v1, %v270_v55  ;;  %365 = vst [vmem:[%s622_s26 + $0x40] sm:$0xff] %v333_v59  ;;  %366 = vst [vmem:[%s622_s26 + $0x48] sm:$0xff] %v334_v60  ;;  %v271_v10 = vmul.f32 %v589_v0, %v233_v56  ;;  %v272_v11 = vmul.f32 %v589_v0, %v234_v57 }
  0x1f   : > { %367 = vst [vmem:[%s622_s26 + $0x50] sm:$0xff] %v335_v61  ;;  %v339_v9 = vmax.f32 %v307_v62, 0.0  ;;  %v273_v12 = vmul.f32 %v589_v0, %v235_v58  ;;  %368 = vst [vmem:[%s622_s26 + $0x58] sm:$0xff] %v336_v4  ;;  %v274_v15 = vmul.f32 %v589_v0, %v236_v63  ;;  %v275_v16 = vmul.f32 %v589_v0, %v237_v2 }
  0x20   : > { %369 = vst [vmem:[%s622_s26 + $0x60] sm:$0xff] %v337_v5  ;;  %370 = vst [vmem:[%s622_s26 + $0x68] sm:$0xff] %v338_v6  ;;  %v340_v14 = vmax.f32 %v308_v7, 0.0  ;;  %v276_v17 = vmul.f32 %v589_v0, %v238_v3  ;;  %v309_v18 = vadd.f32 %v599_v1, %v271_v10  ;;  %v310_v19 = vadd.f32 %v599_v1, %v272_v11 }
  0x21   : > { %371 = vst [vmem:[%s622_s26 + $0x70] sm:$0xff] %v339_v9  ;;  %v311_v20 = vadd.f32 %v599_v1, %v273_v12  ;;  %v277_v21 = vmul.f32 %v589_v0, %v239_v8  ;;  %v312_v22 = vadd.f32 %v599_v1, %v274_v15  ;;  %v313_v23 = vadd.f32 %v599_v1, %v275_v16 }
  0x22   : > { %372 = vst [vmem:[%s622_s26 + $0x78] sm:$0xff] %v340_v14  ;;  %v314_v24 = vadd.f32 %v599_v1, %v276_v17  ;;  %v278_v25 = vmul.f32 %v589_v0, %v240_v13  ;;  %v341_v29 = vmax.f32 %v309_v18, 0.0  ;;  %v342_v30 = vmax.f32 %v310_v19, 0.0 }
  0x23   : > { %v343_v31 = vmax.f32 %v311_v20, 0.0  ;;  %v315_v32 = vadd.f32 %v599_v1, %v277_v21  ;;  %v344_v36 = vmax.f32 %v312_v22, 0.0  ;;  %v345_v37 = vmax.f32 %v313_v23, 0.0 }
  0x24   : > { %v346_v38 = vmax.f32 %v314_v24, 0.0  ;;  %v316_v39 = vadd.f32 %v599_v1, %v278_v25  ;;  %373 = vst [vmem:[%s622_s26 + $0x80] sm:$0xff] %v341_v29  ;;  %374 = vst [vmem:[%s622_s26 + $0x88] sm:$0xff] %v342_v30  ;;  %v279_v42 = vmul.f32 %v589_v0, %v241_v26  ;;  %v280_v43 = vmul.f32 %v589_v0, %v242_v27 }
  0x25   : > { %375 = vst [vmem:[%s622_s26 + $0x90] sm:$0xff] %v343_v31  ;;  %v347_v41 = vmax.f32 %v315_v32, 0.0  ;;  %v281_v44 = vmul.f32 %v589_v0, %v243_v28  ;;  %376 = vst [vmem:[%s622_s26 + $0x98] sm:$0xff] %v344_v36  ;;  %v282_v47 = vmul.f32 %v589_v0, %v244_v33  ;;  %v283_v48 = vmul.f32 %v589_v0, %v245_v34 }
  0x26   : > { %377 = vst [vmem:[%s622_s26 + $0xa0] sm:$0xff] %v345_v37  ;;  %378 = vst [vmem:[%s622_s26 + $0xa8] sm:$0xff] %v346_v38  ;;  %v348_v46 = vmax.f32 %v316_v39, 0.0  ;;  %v284_v49 = vmul.f32 %v589_v0, %v246_v35  ;;  %v317_v50 = vadd.f32 %v599_v1, %v279_v42  ;;  %v318_v51 = vadd.f32 %v599_v1, %v280_v43 }
  0x27   : > { %379 = vst [vmem:[%s622_s26 + $0xb0] sm:$0xff] %v347_v41  ;;  %v319_v52 = vadd.f32 %v599_v1, %v281_v44  ;;  %v285_v53 = vmul.f32 %v589_v0, %v247_v40  ;;  %v320_v54 = vadd.f32 %v599_v1, %v282_v47  ;;  %v321_v55 = vadd.f32 %v599_v1, %v283_v48 }
  0x28   : > { %380 = vst [vmem:[%s622_s26 + $0xb8] sm:$0xff] %v348_v46  ;;  %v322_v56 = vadd.f32 %v599_v1, %v284_v49  ;;  %v286_v57 = vmul.f32 %v589_v0, %v248_v45  ;;  %v349_v58 = vmax.f32 %v317_v50, 0.0  ;;  %v350_v59 = vmax.f32 %v318_v51, 0.0 }
  0x29   : > { %v351_v60 = vmax.f32 %v319_v52, 0.0  ;;  %v323_v61 = vadd.f32 %v599_v1, %v285_v53  ;;  %v352_v62 = vmax.f32 %v320_v54, 0.0  ;;  %v353_v63 = vmax.f32 %v321_v55, 0.0 }
  0x2a   : > { %v354_v2 = vmax.f32 %v322_v56, 0.0  ;;  %v324_v3 = vadd.f32 %v599_v1, %v286_v57  ;;  %381 = vst [vmem:[%s622_s26 + $0xc0] sm:$0xff] %v349_v58  ;;  %382 = vst [vmem:[%s622_s26 + $0xc8] sm:$0xff] %v350_v59 }
  0x2b   : > { %383 = vst [vmem:[%s622_s26 + $0xd0] sm:$0xff] %v351_v60  ;;  %v355_v4 = vmax.f32 %v323_v61, 0.0  ;;  %384 = vst [vmem:[%s622_s26 + $0xd8] sm:$0xff] %v352_v62 }
  0x2c   : > { %385 = vst [vmem:[%s622_s26 + $0xe0] sm:$0xff] %v353_v63  ;;  %386 = vst [vmem:[%s622_s26 + $0xe8] sm:$0xff] %v354_v2  ;;  %v356_v0 = vmax.f32 %v324_v3, 0.0 }
  0x2d   : > { %387 = vst [vmem:[%s622_s26 + $0xf0] sm:$0xff] %v355_v4 }
  0x2e   : > { %388 = vst [vmem:[%s622_s26 + $0xf8] sm:$0xff] %v356_v0 }
  0x2f PF: > { %s13_s14 = sadd.s32 1, %s546_s14   ;;  %s747_s12 = smov %s542_s13 }
  0x30   : > { %p10_p5 = scmp.ge.s32.totalorder %s13_s14, 4   ;;  %s748_s13 = smov %s750_s15 }
  0x32   :  { %12 = sbr.rel (!%p10_p5) target bundleno = 2 (0x2), region = 62 }

// kernel: recurrent_block_forward.4
= control target key start
LH: loop header
LB: loop body
LE: loop exit
PB: predicated region body
PF: predicated region fallthrough
CT: control target
= control target key end

     0   :  { %s4336_s21 = smov 0   ;;  %s4338_s22 = smov 0   ;;  %s6421_s0 = inlined_call_operand.vmem [shape: f32[2,16,16,128], index: 0, kind: input, shape index: {}, may-alias: {0,1,2}]   ;;  %s6422_s1 = inlined_call_operand.vmem [shape: f32[2,16,16,128], index: 1, kind: input, shape index: {}, may-alias: {0,1,2}]   ;;  %s6423_s2 = inlined_call_operand.vmem [shape: f32[2,16,16,128], index: 2, kind: input, shape index: {}, may-alias: {0,1,2}]   ;;  %s6424_s3 = inlined_call_operand.vmem [shape: f32[3,384,128], index: 3, kind: input, shape index: {}]   ;;  %s6425_s4 = inlined_call_operand.vmem [shape: f32[1,128], index: 4, kind: input, shape index: {}]   ;;  %s6426_s5 = inlined_call_operand.vmem [shape: f32[2,16,16,128], index: 5, kind: output, shape index: {0}]   ;;  %s6427_s6 = inlined_call_operand.vmem [shape: f32[2,1,2,128], index: 6, kind: output, shape index: {1}]  }
   0x1   :  { %s4340_s23 = smov 0  }
   0x2 LB: > { %s29_s24 = sadd.s32 1, %s4293_s22  ;;  %p3480_p0 = scmp.ge.s32.totalorder %s4297_s23, 1  ;;  %s4297_s23 = sphi %s4340_s23, %s17_s23   ;;  %s4293_s22 = sphi %s4338_s22, %s6471_s22   ;;  %s4289_s21 = sphi %s4336_s21, %s6470_s21  }
   0x3   : > { %p31_p1 = scmp.ge.s32.totalorder %s29_s24, 2  ;;  %p303_p2 = scmp.lt.s32.totalorder %s4297_s23, 3 }
   0x5   : > { %s6473_s24 = smov (%p31_p1, %s29_s24), 0  ;;  %p304_p3 = pnand %p3480_p0, %p303_p2 }
   0x7   : > { %307 = sbr.rel (%p304_p3) target bundleno = 678 (0x2a6), region = 40 }
   0xe   : > { %v890_v0 = vld [vmem:[%s6424_s3] sm:$0xff]  ;;  %v891_v1 = vld [vmem:[%s6424_s3 + $0x8] sm:$0xff]  ;;  %p377_p4 = scmp.lt.s32.totalorder %s4289_s21, 1  ;;  %v6428_v3 = vmov 0.0|0.0   ;;  %v892_v6 = vld [vmem:[%s6424_s3 + $0x10] sm:$0xff]  ;;  %v4300_v8 = vmov 0.0  }
   0xf   : > { %v922_v2 = vld [vmem:[%s6424_s3 + $0x100] sm:$0xff]  ;;  %3979 = vmatprep.subr.bf16.mxu0 %v6428_v3  ;;  %v3980_v4 = vpack.c.bf16 %v891_v1, %v890_v0  ;;  %v923_v5 = vld [vmem:[%s6424_s3 + $0x108] sm:$0xff]  ;;  %v893_v7 = vld [vmem:[%s6424_s3 + $0x18] sm:$0xff]  ;;  %525 = vst [vmem:[#allocation2] sm:$0x1] %v4300_v8  ;;  %vm777_vm0 = vcmask 1045504  }
  0x10   : > { %526 = vst [vmem:[#allocation2 + $0x18] sm:$0x1] %v4300_v8  ;;  %527 = vst [vmem:[#allocation2 + $0x30] sm:$0x1] %v4300_v8  ;;  %v4027_v9 = vpack.c.bf16 %v923_v5, %v922_v2  ;;  %v924_v10 = vld [vmem:[%s6424_s3 + $0x110] sm:$0xff]  ;;  %v925_v11 = vld [vmem:[%s6424_s3 + $0x118] sm:$0xff]  ;;  %v3983_v12 = vpack.c.bf16 %v893_v7, %v892_v6 }
  0x11   : > { %528 = vst [vmem:[#allocation2 + $0x48] sm:$0x1] %v4300_v8  ;;  %529 = vst [vmem:[#allocation2 + $0x60] sm:$0x1] %v4300_v8  ;;  %s6475_s21 = smov (!%p377_p4, %s4289_s21), 1  ;;  %3981 = vmatpush1.bf16.msra.mxu0 %v3980_v4  ;;  %v4031_v13 = vpack.c.bf16 %v925_v11, %v924_v10  ;;  %v926_v14 = vld [vmem:[%s6424_s3 + $0x120] sm:$0xff] }
  0x12   : > { %530 = vst [vmem:[#allocation2 + $0x78] sm:$0x1] %v4300_v8  ;;  %531 = vst [vmem:[#allocation2 + $0x90] sm:$0x1] %v4300_v8  ;;  %v927_v15 = vld [vmem:[%s6424_s3 + $0x128] sm:$0xff]  ;;  %4028 = vmatprep.subr.bf16.mxu1 %v4027_v9  ;;  %3982 = vmatprep.subr.bf16.mxu0 %v6428_v3  ;;  %v894_v16 = vld [vmem:[%s6424_s3 + $0x20] sm:$0xff] }
  0x13   : > { %532 = vst [vmem:[#allocation2 + $0xa8] sm:$0x1] %v4300_v8  ;;  %533 = vst [vmem:[#allocation2 + $0xc0] sm:$0x1] %v4300_v8  ;;  %v895_v17 = vld [vmem:[%s6424_s3 + $0x28] sm:$0xff]  ;;  %s4401_s29 = sshll.u32 %s6475_s21, 8  ;;  %4030 = vmatpush3.bf16.msra.mxu1 %v4027_v9  ;;  %v4035_v18 = vpack.c.bf16 %v927_v15, %v926_v14 }
  0x14   : > { %534 = vst [vmem:[#allocation2 + $0xd8] sm:$0x1] %v4300_v8  ;;  %535 = vst [vmem:[#allocation2 + $0xf0] sm:$0x1] %v4300_v8  ;;  %4032 = vmatprep.subr.bf16.mxu1 %v4031_v13  ;;  %v3986_v19 = vpack.c.bf16 %v895_v17, %v894_v16  ;;  %v928_v20 = vld [vmem:[%s6424_s3 + $0x130] sm:$0xff]  ;;  %v929_v21 = vld [vmem:[%s6424_s3 + $0x138] sm:$0xff]  ;;  %s399_s12 = scalar_lea.vmem %s6422_s1, %s4401_s29  ;;  %s4424_s19 = scalar_lea.vmem %s6421_s0, %s4401_s29 }
  0x15   : > { %536 = vst [vmem:[#allocation2 + $0x108] sm:$0x1] %v4300_v8  ;;  %537 = vst [vmem:[#allocation2 + $0x120] sm:$0x1] %v4300_v8  ;;  %3984 = vmatpush1.bf16.msra.mxu0 %v3983_v12  ;;  %v896_v22 = vld [vmem:[%s6424_s3 + $0x30] sm:$0xff]  ;;  %v897_v23 = vld [vmem:[%s6424_s3 + $0x38] sm:$0xff]  ;;  %v4039_v24 = vpack.c.bf16 %v929_v21, %v928_v20  ;;  %s6145_s30 = scalar_lea.vmem %s6426_s5, %s4401_s29 }
  0x16   : > { %538 = vst [vmem:[#allocation2 + $0x138] sm:$0x1] %v4300_v8  ;;  %539 = vst [vmem:[#allocation2 + $0x150] sm:$0x1] %v4300_v8  ;;  %3985 = vmatprep.subr.bf16.mxu0 %v6428_v3  ;;  %v471_v25 = vld [vmem:[%s399_s12] sm:$0xff]  ;;  %v3989_v26 = vpack.c.bf16 %v897_v23, %v896_v22  ;;  %v931_v28 = vld [vmem:[%s6424_s3 + $0x148] sm:$0xff] }
  0x17   : > { %540 = vst [vmem:[#allocation2 + $0x168] sm:$0x1] %v4300_v8  ;;  %541 = vst [vmem:[#allocation2 + $0x180] sm:$0x1] %v4300_v8  ;;  %4034 = vmatpush3.bf16.msra.mxu1 %v4031_v13  ;;  %v930_v27 = vld [vmem:[%s6424_s3 + $0x140] sm:$0xff]  ;;  %v472_v29 = vld [vmem:[%s399_s12 + $0x8] sm:$0xff] }
  0x18   : > { %542 = vst [vmem:[#allocation2 + $0x198] sm:$0x1] %v4300_v8  ;;  %543 = vst [vmem:[#allocation2 + $0x11] sm:$0x1] %v4300_v8  ;;  %4036 = vmatprep.subr.bf16.mxu1 %v4035_v18  ;;  %v479_v30 = vmul.f32 0.0, %v471_v25  ;;  %v898_v31 = vld [vmem:[%s6424_s3 + $0x40] sm:$0xff]  ;;  %v4043_v36 = vpack.c.bf16 %v931_v28, %v930_v27 }
  0x19   : > { %544 = vst [vmem:[#allocation2 + $0x29] sm:$0x1] %v4300_v8  ;;  %545 = vst [vmem:[#allocation2 + $0x41] sm:$0x1] %v4300_v8  ;;  %3987 = vmatpush1.bf16.msra.mxu0 %v3986_v19  ;;  %v899_v32 = vld [vmem:[%s6424_s3 + $0x48] sm:$0xff]  ;;  %v480_v33 = vmul.f32 0.0, %v472_v29 }
  0x1a   : > { %546 = vst [vmem:[#allocation2 + $0x59] sm:$0x1] %v4300_v8  ;;  %547 = vst [vmem:[#allocation2 + $0x71] sm:$0x1] %v4300_v8  ;;  %3988 = vmatprep.subr.bf16.mxu0 %v6428_v3  ;;  %v439_v34 = vld [vmem:[%s4424_s19] sm:$0xff]  ;;  %v440_v35 = vld [vmem:[%s4424_s19 + $0x8] sm:$0xff]  ;;  %v3992_v38 = vpack.c.bf16 %v899_v32, %v898_v31 }
  0x1b   : > { %548 = vst [vmem:[#allocation2 + $0x89] sm:$0x1] %v4300_v8  ;;  %549 = vst [vmem:[#allocation2 + $0xa1] sm:$0x1] %v4300_v8  ;;  %4038 = vmatpush3.bf16.msra.mxu1 %v4035_v18  ;;  %v441_v37 = vld [vmem:[%s4424_s19 + $0x10] sm:$0xff]  ;;  %v933_v40 = vld [vmem:[%s6424_s3 + $0x158] sm:$0xff] }
  0x1c   : > { %550 = vst [vmem:[#allocation2 + $0xb9] sm:$0x1] %v4300_v8  ;;  %551 = vst [vmem:[#allocation2 + $0xd1] sm:$0x1] %v4300_v8  ;;  %4040 = vmatprep.subr.bf16.mxu1 %v4039_v24  ;;  %v932_v39 = vld [vmem:[%s6424_s3 + $0x150] sm:$0xff]  ;;  %v442_v41 = vld [vmem:[%s4424_s19 + $0x18] sm:$0xff] }
  0x1d   : > { %552 = vst [vmem:[#allocation2 + $0xe9] sm:$0x1] %v4300_v8  ;;  %553 = vst [vmem:[#allocation2 + $0x101] sm:$0x1] %v4300_v8  ;;  %3990 = vmatpush1.bf16.msra.mxu0 %v3989_v26  ;;  %v900_v42 = vld [vmem:[%s6424_s3 + $0x50] sm:$0xff]  ;;  %v901_v43 = vld [vmem:[%s6424_s3 + $0x58] sm:$0xff]  ;;  %v4047_v46 = vpack.c.bf16 %v933_v40, %v932_v39 }
  0x1e   : > { %554 = vst [vmem:[#allocation2 + $0x119] sm:$0x1] %v4300_v8  ;;  %555 = vst [vmem:[#allocation2 + $0x131] sm:$0x1] %v4300_v8  ;;  %3991 = vmatprep.subr.bf16.mxu0 %v6428_v3  ;;  %v443_v44 = vld [vmem:[%s4424_s19 + $0x20] sm:$0xff]  ;;  %v444_v45 = vld [vmem:[%s4424_s19 + $0x28] sm:$0xff]  ;;  %v3995_v48 = vpack.c.bf16 %v901_v43, %v900_v42 }
  0x1f   : > { %556 = vst [vmem:[#allocation2 + $0x149] sm:$0x1] %v4300_v8  ;;  %557 = vst [vmem:[#allocation2 + $0x161] sm:$0x1] %v4300_v8  ;;  %4042 = vmatpush3.bf16.msra.mxu1 %v4039_v24  ;;  %v445_v47 = vld [vmem:[%s4424_s19 + $0x30] sm:$0xff]  ;;  %v934_v49 = vld [vmem:[%s6424_s3 + $0x160] sm:$0xff] }
  0x20   : > { %558 = vst [vmem:[#allocation2 + $0x179] sm:$0x1] %v4300_v8  ;;  %559 = vst [vmem:[#allocation2 + $0x191] sm:$0x1] %v4300_v8  ;;  %4044 = vmatprep.subr.bf16.mxu1 %v4043_v36  ;;  %v935_v50 = vld [vmem:[%s6424_s3 + $0x168] sm:$0xff]  ;;  %v446_v51 = vld [vmem:[%s4424_s19 + $0x38] sm:$0xff] }
  0x21   : > { %560 = vst [vmem:[#allocation2 + $0x1a9] sm:$0x1] %v4300_v8  ;;  %487 = vst [vmem:[#allocation2 + $0x1] sm:$0xff] %v479_v30  ;;  %3993 = vmatpush1.bf16.msra.mxu0 %v3992_v38  ;;  %v902_v52 = vld [vmem:[%s6424_s3 + $0x60] sm:$0xff]  ;;  %v903_v53 = vld [vmem:[%s6424_s3 + $0x68] sm:$0xff]  ;;  %v4051_v57 = vpack.c.bf16 %v935_v50, %v934_v49  ;;  %vm664_vm1 = vcmask 1046528  }
  0x22   : > { %490 = vst [vmem:[#allocation2 + $0x19] sm:$0xff] %v439_v34  ;;  %488 = vst [vmem:[#allocation2 + $0x9] sm:$0xff] %v480_v33  ;;  %3994 = vmatprep.subr.bf16.mxu0 %v6428_v3  ;;  %v3998_v59 = vpack.c.bf16 %v903_v53, %v902_v52  ;;  %v904_v60 = vld [vmem:[%s6424_s3 + $0x70] sm:$0xff]  ;;  %v937_v62 = vld [vmem:[%s6424_s3 + $0x178] sm:$0xff]  ;;  %s3592_s28 = sadd.s32 240, %s4401_s29  ;;  %s3489_s29 = sshll.u32 %s6475_s21, 1 }
  0x23   : > { %491 = vst [vmem:[#allocation2 + $0x21] sm:$0xff] %v440_v35  ;;  %492 = vst [vmem:[#allocation2 + $0x31] sm:$0xff] %v441_v37  ;;  %4046 = vmatpush3.bf16.msra.mxu1 %v4043_v36  ;;  %v936_v61 = vld [vmem:[%s6424_s3 + $0x170] sm:$0xff]  ;;  %v905_v63 = vld [vmem:[%s6424_s3 + $0x78] sm:$0xff]  ;;  %s416_s8 = scalar_lea.vmem %s6423_s2, %s3592_s28  ;;  %vm3294_vm2 = vcmask 1040384   ;;  %s438_s9 = scalar_lea.vmem %s6427_s6, %s3489_s29 }
  0x24   : > { %493 = vst [vmem:[#allocation2 + $0x39] sm:$0xff] %v442_v41  ;;  %494 = vst [vmem:[#allocation2 + $0x49] sm:$0xff] %v443_v44  ;;  %4048 = vmatprep.subr.bf16.mxu1 %v4047_v46  ;;  %v447_v1 = vld [vmem:[%s4424_s19 + $0x40] sm:$0xff]  ;;  %v448_v2 = vld [vmem:[%s4424_s19 + $0x48] sm:$0xff]  ;;  %v4055_v4 = vpack.c.bf16 %v937_v62, %v936_v61  ;;  %v4001_v7 = vpack.c.bf16 %v905_v63, %v904_v60 }
  0x25   : > { %495 = vst [vmem:[#allocation2 + $0x51] sm:$0xff] %v444_v45  ;;  %496 = vst [vmem:[#allocation2 + $0x61] sm:$0xff] %v445_v47  ;;  %3996 = vmatpush1.bf16.msra.mxu0 %v3995_v48  ;;  %v906_v8 = vld [vmem:[%s6424_s3 + $0x80] sm:$0xff]  ;;  %v907_v12 = vld [vmem:[%s6424_s3 + $0x88] sm:$0xff] }
  0x26   : > { %497 = vst [vmem:[#allocation2 + $0x69] sm:$0xff] %v446_v51  ;;  %3997 = vmatprep.subr.bf16.mxu0 %v6428_v3  ;;  %498 = vst [vmem:[#allocation2 + $0x79] sm:$0xff] %v447_v1  ;;  %v449_v13 = vld [vmem:[%s4424_s19 + $0x50] sm:$0xff]  ;;  %v450_v14 = vld [vmem:[%s4424_s19 + $0x58] sm:$0xff]  ;;  %v4004_v24 = vpack.c.bf16 %v907_v12, %v906_v8 }
  0x27   : > { %4050 = vmatpush3.bf16.msra.mxu1 %v4047_v46  ;;  %499 = vst [vmem:[#allocation2 + $0x81] sm:$0xff] %v448_v2  ;;  %v3491_v16 = vld [vmem:[%s6424_s3 + $0x180] sm:$0xff]  ;;  %v3492_v17 = vld [vmem:[%s6424_s3 + $0x188] sm:$0xff]  ;;  %500 = vst [vmem:[#allocation2 + $0x91] sm:$0xff] %v449_v13 }
  0x28   : > { %v4473_v54 = vld [vmem:[#allocation2] sm:$0xff]  ;;  %4052 = vmatprep.subr.bf16.mxu1 %v4051_v57  ;;  %501 = vst [vmem:[#allocation2 + $0x99] sm:$0xff] %v450_v14  ;;  %v452_v23 = vld [vmem:[%s4424_s19 + $0x68] sm:$0xff]  ;;  %v908_v27 = vld [vmem:[%s6424_s3 + $0x90] sm:$0xff]  ;;  %v4060_v31 = vpack.c.bf16 %v3492_v17, %v3491_v16 }
  0x29   : > { %v4475_v55 = vld [vmem:[#allocation2 + $0x8] sm:$0xff]  ;;  %v778_v56 = vrot.slane %v4473_v54, 2  ;;  %v4495_v5 = vld [vmem:[#allocation2 + $0x10] sm:$0x3]  ;;  %v665_v6 = vrot.slane %v4473_v54, 1  ;;  %3999 = vmatpush1.bf16.msra.mxu0 %v3998_v59  ;;  %v4501_v9 = vld [vmem:[#allocation2 + $0x18] sm:$0xff] }
  0x2a   : > { %v779_v58 = vrot.slane %v4475_v55, 2  ;;  %v4503_v10 = vld [vmem:[#allocation2 + $0x20] sm:$0xff]  ;;  %v666_v11 = vrot.slane %v4475_v55, 1  ;;  %4000 = vmatprep.subr.bf16.mxu0 %v6428_v3  ;;  %v781_v15 = vrot.slane %v4495_v5, 2  ;;  %v783_v19 = vrot.slane %v4501_v9, 2  ;;  %v4528_v25 = vld [vmem:[#allocation2 + $0x30] sm:$0xff] }
  0x2b   : > { %4054 = vmatpush3.bf16.msra.mxu1 %v4051_v57  ;;  %v784_v20 = vrot.slane %v4503_v10, 2  ;;  %v4524_v21 = vld [vmem:[#allocation2 + $0x28] sm:$0x3]  ;;  %v451_v22 = vld [vmem:[%s4424_s19 + $0x60] sm:$0xff]  ;;  %v4530_v26 = vld [vmem:[#allocation2 + $0x38] sm:$0xff]  ;;  %503 = vst [vmem:[#allocation2 + $0xb1] sm:$0xff] %v452_v23 }
  0x2c   : > { %v780_v0 = vsel %vm777_vm0, %v778_v56, %v779_v58  ;;  %v667_v18 = vsel %vm664_vm1, %v665_v6, %v666_v11  ;;  %4056 = vmatprep.subr.bf16.mxu1 %v4055_v4  ;;  %502 = vst [vmem:[#allocation2 + $0xa9] sm:$0xff] %v451_v22  ;;  %v909_v28 = vld [vmem:[%s6424_s3 + $0x98] sm:$0xff]  ;;  %v3493_v29 = vld [vmem:[%s6424_s3 + $0x190] sm:$0xff]  ;;  %v782_v30 = vsel %vm777_vm0, %v779_v58, %v781_v15  ;;  %v786_v32 = vrot.slane %v4524_v21, 2  ;;  %v4553_v39 = vld [vmem:[#allocation2 + $0x40] sm:$0x3] }
  0x2d   : > { %3771 = vmatprep.mubr.f32.mxu1 %v780_v0  ;;  %4002 = vmatpush1.bf16.msra.mxu0 %v4001_v7  ;;  %v3494_v33 = vld [vmem:[%s6424_s3 + $0x198] sm:$0xff]  ;;  %v453_v34 = vld [vmem:[%s4424_s19 + $0x70] sm:$0xff]  ;;  %v785_v36 = vsel %vm777_vm0, %v783_v19, %v784_v20  ;;  %v788_v37 = vrot.slane %v4528_v25, 2  ;;  %v789_v38 = vrot.slane %v4530_v26, 2  ;;  %v455_v40 = vld [vmem:[%s4424_s19 + $0x80] sm:$0xff]  ;;  %v4007_v42 = vpack.c.bf16 %v909_v28, %v908_v27 }
  0x2e   : > { %1002 = vmatprep.mubr.f32.mxu0 %v667_v18  ;;  %4003 = vmatprep.subr.bf16.mxu0 %v6428_v3  ;;  %v454_v35 = vld [vmem:[%s4424_s19 + $0x78] sm:$0xff]  ;;  %504 = vst [vmem:[#allocation2 + $0xc1] sm:$0xff] %v453_v34  ;;  %v456_v41 = vld [vmem:[%s4424_s19 + $0x88] sm:$0xff]  ;;  %v4559_v44 = vld [vmem:[#allocation2 + $0x50] sm:$0xff]  ;;  %v787_v48 = vsel %vm777_vm0, %v784_v20, %v786_v32  ;;  %v4063_v49 = vpack.c.bf16 %v3494_v33, %v3493_v29  ;;  %v791_v50 = vrot.slane %v4553_v39, 2 }
  0x2f   : > { %4058 = vmatpush3.bf16.msra.mxu1 %v4055_v4  ;;  %505 = vst [vmem:[#allocation2 + $0xc9] sm:$0xff] %v454_v35  ;;  %v4557_v43 = vld [vmem:[#allocation2 + $0x48] sm:$0xff]  ;;  %506 = vst [vmem:[#allocation2 + $0xd9] sm:$0xff] %v455_v40  ;;  %v457_v45 = vld [vmem:[%s4424_s19 + $0x90] sm:$0xff]  ;;  %v790_v56 = vsel %vm777_vm0, %v788_v37, %v789_v38  ;;  %v794_v58 = vrot.slane %v4559_v44, 2 }
  0x30   : > { %4059 = vmatprep.subr.bf16.mxu1 %v6428_v3  ;;  %507 = vst [vmem:[#allocation2 + $0xe1] sm:$0xff] %v456_v41  ;;  %v910_v46 = vld [vmem:[%s6424_s3 + $0xa0] sm:$0xff]  ;;  %v911_v47 = vld [vmem:[%s6424_s3 + $0xa8] sm:$0xff]  ;;  %508 = vst [vmem:[#allocation2 + $0xf1] sm:$0xff] %v457_v45  ;;  %v793_v57 = vrot.slane %v4557_v43, 2  ;;  %v792_v7 = vsel %vm777_vm0, %v789_v38, %v791_v50 }
  0x31   : > { %4005 = vmatpush1.bf16.msra.mxu0 %v4004_v24  ;;  %v3495_v51 = vld [vmem:[%s6424_s3 + $0x1a0] sm:$0xff]  ;;  %v3496_v52 = vld [vmem:[%s6424_s3 + $0x1a8] sm:$0xff]  ;;  %v458_v53 = vld [vmem:[%s4424_s19 + $0x98] sm:$0xff]  ;;  %v4010_v62 = vpack.c.bf16 %v911_v47, %v910_v46 }
  0x32   : > { %3772 = vmatmul.mubr.f32.vlgmr.msra.gmra.mrb[0].mxu1 %v782_v30  ;;  %4006 = vmatprep.subr.bf16.mxu0 %v6428_v3  ;;  %v912_v59 = vld [vmem:[%s6424_s3 + $0xb0] sm:$0xff]  ;;  %v4585_v60 = vld [vmem:[#allocation2 + $0x58] sm:$0x3]  ;;  %v4587_v61 = vld [vmem:[#allocation2 + $0x60] sm:$0xff]  ;;  %509 = vst [vmem:[#allocation2 + $0xf9] sm:$0xff] %v458_v53  ;;  %v4066_v8 = vpack.c.bf16 %v3496_v52, %v3495_v51  ;;  %v795_v13 = vsel %vm777_vm0, %v793_v57, %v794_v58 }
  0x33   : > { %4061 = vmatpush1.bf16.msra.mxu1 %v4060_v31  ;;  %3774 = vmatprep.mubr.f32.mxu1 %v785_v36  ;;  %v4589_v63 = vld [vmem:[#allocation2 + $0x68] sm:$0xff]  ;;  %v459_v0 = vld [vmem:[%s4424_s19 + $0xa0] sm:$0xff]  ;;  %v913_v2 = vld [vmem:[%s6424_s3 + $0xb8] sm:$0xff]  ;;  %v796_v12 = vrot.slane %v4585_v60, 2  ;;  %v798_v16 = vrot.slane %v4587_v61, 2 }
  0x34   : > { %4062 = vmatprep.subr.bf16.mxu1 %v6428_v3  ;;  %v460_v1 = vld [vmem:[%s4424_s19 + $0xa8] sm:$0xff]  ;;  %510 = vst [vmem:[#allocation2 + $0x109] sm:$0xff] %v459_v0  ;;  %v461_v4 = vld [vmem:[%s4424_s19 + $0xb0] sm:$0xff]  ;;  %v462_v6 = vld [vmem:[%s4424_s19 + $0xb8] sm:$0xff]  ;;  %v799_v17 = vrot.slane %v4589_v63, 2  ;;  %v4013_v19 = vpack.c.bf16 %v913_v2, %v912_v59 }
  0x35   : > { %4008 = vmatpush1.bf16.msra.mxu0 %v4007_v42  ;;  %511 = vst [vmem:[#allocation2 + $0x111] sm:$0xff] %v460_v1  ;;  %512 = vst [vmem:[#allocation2 + $0x121] sm:$0xff] %v461_v4  ;;  %v3497_v14 = vld [vmem:[%s6424_s3 + $0x1b0] sm:$0xff]  ;;  %v3498_v15 = vld [vmem:[%s6424_s3 + $0x1b8] sm:$0xff]  ;;  %v797_v29 = vsel %vm777_vm0, %v794_v58, %v796_v12 }
  0x36   : > { %3775 = vmatmul.mubr.f32.gmra.mrb[2].mxu1 %v787_v48  ;;  %4009 = vmatprep.subr.bf16.mxu0 %v6428_v3  ;;  %513 = vst [vmem:[#allocation2 + $0x129] sm:$0xff] %v462_v6  ;;  %v4611_v18 = vld [vmem:[#allocation2 + $0x70] sm:$0x3]  ;;  %v914_v20 = vld [vmem:[%s6424_s3 + $0xc0] sm:$0xff]  ;;  %v4616_v22 = vld [vmem:[#allocation2 + $0x78] sm:$0xff]  ;;  %v4069_v30 = vpack.c.bf16 %v3498_v15, %v3497_v14  ;;  %v800_v34 = vsel %vm777_vm0, %v798_v16, %v799_v17 }
  0x37   : > { %4064 = vmatpush1.bf16.msra.mxu1 %v4063_v49  ;;  %3777 = vmatprep.mubr.f32.mxu1 %v790_v56  ;;  %v4618_v23 = vld [vmem:[#allocation2 + $0x80] sm:$0xff]  ;;  %v915_v24 = vld [vmem:[%s6424_s3 + $0xc8] sm:$0xff]  ;;  %v801_v31 = vrot.slane %v4611_v18, 2  ;;  %v803_v35 = vrot.slane %v4616_v22, 2  ;;  %v465_v38 = vld [vmem:[%s4424_s19 + $0xd0] sm:$0xff] }
  0x38   : > { %4065 = vmatprep.subr.bf16.mxu1 %v6428_v3  ;;  %v463_v27 = vld [vmem:[%s4424_s19 + $0xc0] sm:$0xff]  ;;  %v464_v28 = vld [vmem:[%s4424_s19 + $0xc8] sm:$0xff]  ;;  %v804_v36 = vrot.slane %v4618_v23, 2  ;;  %v466_v40 = vld [vmem:[%s4424_s19 + $0xd8] sm:$0xff]  ;;  %v4016_v41 = vpack.c.bf16 %v915_v24, %v914_v20  ;;  %516 = vst [vmem:[#allocation2 + $0x151] sm:$0xff] %v465_v38 }
  0x39   : > { %4011 = vmatpush1.bf16.msra.mxu0 %v4010_v62  ;;  %v3499_v32 = vld [vmem:[%s6424_s3 + $0x1c0] sm:$0xff]  ;;  %v3500_v33 = vld [vmem:[%s6424_s3 + $0x1c8] sm:$0xff]  ;;  %514 = vst [vmem:[#allocation2 + $0x139] sm:$0xff] %v463_v27  ;;  %515 = vst [vmem:[#allocation2 + $0x141] sm:$0xff] %v464_v28  ;;  %v802_v48 = vsel %vm777_vm0, %v799_v17, %v801_v31 }
  0x3a   : > { %3778 = vmatmul.mubr.f32.gmra.mrb[4].mxu1 %v792_v7  ;;  %4012 = vmatprep.subr.bf16.mxu0 %v6428_v3  ;;  %v4638_v37 = vld [vmem:[#allocation2 + $0x88] sm:$0x3]  ;;  %v4642_v42 = vld [vmem:[#allocation2 + $0x90] sm:$0xff]  ;;  %v4644_v45 = vld [vmem:[#allocation2 + $0x98] sm:$0xff]  ;;  %517 = vst [vmem:[#allocation2 + $0x159] sm:$0xff] %v466_v40  ;;  %v4072_v49 = vpack.c.bf16 %v3500_v33, %v3499_v32  ;;  %v805_v53 = vsel %vm777_vm0, %v803_v35, %v804_v36 }
  0x3b   : > { %4067 = vmatpush1.bf16.msra.mxu1 %v4066_v8  ;;  %3780 = vmatprep.mubr.f32.mxu1 %v795_v13  ;;  %v916_v46 = vld [vmem:[%s6424_s3 + $0xd0] sm:$0xff]  ;;  %v917_v47 = vld [vmem:[%s6424_s3 + $0xd8] sm:$0xff]  ;;  %v806_v50 = vrot.slane %v4638_v37, 2  ;;  %v467_v52 = vld [vmem:[%s4424_s19 + $0xe0] sm:$0xff]  ;;  %v808_v57 = vrot.slane %v4642_v42, 2  ;;  %v809_v58 = vrot.slane %v4644_v45, 2 }
  0x3c   : > { %4068 = vmatprep.subr.bf16.mxu1 %v6428_v3  ;;  %v3501_v51 = vld [vmem:[%s6424_s3 + $0x1d0] sm:$0xff]  ;;  %v3502_v56 = vld [vmem:[%s6424_s3 + $0x1d8] sm:$0xff]  ;;  %v4666_v59 = vld [vmem:[#allocation2 + $0xa0] sm:$0x3]  ;;  %518 = vst [vmem:[#allocation2 + $0x169] sm:$0xff] %v467_v52  ;;  %v4019_v0 = vpack.c.bf16 %v917_v47, %v916_v46 }
  0x3d   : > { %4014 = vmatpush1.bf16.msra.mxu0 %v4013_v19  ;;  %v468_v62 = vld [vmem:[%s4424_s19 + $0xe8] sm:$0xff]  ;;  %v4671_v2 = vld [vmem:[#allocation2 + $0xb0] sm:$0xff]  ;;  %v918_v4 = vld [vmem:[%s6424_s3 + $0xe0] sm:$0xff]  ;;  %v807_v7 = vsel %vm777_vm0, %v804_v36, %v806_v50  ;;  %v4075_v8 = vpack.c.bf16 %v3502_v56, %v3501_v51  ;;  %v811_v12 = vrot.slane %v4666_v59, 2  ;;  %v810_v13 = vsel %vm777_vm0, %v808_v57, %v809_v58 }
  0x3e   : > { %3781 = vmatmul.mubr.f32.gmra.mrb[6].mxu1 %v797_v29  ;;  %4015 = vmatprep.subr.bf16.mxu0 %v6428_v3  ;;  %v4669_v1 = vld [vmem:[#allocation2 + $0xa8] sm:$0xff]  ;;  %519 = vst [vmem:[#allocation2 + $0x171] sm:$0xff] %v468_v62  ;;  %v3503_v14 = vld [vmem:[%s6424_s3 + $0x1e0] sm:$0xff]  ;;  %v814_v17 = vrot.slane %v4671_v2, 2  ;;  %v4692_v19 = vld [vmem:[#allocation2 + $0xb8] sm:$0x3] }
  0x3f   : > { %4070 = vmatpush1.bf16.msra.mxu1 %v4069_v30  ;;  %3783 = vmatprep.mubr.f32.mxu1 %v800_v34  ;;  %v919_v6 = vld [vmem:[%s6424_s3 + $0xe8] sm:$0xff]  ;;  %v813_v16 = vrot.slane %v4669_v1, 2  ;;  %v4694_v24 = vld [vmem:[#allocation2 + $0xc0] sm:$0xff]  ;;  %v920_v28 = vld [vmem:[%s6424_s3 + $0xf0] sm:$0xff]  ;;  %v812_v30 = vsel %vm777_vm0, %v809_v58, %v811_v12  ;;  %v816_v32 = vrot.slane %v4692_v19, 2  ;;  %v668_v50 = vrot.slane %v4495_v5, 1 }
  0x40   : > { %4071 = vmatprep.subr.bf16.mxu1 %v6428_v3  ;;  %v3504_v15 = vld [vmem:[%s6424_s3 + $0x1e8] sm:$0xff]  ;;  %v4022_v20 = vpack.c.bf16 %v919_v6, %v918_v4  ;;  %v921_v29 = vld [vmem:[%s6424_s3 + $0xf8] sm:$0xff]  ;;  %v3523_v33 = vld [vmem:[%s6424_s3 + $0x280] sm:$0xff]  ;;  %v818_v40 = vrot.slane %v4694_v24, 2 }
  0x41   : > { %4017 = vmatpush1.bf16.msra.mxu0 %v4016_v41  ;;  %v4696_v27 = vld [vmem:[#allocation2 + $0xc8] sm:$0xff]  ;;  %v4078_v31 = vpack.c.bf16 %v3504_v15, %v3503_v14  ;;  %v815_v35 = vsel %vm777_vm0, %v813_v16, %v814_v17  ;;  %v3505_v36 = vld [vmem:[%s6424_s3 + $0x1f0] sm:$0xff]  ;;  %v3506_v38 = vld [vmem:[%s6424_s3 + $0x1f8] sm:$0xff]  ;;  %v4025_v47 = vpack.c.bf16 %v921_v29, %v920_v28  ;;  %v817_v52 = vsel %vm777_vm0, %v814_v17, %v816_v32 }
  0x42   : > { %3784 = vmatmul.mubr.f32.gmra.mrb[8].mxu1 %v802_v48  ;;  %4018 = vmatprep.subr.bf16.mxu0 %v6428_v3  ;;  %v3524_v34 = vld [vmem:[%s6424_s3 + $0x288] sm:$0xff]  ;;  %v819_v41 = vrot.slane %v4696_v27, 2  ;;  %v4723_v46 = vld [vmem:[#allocation2 + $0xd0] sm:$0x3]  ;;  %v4725_v48 = vld [vmem:[#allocation2 + $0xd8] sm:$0xff]  ;;  %v670_v14 = vrot.slane %v4501_v9, 1 }
  0x43   : > { %4073 = vmatpush1.bf16.msra.mxu1 %v4072_v49  ;;  %3786 = vmatprep.mubr.f32.mxu1 %v805_v53  ;;  %v4727_v49 = vld [vmem:[#allocation2 + $0xe0] sm:$0xff]  ;;  %v4107_v51 = vpack.c.bf16 %v3524_v34, %v3523_v33  ;;  %v4081_v53 = vpack.c.bf16 %v3506_v38, %v3505_v36  ;;  %v821_v56 = vrot.slane %v4723_v46, 2  ;;  %v3525_v57 = vld [vmem:[%s6424_s3 + $0x290] sm:$0xff]  ;;  %v3526_v58 = vld [vmem:[%s6424_s3 + $0x298] sm:$0xff]  ;;  %v823_v4 = vrot.slane %v4725_v48, 2 }
  0x44   : > { %4074 = vmatprep.subr.bf16.mxu1 %v6428_v3  ;;  %v820_v5 = vsel %vm777_vm0, %v818_v40, %v819_v41  ;;  %v3507_v62 = vld [vmem:[%s6424_s3 + $0x200] sm:$0xff]  ;;  %v824_v6 = vrot.slane %v4727_v49, 2  ;;  %v4753_v12 = vld [vmem:[#allocation2 + $0xf8] sm:$0xff]  ;;  %v4760_v15 = vrot.slane %v4503_v10, 1  ;;  %v4111_v16 = vpack.c.bf16 %v3526_v58, %v3525_v57  ;;  %v4785_v36 = vld [vmem:[#allocation2 + $0x110] sm:$0xff] }
  0x45   : > { %4020 = vmatpush1.bf16.msra.mxu0 %v4019_v0  ;;  %v3508_v0 = vld [vmem:[%s6424_s3 + $0x208] sm:$0xff]  ;;  %v822_v17 = vsel %vm777_vm0, %v819_v41, %v821_v56  ;;  %v3527_v29 = vld [vmem:[%s6424_s3 + $0x2a0] sm:$0xff]  ;;  %v3510_v32 = vld [vmem:[%s6424_s3 + $0x218] sm:$0xff]  ;;  %v829_v34 = vrot.slane %v4753_v12, 2  ;;  %v673_v40 = vrot.slane %v4524_v21, 1 }
  0x46   : > { %3787 = vmatmul.mubr.f32.gmra.mrb[10].mxu1 %v807_v7  ;;  %4021 = vmatprep.subr.bf16.mxu0 %v6428_v3  ;;  %v4749_v7 = vld [vmem:[#allocation2 + $0xe8] sm:$0x3]  ;;  %v4789_v38 = vsel %vm664_vm1, %v670_v14, %v4760_v15  ;;  %v3511_v56 = vld [vmem:[%s6424_s3 + $0x220] sm:$0xff] }
  0x47   : > { %4076 = vmatpush1.bf16.msra.mxu1 %v4075_v8  ;;  %3789 = vmatprep.mubr.f32.mxu1 %v810_v13  ;;  %v4751_v8 = vld [vmem:[#allocation2 + $0xf0] sm:$0xff]  ;;  %v669_v13 = vsel %vm664_vm1, %v666_v11, %v668_v50  ;;  %v826_v28 = vrot.slane %v4749_v7, 2  ;;  %v3528_v11 = vld [vmem:[%s6424_s3 + $0x2a8] sm:$0xff] }
  0x48   : > { %4077 = vmatprep.subr.bf16.mxu1 %v6428_v3  ;;  %v828_v33 = vrot.slane %v4751_v8, 2  ;;  %v4115_v41 = vpack.c.bf16 %v3528_v11, %v3527_v29  ;;  %v3512_v57 = vld [vmem:[%s6424_s3 + $0x228] sm:$0xff] }
  0x49   : > { %4023 = vmatpush1.bf16.msra.mxu0 %v4022_v20  ;;  %v4084_v20 = vpack.c.bf16 %v3508_v0, %v3507_v62  ;;  %v4811_v62 = vld [vmem:[#allocation2 + $0x118] sm:$0x3]  ;;  %v4816_v0 = vld [vmem:[#allocation2 + $0x128] sm:$0xff] }
  0x4a   : > { %3790 = vmatmul.mubr.f32.gmra.mrb[12].mxu1 %v812_v30  ;;  %4024 = vmatprep.subr.bf16.mxu0 %v6428_v3  ;;  %v825_v30 = vsel %vm777_vm0, %v823_v4, %v824_v6  ;;  %v830_v21 = vsel %vm777_vm0, %v828_v33, %v829_v34  ;;  %v674_v4 = vsel %vm664_vm1, %v4760_v15, %v673_v40  ;;  %v3532_v29 = vld [vmem:[%s6424_s3 + $0x2c8] sm:$0xff]  ;;  %v839_v33 = vrot.slane %v4816_v0, 2  ;;  %v4845_v40 = vld [vmem:[#allocation2 + $0x138] sm:$0xff] }
  0x4b   : > { %4079 = vmatpush1.bf16.msra.mxu1 %v4078_v31  ;;  %3792 = vmatprep.mubr.f32.mxu1 %v815_v35  ;;  %v3509_v31 = vld [vmem:[%s6424_s3 + $0x210] sm:$0xff]  ;;  %v4781_v35 = vld [vmem:[#allocation2 + $0x100] sm:$0x3] }
  0x4c   : > { %4080 = vmatprep.subr.bf16.mxu1 %v6428_v3  ;;  %v4087_v50 = vpack.c.bf16 %v3510_v32, %v3509_v31  ;;  %v3514_v31 = vld [vmem:[%s6424_s3 + $0x238] sm:$0xff] }
  0x4d   : > { %4026 = vmatpush1.bf16.msra.mxu0 %v4025_v47  ;;  %v827_v47 = vsel %vm777_vm0, %v824_v6, %v826_v28  ;;  %v675_v6 = vrot.slane %v4528_v25, 1  ;;  %v836_v28 = vrot.slane %v4811_v62, 2 }
  0x4e   : > { %3793 = vmatmul.mubr.f32.gmra.mrb[14].mxu1 %v817_v52  ;;  %4108 = vmatprep.subr.bf16.mxu0 %v4107_v51  ;;  %v831_v52 = vrot.slane %v4781_v35, 2 }
  0x4f   : > { %4082 = vmatpush1.bf16.msra.mxu1 %v4081_v53  ;;  %3795 = vmatprep.mubr.f32.mxu1 %v820_v5  ;;  %v3530_v53 = vld [vmem:[%s6424_s3 + $0x2b8] sm:$0xff]  ;;  %v834_v5 = vrot.slane %v4785_v36, 2 }
  0x50   : > { %1003 = vmatmul.mubr.f32.vlgmr.msra.gmra.mrb[0].mxu0 %v4473_v54  ;;  %4083 = vmatprep.subr.bf16.mxu1 %v6428_v3  ;;  %v4783_v54 = vld [vmem:[#allocation2 + $0x108] sm:$0xff] }
  0x51   : > { %1007 = vmatprep.mubr.f32.mxu0 %v669_v13  ;;  %4110 = vmatpush3.bf16.msra.mxu0 %v4107_v51  ;;  %v3529_v51 = vld [vmem:[%s6424_s3 + $0x2b0] sm:$0xff]  ;;  %v833_v58 = vrot.slane %v4783_v54, 2  ;;  %v4822_v13 = vrot.slane %v4530_v26, 1 }
  0x52   : > { %3796 = vmatmul.mubr.f32.gmra.mrb[16].mxu1 %v822_v17  ;;  %4112 = vmatprep.subr.bf16.mxu0 %v4111_v16  ;;  %v4119_v14 = vpack.c.bf16 %v3530_v53, %v3529_v51  ;;  %v832_v17 = vsel %vm777_vm0, %v829_v34, %v831_v52  ;;  %v4843_v34 = vld [vmem:[#allocation2 + $0x130] sm:$0x3]  ;;  %v678_v52 = vrot.slane %v4553_v39, 1  ;;  %v837_v53 = vsel %vm777_vm0, %v834_v5, %v836_v28  ;;  %v3534_v39 = vld [vmem:[%s6424_s3 + $0x2d8] sm:$0xff] }
  0x53   : > { %4085 = vmatpush1.bf16.msra.mxu1 %v4084_v20  ;;  %3798 = vmatprep.mubr.f32.mxu1 %v825_v30  ;;  %v4090_v20 = vpack.c.bf16 %v3512_v57, %v3511_v56  ;;  %v835_v11 = vsel %vm777_vm0, %v833_v58, %v834_v5  ;;  %v3513_v30 = vld [vmem:[%s6424_s3 + $0x230] sm:$0xff]  ;;  %v841_v56 = vrot.slane %v4843_v34, 2  ;;  %v3516_v5 = vld [vmem:[%s6424_s3 + $0x248] sm:$0xff]  ;;  %v4878_v28 = vld [vmem:[#allocation2 + $0x158] sm:$0xff] }
  0x54   : > { %1008 = vmatmul.mubr.f32.gmra.mrb[2].mxu0 %v4475_v55  ;;  %4086 = vmatprep.subr.bf16.mxu1 %v6428_v3  ;;  %v4814_v55 = vld [vmem:[#allocation2 + $0x120] sm:$0xff]  ;;  %v3533_v57 = vld [vmem:[%s6424_s3 + $0x2d0] sm:$0xff]  ;;  %6444 = vst [vmem:[#allocation6_spill] sm:$0xff] %v4878_v28 }
  0x55   : > { %1012 = vmatprep.mubr.f32.mxu0 %v4789_v38  ;;  %4114 = vmatpush3.bf16.msra.mxu0 %v4111_v16  ;;  %v3531_v16 = vld [vmem:[%s6424_s3 + $0x2c0] sm:$0xff]  ;;  %v838_v32 = vrot.slane %v4814_v55, 2 }
  0x56   : > { %3799 = vmatmul.mubr.f32.gmra.mrb[18].mxu1 %v827_v47  ;;  %4116 = vmatprep.subr.bf16.mxu0 %v4115_v41  ;;  %v4847_v47 = vld [vmem:[#allocation2 + $0x140] sm:$0xff]  ;;  %v4123_v51 = vpack.c.bf16 %v3532_v29, %v3531_v16  ;;  %v469_v16 = vld [vmem:[%s4424_s19 + $0xf0] sm:$0xff]  ;;  %v470_v29 = vld [vmem:[%s4424_s19 + $0xf8] sm:$0xff] }
  0x57   : > { %4088 = vmatpush1.bf16.msra.mxu1 %v4087_v50  ;;  %3801 = vmatprep.mubr.f32.mxu1 %v830_v21  ;;  %6441 = vst [vmem:[#allocation3_spill] sm:$0xff] %v4847_v47  ;;  %v4851_v50 = vsel %vm664_vm1, %v675_v6, %v4822_v13  ;;  %v4093_v21 = vpack.c.bf16 %v3514_v31, %v3513_v30  ;;  %v844_v6 = vrot.slane %v4847_v47, 2  ;;  %v680_v30 = vrot.slane %v4557_v43, 1 }
  0x58   : > { %1013 = vmatmul.mubr.f32.gmra.mrb[4].mxu0 %v4501_v9  ;;  %4089 = vmatprep.subr.bf16.mxu1 %v6428_v3  ;;  %v840_v58 = vsel %vm777_vm0, %v838_v32, %v839_v33  ;;  %v4886_v31 = vrot.slane %v4559_v44, 1  ;;  %v4127_v32 = vpack.c.bf16 %v3534_v39, %v3533_v57  ;;  %520 = vst [vmem:[#allocation2 + $0x181] sm:$0xff] %v469_v16  ;;  %521 = vst [vmem:[#allocation2 + $0x189] sm:$0xff] %v470_v29  ;;  %v6445_v57 = vmov 0.0|0.0   ;;  %v4911_v16 = vld [vmem:[#allocation2 + $0x170] sm:$0xff] }
  0x59   : > { %1017 = vmatprep.mubr.f32.mxu0 %v674_v4  ;;  %4118 = vmatpush3.bf16.msra.mxu0 %v4115_v41  ;;  %v3515_v41 = vld [vmem:[%s6424_s3 + $0x240] sm:$0xff]  ;;  %v843_v4 = vrot.slane %v4845_v40, 2  ;;  %v849_v39 = vrot.slane %v4878_v28, 2  ;;  %6447 = vst [vmem:[#allocation8_spill] sm:$0xff] %v4911_v16  ;;  %v683_v29 = vrot.slane %v4585_v60, 1 }
  0x5a   : > { %3802 = vmatmul.mubr.f32.gmra.mrb[20].mxu1 %v832_v17  ;;  %4120 = vmatprep.subr.bf16.mxu0 %v4119_v14  ;;  %v4873_v17 = vld [vmem:[#allocation2 + $0x148] sm:$0x3] }
  0x5b   : > { %4091 = vmatpush1.bf16.msra.mxu1 %v4090_v20  ;;  %3804 = vmatprep.mubr.f32.mxu1 %v835_v11  ;;  %6442 = vst [vmem:[#allocation4_spill] sm:$0xff] %v4873_v17  ;;  %v4875_v20 = vld [vmem:[#allocation2 + $0x150] sm:$0xff]  ;;  %v679_v11 = vsel %vm664_vm1, %v4822_v13, %v678_v52  ;;  %v846_v47 = vrot.slane %v4873_v17, 2  ;;  %v3535_v52 = vld [vmem:[%s6424_s3 + $0x2e0] sm:$0xff] }
  0x5c   : > { %1018 = vmatmul.mubr.f32.gmra.mrb[6].mxu0 %v4503_v10  ;;  %4092 = vmatprep.subr.bf16.mxu1 %v6428_v3  ;;  %6443 = vst [vmem:[#allocation5_spill] sm:$0xff] %v4875_v20  ;;  %v842_v3 = vsel %vm777_vm0, %v839_v33, %v841_v56  ;;  %v3517_v33 = vld [vmem:[%s6424_s3 + $0x250] sm:$0xff]  ;;  %v3518_v56 = vld [vmem:[%s6424_s3 + $0x258] sm:$0xff] }
  0x5d   : > { %1022 = vmatprep.mubr.f32.mxu0 %v4851_v50  ;;  %4122 = vmatpush3.bf16.msra.mxu0 %v4119_v14  ;;  %v4096_v14 = vpack.c.bf16 %v3516_v5, %v3515_v41  ;;  %v848_v41 = vrot.slane %v4875_v20, 2  ;;  %v4909_v5 = vld [vmem:[#allocation2 + $0x168] sm:$0xff]  ;;  %v847_v28 = vsel %vm777_vm0, %v844_v6, %v846_v47  ;;  %v4099_v20 = vpack.c.bf16 %v3518_v56, %v3517_v33  ;;  %v3519_v47 = vld [vmem:[%s6424_s3 + $0x260] sm:$0xff] }
  0x5e   : > { %3805 = vmatmul.mubr.f32.gmra.mrb[22].mxu1 %v837_v53  ;;  %4124 = vmatprep.subr.bf16.mxu0 %v4123_v51  ;;  %v3536_v53 = vld [vmem:[%s6424_s3 + $0x2e8] sm:$0xff]  ;;  %6446 = vst [vmem:[#allocation7_spill] sm:$0xff] %v4909_v5  ;;  %v4944_v33 = vrot.slane %v4589_v63, 1 }
  0x5f   : > { %4094 = vmatpush1.bf16.msra.mxu1 %v4093_v21  ;;  %3807 = vmatprep.mubr.f32.mxu1 %v840_v58  ;;  %v845_v21 = vsel %vm777_vm0, %v843_v4, %v844_v6  ;;  %v4907_v58 = vld [vmem:[#allocation2 + $0x160] sm:$0x3]  ;;  %v4915_v4 = vsel %vm664_vm1, %v680_v30, %v4886_v31  ;;  %v4131_v17 = vpack.c.bf16 %v3536_v53, %v3535_v52  ;;  %v3520_v6 = vld [vmem:[%s6424_s3 + $0x268] sm:$0xff]  ;;  %v853_v30 = vrot.slane %v4909_v5, 2  ;;  %v4937_v52 = vld [vmem:[#allocation2 + $0x178] sm:$0x3] }
  0x60   : > { %1023 = vmatmul.mubr.f32.gmra.mrb[8].mxu0 %v4528_v25  ;;  %4095 = vmatprep.subr.bf16.mxu1 %v6445_v57  ;;  %v850_v60 = vsel %vm777_vm0, %v848_v41, %v849_v39  ;;  %v684_v53 = vsel %vm664_vm1, %v4886_v31, %v683_v29  ;;  %v856_v5 = vrot.slane %v4937_v52, 2  ;;  %v4957_v29 = vld [vmem:[#allocation2 + $0x28] sm:$0x3] }
  0x61   : > { %1027 = vmatprep.mubr.f32.mxu0 %v679_v11  ;;  %4126 = vmatpush3.bf16.msra.mxu0 %v4123_v51  ;;  %v851_v11 = vrot.slane %v4907_v58, 2  ;;  %v3537_v51 = vld [vmem:[%s6424_s3 + $0x2f0] sm:$0xff] }
  0x62   : > { %3808 = vmatmul.mubr.f32.gmra.mrb[24].mxu1 %v842_v3  ;;  %4128 = vmatprep.subr.bf16.mxu0 %v4127_v32  ;;  %v3538_v3 = vld [vmem:[%s6424_s3 + $0x2f8] sm:$0xff] }
  0x63   : > { %4097 = vmatpush1.bf16.msra.mxu1 %v4096_v14  ;;  %3810 = vmatprep.mubr.f32.mxu1 %v845_v21  ;;  %v854_v14 = vrot.slane %v4911_v16, 2  ;;  %v685_v21 = vrot.slane %v4587_v61, 1  ;;  %v4135_v56 = vpack.c.bf16 %v3538_v3, %v3537_v51  ;;  %v852_v41 = vsel %vm777_vm0, %v849_v39, %v851_v11 }
  0x64   : > { %1028 = vmatmul.mubr.f32.gmra.mrb[10].mxu0 %v4530_v26  ;;  %4098 = vmatprep.subr.bf16.mxu1 %v6445_v57  ;;  %v4102_v16 = vpack.c.bf16 %v3520_v6, %v3519_v47  ;;  %v688_v11 = vrot.slane %v4611_v18, 1  ;;  %v1519_v18 = vrot.slane %v4957_v29, 1  ;;  %v4979_v47 = vrot.slane %v4618_v23, 1  ;;  %v3571_v6 = vld [vmem:[%s6424_s3 + $0x400] sm:$0xff] }
  0x65   : > { %1032 = vmatprep.mubr.f32.mxu0 %v4915_v4  ;;  %4130 = vmatpush3.bf16.msra.mxu0 %v4127_v32  ;;  %v3521_v32 = vld [vmem:[%s6424_s3 + $0x270] sm:$0xff]  ;;  %v4961_v39 = vsel %vm664_vm1, %v685_v21, %v4944_v33  ;;  %v857_v51 = vsel %vm777_vm0, %v854_v14, %v856_v5 }
  0x66   : > { %3811 = vmatmul.mubr.f32.gmra.mrb[26].mxu1 %v847_v28  ;;  %4132 = vmatprep.subr.bf16.mxu0 %v4131_v17  ;;  %v855_v28 = vsel %vm777_vm0, %v853_v30, %v854_v14  ;;  %v689_v5 = vsel %vm664_vm1, %v4944_v33, %v688_v11  ;;  %v3572_v30 = vld [vmem:[%s6424_s3 + $0x408] sm:$0xff]  ;;  %v1520_v21 = vsel %vm664_vm1, %v4760_v15, %v1519_v18  ;;  %v693_v15 = vrot.slane %v4638_v37, 1  ;;  %v3543_v11 = vld [vmem:[%s6424_s3 + $0x320] sm:$0xff]  ;;  %v3546_v18 = vld [vmem:[%s6424_s3 + $0x338] sm:$0xff] }
  0x67   : > { %4100 = vmatpush1.bf16.msra.mxu1 %v4099_v20  ;;  %3813 = vmatprep.mubr.f32.mxu1 %v850_v60  ;;  %v3522_v20 = vld [vmem:[%s6424_s3 + $0x278] sm:$0xff]  ;;  %v3540_v60 = vld [vmem:[%s6424_s3 + $0x308] sm:$0xff] }
  0x68   : > { %1033 = vmatmul.mubr.f32.gmra.mrb[12].mxu0 %v4557_v43  ;;  %4101 = vmatprep.subr.bf16.mxu1 %v6445_v57  ;;  %v4105_v3 = vpack.c.bf16 %v3522_v20, %v3521_v32  ;;  %v694_v37 = vsel %vm664_vm1, %v4979_v47, %v693_v15  ;;  %v3550_v15 = vld [vmem:[%s6424_s3 + $0x358] sm:$0xff] }
  0x69   : > { %1037 = vmatprep.mubr.f32.mxu0 %v684_v53  ;;  %4134 = vmatpush3.bf16.msra.mxu0 %v4131_v17  ;;  %v3539_v17 = vld [vmem:[%s6424_s3 + $0x300] sm:$0xff]  ;;  %v4988_v53 = vpack.c.bf16 %v3572_v30, %v3571_v6 }
  0x6a   : > { %3814 = vmatmul.mubr.f32.gmra.mrb[28].mxu1 %v852_v41  ;;  %4136 = vmatprep.subr.bf16.mxu0 %v4135_v56  ;;  %v4140_v14 = vpack.c.bf16 %v3540_v60, %v3539_v17  ;;  %v3542_v41 = vld [vmem:[%s6424_s3 + $0x318] sm:$0xff]  ;;  %v3547_v30 = vld [vmem:[%s6424_s3 + $0x340] sm:$0xff] }
  0x6b   : > { %4103 = vmatpush1.bf16.msra.mxu1 %v4102_v16  ;;  %3816 = vmatprep.mubr.f32.mxu1 %v855_v28  ;;  %v690_v16 = vrot.slane %v4616_v22, 1 }
  0x6c   : > { %1038 = vmatmul.mubr.f32.gmra.mrb[14].mxu0 %v4559_v44  ;;  %4104 = vmatprep.subr.bf16.mxu1 %v6445_v57 }
  0x6d   : > { %1042 = vmatprep.mubr.f32.mxu0 %v4961_v39  ;;  %4138 = vmatpush3.bf16.msra.mxu0 %v4135_v56  ;;  %v3541_v56 = vld [vmem:[%s6424_s3 + $0x310] sm:$0xff]  ;;  %v5006_v28 = vsel %vm664_vm1, %v690_v16, %v4979_v47 }
  0x6e   : > { %3817 = vmatmul.mubr.f32.gmra.mrb[30].mxu1 %v857_v51  ;;  %4188 = vmatprep.subr.bf16.mxu0 %v4988_v53  ;;  %v4143_v32 = vpack.c.bf16 %v3542_v41, %v3541_v56  ;;  %v695_v51 = vrot.slane %v4642_v42, 1 }
  0x6f   : > { %4106 = vmatpush1.bf16.msra.mxu1 %v4105_v3  ;;  %1853 = vmatprep.mubr.f32.mxu1 %v4789_v38  ;;  %v5000_v38 = vld [vmem:[#allocation2 + $0x40] sm:$0x3]  ;;  %v5024_v3 = vrot.slane %v4644_v45, 1 }
  0x70   : > { %1043 = vmatmul.mubr.f32.gmra.mrb[16].mxu0 %v4587_v61  ;;  %4139 = vmatprep.subr.bf16.mxu1 %v6445_v57  ;;  %v1524_v20 = vrot.slane %v5000_v38, 1 }
  0x71   : > { %1047 = vmatprep.mubr.f32.mxu0 %v689_v5  ;;  %v5037_v5 = vld [vmem:[#allocation2 + $0x58] sm:$0x3] }
  0x72   : > { %1854 = vmatmul.mubr.f32.vlgmr.msra.gmra.mrb[32].mxu1 %v4501_v9  ;;  %v3544_v9 = vld [vmem:[%s6424_s3 + $0x328] sm:$0xff]  ;;  %v1525_v60 = vsel %vm664_vm1, %v4822_v13, %v1524_v20  ;;  %v698_v13 = vrot.slane %v4666_v59, 1  ;;  %v1529_v6 = vrot.slane %v5037_v5, 1 }
  0x73   : > { %4141 = vmatpush1.bf16.msra.mxu1 %v4140_v14  ;;  %1858 = vmatprep.mubr.f32.mxu1 %v1520_v21  ;;  %v4146_v17 = vpack.c.bf16 %v3544_v9, %v3543_v11  ;;  %v700_v14 = vrot.slane %v4669_v1, 1  ;;  %v5060_v21 = vrot.slane %v4671_v2, 1  ;;  %v3551_v9 = vld [vmem:[%s6424_s3 + $0x360] sm:$0xff] }
  0x74   : > { %1048 = vmatmul.mubr.f32.gmra.mrb[18].mxu0 %v4589_v63  ;;  %4142 = vmatprep.subr.bf16.mxu1 %v6445_v57  ;;  %v699_v59 = vsel %vm664_vm1, %v5024_v3, %v698_v13  ;;  %v1530_v41 = vsel %vm664_vm1, %v4886_v31, %v1529_v6  ;;  %v703_v31 = vrot.slane %v4692_v19, 1  ;;  %v3555_v6 = vld [vmem:[%s6424_s3 + $0x380] sm:$0xff] }
  0x75   : > { %1052 = vmatprep.mubr.f32.mxu0 %v5006_v28 }
  0x76   : > { %1859 = vmatmul.mubr.f32.gmra.mrb[34].mxu1 %v4503_v10  ;;  %v3545_v10 = vld [vmem:[%s6424_s3 + $0x330] sm:$0xff]  ;;  %v704_v19 = vsel %vm664_vm1, %v5060_v21, %v703_v31  ;;  %v3559_v31 = vld [vmem:[%s6424_s3 + $0x3a0] sm:$0xff] }
  0x77   : > { %1863 = vmatprep.mubr.f32.mxu1 %v4851_v50  ;;  %4144 = vmatpush1.bf16.msra.mxu1 %v4143_v32  ;;  %v5042_v50 = vsel %vm664_vm1, %v695_v51, %v5024_v3  ;;  %v4149_v16 = vpack.c.bf16 %v3546_v18, %v3545_v10  ;;  %v5073_v32 = vld [vmem:[#allocation2 + $0x70] sm:$0x3]  ;;  %v5096_v51 = vrot.slane %v4696_v27, 1  ;;  %v3554_v10 = vld [vmem:[%s6424_s3 + $0x378] sm:$0xff]  ;;  %v5109_v18 = vld [vmem:[#allocation2 + $0x88] sm:$0x3] }
  0x78   : > { %1053 = vmatmul.mubr.f32.gmra.mrb[20].mxu0 %v4616_v22  ;;  %4145 = vmatprep.subr.bf16.mxu1 %v6445_v57  ;;  %v1534_v11 = vrot.slane %v5073_v32, 1 }
  0x79   : > { %1057 = vmatprep.mubr.f32.mxu0 %v694_v37  ;;  %v705_v37 = vrot.slane %v4694_v24, 1 }
  0x7a   : > { %1864 = vmatmul.mubr.f32.gmra.mrb[36].mxu1 %v4528_v25  ;;  %v3548_v25 = vld [vmem:[%s6424_s3 + $0x348] sm:$0xff] }
  0x7b   : > { %1868 = vmatprep.mubr.f32.mxu1 %v1525_v60  ;;  %4147 = vmatpush1.bf16.msra.mxu1 %v4146_v17  ;;  %v4152_v56 = vpack.c.bf16 %v3548_v25, %v3547_v30  ;;  %v1535_v60 = vsel %vm664_vm1, %v4944_v33, %v1534_v11  ;;  %v708_v33 = vrot.slane %v4723_v46, 1  ;;  %v710_v30 = vrot.slane %v4725_v48, 1 }
  0x7c   : > { %1058 = vmatmul.mubr.f32.gmra.mrb[22].mxu0 %v4618_v23  ;;  %4148 = vmatprep.subr.bf16.mxu1 %v6445_v57  ;;  %v5132_v25 = vrot.slane %v4727_v49, 1  ;;  %v5168_v11 = vrot.slane %v4753_v12, 1 }
  0x7d   : > { %1062 = vmatprep.mubr.f32.mxu0 %v5042_v50  ;;  %v709_v46 = vsel %vm664_vm1, %v5096_v51, %v708_v33  ;;  %v5204_v33 = vrot.slane %v4785_v36, 1 }
  0x7e   : > { %1869 = vmatmul.mubr.f32.gmra.mrb[38].mxu1 %v4530_v26  ;;  %v3549_v26 = vld [vmem:[%s6424_s3 + $0x350] sm:$0xff] }
  0x7f   : > { %1873 = vmatprep.mubr.f32.mxu1 %v4915_v4  ;;  %4150 = vmatpush1.bf16.msra.mxu1 %v4149_v16  ;;  %v5078_v4 = vsel %vm664_vm1, %v700_v14, %v5060_v21  ;;  %v4155_v20 = vpack.c.bf16 %v3550_v15, %v3549_v26  ;;  %v1539_v16 = vrot.slane %v5109_v18, 1 }
  0x80   : > { %1063 = vmatmul.mubr.f32.gmra.mrb[24].mxu0 %v4642_v42  ;;  %4151 = vmatprep.subr.bf16.mxu1 %v6445_v57 }
  0x81   : > { %1067 = vmatprep.mubr.f32.mxu0 %v699_v59  ;;  %v1540_v14 = vsel %vm664_vm1, %v4979_v47, %v1539_v16  ;;  %v713_v47 = vrot.slane %v4749_v7, 1 }
  0x82   : > { %1874 = vmatmul.mubr.f32.gmra.mrb[40].mxu1 %v4557_v43  ;;  %v3552_v43 = vld [vmem:[%s6424_s3 + $0x368] sm:$0xff] }
  0x83   : > { %1878 = vmatprep.mubr.f32.mxu1 %v1530_v41  ;;  %4153 = vmatpush1.bf16.msra.mxu1 %v4152_v56  ;;  %v4158_v17 = vpack.c.bf16 %v3552_v43, %v3551_v9  ;;  %v3558_v56 = vld [vmem:[%s6424_s3 + $0x398] sm:$0xff]  ;;  %v5145_v41 = vld [vmem:[#allocation2 + $0xa0] sm:$0x3]  ;;  %v714_v7 = vsel %vm664_vm1, %v5132_v25, %v713_v47 }
  0x84   : > { %1068 = vmatmul.mubr.f32.gmra.mrb[26].mxu0 %v4644_v45  ;;  %4154 = vmatprep.subr.bf16.mxu1 %v6445_v57  ;;  %v1544_v15 = vrot.slane %v5145_v41, 1 }
  0x85   : > { %1072 = vmatprep.mubr.f32.mxu0 %v5078_v4 }
  0x86   : > { %1879 = vmatmul.mubr.f32.gmra.mrb[42].mxu1 %v4559_v44  ;;  %v3553_v44 = vld [vmem:[%s6424_s3 + $0x370] sm:$0xff]  ;;  %v1545_v43 = vsel %vm664_vm1, %v5024_v3, %v1544_v15  ;;  %v718_v3 = vrot.slane %v4781_v35, 1  ;;  %v5253_v15 = vld [vmem:[#allocation2 + $0xe8] sm:$0x3] }
  0x87   : > { %1883 = vmatprep.mubr.f32.mxu1 %v4961_v39  ;;  %4156 = vmatpush1.bf16.msra.mxu1 %v4155_v20  ;;  %v5114_v39 = vsel %vm664_vm1, %v705_v37, %v5096_v51  ;;  %v4161_v13 = vpack.c.bf16 %v3554_v10, %v3553_v44  ;;  %v715_v20 = vrot.slane %v4751_v8, 1  ;;  %v5181_v37 = vld [vmem:[#allocation2 + $0xb8] sm:$0x3]  ;;  %v3563_v44 = vld [vmem:[%s6424_s3 + $0x3c0] sm:$0xff]  ;;  %v720_v10 = vrot.slane %v4783_v54, 1 }
  0x88   : > { %1073 = vmatmul.mubr.f32.gmra.mrb[28].mxu0 %v4669_v1  ;;  %4157 = vmatprep.subr.bf16.mxu1 %v6445_v57  ;;  %v719_v35 = vsel %vm664_vm1, %v5168_v11, %v718_v3  ;;  %v6451_v3 = vld [vmem:[#allocation6_spill] sm:$0xff] }
  0x89   : > { %1077 = vmatprep.mubr.f32.mxu0 %v704_v19  ;;  %v3562_v19 = vld [vmem:[%s6424_s3 + $0x3b8] sm:$0xff] }
  0x8a   : > { %1884 = vmatmul.mubr.f32.gmra.mrb[44].mxu1 %v4587_v61  ;;  %v3556_v61 = vld [vmem:[%s6424_s3 + $0x388] sm:$0xff] }
  0x8b   : > { %1888 = vmatprep.mubr.f32.mxu1 %v1535_v60  ;;  %4159 = vmatpush1.bf16.msra.mxu1 %v4158_v17  ;;  %v4164_v59 = vpack.c.bf16 %v3556_v61, %v3555_v6  ;;  %v1549_v60 = vrot.slane %v5181_v37, 1  ;;  %v3566_v6 = vld [vmem:[%s6424_s3 + $0x3d8] sm:$0xff]  ;;  %v5217_v61 = vld [vmem:[#allocation2 + $0xd0] sm:$0x3] }
  0x8c   : > { %1078 = vmatmul.mubr.f32.gmra.mrb[30].mxu0 %v4671_v2  ;;  %4160 = vmatprep.subr.bf16.mxu1 %v6445_v57 }
  0x8d   : > { %1082 = vmatprep.mubr.f32.mxu0 %v5114_v39  ;;  %v1550_v16 = vsel %vm664_vm1, %v5060_v21, %v1549_v60  ;;  %v723_v21 = vrot.slane %v4811_v62, 1 }
  0x8e   : > { %1889 = vmatmul.mubr.f32.gmra.mrb[46].mxu1 %v4589_v63  ;;  %v3557_v63 = vld [vmem:[%s6424_s3 + $0x390] sm:$0xff] }
  0x8f   : > { %1893 = vmatprep.mubr.f32.mxu1 %v5006_v28  ;;  %4162 = vmatpush1.bf16.msra.mxu1 %v4161_v13  ;;  %v5150_v28 = vsel %vm664_vm1, %v710_v30, %v5132_v25  ;;  %v4167_v26 = vpack.c.bf16 %v3558_v56, %v3557_v63  ;;  %v1554_v30 = vrot.slane %v5217_v61, 1  ;;  %v724_v62 = vsel %vm664_vm1, %v5204_v33, %v723_v21  ;;  %v4246_v21 = vld [vmem:[#allocation2 + $0x20] sm:$0xff] }
  0x90   : > { %1083 = vmatmul.mubr.f32.gmra.mrb[32].mxu0 %v4694_v24  ;;  %4163 = vmatprep.subr.bf16.mxu1 %v6445_v57  ;;  %v5240_v63 = vrot.slane %v4816_v0, 1 }
  0x91   : > { %1087 = vmatprep.mubr.f32.mxu0 %v709_v46  ;;  %v1555_v47 = vsel %vm664_vm1, %v5096_v51, %v1554_v30  ;;  %v728_v51 = vrot.slane %v4843_v34, 1  ;;  %v1631_v30 = vrot.slane %v4957_v29, 2  ;;  %v3574_v29 = vld [vmem:[%s6424_s3 + $0x418] sm:$0xff] }
  0x92   : > { %1894 = vmatmul.mubr.f32.gmra.mrb[48].mxu1 %v4616_v22  ;;  %v3560_v22 = vld [vmem:[%s6424_s3 + $0x3a8] sm:$0xff] }
  0x93   : > { %1898 = vmatprep.mubr.f32.mxu1 %v1540_v14  ;;  %4165 = vmatpush1.bf16.msra.mxu1 %v4164_v59  ;;  %v4170_v9 = vpack.c.bf16 %v3560_v22, %v3559_v31  ;;  %v3567_v59 = vld [vmem:[%s6424_s3 + $0x3e0] sm:$0xff]  ;;  %v725_v14 = vrot.slane %v4814_v55, 1  ;;  %v1559_v22 = vrot.slane %v5253_v15, 1 }
  0x94   : > { %1088 = vmatmul.mubr.f32.gmra.mrb[34].mxu0 %v4696_v27  ;;  %4166 = vmatprep.subr.bf16.mxu1 %v6445_v57 }
  0x95   : > { %1092 = vmatprep.mubr.f32.mxu0 %v5150_v28 }
  0x96   : > { %1899 = vmatmul.mubr.f32.gmra.mrb[50].mxu1 %v4618_v23  ;;  %v3561_v23 = vld [vmem:[%s6424_s3 + $0x3b0] sm:$0xff] }
  0x97   : > { %1903 = vmatprep.mubr.f32.mxu1 %v5042_v50  ;;  %4168 = vmatpush1.bf16.msra.mxu1 %v4167_v26  ;;  %v5186_v50 = vsel %vm664_vm1, %v715_v20, %v5168_v11  ;;  %v4173_v17 = vpack.c.bf16 %v3562_v19, %v3561_v23  ;;  %v3570_v26 = vld [vmem:[%s6424_s3 + $0x3f8] sm:$0xff]  ;;  %v6448_v20 = vld [vmem:[#allocation3_spill] sm:$0xff]  ;;  %v6450_v19 = vld [vmem:[#allocation5_spill] sm:$0xff] }
  0x98   : > { %1093 = vmatmul.mubr.f32.gmra.mrb[36].mxu0 %v4725_v48  ;;  %4169 = vmatprep.subr.bf16.mxu1 %v6445_v57  ;;  %v5270_v34 = vrot.slane %v6448_v20, 1 }
  0x99   : > { %1097 = vmatprep.mubr.f32.mxu0 %v714_v7  ;;  %v730_v7 = vrot.slane %v4845_v40, 1 }
  0x9a   : > { %1904 = vmatmul.mubr.f32.gmra.mrb[52].mxu1 %v4642_v42  ;;  %v3564_v42 = vld [vmem:[%s6424_s3 + $0x3c8] sm:$0xff] }
  0x9b   : > { %1908 = vmatprep.mubr.f32.mxu1 %v1545_v43  ;;  %4171 = vmatpush1.bf16.msra.mxu1 %v4170_v9  ;;  %v4176_v13 = vpack.c.bf16 %v3564_v42, %v3563_v44  ;;  %v5276_v9 = vld [vmem:[#allocation2 + $0x100] sm:$0x3]  ;;  %v6449_v43 = vld [vmem:[#allocation4_spill] sm:$0xff]  ;;  %v738_v42 = vrot.slane %v4907_v58, 1 }
  0x9c   : > { %1098 = vmatmul.mubr.f32.gmra.mrb[38].mxu0 %v4727_v49  ;;  %4172 = vmatprep.subr.bf16.mxu1 %v6445_v57  ;;  %v733_v23 = vrot.slane %v6449_v43, 1  ;;  %v5298_v44 = vld [vmem:[#allocation2 + $0x118] sm:$0x3]  ;;  %v1641_v43 = vrot.slane %v5037_v5, 2 }
  0x9d   : > { %1102 = vmatprep.mubr.f32.mxu0 %v5186_v50  ;;  %v3578_v5 = vld [vmem:[%s6424_s3 + $0x438] sm:$0xff] }
  0x9e   : > { %1909 = vmatmul.mubr.f32.gmra.mrb[54].mxu1 %v4644_v45  ;;  %v3565_v45 = vld [vmem:[%s6424_s3 + $0x3d0] sm:$0xff] }
  0x9f   : > { %1913 = vmatprep.mubr.f32.mxu1 %v5078_v4  ;;  %4174 = vmatpush1.bf16.msra.mxu1 %v4173_v17  ;;  %v5222_v4 = vsel %vm664_vm1, %v720_v10, %v5204_v33  ;;  %v4179_v46 = vpack.c.bf16 %v3566_v6, %v3565_v45  ;;  %v5292_v17 = vrot.slane %v6451_v3, 1  ;;  %v6453_v10 = vld [vmem:[#allocation8_spill] sm:$0xff]  ;;  %v743_v45 = vrot.slane %v4937_v52, 1 }
  0xa0   : > { %1103 = vmatmul.mubr.f32.gmra.mrb[40].mxu0 %v4751_v8  ;;  %4175 = vmatprep.subr.bf16.mxu1 %v6445_v57 }
  0xa1   : > { %1107 = vmatprep.mubr.f32.mxu0 %v719_v35  ;;  %v6452_v35 = vld [vmem:[#allocation7_spill] sm:$0xff] }
  0xa2   : > { %1914 = vmatmul.mubr.f32.gmra.mrb[56].mxu1 %v4669_v1  ;;  %v3568_v1 = vld [vmem:[%s6424_s3 + $0x3e8] sm:$0xff] }
  0xa3   : > { %1918 = vmatprep.mubr.f32.mxu1 %v1550_v16  ;;  %4177 = vmatpush1.bf16.msra.mxu1 %v4176_v13  ;;  %v4182_v56 = vpack.c.bf16 %v3568_v1, %v3567_v59  ;;  %v5314_v13 = vrot.slane %v6453_v10, 1  ;;  %v5320_v16 = vld [vmem:[#allocation2 + $0x130] sm:$0x3]  ;;  %v5339_v59 = vld [vmem:[#allocation2 + $0x148] sm:$0x3] }
  0xa4   : > { %1108 = vmatmul.mubr.f32.gmra.mrb[42].mxu0 %v4753_v12  ;;  %4178 = vmatprep.subr.bf16.mxu1 %v6445_v57  ;;  %v1574_v6 = vrot.slane %v5320_v16, 1  ;;  %v4247_v1 = vld [vmem:[#allocation2 + $0x30] sm:$0xff] }
  0xa5   : > { %1112 = vmatprep.mubr.f32.mxu0 %v5222_v4 }
  0xa6   : > { %1919 = vmatmul.mubr.f32.gmra.mrb[58].mxu1 %v4671_v2  ;;  %v3569_v2 = vld [vmem:[%s6424_s3 + $0x3f0] sm:$0xff]  ;;  %v1575_v52 = vsel %vm664_vm1, %v5240_v63, %v1574_v6 }
  0xa7   : > { %1923 = vmatprep.mubr.f32.mxu1 %v5114_v39  ;;  %4180 = vmatpush1.bf16.msra.mxu1 %v4179_v46  ;;  %v5258_v39 = vsel %vm664_vm1, %v725_v14, %v5240_v63  ;;  %v4185_v31 = vpack.c.bf16 %v3570_v26, %v3569_v2  ;;  %v1629_v46 = vrot.slane %v4246_v21, 2  ;;  %v4248_v14 = vld [vmem:[#allocation2 + $0x38] sm:$0xff]  ;;  %v1636_v2 = vrot.slane %v5000_v38, 2 }
  0xa8   : > { %1113 = vmatmul.mubr.f32.gmra.mrb[44].mxu0 %v4783_v54  ;;  %4181 = vmatprep.subr.bf16.mxu1 %v6445_v57  ;;  %v1651_v21 = vrot.slane %v5109_v18, 2  ;;  %v3581_v18 = vld [vmem:[%s6424_s3 + $0x450] sm:$0xff] }
  0xa9   : > { %1117 = vmatprep.mubr.f32.mxu0 %v724_v62  ;;  %v1633_v62 = vrot.slane %v4247_v1, 2 }
  0xaa   : > { %1924 = vmatmul.mubr.f32.gmra.mrb[60].mxu1 %v4694_v24  ;;  %v729_v24 = vsel %vm664_vm1, %v5240_v63, %v728_v51  ;;  %v1579_v63 = vrot.slane %v5339_v59, 1 }
  0xab   : > { %1928 = vmatprep.mubr.f32.mxu1 %v1555_v47  ;;  %4183 = vmatpush1.bf16.msra.mxu1 %v4182_v56  ;;  %v1634_v56 = vrot.slane %v4248_v14, 2  ;;  %v3573_v47 = vld [vmem:[%s6424_s3 + $0x410] sm:$0xff]  ;;  %v474_v14 = vld [vmem:[%s416_s8 + $0x8] sm:$0xff] }
  0xac   : > { %1118 = vmatmul.mubr.f32.gmra.mrb[46].mxu0 %v4785_v36  ;;  %4184 = vmatprep.subr.bf16.mxu1 %v6445_v57  ;;  %v1560_v57 = vsel %vm664_vm1, %v5132_v25, %v1559_v22  ;;  %v734_v25 = vsel %vm664_vm1, %v5270_v34, %v733_v23  ;;  %v5366_v23 = vld [vmem:[#allocation2 + $0x160] sm:$0x3] }
  0xad   : > { %1122 = vmatprep.mubr.f32.mxu0 %v5258_v39  ;;  %v1635_v26 = vsel %vm777_vm0, %v1633_v62, %v1634_v56  ;;  %v1637_v38 = vsel %vm777_vm0, %v1634_v56, %v1636_v2  ;;  %v473_v62 = vld [vmem:[%s416_s8] sm:$0xff]  ;;  %v3582_v56 = vld [vmem:[%s6424_s3 + $0x458] sm:$0xff] }
  0xae   : > { %1929 = vmatmul.mubr.f32.gmra.mrb[62].mxu1 %v4696_v27  ;;  %v5281_v27 = vsel %vm664_vm1, %v730_v7, %v5270_v34  ;;  %v3575_v7 = vld [vmem:[%s6424_s3 + $0x420] sm:$0xff] }
  0xaf   : > { %1933 = vmatprep.mubr.f32.mxu1 %v5150_v28  ;;  %4186 = vmatpush1.bf16.msra.mxu1 %v4185_v31  ;;  %v1564_v28 = vrot.slane %v5276_v9, 1  ;;  %v4250_v31 = vld [vmem:[#allocation2 + $0x50] sm:$0xff]  ;;  %v5410_v2 = vld [vmem:[#allocation2 + $0x180] sm:$0xff] }
  0xb0   : > { %1123 = vmatmul.mubr.f32.gmra.mrb[48].mxu0 %v4814_v55  ;;  %v1639_v22 = vrot.slane %v4250_v31, 2 }
  0xb1   : > { %1127 = vmatprep.mubr.f32.mxu0 %v729_v24  ;;  %v1565_v60 = vsel %vm664_vm1, %v5168_v11, %v1564_v28  ;;  %v739_v11 = vsel %vm664_vm1, %v5292_v17, %v738_v42  ;;  %v4191_v24 = vpack.c.bf16 %v3574_v29, %v3573_v47  ;;  %v4251_v28 = vld [vmem:[#allocation2 + $0x60] sm:$0xff]  ;;  %v486_v47 = vmul.f32 0.0, %v474_v14 }
  0xb2   : > { %1934 = vmatmul.mubr.f32.gmra.mrb[64].mxu1 %v4725_v48  ;;  %v735_v48 = vrot.slane %v6450_v19, 1  ;;  %v1676_v14 = vrot.slane %v5276_v9, 2 }
  0xb3   : > { %1938 = vmatprep.mubr.f32.mxu1 %v1560_v57  ;;  %v3576_v57 = vld [vmem:[%s6424_s3 + $0x428] sm:$0xff]  ;;  %524 = vst [vmem:[#allocation2 + $0x1a1] sm:$0xff] %v486_v47 }
  0xb4   : > { %1128 = vmatmul.mubr.f32.gmra.mrb[50].mxu0 %v4816_v0  ;;  %v4195_v42 = vpack.c.bf16 %v3576_v57, %v3575_v7  ;;  %v4207_v7 = vpack.c.bf16 %v3582_v56, %v3581_v18  ;;  %v3584_v57 = vld [vmem:[%s6424_s3 + $0x468] sm:$0xff]  ;;  %v5471_v56 = vld [vmem:[#allocation2 + $0x50] sm:$0xff] }
  0xb5   : > { %1132 = vmatprep.mubr.f32.mxu0 %v5281_v27  ;;  %v5469_v18 = vld [vmem:[#allocation2 + $0x48] sm:$0xff]  ;;  %v2374_v9 = vrot.slane %v5471_v56, 1 }
  0xb6   : > { %1939 = vmatmul.mubr.f32.gmra.mrb[66].mxu1 %v4727_v49  ;;  %v5303_v49 = vsel %vm664_vm1, %v735_v48, %v5292_v17  ;;  %v4252_v48 = vld [vmem:[#allocation2 + $0x68] sm:$0xff] }
  0xb7   : > { %1943 = vmatprep.mubr.f32.mxu1 %v5186_v50  ;;  %v1569_v50 = vrot.slane %v5298_v44, 1  ;;  %v4265_v47 = vld [vmem:[#allocation2 + $0x108] sm:$0xff] }
  0xb8   : > { %1133 = vmatmul.mubr.f32.gmra.mrb[52].mxu0 %v4845_v40 }
  0xb9   : > { %1137 = vmatprep.mubr.f32.mxu0 %v734_v25  ;;  %v1570_v58 = vsel %vm664_vm1, %v5204_v33, %v1569_v50  ;;  %v744_v33 = vsel %vm664_vm1, %v5314_v13, %v743_v45  ;;  %v1643_v25 = vrot.slane %v4251_v28, 2  ;;  %v1646_v50 = vrot.slane %v5073_v32, 2  ;;  %v4254_v45 = vld [vmem:[#allocation2 + $0x80] sm:$0xff]  ;;  %v3580_v32 = vld [vmem:[%s6424_s3 + $0x448] sm:$0xff] }
  0xba   : > { %1944 = vmatmul.mubr.f32.gmra.mrb[68].mxu1 %v4751_v8  ;;  %v740_v8 = vrot.slane %v6452_v35, 1  ;;  %v1649_v6 = vrot.slane %v4254_v45, 2 }
  0xbb   : > { %1948 = vmatprep.mubr.f32.mxu1 %v1565_v60  ;;  %v1644_v60 = vrot.slane %v4252_v48, 2 }
  0xbc   : > { %1138 = vmatmul.mubr.f32.gmra.mrb[54].mxu0 %v6448_v20 }
  0xbd   : > { %1142 = vmatprep.mubr.f32.mxu0 %v5303_v49 }
  0xbe   : > { %1949 = vmatmul.mubr.f32.gmra.mrb[70].mxu1 %v4753_v12  ;;  %v5325_v12 = vsel %vm664_vm1, %v740_v8, %v5314_v13  ;;  %v4253_v8 = vld [vmem:[#allocation2 + $0x78] sm:$0xff] }
  0xbf   : > { %1953 = vmatprep.mubr.f32.mxu1 %v5222_v4  ;;  %v4245_v4 = vld [vmem:[#allocation2 + $0x18] sm:$0xff] }
  0xc0   : > { %1143 = vmatmul.mubr.f32.gmra.mrb[56].mxu0 %v6450_v19 }
  0xc1   : > { %1147 = vmatprep.mubr.f32.mxu0 %v739_v11  ;;  %v1645_v11 = vsel %vm777_vm0, %v1643_v25, %v1644_v60  ;;  %v4259_v25 = vld [vmem:[#allocation2 + $0xc0] sm:$0xff] }
  0xc2   : > { %1954 = vmatmul.mubr.f32.gmra.mrb[72].mxu1 %v4783_v54  ;;  %v1628_v54 = vrot.slane %v4245_v4, 2  ;;  %v3579_v4 = vld [vmem:[%s6424_s3 + $0x440] sm:$0xff]  ;;  %v1663_v48 = vrot.slane %v4259_v25, 2 }
  0xc3   : > { %1958 = vmatprep.mubr.f32.mxu1 %v1570_v58  ;;  %v1648_v58 = vrot.slane %v4253_v8, 2  ;;  %v4203_v1 = vpack.c.bf16 %v3580_v32, %v3579_v4  ;;  %v5488_v25 = vld [vmem:[#allocation2 + $0x60] sm:$0xff] }
  0xc4   : > { %1148 = vmatmul.mubr.f32.gmra.mrb[58].mxu0 %v6451_v3 }
  0xc5   : > { %1152 = vmatprep.mubr.f32.mxu0 %v5325_v12 }
  0xc6   : > { %1959 = vmatmul.mubr.f32.gmra.mrb[74].mxu1 %v4785_v36  ;;  %v1630_v36 = vsel %vm777_vm0, %v1628_v54, %v1629_v46  ;;  %v1647_v54 = vsel %vm777_vm0, %v1644_v60, %v1646_v50  ;;  %v5448_v50 = vld [vmem:[#allocation2 + $0x30] sm:$0xff] }
  0xc7   : > { %1963 = vmatprep.mubr.f32.mxu1 %v5258_v39  ;;  %v4249_v39 = vld [vmem:[#allocation2 + $0x48] sm:$0xff]  ;;  %v2368_v32 = vrot.slane %v5448_v50, 1 }
  0xc8   : > { %1153 = vmatmul.mubr.f32.gmra.mrb[60].mxu0 %v6452_v35  ;;  %v1638_v51 = vrot.slane %v4249_v39, 2 }
  0xc9   : > { %1157 = vmatprep.mubr.f32.mxu0 %v744_v33 }
  0xca   : > { %1964 = vmatmul.mubr.f32.gmra.mrb[76].mxu1 %v4814_v55  ;;  %v1632_v55 = vsel %vm777_vm0, %v1629_v46, %v1631_v30  ;;  %v5394_v46 = vld [vmem:[#allocation2 + $0x178] sm:$0x3] }
  0xcb   : > { %1968 = vmatprep.mubr.f32.mxu1 %v1575_v52  ;;  %v4255_v52 = vld [vmem:[#allocation2 + $0x90] sm:$0xff]  ;;  %v1589_v29 = vrot.slane %v5394_v46, 1 }
  0xcc   : > { %1158 = vmatmul.mubr.f32.gmra.mrb[62].mxu0 %v6453_v10  ;;  %v1653_v30 = vrot.slane %v4255_v52, 2  ;;  %v4263_v52 = vld [vmem:[#allocation2 + $0xf0] sm:$0xff] }
  0xcd   : > { %3851 = vmatprep.mubr.f32.mxu0 %v1630_v36 }
  0xce   : > { %1969 = vmatmul.mubr.f32.gmra.mrb[78].mxu1 %v4816_v0  ;;  %v1580_v0 = vsel %vm664_vm1, %v5270_v34, %v1579_v63  ;;  %v3577_v34 = vld [vmem:[%s6424_s3 + $0x430] sm:$0xff]  ;;  %v1652_v63 = vsel %vm777_vm0, %v1649_v6, %v1651_v21  ;;  %v5461_v21 = vld [vmem:[#allocation2 + $0x40] sm:$0x3] }
  0xcf   : > { %1973 = vmatprep.mubr.f32.mxu1 %v5281_v27  ;;  %v1640_v27 = vsel %vm777_vm0, %v1638_v51, %v1639_v22  ;;  %v4199_v33 = vpack.c.bf16 %v3578_v5, %v3577_v34  ;;  %v4257_v51 = vld [vmem:[#allocation2 + $0xa8] sm:$0xff]  ;;  %v3585_v34 = vld [vmem:[%s6424_s3 + $0x470] sm:$0xff] }
  0xd0   : > { %3852 = vmatmul.mubr.f32.vlgmr.msra.gmra.mrb[64].mxu0 %v1632_v55  ;;  %v1656_v55 = vrot.slane %v5145_v41, 2  ;;  %v1658_v31 = vrot.slane %v4257_v51, 2  ;;  %v3583_v41 = vld [vmem:[%s6424_s3 + $0x460] sm:$0xff]  ;;  %v2373_v51 = vrot.slane %v5469_v18, 1 }
  0xd1   : > { %3854 = vmatprep.mubr.f32.mxu0 %v1635_v26  ;;  %4190 = vmatpush3.bf16.msra.mxu0 %v4988_v53  ;;  %v1642_v53 = vsel %vm777_vm0, %v1639_v22, %v1641_v43  ;;  %v5412_v26 = vld [vmem:[#allocation2 + $0x188] sm:$0xff]  ;;  %v4258_v22 = vld [vmem:[#allocation2 + $0xb0] sm:$0xff]  ;;  %v1661_v43 = vrot.slane %v5181_v37, 2  ;;  %v3586_v37 = vld [vmem:[%s6424_s3 + $0x478] sm:$0xff] }
  0xd2   : > { %1974 = vmatmul.mubr.f32.gmra.mrb[80].mxu1 %v4845_v40  ;;  %4192 = vmatprep.subr.bf16.mxu0 %v4191_v24  ;;  %v1584_v40 = vrot.slane %v5366_v23, 1  ;;  %v4215_v4 = vpack.c.bf16 %v3586_v37, %v3585_v34  ;;  %v4270_v34 = vld [vmem:[#allocation2 + $0x140] sm:$0xff] }
  0xd3   : > { %1978 = vmatprep.mubr.f32.mxu1 %v1580_v0  ;;  %v1591_v0 = vrot.slane %v5410_v2, 1  ;;  %v1689_v37 = vrot.slane %v4270_v34, 2  ;;  %v2486_v34 = vrot.slane %v5471_v56, 2 }
  0xd4   : > { %3855 = vmatmul.mubr.f32.gmra.mrb[66].mxu0 %v1637_v38  ;;  %v5427_v38 = vrot.slane %v5412_v26, 1 }
  0xd5   : > { %3857 = vmatprep.mubr.f32.mxu0 %v1640_v27  ;;  %4194 = vmatpush3.bf16.msra.mxu0 %v4191_v24  ;;  %v1659_v24 = vrot.slane %v4258_v22, 2  ;;  %v5431_v27 = vld [vmem:[#allocation2 + $0x190] sm:$0x3]  ;;  %v1681_v22 = vrot.slane %v5298_v44, 2  ;;  %v1686_v44 = vrot.slane %v5320_v16, 2 }
  0xd6   : > { %1979 = vmatmul.mubr.f32.gmra.mrb[82].mxu1 %v6448_v20  ;;  %4196 = vmatprep.subr.bf16.mxu0 %v4195_v42  ;;  %v1585_v20 = vsel %vm664_vm1, %v5292_v17, %v1584_v40  ;;  %v4256_v17 = vld [vmem:[#allocation2 + $0x98] sm:$0xff]  ;;  %v1594_v5 = vrot.slane %v5431_v27, 1 }
  0xd7   : > { %1983 = vmatprep.mubr.f32.mxu1 %v5303_v49  ;;  %v1650_v49 = vsel %vm777_vm0, %v1648_v58, %v1649_v6  ;;  %v1654_v36 = vrot.slane %v4256_v17, 2  ;;  %v1660_v28 = vsel %vm777_vm0, %v1658_v31, %v1659_v24  ;;  %v1662_v40 = vsel %vm777_vm0, %v1659_v24, %v1661_v43  ;;  %v4261_v58 = vld [vmem:[#allocation2 + $0xd8] sm:$0xff]  ;;  %v4262_v6 = vld [vmem:[#allocation2 + $0xe0] sm:$0xff] }
  0xd8   : > { %3858 = vmatmul.mubr.f32.gmra.mrb[68].mxu0 %v1642_v53  ;;  %v1666_v53 = vrot.slane %v5217_v61, 2  ;;  %v1668_v45 = vrot.slane %v4261_v58, 2  ;;  %v1595_v61 = vsel %vm664_vm1, %v5427_v38, %v1594_v5  ;;  %v4264_v17 = vld [vmem:[#allocation2 + $0xf8] sm:$0xff]  ;;  %v5499_v58 = vld [vmem:[#allocation2 + $0x70] sm:$0x3] }
  0xd9   : > { %3860 = vmatprep.mubr.f32.mxu0 %v1645_v11  ;;  %4198 = vmatpush3.bf16.msra.mxu0 %v4195_v42  ;;  %v1655_v39 = vsel %vm777_vm0, %v1653_v30, %v1654_v36  ;;  %v4211_v42 = vpack.c.bf16 %v3584_v57, %v3583_v41  ;;  %v5450_v11 = vld [vmem:[#allocation2 + $0x38] sm:$0xff]  ;;  %v1673_v30 = vrot.slane %v4263_v52, 2  ;;  %v4267_v41 = vld [vmem:[#allocation2 + $0x120] sm:$0xff] }
  0xda   : > { %1984 = vmatmul.mubr.f32.gmra.mrb[84].mxu1 %v6450_v19  ;;  %4200 = vmatprep.subr.bf16.mxu0 %v4199_v33  ;;  %v485_v19 = vmul.f32 0.0, %v473_v62  ;;  %v2371_v62 = vrot.slane %v5461_v21, 1  ;;  %v5480_v24 = vld [vmem:[#allocation2 + $0x58] sm:$0x3]  ;;  %v1683_v57 = vrot.slane %v4267_v41, 2 }
  0xdb   : > { %1988 = vmatprep.mubr.f32.mxu1 %v1585_v20  ;;  %v2369_v20 = vrot.slane %v5450_v11, 1  ;;  %v2376_v43 = vrot.slane %v5480_v24, 1 }
  0xdc   : > { %3861 = vmatmul.mubr.f32.gmra.mrb[70].mxu0 %v1647_v54  ;;  %523 = vst [vmem:[#allocation2 + $0x199] sm:$0xff] %v485_v19  ;;  %v1671_v54 = vrot.slane %v5253_v15, 2 }
  0xdd   : > { %3863 = vmatprep.mubr.f32.mxu0 %v1650_v49  ;;  %4202 = vmatpush3.bf16.msra.mxu0 %v4199_v33  ;;  %v1669_v33 = vrot.slane %v4262_v6, 2  ;;  %v2377_v5 = vsel %vm664_vm1, %v2374_v9, %v2376_v43  ;;  %v4271_v6 = vld [vmem:[#allocation2 + $0x150] sm:$0xff] }
  0xde   : > { %1989 = vmatmul.mubr.f32.gmra.mrb[86].mxu1 %v6451_v3  ;;  %4204 = vmatprep.subr.bf16.mxu0 %v4203_v1  ;;  %v1590_v3 = vsel %vm664_vm1, %v5314_v13, %v1589_v29  ;;  %v4260_v13 = vld [vmem:[#allocation2 + $0xc8] sm:$0xff]  ;;  %v1678_v29 = vrot.slane %v4265_v47, 2 }
  0xdf   : > { %1993 = vmatprep.mubr.f32.mxu1 %v5325_v12  ;;  %v1657_v12 = vsel %vm777_vm0, %v1654_v36, %v1656_v55  ;;  %v1664_v60 = vrot.slane %v4260_v13, 2  ;;  %v1670_v49 = vsel %vm777_vm0, %v1668_v45, %v1669_v33  ;;  %v1674_v36 = vrot.slane %v4264_v17, 2  ;;  %v5518_v47 = vld [vmem:[#allocation2 + $0x88] sm:$0x3] }
  0xe0   : > { %3864 = vmatmul.mubr.f32.gmra.mrb[72].mxu0 %v1652_v63  ;;  %v1672_v15 = vsel %vm777_vm0, %v1669_v33, %v1671_v54  ;;  %v4266_v63 = vld [vmem:[#allocation2 + $0x110] sm:$0xff]  ;;  %v1693_v33 = vrot.slane %v4271_v6, 2  ;;  %v5507_v54 = vld [vmem:[#allocation2 + $0x78] sm:$0xff] }
  0xe1   : > { %3866 = vmatprep.mubr.f32.mxu0 %v1655_v39  ;;  %4206 = vmatpush3.bf16.msra.mxu0 %v4203_v1  ;;  %v1665_v8 = vsel %vm777_vm0, %v1663_v48, %v1664_v60  ;;  %v2370_v1 = vsel %vm664_vm1, %v2368_v32, %v2369_v20  ;;  %v1675_v19 = vsel %vm777_vm0, %v1673_v30, %v1674_v36  ;;  %v1679_v55 = vrot.slane %v4266_v63, 2  ;;  %v5490_v48 = vld [vmem:[#allocation2 + $0x68] sm:$0xff] }
  0xe2   : > { %1994 = vmatmul.mubr.f32.gmra.mrb[88].mxu1 %v6452_v35  ;;  %4208 = vmatprep.subr.bf16.mxu0 %v4207_v7  ;;  %v5443_v35 = vsel %vm664_vm1, %v1591_v0, %v5427_v38  ;;  %v2372_v39 = vsel %vm664_vm1, %v2369_v20, %v2371_v62  ;;  %v1677_v31 = vsel %vm777_vm0, %v1674_v36, %v1676_v14  ;;  %v2379_v16 = vrot.slane %v5490_v48, 1  ;;  %v4273_v30 = vld [vmem:[#allocation2 + $0x168] sm:$0xff]  ;;  %v4274_v36 = vld [vmem:[#allocation2 + $0x170] sm:$0xff] }
  0xe3   : > { %1998 = vmatprep.mubr.f32.mxu1 %v1590_v3  ;;  %v4268_v3 = vld [vmem:[#allocation2 + $0x128] sm:$0xff]  ;;  %v2381_v20 = vrot.slane %v5499_v58, 1  ;;  %v1698_v17 = vrot.slane %v4273_v30, 2  ;;  %v1703_v63 = vrot.slane %v5410_v2, 2  ;;  %v2491_v6 = vrot.slane %v5490_v48, 2 }
  0xe4   : > { %3867 = vmatmul.mubr.f32.gmra.mrb[74].mxu0 %v1657_v12  ;;  %v1684_v0 = vrot.slane %v4268_v3, 2  ;;  %v2375_v12 = vsel %vm664_vm1, %v2373_v51, %v2374_v9  ;;  %v2386_v51 = vrot.slane %v5518_v47, 1  ;;  %v2480_v3 = vrot.slane %v5448_v50, 2 }
  0xe5   : > { %3869 = vmatprep.mubr.f32.mxu0 %v1660_v28  ;;  %4210 = vmatpush3.bf16.msra.mxu0 %v4207_v7  ;;  %v1680_v7 = vsel %vm777_vm0, %v1678_v29, %v1679_v55  ;;  %v1682_v28 = vsel %vm777_vm0, %v1679_v55, %v1681_v22  ;;  %v2382_v62 = vsel %vm664_vm1, %v2379_v16, %v2381_v20  ;;  %v5524_v55 = vrot.slane %v5412_v26, 2  ;;  %v5532_v22 = vld [vmem:[#allocation2 + $0x90] sm:$0xff] }
  0xe6   : > { %1999 = vmatmul.mubr.f32.gmra.mrb[90].mxu1 %v6453_v10  ;;  %4212 = vmatprep.subr.bf16.mxu0 %v4211_v42  ;;  %v1667_v10 = vsel %vm777_vm0, %v1664_v60, %v1666_v53  ;;  %v1685_v13 = vsel %vm777_vm0, %v1683_v57, %v1684_v0  ;;  %v4269_v60 = vld [vmem:[#allocation2 + $0x138] sm:$0xff]  ;;  %v1687_v53 = vsel %vm777_vm0, %v1684_v0, %v1686_v44  ;;  %v2481_v0 = vrot.slane %v5450_v11, 2 }
  0xe7   : > { %2003 = vmatprep.mubr.f32.mxu1 %v5443_v35  ;;  %v5541_v57 = vsel %vm777_vm0, %v1703_v63, %v5524_v55  ;;  %v2493_v20 = vrot.slane %v5499_v58, 2 }
  0xe8   : > { %3870 = vmatmul.mubr.f32.gmra.mrb[76].mxu0 %v1662_v40  ;;  %v2378_v40 = vrot.slane %v5488_v25, 1 }
  0xe9   : > { %3872 = vmatprep.mubr.f32.mxu0 %v1665_v8  ;;  %4214 = vmatpush3.bf16.msra.mxu0 %v4211_v42  ;;  %v1688_v42 = vrot.slane %v4269_v60, 2  ;;  %v1691_v8 = vrot.slane %v5339_v59, 2  ;;  %v1696_v59 = vrot.slane %v5366_v23, 2  ;;  %v2482_v60 = vsel %vm777_vm0, %v2480_v3, %v2481_v0 }
  0xea   : > { %2004 = vmatmul.mubr.f32.gmra.mrb[92].mxu1 %v5410_v2  ;;  %4216 = vmatprep.subr.bf16.mxu0 %v4215_v4  ;;  %v2380_v32 = vsel %vm664_vm1, %v2378_v40, %v2379_v16  ;;  %v2488_v16 = vrot.slane %v5480_v24, 2  ;;  %v2494_v58 = vsel %vm777_vm0, %v2491_v6, %v2493_v20  ;;  %v5636_v20 = vld [vmem:[#allocation2 + $0xf0] sm:$0xff] }
  0xeb   : > { %2008 = vmatprep.mubr.f32.mxu1 %v1595_v61  ;;  %v1690_v45 = vsel %vm777_vm0, %v1688_v42, %v1689_v37  ;;  %v2485_v42 = vrot.slane %v5469_v18, 2 }
  0xec   : > { %3873 = vmatmul.mubr.f32.gmra.mrb[78].mxu0 %v1667_v10  ;;  %v1692_v10 = vsel %vm777_vm0, %v1689_v37, %v1691_v8  ;;  %v5570_v8 = vld [vmem:[#allocation2 + $0xb0] sm:$0xff] }
  0xed   : > { %3875 = vmatprep.mubr.f32.mxu0 %v1670_v49  ;;  %4218 = vmatpush3.bf16.msra.mxu0 %v4215_v4  ;;  %v4272_v4 = vld [vmem:[#allocation2 + $0x158] sm:$0xff]  ;;  %v5509_v49 = vld [vmem:[#allocation2 + $0x80] sm:$0xff]  ;;  %v2506_v3 = vrot.slane %v5570_v8, 2 }
  0xee   : > { %2009 = vmatmul.mubr.f32.gmra.mrb[94].mxu1 %v5412_v26  ;;  %v1694_v61 = vrot.slane %v4272_v4, 2  ;;  %v2384_v23 = vrot.slane %v5509_v49, 1  ;;  %v2394_v4 = vrot.slane %v5570_v8, 1 }
  0xef   : > { %2705 = vmatprep.mubr.f32.mxu1 %v2370_v1  ;;  %v1699_v1 = vrot.slane %v4274_v36, 2 }
  0xf0   : > { %3876 = vmatmul.mubr.f32.gmra.mrb[80].mxu0 %v1672_v15  ;;  %v1695_v52 = vsel %vm777_vm0, %v1693_v33, %v1694_v61  ;;  %v2383_v15 = vrot.slane %v5507_v54, 1  ;;  %v1697_v14 = vsel %vm777_vm0, %v1694_v61, %v1696_v59 }
  0xf1   : > { %3878 = vmatprep.mubr.f32.mxu0 %v1675_v19  ;;  %v1701_v19 = vrot.slane %v5394_v46, 2  ;;  %v1700_v29 = vsel %vm777_vm0, %v1698_v17, %v1699_v1 }
  0xf2   : > { %2706 = vmatmul.mubr.f32.vlgmr.msra.gmra.mrb[96].mxu1 %v5448_v50  ;;  %v5554_v50 = vld [vmem:[#allocation2 + $0xa0] sm:$0x3] }
  0xf3   : > { %2710 = vmatprep.mubr.f32.mxu1 %v2372_v39  ;;  %v2385_v39 = vsel %vm664_vm1, %v2383_v15, %v2384_v23  ;;  %v1702_v46 = vsel %vm777_vm0, %v1699_v1, %v1701_v19  ;;  %v2391_v37 = vrot.slane %v5554_v50, 1  ;;  %v2498_v1 = vrot.slane %v5518_v47, 2  ;;  %v5596_v15 = vld [vmem:[#allocation2 + $0xc8] sm:$0xff] }
  0xf4   : > { %3879 = vmatmul.mubr.f32.gmra.mrb[82].mxu0 %v1677_v31  ;;  %v1706_v31 = vrot.slane %v5431_v27, 2  ;;  %v2387_v27 = vsel %vm664_vm1, %v2384_v23, %v2386_v51  ;;  %v2399_v47 = vrot.slane %v5596_v15, 1  ;;  %v2503_v51 = vrot.slane %v5554_v50, 2  ;;  %v5620_v50 = vld [vmem:[#allocation2 + $0xe0] sm:$0xff] }
  0xf5   : > { %3881 = vmatprep.mubr.f32.mxu0 %v1680_v7  ;;  %v5534_v7 = vld [vmem:[#allocation2 + $0x98] sm:$0xff] }
  0xf6   : > { %2711 = vmatmul.mubr.f32.gmra.mrb[98].mxu1 %v5450_v11  ;;  %v2389_v43 = vrot.slane %v5534_v7, 1 }
  0xf7   : > { %2715 = vmatprep.mubr.f32.mxu1 %v2375_v12  ;;  %v2388_v12 = vrot.slane %v5532_v22, 1 }
  0xf8   : > { %3882 = vmatmul.mubr.f32.gmra.mrb[84].mxu0 %v1682_v28  ;;  %v2483_v28 = vrot.slane %v5461_v21, 2  ;;  %v2392_v33 = vsel %vm664_vm1, %v2389_v43, %v2391_v37 }
  0xf9   : > { %3884 = vmatprep.mubr.f32.mxu0 %v1685_v13  ;;  %v1707_v13 = vsel %vm777_vm0, %v5524_v55, %v1706_v31  ;;  %v2390_v21 = vsel %vm664_vm1, %v2388_v12, %v2389_v43 }
  0xfa   : > { %2716 = vmatmul.mubr.f32.gmra.mrb[100].mxu1 %v5469_v18  ;;  %v2484_v40 = vsel %vm777_vm0, %v2481_v0, %v2483_v28 }
  0xfb   : > { %2720 = vmatprep.mubr.f32.mxu1 %v2377_v5 }
  0xfc   : > { %3885 = vmatmul.mubr.f32.gmra.mrb[86].mxu0 %v1687_v53  ;;  %v5568_v53 = vld [vmem:[#allocation2 + $0xa8] sm:$0xff] }
  0xfd   : > { %3887 = vmatprep.mubr.f32.mxu0 %v1690_v45  ;;  %v2490_v45 = vrot.slane %v5488_v25, 2  ;;  %v2393_v24 = vrot.slane %v5568_v53, 1 }
  0xfe   : > { %2721 = vmatmul.mubr.f32.gmra.mrb[102].mxu1 %v5471_v56  ;;  %v2487_v56 = vsel %vm777_vm0, %v2485_v42, %v2486_v34 }
  0xff   : > { %2725 = vmatprep.mubr.f32.mxu1 %v2380_v32  ;;  %v2489_v32 = vsel %vm777_vm0, %v2486_v34, %v2488_v16  ;;  %v2395_v30 = vsel %vm664_vm1, %v2393_v24, %v2394_v4  ;;  %v2404_v16 = vrot.slane %v5620_v50, 1 }
 0x100   : > { %3888 = vmatmul.mubr.f32.gmra.mrb[88].mxu0 %v1692_v10  ;;  %v2289_v10 = vld [vmem:[#allocation2 + $0xb8] sm:$0x3] }
 0x101   : > { %3890 = vmatprep.mubr.f32.mxu0 %v1695_v52  ;;  %v2496_v52 = vrot.slane %v5509_v49, 2  ;;  %v2396_v17 = vrot.slane %v2289_v10, 1  ;;  %v2508_v28 = vrot.slane %v2289_v10, 2  ;;  %v5638_v10 = vld [vmem:[#allocation2 + $0xf8] sm:$0xff] }
 0x102   : > { %2726 = vmatmul.mubr.f32.gmra.mrb[104].mxu1 %v5488_v25  ;;  %v2492_v25 = vsel %vm777_vm0, %v2490_v45, %v2491_v6  ;;  %v2295_v6 = vld [vmem:[#allocation2 + $0xe8] sm:$0x3] }
 0x103   : > { %2730 = vmatprep.mubr.f32.mxu1 %v2382_v62  ;;  %v2290_v62 = vld [vmem:[#allocation2 + $0xc0] sm:$0xff]  ;;  %v2397_v19 = vsel %vm664_vm1, %v2394_v4, %v2396_v17  ;;  %v2516_v4 = vrot.slane %v5620_v50, 2 }
 0x104   : > { %3891 = vmatmul.mubr.f32.gmra.mrb[90].mxu0 %v1697_v14  ;;  %v2501_v14 = vrot.slane %v5534_v7, 2  ;;  %v2510_v34 = vrot.slane %v2290_v62, 2 }
 0x105   : > { %v5528_v9 = vpop.f32.mrb[0].mxu1  ;;  %3893 = vmatprep.mubr.f32.mxu0 %v1700_v29  ;;  %v2398_v29 = vrot.slane %v2290_v62, 1 }
 0x106   : > { %v5536_v41 = vpop.f32.mrb[1].mxu1  ;;  %2731 = vmatmul.mubr.f32.gmra.mrb[106].mxu1 %v5490_v48  ;;  %v2495_v48 = vrot.slane %v5507_v54, 2  ;;  %v2504_v43 = vsel %vm777_vm0, %v2501_v14, %v2503_v51 }
 0x107   : > { %2735 = vmatprep.mubr.f32.mxu1 %v2385_v39  ;;  %v2499_v39 = vsel %vm777_vm0, %v2496_v52, %v2498_v1  ;;  %v2400_v0 = vsel %vm664_vm1, %v2398_v29, %v2399_v47  ;;  %v2518_v1 = vrot.slane %v2295_v6, 2  ;;  %v5653_v29 = vld [vmem:[#allocation2 + $0x108] sm:$0xff] }
 0x108   : > { %3894 = vmatmul.mubr.f32.gmra.mrb[92].mxu0 %v1702_v46  ;;  %v2292_v46 = vld [vmem:[#allocation2 + $0xd0] sm:$0x3] }
 0x109   : > { %v5549_v44 = vpop.f32.mrb[2].mxu1  ;;  %3896 = vmatprep.mubr.f32.mxu0 %v5541_v57  ;;  %v2513_v45 = vrot.slane %v2292_v46, 2 }
 0x10a   : > { %v5556_v11 = vpop.f32.mrb[3].mxu1  ;;  %2736 = vmatmul.mubr.f32.gmra.mrb[108].mxu1 %v5507_v54  ;;  %v2497_v54 = vsel %vm777_vm0, %v2495_v48, %v2496_v52 }
 0x10b   : > { %2740 = vmatprep.mubr.f32.mxu1 %v2387_v27  ;;  %v2401_v27 = vrot.slane %v2292_v46, 1  ;;  %v2408_v46 = vrot.slane %v5636_v20, 1 }
 0x10c   : > { %3897 = vmatmul.mubr.f32.gmra.mrb[94].mxu0 %v1707_v13  ;;  %v2293_v13 = vld [vmem:[#allocation2 + $0xd8] sm:$0xff] }
 0x10d   : > { %v5564_v5 = vpop.f32.mrb[4].mxu1  ;;  %3931 = vmatprep.mubr.f32.mxu0 %v2482_v60  ;;  %v2402_v37 = vsel %vm664_vm1, %v2399_v47, %v2401_v27  ;;  %v2515_v24 = vrot.slane %v2293_v13, 2  ;;  %v5655_v47 = vld [vmem:[#allocation2 + $0x110] sm:$0xff] }
 0x10e   : > { %v5572_v18 = vpop.f32.mrb[5].mxu1  ;;  %2741 = vmatmul.mubr.f32.gmra.mrb[110].mxu1 %v5509_v49  ;;  %v2500_v49 = vrot.slane %v5532_v22, 2 }
 0x10f   : > { %2745 = vmatprep.mubr.f32.mxu1 %v2390_v21  ;;  %v2511_v21 = vrot.slane %v5596_v15, 2 }
 0x110   : > { %3932 = vmatmul.mubr.f32.vlgmr.msra.gmra.mrb[96].mxu0 %v2484_v40  ;;  %v2403_v40 = vrot.slane %v2293_v13, 1 }
 0x111   : > { %v5581_v61 = vpop.f32.mrb[6].mxu1  ;;  %3934 = vmatprep.mubr.f32.mxu0 %v2487_v56  ;;  %v2509_v56 = vsel %vm777_vm0, %v2506_v3, %v2508_v28  ;;  %v2526_v28 = vrot.slane %v5655_v47, 2 }
 0x112   : > { %v5585_v59 = vpop.f32.mrb[7].mxu1  ;;  %2746 = vmatmul.mubr.f32.gmra.mrb[112].mxu1 %v5532_v22  ;;  %v2502_v22 = vsel %vm777_vm0, %v2500_v49, %v2501_v14  ;;  %v2405_v52 = vsel %vm664_vm1, %v2403_v40, %v2404_v16  ;;  %v2521_v49 = vrot.slane %v5638_v10, 2  ;;  %v2298_v14 = vld [vmem:[#allocation2 + $0x100] sm:$0x3] }
 0x113   : > { %2750 = vmatprep.mubr.f32.mxu1 %v2392_v33  ;;  %v2512_v33 = vsel %vm777_vm0, %v2510_v34, %v2511_v21 }
 0x114   : > { %3935 = vmatmul.mubr.f32.gmra.mrb[98].mxu0 %v2489_v32 }
 0x115   : > { %v5592_v36 = vpop.f32.mrb[8].mxu1  ;;  %3937 = vmatprep.mubr.f32.mxu0 %v2492_v25 }
 0x116   : > { %v5598_v23 = vpop.f32.mrb[9].mxu1  ;;  %2751 = vmatmul.mubr.f32.gmra.mrb[114].mxu1 %v5534_v7  ;;  %v2505_v7 = vrot.slane %v5568_v53, 2 }
 0x117   : > { %2755 = vmatprep.mubr.f32.mxu1 %v2395_v30  ;;  %v2406_v30 = vrot.slane %v2295_v6, 1 }
 0x118   : > { %3938 = vmatmul.mubr.f32.gmra.mrb[100].mxu0 %v2494_v58  ;;  %v2507_v42 = vsel %vm777_vm0, %v2505_v7, %v2506_v3  ;;  %v2514_v58 = vsel %vm777_vm0, %v2511_v21, %v2513_v45  ;;  %v2519_v3 = vsel %vm777_vm0, %v2516_v4, %v2518_v1  ;;  %v5673_v21 = vld [vmem:[#allocation2 + $0x120] sm:$0xff] }
 0x119   : > { %v5606_v63 = vpop.f32.mrb[10].mxu1  ;;  %3940 = vmatprep.mubr.f32.mxu0 %v2497_v54  ;;  %v2517_v54 = vsel %vm777_vm0, %v2515_v24, %v2516_v4 }
 0x11a   : > { %v5610_v31 = vpop.f32.mrb[11].mxu1  ;;  %2756 = vmatmul.mubr.f32.gmra.mrb[116].mxu1 %v5568_v53 }
 0x11b   : > { %2760 = vmatprep.mubr.f32.mxu1 %v2397_v19 }
 0x11c   : > { %3941 = vmatmul.mubr.f32.gmra.mrb[102].mxu0 %v2499_v39 }
 0x11d   : > { %v5617_v12 = vpop.f32.mrb[12].mxu1  ;;  %3943 = vmatprep.mubr.f32.mxu0 %v2502_v22  ;;  %v2409_v22 = vrot.slane %v5638_v10, 1 }
 0x11e   : > { %v5622_v60 = vpop.f32.mrb[13].mxu1  ;;  %2761 = vmatmul.mubr.f32.gmra.mrb[118].mxu1 %v5570_v8 }
 0x11f   : > { %2765 = vmatprep.mubr.f32.mxu1 %v2400_v0  ;;  %v2523_v0 = vrot.slane %v2298_v14, 2 }
 0x120   : > { %3944 = vmatmul.mubr.f32.gmra.mrb[104].mxu0 %v2504_v43  ;;  %v2525_v43 = vrot.slane %v5653_v29, 2 }
 0x121   : > { %v5629_v53 = vpop.f32.mrb[14].mxu1  ;;  %3946 = vmatprep.mubr.f32.mxu0 %v2507_v42  ;;  %v5671_v42 = vld [vmem:[#allocation2 + $0x118] sm:$0x3]  ;;  %v2524_v6 = vsel %vm777_vm0, %v2521_v49, %v2523_v0 }
 0x122   : > { %v5632_v8 = vpop.f32.mrb[15].mxu1  ;;  %2766 = vmatmul.mubr.f32.gmra.mrb[120].mxu1 %v2290_v62  ;;  %v2527_v4 = vsel %vm777_vm0, %v2525_v43, %v2526_v28  ;;  %v5717_v43 = vld [vmem:[#allocation2 + $0x158] sm:$0xff] }
 0x123   : > { %v1004_v32 = vpop.f32.mrb[0].mxu0  ;;  %2770 = vmatprep.mubr.f32.mxu1 %v2402_v37  ;;  %v5675_v37 = vld [vmem:[#allocation2 + $0x128] sm:$0xff] }
 0x124   : > { %v5641_v25 = vadd.f32 %v5536_v41, %v1004_v32  ;;  %3947 = vmatmul.mubr.f32.gmra.mrb[106].mxu0 %v2509_v56  ;;  %v1006_v48 = vpop.f32.mrb[1].mxu0  ;;  %v2520_v41 = vrot.slane %v5636_v20, 2  ;;  %v2411_v56 = vrot.slane %v2298_v14, 1  ;;  %v2531_v32 = vrot.slane %v5675_v37, 2 }
 0x125   : > { %v5644_v17 = vpop.f32.mrb[16].mxu1  ;;  %3949 = vmatprep.mubr.f32.mxu0 %v2512_v33  ;;  %v2528_v33 = vrot.slane %v5671_v42, 2  ;;  %v5691_v48 = vld [vmem:[#allocation2 + $0x130] sm:$0x3] }
 0x126   : > { %v5647_v62 = vpop.f32.mrb[17].mxu1  ;;  %2771 = vmatmul.mubr.f32.gmra.mrb[122].mxu1 %v5596_v15  ;;  %v2407_v15 = vsel %vm664_vm1, %v2404_v16, %v2406_v30  ;;  %v5693_v30 = vld [vmem:[#allocation2 + $0x138] sm:$0xff] }
 0x127   : > { %v1009_v19 = vpop.f32.mrb[2].mxu0  ;;  %2775 = vmatprep.mubr.f32.mxu1 %v2405_v52 }
 0x128   : > { %v5658_v39 = vadd.f32 %v5528_v9, %v1009_v19  ;;  %3950 = vmatmul.mubr.f32.gmra.mrb[108].mxu0 %v2514_v58  ;;  %v1011_v51 = vpop.f32.mrb[3].mxu0  ;;  %v2522_v9 = vsel %vm777_vm0, %v2520_v41, %v2521_v49  ;;  %v5695_v58 = vld [vmem:[#allocation2 + $0x140] sm:$0xff]  ;;  %v2413_v41 = vrot.slane %v5653_v29, 1  ;;  %v2414_v49 = vrot.slane %v5655_v47, 1 }
 0x129   : > { %v5663_v7 = vpop.f32.mrb[18].mxu1  ;;  %3952 = vmatprep.mubr.f32.mxu0 %v2517_v54  ;;  %v2529_v19 = vsel %vm777_vm0, %v2526_v28, %v2528_v33  ;;  %v2533_v51 = vrot.slane %v5691_v48, 2 }
 0x12a   : > { %v5666_v27 = vpop.f32.mrb[19].mxu1  ;;  %2776 = vmatmul.mubr.f32.gmra.mrb[124].mxu1 %v2293_v13  ;;  %v2410_v13 = vsel %vm664_vm1, %v2408_v46, %v2409_v22  ;;  %v2535_v46 = vrot.slane %v5693_v30, 2 }
 0x12b   : > { %v1014_v34 = vpop.f32.mrb[4].mxu0  ;;  %2780 = vmatprep.mubr.f32.mxu1 %v2407_v15 }
 0x12c   : > { %v5678_v40 = vadd.f32 %v5556_v11, %v1014_v34  ;;  %3953 = vmatmul.mubr.f32.gmra.mrb[110].mxu0 %v2519_v3  ;;  %v1016_v16 = vpop.f32.mrb[5].mxu0  ;;  %v2530_v11 = vrot.slane %v5673_v21, 2  ;;  %v5713_v3 = vld [vmem:[#allocation2 + $0x148] sm:$0x3] }
 0x12d   : > { %v5681_v45 = vpop.f32.mrb[20].mxu1  ;;  %3955 = vmatprep.mubr.f32.mxu0 %v2522_v9  ;;  %v5715_v9 = vld [vmem:[#allocation2 + $0x150] sm:$0xff]  ;;  %v2416_v16 = vrot.slane %v5671_v42, 1 }
 0x12e   : > { %v5685_v24 = vpop.f32.mrb[21].mxu1  ;;  %2781 = vmatmul.mubr.f32.gmra.mrb[126].mxu1 %v5620_v50  ;;  %v2412_v50 = vsel %vm664_vm1, %v2409_v22, %v2411_v56  ;;  %v2536_v22 = vrot.slane %v5695_v58, 2  ;;  %v2534_v56 = vsel %vm777_vm0, %v2531_v32, %v2533_v51  ;;  %v2419_v51 = vrot.slane %v5675_v37, 1 }
 0x12f   : > { %v1019_v52 = vpop.f32.mrb[6].mxu0  ;;  %2785 = vmatprep.mubr.f32.mxu1 %v2410_v13 }
 0x130   : > { %v5698_v1 = vadd.f32 %v5549_v44, %v1019_v52  ;;  %3956 = vmatmul.mubr.f32.gmra.mrb[112].mxu0 %v2524_v6  ;;  %v1021_v54 = vpop.f32.mrb[7].mxu0  ;;  %v2532_v44 = vsel %vm777_vm0, %v2530_v11, %v2531_v32  ;;  %v2538_v6 = vrot.slane %v5713_v3, 2  ;;  %v2541_v11 = vrot.slane %v5717_v43, 2  ;;  %v5734_v52 = vld [vmem:[#allocation2 + $0x160] sm:$0x3] }
 0x131   : > { %v5703_v14 = vpop.f32.mrb[22].mxu1  ;;  %3958 = vmatprep.mubr.f32.mxu0 %v2527_v4  ;;  %v2540_v4 = vrot.slane %v5715_v9, 2  ;;  %v5736_v54 = vld [vmem:[#allocation2 + $0x168] sm:$0xff] }
 0x132   : > { %v5707_v15 = vpop.f32.mrb[23].mxu1  ;;  %2786 = vmatmul.mubr.f32.gmra.mrb[128].mxu1 %v5636_v20  ;;  %v2415_v20 = vsel %vm664_vm1, %v2413_v41, %v2414_v49 }
 0x133   : > { %v1024_v0 = vpop.f32.mrb[8].mxu0  ;;  %2790 = vmatprep.mubr.f32.mxu1 %v2412_v50  ;;  %v5738_v50 = vld [vmem:[#allocation2 + $0x170] sm:$0xff] }
 0x134   : > { %v5720_v28 = vadd.f32 %v5572_v18, %v1024_v0  ;;  %v1026_v34 = vpop.f32.mrb[9].mxu0  ;;  %3959 = vmatmul.mubr.f32.gmra.mrb[114].mxu0 %v2529_v19  ;;  %v2537_v18 = vsel %vm777_vm0, %v2535_v46, %v2536_v22  ;;  %v2418_v19 = vrot.slane %v5673_v21, 1  ;;  %v2539_v46 = vsel %vm777_vm0, %v2536_v22, %v2538_v6 }
 0x135   : > { %v5724_v13 = vpop.f32.mrb[24].mxu1  ;;  %3961 = vmatprep.mubr.f32.mxu0 %v2532_v44  ;;  %v2543_v0 = vrot.slane %v5734_v52, 2 }
 0x136   : > { %6454 = vst [vmem:[#allocation3_spill] sm:$0xff] %v5720_v28  ;;  %v5728_v33 = vpop.f32.mrb[25].mxu1  ;;  %2791 = vmatmul.mubr.f32.gmra.mrb[130].mxu1 %v5638_v10  ;;  %v2417_v10 = vsel %vm664_vm1, %v2414_v49, %v2416_v16  ;;  %v2545_v49 = vrot.slane %v5736_v54, 2  ;;  %v5756_v16 = vld [vmem:[#allocation2 + $0x178] sm:$0x3]  ;;  %v2420_v6 = vsel %vm664_vm1, %v2418_v19, %v2419_v51 }
 0x137   : > { %v1029_v42 = vpop.f32.mrb[10].mxu0  ;;  %2795 = vmatprep.mubr.f32.mxu1 %v2415_v20  ;;  %v2546_v20 = vrot.slane %v5738_v50, 2  ;;  %v5773_v19 = vld [vmem:[#allocation2 + $0x198] sm:$0xff] }
 0x138   : > { %v5741_v32 = vadd.f32 %v5564_v5, %v1029_v42  ;;  %v1031_v41 = vpop.f32.mrb[11].mxu0  ;;  %3962 = vmatmul.mubr.f32.gmra.mrb[116].mxu0 %v2534_v56  ;;  %v2542_v5 = vsel %vm777_vm0, %v2540_v4, %v2541_v11  ;;  %v2421_v42 = vrot.slane %v5691_v48, 1  ;;  %v2544_v4 = vsel %vm777_vm0, %v2541_v11, %v2543_v0  ;;  %v5775_v48 = vld [vmem:[#allocation2 + $0x1a0] sm:$0xff] }
 0x139   : > { %v5746_v44 = vpop.f32.mrb[26].mxu1  ;;  %3964 = vmatprep.mubr.f32.mxu0 %v2537_v18  ;;  %v2548_v41 = vrot.slane %v5756_v16, 2 }
 0x13a   : > { %6455 = vst [vmem:[#allocation4_spill] sm:$0xff] %v5741_v32  ;;  %v5750_v34 = vpop.f32.mrb[27].mxu1  ;;  %2796 = vmatmul.mubr.f32.gmra.mrb[132].mxu1 %v5653_v29  ;;  %v2422_v0 = vsel %vm664_vm1, %v2419_v51, %v2421_v42  ;;  %v2556_v51 = vrot.slane %v5775_v48, 2  ;;  %v5792_v42 = vld [vmem:[#allocation2 + $0x1a8] sm:$0x3] }
 0x13b   : > { %v1034_v56 = vpop.f32.mrb[12].mxu0  ;;  %2800 = vmatprep.mubr.f32.mxu1 %v2417_v10  ;;  %v5771_v10 = vld [vmem:[#allocation2 + $0x190] sm:$0x3] }
 0x13c   : > { %v5759_v18 = vadd.f32 %v5585_v59, %v1034_v56  ;;  %v1036_v22 = vpop.f32.mrb[13].mxu0  ;;  %3965 = vmatmul.mubr.f32.gmra.mrb[118].mxu0 %v2539_v46  ;;  %v2547_v59 = vsel %vm777_vm0, %v2545_v49, %v2546_v20 }
 0x13d   : > { %v5763_v29 = vpop.f32.mrb[28].mxu1  ;;  %3967 = vmatprep.mubr.f32.mxu0 %v2542_v5  ;;  %v2423_v5 = vrot.slane %v5693_v30, 1  ;;  %v2549_v22 = vsel %vm777_vm0, %v2546_v20, %v2548_v41  ;;  %v2426_v41 = vrot.slane %v5713_v3, 1 }
 0x13e   : > { %6456 = vst [vmem:[#allocation5_spill] sm:$0xff] %v5759_v18  ;;  %v5767_v28 = vpop.f32.mrb[29].mxu1  ;;  %2801 = vmatmul.mubr.f32.gmra.mrb[134].mxu1 %v5655_v47  ;;  %v2424_v47 = vrot.slane %v5695_v58, 1 }
 0x13f   : > { %v1039_v56 = vpop.f32.mrb[14].mxu0  ;;  %2805 = vmatprep.mubr.f32.mxu1 %v2420_v6  ;;  %v2553_v6 = vrot.slane %v5771_v10, 2 }
 0x140   : > { %v5778_v46 = vadd.f32 %v5581_v61, %v1039_v56  ;;  %v1041_v11 = vpop.f32.mrb[15].mxu0  ;;  %3968 = vmatmul.mubr.f32.gmra.mrb[120].mxu0 %v2544_v4  ;;  %v2555_v61 = vrot.slane %v5773_v19, 2  ;;  %v2425_v20 = vsel %vm664_vm1, %v2423_v5, %v2424_v47 }
 0x141   : > { %v5783_v49 = vpop.f32.mrb[30].mxu1  ;;  %3970 = vmatprep.mubr.f32.mxu0 %v2547_v59 }
 0x142   : > { %6457 = vst [vmem:[#allocation6_spill] sm:$0xff] %v5778_v46  ;;  %v5787_v18 = vpop.f32.mrb[31].mxu1  ;;  %2806 = vmatmul.mubr.f32.gmra.mrb[136].mxu1 %v5673_v21  ;;  %v2554_v21 = vsel %vm777_vm0, %v5524_v55, %v2553_v6  ;;  %v2558_v46 = vrot.slane %v5792_v42, 2 }
 0x143   : > { %v1044_v56 = vpop.f32.mrb[16].mxu0  ;;  %2810 = vmatprep.mubr.f32.mxu1 %v2422_v0 }
 0x144   : > { %v5795_v4 = vadd.f32 %v5598_v23, %v1044_v56  ;;  %v1046_v59 = vpop.f32.mrb[17].mxu0  ;;  %3971 = vmatmul.mubr.f32.gmra.mrb[122].mxu0 %v2549_v22  ;;  %v2557_v23 = vsel %vm777_vm0, %v2555_v61, %v2556_v51  ;;  %v2427_v22 = vsel %vm664_vm1, %v2424_v47, %v2426_v41  ;;  %v2429_v56 = vrot.slane %v5717_v43, 1 }
 0x145   : > { %v5799_v11 = vpop.f32.mrb[32].mxu1  ;;  %3973 = vmatprep.mubr.f32.mxu0 %v5541_v57  ;;  %v2428_v57 = vrot.slane %v5715_v9, 1  ;;  %v2431_v59 = vrot.slane %v5734_v52, 1 }
 0x146   : > { %v1857_v32 = vpop.f32.mrb[33].mxu1  ;;  %2811 = vmatmul.mubr.f32.gmra.mrb[138].mxu1 %v5675_v37  ;;  %v2559_v37 = vsel %vm777_vm0, %v2556_v51, %v2558_v46 }
 0x147   : > { %v1049_v0 = vpop.f32.mrb[18].mxu0  ;;  %2815 = vmatprep.mubr.f32.mxu1 %v2425_v20  ;;  %v2430_v47 = vsel %vm664_vm1, %v2428_v57, %v2429_v56  ;;  %v2436_v57 = vrot.slane %v5756_v16, 1 }
 0x148   : > { %v5808_v5 = vadd.f32 %v5592_v36, %v1049_v0  ;;  %v1051_v3 = vpop.f32.mrb[19].mxu0  ;;  %3974 = vmatmul.mubr.f32.gmra.mrb[124].mxu0 %v2554_v21  ;;  %v2433_v21 = vrot.slane %v5736_v54, 1 }
 0x149   : > { %v5813_v55 = vpop.f32.mrb[34].mxu1  ;;  %3976 = vmatprep.mubr.f32.mxu0 %v2557_v23  ;;  %v2434_v23 = vrot.slane %v5738_v50, 1 }
 0x14a   : > { %v1862_v32 = vpop.f32.mrb[35].mxu1  ;;  %2816 = vmatmul.mubr.f32.gmra.mrb[140].mxu1 %v5693_v30 }
 0x14b   : > { %v1054_v6 = vpop.f32.mrb[20].mxu0  ;;  %2820 = vmatprep.mubr.f32.mxu1 %v2427_v22 }
 0x14c   : > { %v5818_v36 = vadd.f32 %v5610_v31, %v1054_v6  ;;  %v1056_v61 = vpop.f32.mrb[21].mxu0  ;;  %3977 = vmatmul.mubr.f32.gmra.mrb[126].mxu0 %v2559_v37  ;;  %v2432_v31 = vsel %vm664_vm1, %v2429_v56, %v2431_v59 }
 0x14d   : > { %v5822_v20 = vpop.f32.mrb[36].mxu1  ;;  %v2437_v61 = vsel %vm664_vm1, %v2434_v23, %v2436_v57 }
 0x14e   : > { %v1867_v41 = vpop.f32.mrb[37].mxu1  ;;  %2821 = vmatmul.mubr.f32.gmra.mrb[142].mxu1 %v5695_v58 }
 0x14f   : > { %v1059_v46 = vpop.f32.mrb[22].mxu0  ;;  %2825 = vmatprep.mubr.f32.mxu1 %v2430_v47 }
 0x150   : > { %v5826_v30 = vadd.f32 %v5606_v63, %v1059_v46  ;;  %v1061_v51 = vpop.f32.mrb[23].mxu0  ;;  %v2435_v63 = vsel %vm664_vm1, %v2433_v21, %v2434_v23  ;;  %v2444_v23 = vrot.slane %v5775_v48, 1 }
 0x151   : > { %v5831_v0 = vpop.f32.mrb[38].mxu1 }
 0x152   : > { %v1872_v52 = vpop.f32.mrb[39].mxu1  ;;  %2826 = vmatmul.mubr.f32.gmra.mrb[144].mxu1 %v5715_v9 }
 0x153   : > { %v1064_v3 = vpop.f32.mrb[24].mxu0  ;;  %2830 = vmatprep.mubr.f32.mxu1 %v2432_v31 }
 0x154   : > { %v5835_v58 = vadd.f32 %v5622_v60, %v1064_v3  ;;  %v1066_v22 = vpop.f32.mrb[25].mxu0 }
 0x155   : > { %v5839_v56 = vpop.f32.mrb[40].mxu1  ;;  %v2446_v22 = vrot.slane %v5792_v42, 1 }
 0x156   : > { %v1877_v37 = vpop.f32.mrb[41].mxu1  ;;  %2831 = vmatmul.mubr.f32.gmra.mrb[146].mxu1 %v5717_v43  ;;  %v2441_v43 = vrot.slane %v5771_v10, 1 }
 0x157   : > { %v1069_v32 = vpop.f32.mrb[26].mxu0  ;;  %2835 = vmatprep.mubr.f32.mxu1 %v2435_v63 }
 0x158   : > { %v5843_v6 = vadd.f32 %v5617_v12, %v1069_v32  ;;  %v1071_v9 = vpop.f32.mrb[27].mxu0  ;;  %v2442_v21 = vsel %vm664_vm1, %v5427_v38, %v2441_v43  ;;  %v2447_v32 = vsel %vm664_vm1, %v2444_v23, %v2446_v22 }
 0x159   : > { %v5846_v60 = vpop.f32.mrb[42].mxu1 }
 0x15a   : > { %v1882_v47 = vpop.f32.mrb[43].mxu1  ;;  %2836 = vmatmul.mubr.f32.gmra.mrb[148].mxu1 %v5736_v54 }
 0x15b   : > { %v1074_v59 = vpop.f32.mrb[28].mxu0  ;;  %2840 = vmatprep.mubr.f32.mxu1 %v2437_v61 }
 0x15c   : > { %v5850_v16 = vadd.f32 %v5632_v8, %v1074_v59  ;;  %v1076_v41 = vpop.f32.mrb[29].mxu0  ;;  %v2443_v8 = vrot.slane %v5773_v19, 1 }
 0x15d   : > { %v5853_v46 = vpop.f32.mrb[44].mxu1 }
 0x15e   : > { %v1887_v12 = vpop.f32.mrb[45].mxu1  ;;  %2841 = vmatmul.mubr.f32.gmra.mrb[150].mxu1 %v5738_v50  ;;  %v2445_v3 = vsel %vm664_vm1, %v2443_v8, %v2444_v23 }
 0x15f   : > { %v1079_v51 = vpop.f32.mrb[30].mxu0  ;;  %2845 = vmatprep.mubr.f32.mxu1 %v5443_v35 }
 0x160   : > { %v5858_v31 = vadd.f32 %v5629_v53, %v1079_v51  ;;  %v1081_v54 = vpop.f32.mrb[31].mxu0 }
 0x161   : > { %v5864_v10 = vpop.f32.mrb[46].mxu1 }
 0x162   : > { %v1892_v52 = vpop.f32.mrb[47].mxu1  ;;  %2846 = vmatmul.mubr.f32.gmra.mrb[152].mxu1 %v5410_v2 }
 0x163   : > { %v1084_v50 = vpop.f32.mrb[32].mxu0  ;;  %2850 = vmatprep.mubr.f32.mxu1 %v2442_v21 }
 0x164   : > { %v5868_v35 = vadd.f32 %v5647_v62, %v1084_v50  ;;  %v1086_v53 = vpop.f32.mrb[33].mxu0 }
 0x165   : > { %v5872_v38 = vpop.f32.mrb[48].mxu1 }
 0x166   : > { %v1897_v63 = vpop.f32.mrb[49].mxu1  ;;  %2851 = vmatmul.mubr.f32.gmra.mrb[154].mxu1 %v5412_v26 }
 0x167   : > { %v1089_v57 = vpop.f32.mrb[34].mxu0  ;;  %2855 = vmatprep.mubr.f32.mxu1 %v2445_v3 }
 0x168   : > { %v5876_v37 = vadd.f32 %v5644_v17, %v1089_v57  ;;  %v1091_v2 = vpop.f32.mrb[35].mxu0 }
 0x169   : > { %v5879_v62 = vpop.f32.mrb[50].mxu1 }
 0x16a   : > { %v1902_v9 = vpop.f32.mrb[51].mxu1  ;;  %2856 = vmatmul.mubr.f32.gmra.mrb[156].mxu1 %v5773_v19 }
 0x16b   : > { %v1094_v61 = vpop.f32.mrb[36].mxu0  ;;  %2860 = vmatprep.mubr.f32.mxu1 %v2447_v32 }
 0x16c   : > { %v5883_v42 = vadd.f32 %v5666_v27, %v1094_v61  ;;  %v1096_v47 = vpop.f32.mrb[37].mxu0 }
 0x16d   : > { %v5885_v26 = vpop.f32.mrb[52].mxu1 }
 0x16e   : > { %v1907_v59 = vpop.f32.mrb[53].mxu1  ;;  %2861 = vmatmul.mubr.f32.gmra.mrb[158].mxu1 %v5775_v48 }
 0x16f   : > { %v1099_v17 = vpop.f32.mrb[38].mxu0 }
 0x170   : > { %v5889_v41 = vadd.f32 %v5663_v7, %v1099_v17  ;;  %v1101_v43 = vpop.f32.mrb[39].mxu0 }
 0x171   : > { %v5891_v12 = vpop.f32.mrb[54].mxu1 }
 0x172   : > { %v1912_v51 = vpop.f32.mrb[55].mxu1 }
 0x173   : > { %v1104_v19 = vpop.f32.mrb[40].mxu0 }
 0x174   : > { %v5894_v54 = vadd.f32 %v5685_v24, %v1104_v19  ;;  %v1106_v27 = vpop.f32.mrb[41].mxu0 }
 0x175   : > { %v5896_v21 = vpop.f32.mrb[56].mxu1 }
 0x176   : > { %v1917_v8 = vpop.f32.mrb[57].mxu1 }
 0x177   : > { %v1109_v23 = vpop.f32.mrb[42].mxu0 }
 0x178   : > { %v5899_v52 = vadd.f32 %v5681_v45, %v1109_v23  ;;  %v1111_v48 = vpop.f32.mrb[43].mxu0 }
 0x179   : > { %v5901_v50 = vpop.f32.mrb[58].mxu1 }
 0x17a   : > { %v1922_v7 = vpop.f32.mrb[59].mxu1 }
 0x17b   : > { %v1114_v53 = vpop.f32.mrb[44].mxu0 }
 0x17c   : > { %v5904_v3 = vadd.f32 %v5707_v15, %v1114_v53  ;;  %v1116_v22 = vpop.f32.mrb[45].mxu0 }
 0x17d   : > { %v5906_v63 = vpop.f32.mrb[60].mxu1 }
 0x17e   : > { %v1927_v24 = vpop.f32.mrb[61].mxu1 }
 0x17f   : > { %v1119_v57 = vpop.f32.mrb[46].mxu0 }
 0x180   : > { %v5909_v2 = vadd.f32 %v5703_v14, %v1119_v57  ;;  %v1121_v32 = vpop.f32.mrb[47].mxu0 }
 0x181   : > { %v5911_v9 = vpop.f32.mrb[62].mxu1 }
 0x182   : > { %v1932_v45 = vpop.f32.mrb[63].mxu1 }
 0x183   : > { %v1124_v61 = vpop.f32.mrb[48].mxu0 }
 0x184   : > { %v5914_v47 = vadd.f32 %v5728_v33, %v1124_v61  ;;  %v1126_v59 = vpop.f32.mrb[49].mxu0 }
 0x185   : > { %v5916_v17 = vpop.f32.mrb[64].mxu1 }
 0x186   : > { %v1937_v15 = vpop.f32.mrb[65].mxu1 }
 0x187   : > { %v1129_v43 = vpop.f32.mrb[50].mxu0 }
 0x188   : > { %v5919_v51 = vadd.f32 %v5724_v13, %v1129_v43  ;;  %v1131_v19 = vpop.f32.mrb[51].mxu0 }
 0x189   : > { %v5921_v27 = vpop.f32.mrb[66].mxu1 }
 0x18a   : > { %v1942_v14 = vpop.f32.mrb[67].mxu1 }
 0x18b   : > { %v1134_v8 = vpop.f32.mrb[52].mxu0 }
 0x18c   : > { %v5924_v23 = vadd.f32 %v5750_v34, %v1134_v8  ;;  %v1136_v48 = vpop.f32.mrb[53].mxu0 }
 0x18d   : > { %v5926_v7 = vpop.f32.mrb[68].mxu1 }
 0x18e   : > { %v1947_v33 = vpop.f32.mrb[69].mxu1 }
 0x18f   : > { %v1139_v53 = vpop.f32.mrb[54].mxu0 }
 0x190   : > { %v5929_v22 = vadd.f32 %v5746_v44, %v1139_v53  ;;  %v1141_v24 = vpop.f32.mrb[55].mxu0 }
 0x191   : > { %v5931_v57 = vpop.f32.mrb[70].mxu1 }
 0x192   : > { %v1952_v13 = vpop.f32.mrb[71].mxu1 }
 0x193   : > { %v1144_v32 = vpop.f32.mrb[56].mxu0 }
 0x194   : > { %v5934_v45 = vadd.f32 %v5767_v28, %v1144_v32  ;;  %v1146_v61 = vpop.f32.mrb[57].mxu0 }
 0x195   : > { %v5936_v59 = vpop.f32.mrb[72].mxu1 }
 0x196   : > { %v1957_v34 = vpop.f32.mrb[73].mxu1 }
 0x197   : > { %v1149_v15 = vpop.f32.mrb[58].mxu0 }
 0x198   : > { %v5939_v43 = vadd.f32 %v5763_v29, %v1149_v15  ;;  %v1151_v19 = vpop.f32.mrb[59].mxu0  ;;  %v5956_v29 = vld [vmem:[%s6425_s4] ss:$0 sm:$0xff] }
 0x199   : > { %v5941_v14 = vpop.f32.mrb[74].mxu1 }
 0x19a   : > { %v1962_v44 = vpop.f32.mrb[75].mxu1 }
 0x19b   : > { %v1154_v8 = vpop.f32.mrb[60].mxu0 }
 0x19c   : > { %v5944_v48 = vadd.f32 %v5787_v18, %v1154_v8  ;;  %v1156_v33 = vpop.f32.mrb[61].mxu0  ;;  %v1389_v18 = vadd.f32 %v5956_v29, %v5658_v39 }
 0x19d   : > { %v5946_v53 = vpop.f32.mrb[76].mxu1 }
 0x19e   : > { %6458 = vst [vmem:[#allocation7_spill] sm:$0xff] %v5944_v48  ;;  %v1967_v28 = vpop.f32.mrb[77].mxu1  ;;  %v1391_v48 = vadd.f32 %v5956_v29, %v5698_v1 }
 0x19f   : > { %v1159_v24 = vpop.f32.mrb[62].mxu0 }
 0x1a0   : > { %v5949_v13 = vadd.f32 %v5783_v49, %v1159_v24  ;;  %v1161_v32 = vpop.f32.mrb[63].mxu0  ;;  %v1388_v49 = vadd.f32 %v5956_v29, %v5641_v25 }
 0x1a1   : > { %v5951_v61 = vpop.f32.mrb[78].mxu1 }
 0x1a2   : > { %6459 = vst [vmem:[#allocation8_spill] sm:$0xff] %v5949_v13  ;;  %v1972_v34 = vpop.f32.mrb[79].mxu1 }
 0x1a3   : > { %v3853_v15 = vpop.f32.mrb[64].mxu0 }
 0x1a4   : > { %v2086_v19 = vadd.f32 %v3853_v15, %v5813_v55  ;;  %v2080_v44 = vpop.f32.mrb[65].mxu0  ;;  %v1390_v15 = vadd.f32 %v5956_v29, %v5678_v40 }
 0x1a5   : > { %v5963_v8 = vpop.f32.mrb[80].mxu1  ;;  %v2081_v33 = vadd.f32 %v2080_v44, %v5799_v11 }
 0x1a6   : > { %v5966_v28 = vadd.f32 %v2086_v19, %v1389_v18  ;;  %v1977_v24 = vpop.f32.mrb[81].mxu1 }
 0x1a7   : > { %v5968_v32 = vadd.f32 %v2081_v33, %v1388_v49  ;;  %v3856_v34 = vpop.f32.mrb[66].mxu0  ;;  %v6462_v49 = vld [vmem:[#allocation4_spill] sm:$0xff]  ;;  %v6463_v24 = vld [vmem:[#allocation3_spill] sm:$0xff] }
 0x1a8   : > { %v2096_v39 = vadd.f32 %v3856_v34, %v5831_v0  ;;  %v2090_v55 = vpop.f32.mrb[67].mxu0  ;;  %v1393_v33 = vadd.f32 %v5956_v29, %v6462_v49  ;;  %v1392_v34 = vadd.f32 %v5956_v29, %v6463_v24 }
 0x1a9   : > { %6460 = vst [vmem:[#allocation9_spill] sm:$0xff] %v5968_v32  ;;  %v5975_v25 = vpop.f32.mrb[82].mxu1  ;;  %v2091_v13 = vadd.f32 %v2090_v55, %v5822_v20  ;;  %v6464_v55 = vld [vmem:[#allocation6_spill] sm:$0xff] }
 0x1aa   : > { %v5978_v11 = vadd.f32 %v2096_v39, %v1391_v48  ;;  %v1982_v18 = vpop.f32.mrb[83].mxu1 }
 0x1ab   : > { %v5980_v19 = vadd.f32 %v2091_v13, %v1390_v15  ;;  %v3859_v44 = vpop.f32.mrb[68].mxu0  ;;  %v1395_v15 = vadd.f32 %v5956_v29, %v6464_v55 }
 0x1ac   : > { %v2106_v1 = vadd.f32 %v3859_v44, %v5846_v60  ;;  %v2100_v0 = vpop.f32.mrb[69].mxu0  ;;  %v6465_v44 = vld [vmem:[#allocation5_spill] sm:$0xff] }
 0x1ad   : > { %6461 = vst [vmem:[#allocation10_spill] sm:$0xff] %v5980_v19  ;;  %v5987_v40 = vpop.f32.mrb[84].mxu1  ;;  %v2101_v32 = vadd.f32 %v2100_v0, %v5839_v56  ;;  %v1394_v49 = vadd.f32 %v5956_v29, %v6465_v44  ;;  %v1397_v0 = vadd.f32 %v5956_v29, %v5808_v5  ;;  %v1398_v44 = vadd.f32 %v5956_v29, %v5818_v36 }
 0x1ae   : > { %v5990_v20 = vadd.f32 %v2106_v1, %v1393_v33  ;;  %v1987_v48 = vpop.f32.mrb[85].mxu1 }
 0x1af   : > { %v5992_v39 = vadd.f32 %v2101_v32, %v1392_v34  ;;  %v3862_v13 = vpop.f32.mrb[70].mxu0  ;;  %v1396_v48 = vadd.f32 %v5956_v29, %v5795_v4 }
 0x1b0   : > { %v2116_v18 = vadd.f32 %v3862_v13, %v5864_v10  ;;  %v2110_v60 = vpop.f32.mrb[71].mxu0 }
 0x1b1   : > { %v5999_v24 = vpop.f32.mrb[86].mxu1  ;;  %v2111_v19 = vadd.f32 %v2110_v60, %v5853_v46  ;;  %v1399_v60 = vadd.f32 %v5956_v29, %v5826_v30 }
 0x1b2   : > { %v6002_v56 = vadd.f32 %v2116_v18, %v1395_v15  ;;  %v1992_v33 = vpop.f32.mrb[87].mxu1 }
 0x1b3   : > { %v6004_v1 = vadd.f32 %v2111_v19, %v1394_v49  ;;  %v3865_v32 = vpop.f32.mrb[72].mxu0 }
 0x1b4   : > { %v2126_v34 = vadd.f32 %v3865_v32, %v5879_v62  ;;  %v2120_v10 = vpop.f32.mrb[73].mxu0 }
 0x1b5   : > { %v6011_v13 = vpop.f32.mrb[88].mxu1  ;;  %v2121_v55 = vadd.f32 %v2120_v10, %v5872_v38  ;;  %v1400_v10 = vadd.f32 %v5956_v29, %v5835_v58 }
 0x1b6   : > { %v6014_v46 = vadd.f32 %v2126_v34, %v1397_v0  ;;  %v1997_v15 = vpop.f32.mrb[89].mxu1  ;;  %v1401_v34 = vadd.f32 %v5956_v29, %v5843_v6 }
 0x1b7   : > { %v6016_v18 = vadd.f32 %v2121_v55, %v1396_v48  ;;  %v3868_v19 = vpop.f32.mrb[74].mxu0 }
 0x1b8   : > { %v2136_v5 = vadd.f32 %v3868_v19, %v5891_v12  ;;  %v2130_v62 = vpop.f32.mrb[75].mxu0 }
 0x1b9   : > { %v6023_v4 = vpop.f32.mrb[90].mxu1  ;;  %v2131_v49 = vadd.f32 %v2130_v62, %v5885_v26 }
 0x1ba   : > { %v6026_v38 = vadd.f32 %v2136_v5, %v1399_v60  ;;  %v2002_v33 = vpop.f32.mrb[91].mxu1  ;;  %v1403_v60 = vadd.f32 %v5956_v29, %v5858_v31  ;;  %v1402_v5 = vadd.f32 %v5956_v29, %v5850_v16 }
 0x1bb   : > { %v6028_v32 = vadd.f32 %v2131_v49, %v1398_v44  ;;  %v3871_v0 = vpop.f32.mrb[76].mxu0 }
 0x1bc   : > { %v2146_v30 = vadd.f32 %v3871_v0, %v5901_v50  ;;  %v2140_v12 = vpop.f32.mrb[77].mxu0  ;;  %v1405_v0 = vadd.f32 %v5956_v29, %v5876_v37 }
 0x1bd   : > { %v6035_v36 = vpop.f32.mrb[92].mxu1  ;;  %v2141_v48 = vadd.f32 %v2140_v12, %v5896_v21 }
 0x1be   : > { %v6038_v26 = vadd.f32 %v2146_v30, %v1401_v34  ;;  %v2007_v55 = vpop.f32.mrb[93].mxu1  ;;  %v1404_v34 = vadd.f32 %v5956_v29, %v5868_v35 }
 0x1bf   : > { %v6040_v15 = vadd.f32 %v2141_v48, %v1400_v10  ;;  %v3874_v19 = vpop.f32.mrb[78].mxu0  ;;  %v1407_v55 = vadd.f32 %v5956_v29, %v5889_v41 }
 0x1c0   : > { %v2156_v6 = vadd.f32 %v3874_v19, %v5911_v9  ;;  %v2150_v50 = vpop.f32.mrb[79].mxu0  ;;  %v1406_v19 = vadd.f32 %v5956_v29, %v5883_v42 }
 0x1c1   : > { %v6047_v58 = vpop.f32.mrb[94].mxu1  ;;  %v2151_v62 = vadd.f32 %v2150_v50, %v5906_v63 }
 0x1c2   : > { %v6050_v21 = vadd.f32 %v2156_v6, %v1403_v60  ;;  %v2012_v44 = vpop.f32.mrb[95].mxu1 }
 0x1c3   : > { %v6052_v49 = vadd.f32 %v2151_v62, %v1402_v5  ;;  %v3877_v33 = vpop.f32.mrb[80].mxu0  ;;  %v1409_v62 = vadd.f32 %v5956_v29, %v5899_v52  ;;  %v1408_v44 = vadd.f32 %v5956_v29, %v5894_v54 }
 0x1c4   : > { %v2166_v31 = vadd.f32 %v3877_v33, %v5921_v27  ;;  %v2160_v9 = vpop.f32.mrb[81].mxu0 }
 0x1c5   : > { %v2161_v16 = vadd.f32 %v2160_v9, %v5916_v17  ;;  %v6060_v30 = vpop.f32.mrb[96].mxu1 }
 0x1c6   : > { %v6062_v63 = vadd.f32 %v2166_v31, %v1405_v0  ;;  %v2709_v12 = vpop.f32.mrb[97].mxu1 }
 0x1c7   : > { %v6064_v10 = vadd.f32 %v2161_v16, %v1404_v34  ;;  %v3880_v48 = vpop.f32.mrb[82].mxu0  ;;  %v1411_v34 = vadd.f32 %v5956_v29, %v5909_v2  ;;  %v1410_v16 = vadd.f32 %v5956_v29, %v5904_v3 }
 0x1c8   : > { %v2176_v37 = vadd.f32 %v3880_v48, %v5931_v57  ;;  %v2170_v27 = vpop.f32.mrb[83].mxu0 }
 0x1c9   : > { %v2171_v35 = vadd.f32 %v2170_v27, %v5926_v7  ;;  %v6072_v17 = vpop.f32.mrb[98].mxu1  ;;  %v1413_v27 = vadd.f32 %v5956_v29, %v5919_v51 }
 0x1ca   : > { %v6074_v60 = vadd.f32 %v2176_v37, %v1407_v55  ;;  %v2714_v6 = vpop.f32.mrb[99].mxu1 }
 0x1cb   : > { %v6076_v50 = vadd.f32 %v2171_v35, %v1406_v19  ;;  %v3883_v5 = vpop.f32.mrb[84].mxu0 }
 0x1cc   : > { %v2186_v41 = vadd.f32 %v3883_v5, %v5941_v14  ;;  %v2180_v57 = vpop.f32.mrb[85].mxu0 }
 0x1cd   : > { %v2181_v42 = vadd.f32 %v2180_v57, %v5936_v59  ;;  %v6084_v7 = vpop.f32.mrb[100].mxu1 }
 0x1ce   : > { %v6086_v33 = vadd.f32 %v2186_v41, %v1409_v62  ;;  %v2719_v0 = vpop.f32.mrb[101].mxu1  ;;  %v1415_v41 = vadd.f32 %v5956_v29, %v5929_v22 }
 0x1cf   : > { %v6088_v31 = vadd.f32 %v2181_v42, %v1408_v44  ;;  %v3886_v9 = vpop.f32.mrb[86].mxu0 }
 0x1d0   : > { %v2196_v52 = vadd.f32 %v3886_v9, %v5951_v61  ;;  %v2190_v14 = vpop.f32.mrb[87].mxu0  ;;  %v1412_v61 = vadd.f32 %v5956_v29, %v5914_v47 }
 0x1d1   : > { %v2191_v54 = vadd.f32 %v2190_v14, %v5946_v53  ;;  %v2722_v59 = vpop.f32.mrb[102].mxu1 }
 0x1d2   : > { %v6096_v12 = vadd.f32 %v2196_v52, %v1411_v34  ;;  %v2724_v48 = vpop.f32.mrb[103].mxu1  ;;  %v1417_v34 = vadd.f32 %v5956_v29, %v5939_v43 }
 0x1d3   : > { %v6098_v55 = vadd.f32 %v2191_v54, %v1410_v16  ;;  %v3889_v37 = vpop.f32.mrb[88].mxu0 }
 0x1d4   : > { %v2206_v2 = vadd.f32 %v3889_v37, %v5975_v25  ;;  %v2200_v19 = vpop.f32.mrb[89].mxu0  ;;  %v1414_v25 = vadd.f32 %v5956_v29, %v5924_v23  ;;  %v6466_v37 = vld [vmem:[#allocation8_spill] sm:$0xff] }
 0x1d5   : > { %v2201_v3 = vadd.f32 %v2200_v19, %v5963_v8  ;;  %v2727_v35 = vpop.f32.mrb[104].mxu1 }
 0x1d6   : > { %v6106_v53 = vadd.f32 %v2206_v2, %v1413_v27  ;;  %v2729_v6 = vpop.f32.mrb[105].mxu1  ;;  %v1419_v27 = vadd.f32 %v5956_v29, %v6466_v37  ;;  %v6467_v2 = vld [vmem:[#allocation7_spill] sm:$0xff] }
 0x1d7   : > { %v6108_v5 = vadd.f32 %v2201_v3, %v1412_v61  ;;  %v3892_v62 = vpop.f32.mrb[90].mxu0  ;;  %v1418_v19 = vadd.f32 %v5956_v29, %v6467_v2 }
 0x1d8   : > { %v2216_v51 = vadd.f32 %v3892_v62, %v5999_v24  ;;  %v2210_v57 = vpop.f32.mrb[91].mxu0  ;;  %v1416_v24 = vadd.f32 %v5956_v29, %v5934_v45 }
 0x1d9   : > { %v2211_v47 = vadd.f32 %v2210_v57, %v5987_v40  ;;  %v2732_v44 = vpop.f32.mrb[106].mxu1 }
 0x1da   : > { %v6116_v8 = vadd.f32 %v2216_v51, %v1415_v41  ;;  %v2734_v42 = vpop.f32.mrb[107].mxu1 }
 0x1db   : > { %v6118_v0 = vadd.f32 %v2211_v47, %v1414_v25  ;;  %v3895_v9 = vpop.f32.mrb[92].mxu0  ;;  %v6468_v25 = vld [vmem:[#allocation9_spill] sm:$0xff] }
 0x1dc   : > { %v2226_v22 = vadd.f32 %v3895_v9, %v6023_v4  ;;  %v2220_v52 = vpop.f32.mrb[93].mxu0 }
 0x1dd   : > { %v2221_v23 = vadd.f32 %v2220_v52, %v6011_v13  ;;  %v2737_v14 = vpop.f32.mrb[108].mxu1 }
 0x1de   : > { %v6126_v40 = vadd.f32 %v2226_v22, %v1417_v34  ;;  %v2739_v16 = vpop.f32.mrb[109].mxu1 }
 0x1df   : > { %v6128_v54 = vadd.f32 %v2221_v23, %v1416_v24  ;;  %v3898_v48 = vpop.f32.mrb[94].mxu0  ;;  %v6469_v24 = vld [vmem:[#allocation10_spill] sm:$0xff] }
 0x1e0   : > { %v2236_v43 = vadd.f32 %v3898_v48, %v6047_v58  ;;  %v2230_v4 = vpop.f32.mrb[95].mxu0 }
 0x1e1   : > { %v2231_v45 = vadd.f32 %v2230_v4, %v6035_v36  ;;  %v2742_v13 = vpop.f32.mrb[110].mxu1 }
 0x1e2   : > { %v6136_v61 = vadd.f32 %v2236_v43, %v1419_v27  ;;  %v2744_v3 = vpop.f32.mrb[111].mxu1 }
 0x1e3   : > { %v6138_v6 = vadd.f32 %v2231_v45, %v1418_v19  ;;  %v3933_v62 = vpop.f32.mrb[96].mxu0 }
 0x1e4   : > { %v2938_v41 = vadd.f32 %v3933_v62, %v6072_v17  ;;  %v2932_v51 = vpop.f32.mrb[97].mxu0 }
 0x1e5   : > { %v2747_v29 = vpop.f32.mrb[112].mxu1  ;;  %v2933_v36 = vadd.f32 %v2932_v51, %v6060_v30 }
 0x1e6   : > { %v6149_v58 = vadd.f32 %v2938_v41, %v5966_v28  ;;  %v2749_v57 = vpop.f32.mrb[113].mxu1 }
 0x1e7   : > { %v6152_v47 = vadd.f32 %v2933_v36, %v6468_v25  ;;  %v3936_v17 = vpop.f32.mrb[98].mxu0 }
 0x1e8   : > { %3124 = vst [vmem:[%s6145_s30 + $0x8] sm:$0xff] %v6149_v58  ;;  %v2948_v42 = vadd.f32 %v3936_v17, %v2722_v59  ;;  %v2942_v9 = vpop.f32.mrb[99].mxu0 }
 0x1e9   : > { %3123 = vst [vmem:[%s6145_s30] sm:$0xff] %v6152_v47  ;;  %v2752_v34 = vpop.f32.mrb[114].mxu1  ;;  %v2943_v22 = vadd.f32 %v2942_v9, %v6084_v7  ;;  %v3155_v52 = vadd.f32 %v6149_v58, %v6152_v47 }
 0x1ea   : > { %v6160_v30 = vadd.f32 %v2948_v42, %v5978_v11  ;;  %v2754_v28 = vpop.f32.mrb[115].mxu1 }
 0x1eb   : > { %v6165_v23 = vadd.f32 %v2943_v22, %v6469_v24  ;;  %v3939_v16 = vpop.f32.mrb[100].mxu0 }
 0x1ec   : > { %3126 = vst [vmem:[%s6145_s30 + $0x18] sm:$0xff] %v6160_v30  ;;  %v2958_v59 = vadd.f32 %v3939_v16, %v2732_v44  ;;  %v2952_v48 = vpop.f32.mrb[101].mxu0 }
 0x1ed   : > { %3125 = vst [vmem:[%s6145_s30 + $0x10] sm:$0xff] %v6165_v23  ;;  %v3156_v7 = vadd.f32 %v3155_v52, %v6165_v23  ;;  %v2757_v11 = vpop.f32.mrb[116].mxu1  ;;  %v2953_v37 = vadd.f32 %v2952_v48, %v2727_v35 }
 0x1ee   : > { %v6173_v27 = vadd.f32 %v2958_v59, %v5990_v20  ;;  %v2759_v43 = vpop.f32.mrb[117].mxu1 }
 0x1ef   : > { %v6176_v4 = vadd.f32 %v2953_v37, %v5992_v39  ;;  %v3157_v2 = vadd.f32 %v3156_v7, %v6160_v30  ;;  %v3942_v19 = vpop.f32.mrb[102].mxu0 }
 0x1f0   : > { %3128 = vst [vmem:[%s6145_s30 + $0x28] sm:$0xff] %v6173_v27  ;;  %v2968_v44 = vadd.f32 %v3942_v19, %v2742_v13  ;;  %v2962_v45 = vpop.f32.mrb[103].mxu0 }
 0x1f1   : > { %3127 = vst [vmem:[%s6145_s30 + $0x20] sm:$0xff] %v6176_v4  ;;  %v3158_v35 = vadd.f32 %v3157_v2, %v6176_v4  ;;  %v2762_v3 = vpop.f32.mrb[118].mxu1  ;;  %v2963_v20 = vadd.f32 %v2962_v45, %v2737_v14 }
 0x1f2   : > { %v6185_v62 = vadd.f32 %v2968_v44, %v6002_v56  ;;  %v2764_v41 = vpop.f32.mrb[119].mxu1 }
 0x1f3   : > { %v6188_v39 = vadd.f32 %v2963_v20, %v6004_v1  ;;  %v3159_v51 = vadd.f32 %v3158_v35, %v6173_v27  ;;  %v3945_v36 = vpop.f32.mrb[104].mxu0 }
 0x1f4   : > { %3130 = vst [vmem:[%s6145_s30 + $0x38] sm:$0xff] %v6185_v62  ;;  %v2978_v13 = vadd.f32 %v3945_v36, %v2752_v34  ;;  %v2972_v57 = vpop.f32.mrb[105].mxu0 }
 0x1f5   : > { %3129 = vst [vmem:[%s6145_s30 + $0x30] sm:$0xff] %v6188_v39  ;;  %v3160_v14 = vadd.f32 %v3159_v51, %v6188_v39  ;;  %v2767_v25 = vpop.f32.mrb[120].mxu1  ;;  %v2973_v56 = vadd.f32 %v2972_v57, %v2747_v29 }
 0x1f6   : > { %v6197_v17 = vadd.f32 %v2978_v13, %v6014_v46  ;;  %v2769_v42 = vpop.f32.mrb[121].mxu1 }
 0x1f7   : > { %v6200_v1 = vadd.f32 %v2973_v56, %v6016_v18  ;;  %v3161_v9 = vadd.f32 %v3160_v14, %v6185_v62  ;;  %v3948_v22 = vpop.f32.mrb[106].mxu0 }
 0x1f8   : > { %3132 = vst [vmem:[%s6145_s30 + $0x48] sm:$0xff] %v6197_v17  ;;  %v2988_v34 = vadd.f32 %v3948_v22, %v2762_v3  ;;  %v2982_v28 = vpop.f32.mrb[107].mxu0 }
 0x1f9   : > { %3131 = vst [vmem:[%s6145_s30 + $0x40] sm:$0xff] %v6200_v1  ;;  %v3162_v29 = vadd.f32 %v3161_v9, %v6200_v1  ;;  %v2772_v52 = vpop.f32.mrb[122].mxu1  ;;  %v2983_v46 = vadd.f32 %v2982_v28, %v2757_v11 }
 0x1fa   : > { %v6209_v24 = vadd.f32 %v2988_v34, %v6026_v38  ;;  %v2774_v18 = vpop.f32.mrb[123].mxu1 }
 0x1fb   : > { %v6212_v16 = vadd.f32 %v2983_v46, %v6028_v32  ;;  %v3163_v59 = vadd.f32 %v3162_v29, %v6197_v17  ;;  %v3951_v48 = vpop.f32.mrb[108].mxu0 }
 0x1fc   : > { %3134 = vst [vmem:[%s6145_s30 + $0x58] sm:$0xff] %v6209_v24  ;;  %v2998_v7 = vadd.f32 %v3951_v48, %v2772_v52  ;;  %v2992_v37 = vpop.f32.mrb[109].mxu0 }
 0x1fd   : > { %3133 = vst [vmem:[%s6145_s30 + $0x50] sm:$0xff] %v6212_v16  ;;  %v2777_v43 = vpop.f32.mrb[124].mxu1  ;;  %v2993_v11 = vadd.f32 %v2992_v37, %v2767_v25  ;;  %v3164_v38 = vadd.f32 %v3163_v59, %v6212_v16 }
 0x1fe   : > { %v6221_v2 = vadd.f32 %v2998_v7, %v6038_v26  ;;  %v2779_v32 = vpop.f32.mrb[125].mxu1 }
 0x1ff   : > { %v6224_v19 = vadd.f32 %v2993_v11, %v6040_v15  ;;  %v3954_v44 = vpop.f32.mrb[110].mxu0  ;;  %v3165_v20 = vadd.f32 %v3164_v38, %v6209_v24 }
 0x200   : > { %3136 = vst [vmem:[%s6145_s30 + $0x68] sm:$0xff] %v6221_v2  ;;  %v3002_v45 = vpop.f32.mrb[111].mxu0 }
 0x201   : > { %3135 = vst [vmem:[%s6145_s30 + $0x60] sm:$0xff] %v6224_v19  ;;  %v2782_v35 = vpop.f32.mrb[126].mxu1  ;;  %v3003_v3 = vadd.f32 %v3002_v45, %v2777_v43  ;;  %v3166_v14 = vadd.f32 %v3165_v20, %v6224_v19 }
 0x202   : > { %v3008_v41 = vadd.f32 %v3954_v44, %v2782_v35  ;;  %v2784_v51 = vpop.f32.mrb[127].mxu1 }
 0x203   : > { %v6232_v26 = vadd.f32 %v3003_v3, %v6052_v49  ;;  %v3957_v36 = vpop.f32.mrb[112].mxu0 }
 0x204   : > { %v6235_v15 = vadd.f32 %v3008_v41, %v6050_v21  ;;  %v3012_v13 = vpop.f32.mrb[113].mxu0  ;;  %v3167_v21 = vadd.f32 %v3166_v14, %v6221_v2 }
 0x205   : > { %3137 = vst [vmem:[%s6145_s30 + $0x70] sm:$0xff] %v6232_v26  ;;  %v2787_v57 = vpop.f32.mrb[128].mxu1 }
 0x206   : > { %3138 = vst [vmem:[%s6145_s30 + $0x78] sm:$0xff] %v6235_v15  ;;  %v3013_v25 = vadd.f32 %v3012_v13, %v2787_v57  ;;  %v2789_v56 = vpop.f32.mrb[129].mxu1  ;;  %v3168_v59 = vadd.f32 %v3167_v21, %v6232_v26 }
 0x207   : > { %v3960_v42 = vpop.f32.mrb[114].mxu0 }
 0x208   : > { %v6243_v9 = vadd.f32 %v3013_v25, %v6064_v10  ;;  %v3022_v49 = vpop.f32.mrb[115].mxu0  ;;  %v3169_v38 = vadd.f32 %v3168_v59, %v6235_v15 }
 0x209   : > { %v2792_v22 = vpop.f32.mrb[130].mxu1 }
 0x20a   : > { %3139 = vst [vmem:[%s6145_s30 + $0x80] sm:$0xff] %v6243_v9  ;;  %v3018_v34 = vadd.f32 %v3957_v36, %v2792_v22  ;;  %v2794_v28 = vpop.f32.mrb[131].mxu1  ;;  %v3170_v20 = vadd.f32 %v3169_v38, %v6243_v9 }
 0x20b   : > { %v3963_v29 = vpop.f32.mrb[116].mxu0 }
 0x20c   : > { %v6249_v52 = vadd.f32 %v3018_v34, %v6062_v63  ;;  %v3032_v46 = vpop.f32.mrb[117].mxu0 }
 0x20d   : > { %v2797_v18 = vpop.f32.mrb[132].mxu1 }
 0x20e   : > { %3140 = vst [vmem:[%s6145_s30 + $0x88] sm:$0xff] %v6249_v52  ;;  %v3023_v10 = vadd.f32 %v3022_v49, %v2797_v18  ;;  %v2799_v48 = vpop.f32.mrb[133].mxu1  ;;  %v3171_v36 = vadd.f32 %v3170_v20, %v6249_v52 }
 0x20f   : > { %v3966_v7 = vpop.f32.mrb[118].mxu0 }
 0x210   : > { %v6255_v37 = vadd.f32 %v3023_v10, %v6076_v50  ;;  %v3042_v43 = vpop.f32.mrb[119].mxu0 }
 0x211   : > { %v2802_v11 = vpop.f32.mrb[134].mxu1 }
 0x212   : > { %3141 = vst [vmem:[%s6145_s30 + $0x90] sm:$0xff] %v6255_v37  ;;  %v3028_v63 = vadd.f32 %v3960_v42, %v2802_v11  ;;  %v2804_v32 = vpop.f32.mrb[135].mxu1 }
 0x213   : > { %v3969_v44 = vpop.f32.mrb[120].mxu0 }
 0x214   : > { %v6261_v45 = vadd.f32 %v3028_v63, %v6074_v60  ;;  %v3052_v35 = vpop.f32.mrb[121].mxu0  ;;  %v3172_v60 = vadd.f32 %v3171_v36, %v6255_v37 }
 0x215   : > { %v2807_v3 = vpop.f32.mrb[136].mxu1 }
 0x216   : > { %3142 = vst [vmem:[%s6145_s30 + $0x98] sm:$0xff] %v6261_v45  ;;  %v3033_v50 = vadd.f32 %v3032_v46, %v2807_v3  ;;  %v2809_v41 = vpop.f32.mrb[137].mxu1  ;;  %v3173_v49 = vadd.f32 %v3172_v60, %v6261_v45 }
 0x217   : > { %v3972_v51 = vpop.f32.mrb[122].mxu0 }
 0x218   : > { %v6268_v13 = vadd.f32 %v3033_v50, %v6088_v31  ;;  %v3062_v57 = vpop.f32.mrb[123].mxu0 }
 0x219   : > { %v2812_v14 = vpop.f32.mrb[138].mxu1 }
 0x21a   : > { %3143 = vst [vmem:[%s6145_s30 + $0xa0] sm:$0xff] %v6268_v13  ;;  %v3038_v25 = vadd.f32 %v3963_v29, %v2812_v14  ;;  %v2814_v56 = vpop.f32.mrb[139].mxu1  ;;  %v3174_v31 = vadd.f32 %v3173_v49, %v6268_v13 }
 0x21b   : > { %v3975_v42 = vpop.f32.mrb[124].mxu0 }
 0x21c   : > { %v6275_v22 = vadd.f32 %v3038_v25, %v6086_v33  ;;  %v3072_v21 = vpop.f32.mrb[125].mxu0 }
 0x21d   : > { %v2817_v34 = vpop.f32.mrb[140].mxu1 }
 0x21e   : > { %3144 = vst [vmem:[%s6145_s30 + $0xa8] sm:$0xff] %v6275_v22  ;;  %v3043_v28 = vadd.f32 %v3042_v43, %v2817_v34  ;;  %v2819_v46 = vpop.f32.mrb[141].mxu1  ;;  %v3175_v29 = vadd.f32 %v3174_v31, %v6275_v22 }
 0x21f   : > { %v3978_v18 = vpop.f32.mrb[126].mxu0 }
 0x220   : > { %v6282_v59 = vadd.f32 %v3043_v28, %v6098_v55  ;;  %v3082_v10 = vpop.f32.mrb[127].mxu0 }
 0x221   : > { %v2822_v48 = vpop.f32.mrb[142].mxu1 }
 0x222   : > { %3145 = vst [vmem:[%s6145_s30 + $0xb0] sm:$0xff] %v6282_v59  ;;  %v3176_v33 = vadd.f32 %v3175_v29, %v6282_v59  ;;  %v3048_v11 = vadd.f32 %v3966_v7, %v2822_v48  ;;  %v2824_v38 = vpop.f32.mrb[143].mxu1 }
 0x224   : > { %v6288_v63 = vadd.f32 %v3048_v11, %v6096_v12 }
 0x225   : > { %v2827_v43 = vpop.f32.mrb[144].mxu1 }
 0x226   : > { %3146 = vst [vmem:[%s6145_s30 + $0xb8] sm:$0xff] %v6288_v63  ;;  %v3177_v32 = vadd.f32 %v3176_v33, %v6288_v63  ;;  %v3053_v3 = vadd.f32 %v3052_v35, %v2827_v43  ;;  %v2829_v55 = vpop.f32.mrb[145].mxu1 }
 0x228   : > { %v6294_v20 = vadd.f32 %v3053_v3, %v6108_v5 }
 0x229   : > { %v2832_v50 = vpop.f32.mrb[146].mxu1 }
 0x22a   : > { %3147 = vst [vmem:[%s6145_s30 + $0xc0] sm:$0xff] %v6294_v20  ;;  %v3178_v7 = vadd.f32 %v3177_v32, %v6294_v20  ;;  %v3058_v41 = vadd.f32 %v3969_v44, %v2832_v50  ;;  %v2834_v12 = vpop.f32.mrb[147].mxu1 }
 0x22c   : > { %v6300_v36 = vadd.f32 %v3058_v41, %v6106_v53 }
 0x22d   : > { %v2837_v14 = vpop.f32.mrb[148].mxu1 }
 0x22e   : > { %3148 = vst [vmem:[%s6145_s30 + $0xc8] sm:$0xff] %v6300_v36  ;;  %v3179_v35 = vadd.f32 %v3178_v7, %v6300_v36  ;;  %v3063_v60 = vadd.f32 %v3062_v57, %v2837_v14  ;;  %v2839_v5 = vpop.f32.mrb[149].mxu1 }
 0x230   : > { %v6306_v25 = vadd.f32 %v3063_v60, %v6118_v0 }
 0x231   : > { %v2842_v56 = vpop.f32.mrb[150].mxu1 }
 0x232   : > { %3149 = vst [vmem:[%s6145_s30 + $0xd0] sm:$0xff] %v6306_v25  ;;  %v3180_v44 = vadd.f32 %v3179_v35, %v6306_v25  ;;  %v3068_v49 = vadd.f32 %v3972_v51, %v2842_v56  ;;  %v2844_v53 = vpop.f32.mrb[151].mxu1 }
 0x234   : > { %v6312_v34 = vadd.f32 %v3068_v49, %v6116_v8 }
 0x235   : > { %v2847_v31 = vpop.f32.mrb[152].mxu1 }
 0x236   : > { %3150 = vst [vmem:[%s6145_s30 + $0xd8] sm:$0xff] %v6312_v34  ;;  %v3181_v57 = vadd.f32 %v3180_v44, %v6312_v34  ;;  %v3073_v28 = vadd.f32 %v3072_v21, %v2847_v31  ;;  %v2849_v0 = vpop.f32.mrb[153].mxu1 }
 0x238   : > { %v6318_v46 = vadd.f32 %v3073_v28, %v6128_v54 }
 0x239   : > { %v2852_v29 = vpop.f32.mrb[154].mxu1 }
 0x23a   : > { %3151 = vst [vmem:[%s6145_s30 + $0xe0] sm:$0xff] %v6318_v46  ;;  %v3182_v51 = vadd.f32 %v3181_v57, %v6318_v46  ;;  %v3078_v48 = vadd.f32 %v3975_v42, %v2852_v29  ;;  %v2854_v8 = vpop.f32.mrb[155].mxu1 }
 0x23c   : > { %v6324_v33 = vadd.f32 %v3078_v48, %v6126_v40 }
 0x23d   : > { %v2857_v11 = vpop.f32.mrb[156].mxu1 }
 0x23e   : > { %3152 = vst [vmem:[%s6145_s30 + $0xe8] sm:$0xff] %v6324_v33  ;;  %v3183_v21 = vadd.f32 %v3182_v51, %v6324_v33  ;;  %v3083_v38 = vadd.f32 %v3082_v10, %v2857_v11  ;;  %v2859_v43 = vpop.f32.mrb[157].mxu1 }
 0x240   : > { %v6330_v54 = vadd.f32 %v3083_v38, %v6138_v6 }
 0x241   : > { %v2862_v32 = vpop.f32.mrb[158].mxu1 }
 0x242   : > { %3153 = vst [vmem:[%s6145_s30 + $0xf0] sm:$0xff] %v6330_v54  ;;  %v3184_v3 = vadd.f32 %v3183_v21, %v6330_v54  ;;  %v3088_v42 = vadd.f32 %v3978_v18, %v2862_v32  ;;  %v2864_v55 = vpop.f32.mrb[159].mxu1 }
 0x244   : > { %v6336_v40 = vadd.f32 %v3088_v42, %v6136_v61 }
 0x246   : > { %3154 = vst [vmem:[%s6145_s30 + $0xf8] sm:$0xff] %v6336_v40  ;;  %v3185_v50 = vadd.f32 %v3184_v3, %v6336_v40 }
 0x248   : > { %v3186_v7 = vrot.slane %v3185_v50, 4 }
 0x24a   : > { %v3187_v10 = vadd.f32 %v3186_v7, %v3185_v50 }
 0x24c   : > { %v3188_v41 = vrot.slane %v3187_v10, 2 }
 0x24e   : > { %v3189_v12 = vadd.f32 %v3188_v41, %v3187_v10 }
 0x250   : > { %v3190_v6 = vrot.slane %v3189_v12, 1 }
 0x252   : > { %v3191_v14 = vadd.f32 %v3190_v6, %v3189_v12 }
 0x254   : > { %v6341_v35 = vmul.f32 0.00390625, %v3191_v14 }
 0x256   : > { %v3193_v60 = vsub.f32 %v6152_v47, %v6341_v35  ;;  %v3194_v18 = vsub.f32 %v6149_v58, %v6341_v35  ;;  %v3195_v61 = vsub.f32 %v6165_v23, %v6341_v35  ;;  %v3196_v44 = vsub.f32 %v6160_v30, %v6341_v35 }
 0x257   : > { %v3197_v49 = vsub.f32 %v6176_v4, %v6341_v35  ;;  %v3198_v57 = vsub.f32 %v6173_v27, %v6341_v35  ;;  %v3199_v58 = vsub.f32 %v6188_v39, %v6341_v35  ;;  %v3200_v29 = vsub.f32 %v6185_v62, %v6341_v35 }
 0x258   : > { %v3225_v5 = vmul.f32 %v3193_v60, %v3193_v60  ;;  %v3226_v56 = vmul.f32 %v3194_v18, %v3194_v18  ;;  %v3227_v53 = vmul.f32 %v3195_v61, %v3195_v61  ;;  %v3228_v47 = vmul.f32 %v3196_v44, %v3196_v44 }
 0x259   : > { %v3229_v0 = vmul.f32 %v3197_v49, %v3197_v49  ;;  %v3230_v51 = vmul.f32 %v3198_v57, %v3198_v57  ;;  %v3201_v4 = vsub.f32 %v6200_v1, %v6341_v35  ;;  %v3231_v48 = vmul.f32 %v3199_v58, %v3199_v58 }
 0x25a   : > { %v3257_v31 = vadd.f32 %v3226_v56, %v3225_v5  ;;  %v3202_v27 = vsub.f32 %v6197_v17, %v6341_v35  ;;  %v3232_v11 = vmul.f32 %v3200_v29, %v3200_v29  ;;  %v3203_v39 = vsub.f32 %v6212_v16, %v6341_v35 }
 0x25b   : > { %v3233_v38 = vmul.f32 %v3201_v4, %v3201_v4  ;;  %v3204_v62 = vsub.f32 %v6209_v24, %v6341_v35  ;;  %v3205_v1 = vsub.f32 %v6224_v19, %v6341_v35  ;;  %v3206_v17 = vsub.f32 %v6221_v2, %v6341_v35 }
 0x25c   : > { %v3258_v28 = vadd.f32 %v3257_v31, %v3227_v53  ;;  %v3234_v32 = vmul.f32 %v3202_v27, %v3202_v27  ;;  %v3235_v42 = vmul.f32 %v3203_v39, %v3203_v39  ;;  %v3207_v16 = vsub.f32 %v6232_v26, %v6341_v35 }
 0x25d   : > { %v3236_v50 = vmul.f32 %v3204_v62, %v3204_v62  ;;  %v3237_v10 = vmul.f32 %v3205_v1, %v3205_v1  ;;  %v3208_v24 = vsub.f32 %v6235_v15, %v6341_v35  ;;  %v3238_v12 = vmul.f32 %v3206_v17, %v3206_v17 }
 0x25e   : > { %v3259_v23 = vadd.f32 %v3258_v28, %v3228_v47  ;;  %v3209_v19 = vsub.f32 %v6243_v9, %v6341_v35  ;;  %v3239_v14 = vmul.f32 %v3207_v16, %v3207_v16  ;;  %v3210_v2 = vsub.f32 %v6249_v52, %v6341_v35 }
 0x25f   : > { %v3240_v18 = vmul.f32 %v3208_v24, %v3208_v24  ;;  %v3211_v26 = vsub.f32 %v6255_v37, %v6341_v35  ;;  %v3212_v15 = vsub.f32 %v6261_v45, %v6341_v35  ;;  %v3213_v9 = vsub.f32 %v6268_v13, %v6341_v35 }
 0x260   : > { %v3260_v30 = vadd.f32 %v3259_v23, %v3229_v0  ;;  %v3241_v5 = vmul.f32 %v3209_v19, %v3209_v19  ;;  %v3242_v44 = vmul.f32 %v3210_v2, %v3210_v2  ;;  %v3214_v52 = vsub.f32 %v6275_v22, %v6341_v35 }
 0x261   : > { %v3243_v53 = vmul.f32 %v3211_v26, %v3211_v26  ;;  %v3244_v57 = vmul.f32 %v3212_v15, %v3212_v15  ;;  %v3215_v37 = vsub.f32 %v6282_v59, %v6341_v35  ;;  %v3245_v28 = vmul.f32 %v3213_v9, %v3213_v9 }
 0x262   : > { %v3261_v8 = vadd.f32 %v3260_v30, %v3230_v51  ;;  %v3216_v45 = vsub.f32 %v6288_v63, %v6341_v35  ;;  %v3246_v0 = vmul.f32 %v3214_v52, %v3214_v52  ;;  %v3217_v13 = vsub.f32 %v6294_v20, %v6341_v35 }
 0x263   : > { %v3247_v29 = vmul.f32 %v3215_v37, %v3215_v37  ;;  %v3218_v22 = vsub.f32 %v6300_v36, %v6341_v35  ;;  %v3219_v59 = vsub.f32 %v6306_v25, %v6341_v35  ;;  %v3220_v63 = vsub.f32 %v6312_v34, %v6341_v35 }
 0x264   : > { %v3262_v21 = vadd.f32 %v3261_v8, %v3231_v48  ;;  %v3248_v30 = vmul.f32 %v3216_v45, %v3216_v45  ;;  %v3249_v48 = vmul.f32 %v3217_v13, %v3217_v13  ;;  %v3221_v20 = vsub.f32 %v6318_v46, %v6341_v35 }
 0x265   : > { %v3250_v27 = vmul.f32 %v3218_v22, %v3218_v22  ;;  %v3222_v36 = vsub.f32 %v6324_v33, %v6341_v35  ;;  %v3223_v25 = vsub.f32 %v6330_v54, %v6341_v35  ;;  %v3224_v34 = vsub.f32 %v6336_v40, %v6341_v35 }
 0x266   : > { %v3263_v43 = vadd.f32 %v3262_v21, %v3232_v11  ;;  %v3251_v21 = vmul.f32 %v3219_v59, %v3219_v59  ;;  %v3253_v62 = vmul.f32 %v3221_v20, %v3221_v20 }
 0x268   : > { %v3264_v3 = vadd.f32 %v3263_v43, %v3233_v38  ;;  %v3252_v38 = vmul.f32 %v3220_v63, %v3220_v63 }
 0x26a   : > { %v3265_v55 = vadd.f32 %v3264_v3, %v3234_v32  ;;  %v3254_v3 = vmul.f32 %v3222_v36, %v3222_v36 }
 0x26c   : > { %v3266_v7 = vadd.f32 %v3265_v55, %v3235_v42  ;;  %v3255_v42 = vmul.f32 %v3223_v25, %v3223_v25  ;;  %v3256_v55 = vmul.f32 %v3224_v34, %v3224_v34 }
 0x26e   : > { %v3267_v41 = vadd.f32 %v3266_v7, %v3236_v50 }
 0x270   : > { %v3268_v6 = vadd.f32 %v3267_v41, %v3237_v10 }
 0x272   : > { %v3269_v60 = vadd.f32 %v3268_v6, %v3238_v12 }
 0x274   : > { %v3270_v61 = vadd.f32 %v3269_v60, %v3239_v14 }
 0x276   : > { %v3271_v56 = vadd.f32 %v3270_v61, %v3240_v18 }
 0x278   : > { %v3272_v49 = vadd.f32 %v3271_v56, %v3241_v5 }
 0x27a   : > { %v3273_v31 = vadd.f32 %v3272_v49, %v3242_v44 }
 0x27c   : > { %v3274_v47 = vadd.f32 %v3273_v31, %v3243_v53 }
 0x27e   : > { %v3275_v58 = vadd.f32 %v3274_v47, %v3244_v57 }
 0x280   : > { %v3276_v23 = vadd.f32 %v3275_v58, %v3245_v28 }
 0x282   : > { %v3277_v51 = vadd.f32 %v3276_v23, %v3246_v0 }
 0x284   : > { %v3278_v4 = vadd.f32 %v3277_v51, %v3247_v29 }
 0x286   : > { %v3279_v8 = vadd.f32 %v3278_v4, %v3248_v30 }
 0x288   : > { %v3280_v11 = vadd.f32 %v3279_v8, %v3249_v48 }
 0x28a   : > { %v3281_v39 = vadd.f32 %v3280_v11, %v3250_v27 }
 0x28c   : > { %v3282_v43 = vadd.f32 %v3281_v39, %v3251_v21 }
 0x28e   : > { %v3283_v32 = vadd.f32 %v3282_v43, %v3252_v38 }
 0x290   : > { %v3284_v1 = vadd.f32 %v3283_v32, %v3253_v62 }
 0x292   : > { %v3285_v46 = vadd.f32 %v3284_v1, %v3254_v3 }
 0x294   : > { %v3286_v17 = vadd.f32 %v3285_v46, %v3255_v42 }
 0x296   : > { %v3287_v50 = vadd.f32 %v3286_v17, %v3256_v55 }
 0x298   : > { %v3288_v7 = vrot.slane %v3287_v50, 4 }
 0x29a   : > { %v3289_v33 = vadd.f32 %v3288_v7, %v3287_v50 }
 0x29c   : > { %v3290_v16 = vrot.slane %v3289_v33, 2 }
 0x29e   : > { %v3291_v10 = vadd.f32 %v3290_v16, %v3289_v33 }
 0x2a0   : > { %v3292_v41 = vrot.slane %v3291_v10, 1 }
 0x2a2   : > { %v3293_v54 = vadd.f32 %v3292_v41, %v3291_v10 }
 0x2a4   : > { %v3295_v40 = vsel %vm3294_vm2, %v6341_v35, %v3293_v54 }
 0x2a5   : > { %3296 = vst [vmem:[%s438_s9] sm:$0x3] %v3295_v40 }
 0x2a6 PF: > { %s17_s23 = sadd.s32 1, %s4297_s23   ;;  %s6470_s21 = smov %s4293_s22 }
 0x2a7   : > { %p14_p5 = scmp.ge.s32.totalorder %s17_s23, 4   ;;  %s6471_s22 = smov %s6473_s24 }
 0x2a9   :  { %16 = sbr.rel (!%p14_p5) target bundleno = 2 (0x2), region = 93 }

// kernel: recurrent_block_forward.5
= control target key start
LH: loop header
LB: loop body
LE: loop exit
PB: predicated region body
PF: predicated region fallthrough
CT: control target
= control target key end

     0   :  { %s4931_s17 = smov 0   ;;  %s4933_s18 = smov 0   ;;  %s7329_s0 = inlined_call_operand.vmem [shape: f32[2,16,16,128], index: 0, kind: input, shape index: {}, may-alias: {0,1,2}]   ;;  %s7330_s1 = inlined_call_operand.vmem [shape: f32[2,16,16,128], index: 1, kind: input, shape index: {}, may-alias: {0,1,2}]   ;;  %s7331_s2 = inlined_call_operand.vmem [shape: f32[2,16,16,128], index: 2, kind: input, shape index: {}, may-alias: {0,1,2}]   ;;  %s7332_s3 = inlined_call_operand.vmem [shape: f32[2,16,16,128], index: 3, kind: input, shape index: {}, may-alias: {3,4,5}]   ;;  %s7333_s4 = inlined_call_operand.vmem [shape: f32[2,16,16,128], index: 4, kind: input, shape index: {}, may-alias: {3,4,5}]   ;;  %s7334_s5 = inlined_call_operand.vmem [shape: f32[2,16,16,128], index: 5, kind: input, shape index: {}, may-alias: {3,4,5}]   ;;  %s7335_s6 = inlined_call_operand.vmem [shape: f32[1,128], index: 6, kind: input, shape index: {}]   ;;  %s7336_s7 = inlined_call_operand.vmem [shape: f32[1,128], index: 7, kind: input, shape index: {}]   ;;  %s7337_s8 = inlined_call_operand.vmem [shape: f32[3,384,128], index: 8, kind: input, shape index: {}]   ;;  %s7338_s9 = inlined_call_operand.vmem [shape: f32[1,128], index: 9, kind: input, shape index: {}]   ;;  %s7339_s10 = inlined_call_operand.vmem [shape: f32[2,16,16,128], index: 10, kind: output, shape index: {0}]   ;;  %s7340_s11 = inlined_call_operand.vmem [shape: f32[2,1,2,128], index: 11, kind: output, shape index: {1}]  }
   0x1   :  { %s4935_s19 = smov 0  }
   0x2 LB: > { %s34_s20 = sadd.s32 1, %s4863_s18  ;;  %p4035_p0 = scmp.ge.s32.totalorder %s4867_s19, 1  ;;  %s4867_s19 = sphi %s4935_s19, %s22_s19   ;;  %s4863_s18 = sphi %s4933_s18, %s7369_s18   ;;  %s4859_s17 = sphi %s4931_s17, %s7368_s17  }
   0x3   : > { %p36_p1 = scmp.ge.s32.totalorder %s34_s20, 2  ;;  %p510_p2 = scmp.lt.s32.totalorder %s4867_s19, 3 }
   0x5   : > { %s7371_s20 = smov (%p36_p1, %s34_s20), 0  ;;  %p511_p3 = pnand %p4035_p0, %p510_p2 }
   0x7   : > { %514 = sbr.rel (%p511_p3) target bundleno = 679 (0x2a7), region = 60 }
   0xe   : > { %v1382_v0 = vld [vmem:[%s7337_s8] sm:$0xff]  ;;  %v1383_v1 = vld [vmem:[%s7337_s8 + $0x8] sm:$0xff]  ;;  %p630_p4 = scmp.lt.s32.totalorder %s4859_s17, 1  ;;  %v7341_v3 = vmov 0.0|0.0   ;;  %v1384_v6 = vld [vmem:[%s7337_s8 + $0x10] sm:$0xff]  ;;  %v4870_v8 = vmov 0.0  }
   0xf   : > { %v1414_v2 = vld [vmem:[%s7337_s8 + $0x100] sm:$0xff]  ;;  %4547 = vmatprep.subr.bf16.mxu0 %v7341_v3  ;;  %v4548_v4 = vpack.c.bf16 %v1383_v1, %v1382_v0  ;;  %v1415_v5 = vld [vmem:[%s7337_s8 + $0x108] sm:$0xff]  ;;  %v1385_v7 = vld [vmem:[%s7337_s8 + $0x18] sm:$0xff]  ;;  %1017 = vst [vmem:[#allocation2] sm:$0x1] %v4870_v8  ;;  %vm1269_vm0 = vcmask 1045504  }
  0x10   : > { %1018 = vst [vmem:[#allocation2 + $0x18] sm:$0x1] %v4870_v8  ;;  %1019 = vst [vmem:[#allocation2 + $0x30] sm:$0x1] %v4870_v8  ;;  %v4595_v9 = vpack.c.bf16 %v1415_v5, %v1414_v2  ;;  %v1416_v10 = vld [vmem:[%s7337_s8 + $0x110] sm:$0xff]  ;;  %v1417_v11 = vld [vmem:[%s7337_s8 + $0x118] sm:$0xff]  ;;  %v4551_v12 = vpack.c.bf16 %v1385_v7, %v1384_v6 }
  0x11   : > { %1020 = vst [vmem:[#allocation2 + $0x48] sm:$0x1] %v4870_v8  ;;  %1021 = vst [vmem:[#allocation2 + $0x60] sm:$0x1] %v4870_v8  ;;  %s7373_s17 = smov (!%p630_p4, %s4859_s17), 1  ;;  %4549 = vmatpush1.bf16.msra.mxu0 %v4548_v4  ;;  %v4599_v13 = vpack.c.bf16 %v1417_v11, %v1416_v10  ;;  %v1418_v14 = vld [vmem:[%s7337_s8 + $0x120] sm:$0xff] }
  0x12   : > { %1022 = vst [vmem:[#allocation2 + $0x78] sm:$0x1] %v4870_v8  ;;  %1023 = vst [vmem:[#allocation2 + $0x90] sm:$0x1] %v4870_v8  ;;  %v1419_v15 = vld [vmem:[%s7337_s8 + $0x128] sm:$0xff]  ;;  %4596 = vmatprep.subr.bf16.mxu1 %v4595_v9  ;;  %4550 = vmatprep.subr.bf16.mxu0 %v7341_v3  ;;  %v1386_v16 = vld [vmem:[%s7337_s8 + $0x20] sm:$0xff] }
  0x13   : > { %1024 = vst [vmem:[#allocation2 + $0xa8] sm:$0x1] %v4870_v8  ;;  %1025 = vst [vmem:[#allocation2 + $0xc0] sm:$0x1] %v4870_v8  ;;  %v1387_v17 = vld [vmem:[%s7337_s8 + $0x28] sm:$0xff]  ;;  %4598 = vmatpush3.bf16.msra.mxu1 %v4595_v9  ;;  %v4603_v18 = vpack.c.bf16 %v1419_v15, %v1418_v14  ;;  %s4996_s30 = sshll.u32 %s7373_s17, 8 }
  0x14   : > { %1026 = vst [vmem:[#allocation2 + $0xd8] sm:$0x1] %v4870_v8  ;;  %1027 = vst [vmem:[#allocation2 + $0xf0] sm:$0x1] %v4870_v8  ;;  %4600 = vmatprep.subr.bf16.mxu1 %v4599_v13  ;;  %v4554_v19 = vpack.c.bf16 %v1387_v17, %v1386_v16  ;;  %v1420_v20 = vld [vmem:[%s7337_s8 + $0x130] sm:$0xff]  ;;  %v1421_v21 = vld [vmem:[%s7337_s8 + $0x138] sm:$0xff]  ;;  %s652_s26 = scalar_lea.vmem %s7330_s1, %s4996_s30  ;;  %s5036_s25 = scalar_lea.vmem %s7329_s0, %s4996_s30 }
  0x15   : > { %1028 = vst [vmem:[#allocation2 + $0x108] sm:$0x1] %v4870_v8  ;;  %1029 = vst [vmem:[#allocation2 + $0x120] sm:$0x1] %v4870_v8  ;;  %4552 = vmatpush1.bf16.msra.mxu0 %v4551_v12  ;;  %v1388_v22 = vld [vmem:[%s7337_s8 + $0x30] sm:$0xff]  ;;  %v1389_v23 = vld [vmem:[%s7337_s8 + $0x38] sm:$0xff]  ;;  %v4607_v24 = vpack.c.bf16 %v1421_v21, %v1420_v20  ;;  %s697_s13 = scalar_lea.vmem %s7333_s4, %s4996_s30  ;;  %s5067_s29 = scalar_lea.vmem %s7332_s3, %s4996_s30 }
  0x16   : > { %1030 = vst [vmem:[#allocation2 + $0x138] sm:$0x1] %v4870_v8  ;;  %1031 = vst [vmem:[#allocation2 + $0x150] sm:$0x1] %v4870_v8  ;;  %4553 = vmatprep.subr.bf16.mxu0 %v7341_v3  ;;  %v1390_v25 = vld [vmem:[%s7337_s8 + $0x40] sm:$0xff]  ;;  %v4557_v27 = vpack.c.bf16 %v1389_v23, %v1388_v22  ;;  %v1391_v28 = vld [vmem:[%s7337_s8 + $0x48] sm:$0xff] }
  0x17   : > { %1032 = vst [vmem:[#allocation2 + $0x168] sm:$0x1] %v4870_v8  ;;  %1033 = vst [vmem:[#allocation2 + $0x180] sm:$0x1] %v4870_v8  ;;  %4602 = vmatpush3.bf16.msra.mxu1 %v4599_v13  ;;  %v5021_v26 = vld [vmem:[%s7335_s6] ss:$0 sm:$0xff]  ;;  %v4560_v40 = vpack.c.bf16 %v1391_v28, %v1390_v25 }
  0x18   : > { %1034 = vst [vmem:[#allocation2 + $0x198] sm:$0x1] %v4870_v8  ;;  %1035 = vst [vmem:[#allocation2 + $0x11] sm:$0x1] %v4870_v8  ;;  %4604 = vmatprep.subr.bf16.mxu1 %v4603_v18  ;;  %v1422_v29 = vld [vmem:[%s7337_s8 + $0x140] sm:$0xff]  ;;  %v1423_v30 = vld [vmem:[%s7337_s8 + $0x148] sm:$0xff] }
  0x19   : > { %1036 = vst [vmem:[#allocation2 + $0x29] sm:$0x1] %v4870_v8  ;;  %1037 = vst [vmem:[#allocation2 + $0x41] sm:$0x1] %v4870_v8  ;;  %4555 = vmatpush1.bf16.msra.mxu0 %v4554_v19  ;;  %v5042_v31 = vld [vmem:[%s7336_s7] ss:$0 sm:$0xff]  ;;  %v4611_v36 = vpack.c.bf16 %v1423_v30, %v1422_v29 }
  0x1a   : > { %1038 = vst [vmem:[#allocation2 + $0x59] sm:$0x1] %v4870_v8  ;;  %1039 = vst [vmem:[#allocation2 + $0x71] sm:$0x1] %v4870_v8  ;;  %4556 = vmatprep.subr.bf16.mxu0 %v7341_v3  ;;  %v945_v32 = vld [vmem:[%s652_s26] sm:$0xff]  ;;  %v946_v33 = vld [vmem:[%s652_s26 + $0x8] sm:$0xff] }
  0x1b   : > { %1040 = vst [vmem:[#allocation2 + $0x89] sm:$0x1] %v4870_v8  ;;  %1041 = vst [vmem:[#allocation2 + $0xa1] sm:$0x1] %v4870_v8  ;;  %4606 = vmatpush3.bf16.msra.mxu1 %v4603_v18  ;;  %v947_v34 = vmul.f32 %v5021_v26, %v945_v32  ;;  %v948_v35 = vmul.f32 %v5021_v26, %v946_v33  ;;  %v1392_v37 = vld [vmem:[%s7337_s8 + $0x50] sm:$0xff]  ;;  %v1393_v38 = vld [vmem:[%s7337_s8 + $0x58] sm:$0xff] }
  0x1c   : > { %1042 = vst [vmem:[#allocation2 + $0xb9] sm:$0x1] %v4870_v8  ;;  %1043 = vst [vmem:[#allocation2 + $0xd1] sm:$0x1] %v4870_v8  ;;  %4608 = vmatprep.subr.bf16.mxu1 %v4607_v24  ;;  %v771_v39 = vld [vmem:[%s5036_s25] sm:$0xff]  ;;  %v1424_v41 = vld [vmem:[%s7337_s8 + $0x150] sm:$0xff]  ;;  %v4563_v62 = vpack.c.bf16 %v1393_v38, %v1392_v37 }
  0x1d   : > { %1044 = vst [vmem:[#allocation2 + $0xe9] sm:$0x1] %v4870_v8  ;;  %1045 = vst [vmem:[#allocation2 + $0x101] sm:$0x1] %v4870_v8  ;;  %4558 = vmatpush1.bf16.msra.mxu0 %v4557_v27  ;;  %v1425_v42 = vld [vmem:[%s7337_s8 + $0x158] sm:$0xff]  ;;  %v949_v43 = vadd.f32 %v5042_v31, %v947_v34  ;;  %v950_v44 = vadd.f32 %v5042_v31, %v948_v35  ;;  %v772_v45 = vld [vmem:[%s5036_s25 + $0x8] sm:$0xff]  ;;  %v809_v46 = vmul.f32 %v5021_v26, %v771_v39 }
  0x1e   : > { %1046 = vst [vmem:[#allocation2 + $0x119] sm:$0x1] %v4870_v8  ;;  %1047 = vst [vmem:[#allocation2 + $0x131] sm:$0x1] %v4870_v8  ;;  %4559 = vmatprep.subr.bf16.mxu0 %v7341_v3  ;;  %v1426_v47 = vld [vmem:[%s7337_s8 + $0x160] sm:$0xff]  ;;  %v944_v49 = vld [vmem:[%s697_s13 + $0x8] sm:$0xff]  ;;  %v810_v50 = vmul.f32 %v5021_v26, %v772_v45  ;;  %v4615_v57 = vpack.c.bf16 %v1425_v42, %v1424_v41 }
  0x1f   : > { %1048 = vst [vmem:[#allocation2 + $0x149] sm:$0x1] %v4870_v8  ;;  %1049 = vst [vmem:[#allocation2 + $0x161] sm:$0x1] %v4870_v8  ;;  %v943_v48 = vld [vmem:[%s697_s13] sm:$0xff]  ;;  %4610 = vmatpush3.bf16.msra.mxu1 %v4607_v24  ;;  %v1427_v51 = vld [vmem:[%s7337_s8 + $0x168] sm:$0xff]  ;;  %v847_v54 = vadd.f32 %v5042_v31, %v809_v46 }
  0x20   : > { %1050 = vst [vmem:[#allocation2 + $0x179] sm:$0x1] %v4870_v8  ;;  %1051 = vst [vmem:[#allocation2 + $0x191] sm:$0x1] %v4870_v8  ;;  %v951_v52 = vmax.f32 %v949_v43, 0.0  ;;  %v952_v53 = vmax.f32 %v950_v44, 0.0  ;;  %4612 = vmatprep.subr.bf16.mxu1 %v4611_v36  ;;  %v848_v59 = vadd.f32 %v5042_v31, %v810_v50  ;;  %v5096_v6 = vpack.c.bf16 %v1427_v51, %v1426_v47 }
  0x21   : > { %1052 = vst [vmem:[#allocation2 + $0x1a9] sm:$0x1] %v4870_v8  ;;  %v773_v55 = vld [vmem:[%s5036_s25 + $0x10] sm:$0xff]  ;;  %v774_v56 = vld [vmem:[%s5036_s25 + $0x18] sm:$0xff]  ;;  %v739_v58 = vld [vmem:[%s5067_s29] sm:$0xff]  ;;  %4561 = vmatpush1.bf16.msra.mxu0 %v4560_v40  ;;  %v879_v4 = vmax.f32 %v847_v54, 0.0 }
  0x22   : > { %v811_v60 = vmul.f32 %v5021_v26, %v773_v55  ;;  %v812_v61 = vmul.f32 %v5021_v26, %v774_v56  ;;  %v1394_v63 = vld [vmem:[%s7337_s8 + $0x60] sm:$0xff]  ;;  %v953_v0 = vadd.f32 %v951_v52, %v943_v48  ;;  %v954_v1 = vadd.f32 %v952_v53, %v944_v49  ;;  %v740_v2 = vld [vmem:[%s5067_s29 + $0x8] sm:$0xff]  ;;  %4562 = vmatprep.subr.bf16.mxu0 %v7341_v3  ;;  %v741_v15 = vld [vmem:[%s5067_s29 + $0x10] sm:$0xff]  ;;  %s4155_s28 = sadd.s32 240, %s4996_s30 }
  0x23   : > { %v1395_v5 = vld [vmem:[%s7337_s8 + $0x68] sm:$0xff]  ;;  %v880_v7 = vmax.f32 %v848_v59, 0.0  ;;  %v775_v10 = vld [vmem:[%s5036_s25 + $0x20] sm:$0xff]  ;;  %4614 = vmatpush3.bf16.msra.mxu1 %v4611_v36  ;;  %v911_v14 = vadd.f32 %v879_v4, %v739_v58  ;;  %v742_v16 = vld [vmem:[%s5067_s29 + $0x18] sm:$0xff]  ;;  %vm1156_vm1 = vcmask 1046528   ;;  %s669_s15 = scalar_lea.vmem %s7331_s2, %s4155_s28  ;;  %s714_s12 = scalar_lea.vmem %s7334_s5, %s4155_s28  ;;  %vm3786_vm2 = vcmask 1040384  }
  0x24   : > { %v849_v8 = vadd.f32 %v5042_v31, %v811_v60  ;;  %v850_v9 = vadd.f32 %v5042_v31, %v812_v61  ;;  %v776_v11 = vld [vmem:[%s5036_s25 + $0x28] sm:$0xff]  ;;  %v971_v12 = vmul.f32 0.0, %v953_v0  ;;  %v972_v13 = vmul.f32 0.0, %v954_v1  ;;  %4616 = vmatprep.subr.bf16.mxu1 %v4615_v57  ;;  %v1428_v18 = vld [vmem:[%s7337_s8 + $0x170] sm:$0xff]  ;;  %v1429_v19 = vld [vmem:[%s7337_s8 + $0x178] sm:$0xff] }
  0x25   : > { %v813_v17 = vmul.f32 %v5021_v26, %v775_v10  ;;  %v912_v20 = vadd.f32 %v880_v7, %v740_v2  ;;  %v814_v23 = vmul.f32 %v5021_v26, %v776_v11  ;;  %v777_v24 = vld [vmem:[%s5036_s25 + $0x30] sm:$0xff]  ;;  %4564 = vmatpush1.bf16.msra.mxu0 %v4563_v62  ;;  %v4566_v25 = vpack.c.bf16 %v1395_v5, %v1394_v63  ;;  %v778_v28 = vld [vmem:[%s5036_s25 + $0x38] sm:$0xff]  ;;  %v743_v35 = vld [vmem:[%s5067_s29 + $0x20] sm:$0xff] }
  0x26   : > { %v881_v21 = vmax.f32 %v849_v8, 0.0  ;;  %v882_v22 = vmax.f32 %v850_v9, 0.0  ;;  %979 = vst [vmem:[#allocation2 + $0x1] sm:$0xff] %v971_v12  ;;  %980 = vst [vmem:[#allocation2 + $0x9] sm:$0xff] %v972_v13  ;;  %v815_v29 = vmul.f32 %v5021_v26, %v777_v24  ;;  %4565 = vmatprep.subr.bf16.mxu0 %v7341_v3  ;;  %v1396_v30 = vld [vmem:[%s7337_s8 + $0x70] sm:$0xff]  ;;  %v1397_v32 = vld [vmem:[%s7337_s8 + $0x78] sm:$0xff]  ;;  %v816_v37 = vmul.f32 %v5021_v26, %v778_v28 }
  0x27   : > { %982 = vst [vmem:[#allocation2 + $0x19] sm:$0xff] %v911_v14  ;;  %v851_v27 = vadd.f32 %v5042_v31, %v813_v17  ;;  %983 = vst [vmem:[#allocation2 + $0x21] sm:$0xff] %v912_v20  ;;  %v852_v36 = vadd.f32 %v5042_v31, %v814_v23  ;;  %4618 = vmatpush3.bf16.msra.mxu1 %v4615_v57  ;;  %v5126_v38 = vpack.c.bf16 %v1429_v19, %v1428_v18  ;;  %v744_v39 = vld [vmem:[%s5067_s29 + $0x28] sm:$0xff]  ;;  %v779_v42 = vld [vmem:[%s5036_s25 + $0x40] sm:$0xff] }
  0x28   : > { %v913_v33 = vadd.f32 %v881_v21, %v741_v15  ;;  %v914_v34 = vadd.f32 %v882_v22, %v742_v16  ;;  %v853_v41 = vadd.f32 %v5042_v31, %v815_v29  ;;  %v780_v43 = vld [vmem:[%s5036_s25 + $0x48] sm:$0xff]  ;;  %4620 = vmatprep.subr.bf16.mxu1 %v5096_v6  ;;  %v5136_v44 = vld [vmem:[%s7337_s8 + $0x80] sm:$0xff]  ;;  %v745_v47 = vld [vmem:[%s5067_s29 + $0x30] sm:$0xff]  ;;  %v854_v48 = vadd.f32 %v5042_v31, %v816_v37 }
  0x29   : > { %v883_v40 = vmax.f32 %v851_v27, 0.0  ;;  %v5141_v45 = vld [vmem:[%s7337_s8 + $0x88] sm:$0xff]  ;;  %v884_v46 = vmax.f32 %v852_v36, 0.0  ;;  %v817_v49 = vmul.f32 %v5021_v26, %v779_v42  ;;  %v818_v50 = vmul.f32 %v5021_v26, %v780_v43  ;;  %4567 = vmatpush1.bf16.msra.mxu0 %v4566_v25  ;;  %v5150_v52 = vld [vmem:[%s7337_s8 + $0x180] sm:$0xff]  ;;  %v746_v55 = vld [vmem:[%s5067_s29 + $0x38] sm:$0xff] }
  0x2a   : > { %984 = vst [vmem:[#allocation2 + $0x31] sm:$0xff] %v913_v33  ;;  %985 = vst [vmem:[#allocation2 + $0x39] sm:$0xff] %v914_v34  ;;  %v4569_v51 = vpack.c.bf16 %v1397_v32, %v1396_v30  ;;  %v5155_v53 = vld [vmem:[%s7337_s8 + $0x188] sm:$0xff]  ;;  %v885_v56 = vmax.f32 %v853_v41, 0.0  ;;  %4568 = vmatprep.subr.bf16.mxu0 %v7341_v3  ;;  %v886_v58 = vmax.f32 %v854_v48, 0.0  ;;  %v781_v61 = vld [vmem:[%s5036_s25 + $0x50] sm:$0xff]  ;;  %v4572_v63 = vpack.c.bf16 %v5141_v45, %v5136_v44 }
  0x2b   : > { %v915_v54 = vadd.f32 %v883_v40, %v743_v35  ;;  %v916_v57 = vadd.f32 %v884_v46, %v744_v39  ;;  %v855_v59 = vadd.f32 %v5042_v31, %v817_v49  ;;  %v856_v60 = vadd.f32 %v5042_v31, %v818_v50  ;;  %v782_v62 = vld [vmem:[%s5036_s25 + $0x58] sm:$0xff]  ;;  %4622 = vmatpush3.bf16.msra.mxu1 %v5096_v6  ;;  %v747_v1 = vld [vmem:[%s5067_s29 + $0x40] sm:$0xff]  ;;  %v748_v2 = vld [vmem:[%s5067_s29 + $0x48] sm:$0xff] }
  0x2c   : > { %v917_v0 = vadd.f32 %v885_v56, %v745_v47  ;;  %v819_v4 = vmul.f32 %v5021_v26, %v781_v61  ;;  %v820_v5 = vmul.f32 %v5021_v26, %v782_v62  ;;  %4624 = vmatprep.subr.bf16.mxu1 %v5126_v38  ;;  %v4628_v6 = vpack.c.bf16 %v5155_v53, %v5150_v52  ;;  %v5182_v10 = vld [vmem:[%s7337_s8 + $0x90] sm:$0xff]  ;;  %v5187_v11 = vld [vmem:[%s7337_s8 + $0x98] sm:$0xff]  ;;  %v783_v29 = vld [vmem:[%s5036_s25 + $0x60] sm:$0xff] }
  0x2d   : > { %986 = vst [vmem:[#allocation2 + $0x49] sm:$0xff] %v915_v54  ;;  %v5171_v7 = vld [vmem:[#allocation2] sm:$0xff]  ;;  %v5173_v8 = vld [vmem:[#allocation2 + $0x8] sm:$0xff]  ;;  %v5175_v9 = vld [vmem:[#allocation2 + $0x10] sm:$0x3]  ;;  %v918_v12 = vadd.f32 %v886_v58, %v746_v55  ;;  %v887_v13 = vmax.f32 %v855_v59, 0.0  ;;  %4570 = vmatpush1.bf16.msra.mxu0 %v4569_v51  ;;  %v4575_v44 = vpack.c.bf16 %v5187_v11, %v5182_v10  ;;  %v821_v56 = vmul.f32 %v5021_v26, %v783_v29 }
  0x2e   : > { %987 = vst [vmem:[#allocation2 + $0x51] sm:$0xff] %v916_v57  ;;  %v888_v14 = vmax.f32 %v856_v60, 0.0  ;;  %v1270_v15 = vrot.slane %v5171_v7, 2  ;;  %v1271_v16 = vrot.slane %v5173_v8, 2  ;;  %v1273_v17 = vrot.slane %v5175_v9, 2  ;;  %v5192_v18 = vld [vmem:[#allocation2 + $0x18] sm:$0xff]  ;;  %4571 = vmatprep.subr.bf16.mxu0 %v7341_v3 }
  0x2f   : > { %v5194_v19 = vld [vmem:[#allocation2 + $0x20] sm:$0xff]  ;;  %v5199_v20 = vld [vmem:[%s7337_s8 + $0x190] sm:$0xff]  ;;  %988 = vst [vmem:[#allocation2 + $0x61] sm:$0xff] %v917_v0  ;;  %v857_v21 = vadd.f32 %v5042_v31, %v819_v4  ;;  %v1275_v22 = vrot.slane %v5192_v18, 2  ;;  %v5205_v24 = vld [vmem:[#allocation2 + $0x28] sm:$0x3]  ;;  %v919_v27 = vadd.f32 %v887_v13, %v747_v1  ;;  %4626 = vmatpush3.bf16.msra.mxu1 %v5126_v38  ;;  %v858_v37 = vadd.f32 %v5042_v31, %v820_v5 }
  0x30   : > { %v1276_v23 = vrot.slane %v5194_v19, 2  ;;  %v5210_v25 = vld [vmem:[%s7337_s8 + $0x198] sm:$0xff]  ;;  %989 = vst [vmem:[#allocation2 + $0x69] sm:$0xff] %v918_v12  ;;  %v920_v28 = vadd.f32 %v888_v14, %v748_v2  ;;  %v1272_v30 = vsel %vm1269_vm0, %v1270_v15, %v1271_v16  ;;  %v1274_v32 = vsel %vm1269_vm0, %v1271_v16, %v1273_v17  ;;  %4627 = vmatprep.subr.bf16.mxu1 %v7341_v3  ;;  %v749_v41 = vld [vmem:[%s5067_s29 + $0x50] sm:$0xff]  ;;  %v784_v43 = vld [vmem:[%s5036_s25 + $0x68] sm:$0xff] }
  0x31   : > { %v1278_v33 = vrot.slane %v5205_v24, 2  ;;  %v5217_v34 = vld [vmem:[#allocation2 + $0x30] sm:$0xff]  ;;  %v5219_v35 = vld [vmem:[#allocation2 + $0x38] sm:$0xff]  ;;  %v5221_v36 = vld [vmem:[#allocation2 + $0x40] sm:$0x3]  ;;  %4339 = vmatprep.mubr.f32.mxu1 %v1272_v30  ;;  %990 = vst [vmem:[#allocation2 + $0x79] sm:$0xff] %v919_v27  ;;  %4573 = vmatpush1.bf16.msra.mxu0 %v4572_v63  ;;  %v4631_v51 = vpack.c.bf16 %v5210_v25, %v5199_v20  ;;  %v822_v62 = vmul.f32 %v5021_v26, %v784_v43 }
  0x32   : > { %v1277_v38 = vsel %vm1269_vm0, %v1275_v22, %v1276_v23  ;;  %v1280_v39 = vrot.slane %v5217_v34, 2  ;;  %v1281_v40 = vrot.slane %v5219_v35, 2  ;;  %991 = vst [vmem:[#allocation2 + $0x81] sm:$0xff] %v920_v28  ;;  %v750_v42 = vld [vmem:[%s5067_s29 + $0x58] sm:$0xff]  ;;  %v5236_v45 = vld [vmem:[%s7337_s8 + $0xa0] sm:$0xff]  ;;  %v5241_v46 = vld [vmem:[%s7337_s8 + $0xa8] sm:$0xff]  ;;  %4340 = vmatmul.mubr.f32.vlgmr.msra.gmra.mrb[0].mxu1 %v1274_v32  ;;  %4574 = vmatprep.subr.bf16.mxu0 %v7341_v3 }
  0x33   : > { %v5246_v47 = vld [vmem:[%s7337_s8 + $0x1a0] sm:$0xff]  ;;  %v889_v48 = vmax.f32 %v857_v21, 0.0  ;;  %v890_v49 = vmax.f32 %v858_v37, 0.0  ;;  %v1279_v50 = vsel %vm1269_vm0, %v1276_v23, %v1278_v33  ;;  %v1283_v52 = vrot.slane %v5221_v36, 2  ;;  %v5256_v53 = vld [vmem:[%s7337_s8 + $0x1a8] sm:$0xff]  ;;  %v5263_v55 = vld [vmem:[%s7337_s8 + $0xb0] sm:$0xff]  ;;  %4629 = vmatpush1.bf16.msra.mxu1 %v4628_v6  ;;  %4342 = vmatprep.mubr.f32.mxu1 %v1277_v38 }
  0x34   : > { %v5258_v54 = vld [vmem:[#allocation2 + $0x48] sm:$0xff]  ;;  %v5271_v58 = vld [vmem:[%s7337_s8 + $0xb8] sm:$0xff]  ;;  %v1157_v63 = vrot.slane %v5171_v7, 1  ;;  %4630 = vmatprep.subr.bf16.mxu1 %v7341_v3  ;;  %v1282_v0 = vsel %vm1269_vm0, %v1280_v39, %v1281_v40  ;;  %v5284_v4 = vld [vmem:[%s7337_s8 + $0x1b0] sm:$0xff]  ;;  %v859_v6 = vadd.f32 %v5042_v31, %v821_v56  ;;  %v4578_v11 = vpack.c.bf16 %v5241_v46, %v5236_v45 }
  0x35   : > { %v5266_v57 = vld [vmem:[#allocation2 + $0x50] sm:$0xff]  ;;  %v5273_v59 = vld [vmem:[#allocation2 + $0x58] sm:$0x3]  ;;  %v921_v60 = vadd.f32 %v889_v48, %v749_v41  ;;  %v922_v61 = vadd.f32 %v890_v49, %v750_v42  ;;  %v1285_v1 = vrot.slane %v5258_v54, 2  ;;  %4576 = vmatpush1.bf16.msra.mxu0 %v4575_v44  ;;  %v751_v14 = vld [vmem:[%s5067_s29 + $0x60] sm:$0xff]  ;;  %v860_v15 = vadd.f32 %v5042_v31, %v822_v62 }
  0x36   : > { %v1286_v2 = vrot.slane %v5266_v57, 2  ;;  %v5289_v5 = vld [vmem:[%s7337_s8 + $0x1b8] sm:$0xff]  ;;  %v785_v10 = vld [vmem:[%s5036_s25 + $0x70] sm:$0xff]  ;;  %v5295_v12 = vld [vmem:[#allocation2 + $0x60] sm:$0xff]  ;;  %v1158_v16 = vrot.slane %v5173_v8, 1  ;;  %4343 = vmatmul.mubr.f32.gmra.mrb[2].mxu1 %v1279_v50  ;;  %4577 = vmatprep.subr.bf16.mxu0 %v7341_v3  ;;  %v1284_v17 = vsel %vm1269_vm0, %v1281_v40, %v1283_v52  ;;  %v4634_v20 = vpack.c.bf16 %v5256_v53, %v5246_v47 }
  0x37   : > { %v5297_v13 = vld [vmem:[#allocation2 + $0x68] sm:$0xff]  ;;  %992 = vst [vmem:[#allocation2 + $0x91] sm:$0xff] %v921_v60  ;;  %993 = vst [vmem:[#allocation2 + $0x99] sm:$0xff] %v922_v61  ;;  %v4581_v21 = vpack.c.bf16 %v5271_v58, %v5263_v55  ;;  %v1288_v22 = vrot.slane %v5273_v59, 2  ;;  %v5309_v23 = vld [vmem:[#allocation2 + $0x70] sm:$0x3]  ;;  %4632 = vmatpush1.bf16.msra.mxu1 %v4631_v51  ;;  %4345 = vmatprep.mubr.f32.mxu1 %v1282_v0  ;;  %v823_v38 = vmul.f32 %v5021_v26, %v785_v10 }
  0x38   : > { %v752_v25 = vld [vmem:[%s5067_s29 + $0x68] sm:$0xff]  ;;  %v786_v27 = vld [vmem:[%s5036_s25 + $0x78] sm:$0xff]  ;;  %v5316_v28 = vld [vmem:[%s7337_s8 + $0xc0] sm:$0xff]  ;;  %v891_v32 = vmax.f32 %v859_v6, 0.0  ;;  %v892_v33 = vmax.f32 %v860_v15, 0.0  ;;  %v1159_v37 = vsel %vm1156_vm1, %v1157_v63, %v1158_v16  ;;  %4633 = vmatprep.subr.bf16.mxu1 %v7341_v3  ;;  %v1287_v39 = vsel %vm1269_vm0, %v1285_v1, %v1286_v2 }
  0x39   : > { %v5321_v29 = vld [vmem:[%s7337_s8 + $0xc8] sm:$0xff]  ;;  %v5326_v30 = vld [vmem:[%s7337_s8 + $0x1c0] sm:$0xff]  ;;  %v4637_v40 = vpack.c.bf16 %v5289_v5, %v5284_v4  ;;  %v1290_v41 = vrot.slane %v5295_v12, 2  ;;  %v1291_v42 = vrot.slane %v5297_v13, 2  ;;  %v5338_v43 = vld [vmem:[#allocation2 + $0x78] sm:$0xff]  ;;  %1494 = vmatprep.mubr.f32.mxu0 %v1159_v37  ;;  %4579 = vmatpush1.bf16.msra.mxu0 %v4578_v11  ;;  %v1293_v46 = vrot.slane %v5309_v23, 2 }
  0x3a   : > { %v5340_v44 = vld [vmem:[#allocation2 + $0x80] sm:$0xff]  ;;  %v5347_v47 = vld [vmem:[%s7337_s8 + $0x1c8] sm:$0xff]  ;;  %v5352_v48 = vld [vmem:[%s7337_s8 + $0xd0] sm:$0xff]  ;;  %v923_v49 = vadd.f32 %v891_v32, %v751_v14  ;;  %v924_v50 = vadd.f32 %v892_v33, %v752_v25  ;;  %v824_v51 = vmul.f32 %v5021_v26, %v786_v27  ;;  %4346 = vmatmul.mubr.f32.gmra.mrb[4].mxu1 %v1284_v17  ;;  %4580 = vmatprep.subr.bf16.mxu0 %v7341_v3  ;;  %v1295_v62 = vrot.slane %v5338_v43, 2 }
  0x3b   : > { %v787_v45 = vld [vmem:[%s5036_s25 + $0x80] sm:$0xff]  ;;  %v788_v52 = vld [vmem:[%s5036_s25 + $0x88] sm:$0xff]  ;;  %v1289_v53 = vsel %vm1269_vm0, %v1286_v2, %v1288_v22  ;;  %v4584_v55 = vpack.c.bf16 %v5321_v29, %v5316_v28  ;;  %v5363_v56 = vld [vmem:[%s7337_s8 + $0xd8] sm:$0xff]  ;;  %v861_v61 = vadd.f32 %v5042_v31, %v823_v38  ;;  %4635 = vmatpush1.bf16.msra.mxu1 %v4634_v20  ;;  %4348 = vmatprep.mubr.f32.mxu1 %v1287_v39  ;;  %v1296_v63 = vrot.slane %v5340_v44, 2 }
  0x3c   : > { %v5368_v58 = vld [vmem:[%s7337_s8 + $0x1d0] sm:$0xff]  ;;  %v5373_v60 = vld [vmem:[%s7337_s8 + $0x1d8] sm:$0xff]  ;;  %994 = vst [vmem:[#allocation2 + $0xa9] sm:$0xff] %v923_v49  ;;  %995 = vst [vmem:[#allocation2 + $0xb1] sm:$0xff] %v924_v50  ;;  %v862_v1 = vadd.f32 %v5042_v31, %v824_v51  ;;  %v825_v2 = vmul.f32 %v5021_v26, %v787_v45  ;;  %4636 = vmatprep.subr.bf16.mxu1 %v7341_v3  ;;  %v1292_v4 = vsel %vm1269_vm0, %v1290_v41, %v1291_v42 }
  0x3d   : > { %v753_v0 = vld [vmem:[%s5067_s29 + $0x70] sm:$0xff]  ;;  %v4640_v5 = vpack.c.bf16 %v5347_v47, %v5326_v30  ;;  %v5385_v6 = vld [vmem:[#allocation2 + $0x88] sm:$0x3]  ;;  %v5392_v11 = vld [vmem:[%s7337_s8 + $0xe0] sm:$0xff]  ;;  %v893_v15 = vmax.f32 %v861_v61, 0.0  ;;  %v826_v17 = vmul.f32 %v5021_v26, %v788_v52  ;;  %4582 = vmatpush1.bf16.msra.mxu0 %v4581_v21  ;;  %v1294_v20 = vsel %vm1269_vm0, %v1291_v42, %v1293_v46 }
  0x3e   : > { %v5387_v10 = vld [vmem:[#allocation2 + $0x90] sm:$0xff]  ;;  %v754_v14 = vld [vmem:[%s5067_s29 + $0x78] sm:$0xff]  ;;  %v4587_v22 = vpack.c.bf16 %v5363_v56, %v5352_v48  ;;  %v4643_v25 = vpack.c.bf16 %v5373_v60, %v5368_v58  ;;  %v5406_v28 = vld [vmem:[%s7337_s8 + $0xe8] sm:$0xff]  ;;  %v894_v29 = vmax.f32 %v862_v1, 0.0  ;;  %4349 = vmatmul.mubr.f32.gmra.mrb[6].mxu1 %v1289_v53  ;;  %4583 = vmatprep.subr.bf16.mxu0 %v7341_v3  ;;  %v863_v33 = vadd.f32 %v5042_v31, %v825_v2 }
  0x3f   : > { %v5401_v27 = vld [vmem:[#allocation2 + $0x98] sm:$0xff]  ;;  %v789_v30 = vld [vmem:[%s5036_s25 + $0x90] sm:$0xff]  ;;  %v5410_v21 = vld [vmem:[#allocation2 + $0xa0] sm:$0x3]  ;;  %v925_v32 = vadd.f32 %v893_v15, %v753_v0  ;;  %v864_v37 = vadd.f32 %v5042_v31, %v826_v17  ;;  %4638 = vmatpush1.bf16.msra.mxu1 %v4637_v40  ;;  %4351 = vmatprep.mubr.f32.mxu1 %v1292_v4  ;;  %v1297_v41 = vsel %vm1269_vm0, %v1295_v62, %v1296_v63  ;;  %v1298_v42 = vrot.slane %v5385_v6, 2 }
  0x40   : > { %v790_v38 = vld [vmem:[%s5036_s25 + $0x98] sm:$0xff]  ;;  %v791_v39 = vld [vmem:[%s5036_s25 + $0xa0] sm:$0xff]  ;;  %v1300_v45 = vrot.slane %v5387_v10, 2  ;;  %v926_v46 = vadd.f32 %v894_v29, %v754_v14  ;;  %v756_v49 = vld [vmem:[%s5067_s29 + $0x88] sm:$0xff]  ;;  %4639 = vmatprep.subr.bf16.mxu1 %v7341_v3  ;;  %v1301_v50 = vrot.slane %v5401_v27, 2  ;;  %v895_v51 = vmax.f32 %v863_v33, 0.0 }
  0x41   : > { %v755_v47 = vld [vmem:[%s5067_s29 + $0x80] sm:$0xff]  ;;  %996 = vst [vmem:[#allocation2 + $0xc1] sm:$0xff] %v925_v32  ;;  %v896_v52 = vmax.f32 %v864_v37, 0.0  ;;  %v827_v53 = vmul.f32 %v5021_v26, %v789_v30  ;;  %4585 = vmatpush1.bf16.msra.mxu0 %v4584_v55  ;;  %v4590_v61 = vpack.c.bf16 %v5406_v28, %v5392_v11  ;;  %v1303_v62 = vrot.slane %v5410_v21, 2  ;;  %v5437_v0 = vld [vmem:[%s7337_s8 + $0x1e8] sm:$0xff]  ;;  %v5442_v1 = vld [vmem:[%s7337_s8 + $0xf0] sm:$0xff] }
  0x42   : > { %v5428_v40 = vld [vmem:[%s7337_s8 + $0x1e0] sm:$0xff]  ;;  %997 = vst [vmem:[#allocation2 + $0xc9] sm:$0xff] %v926_v46  ;;  %v828_v2 = vmul.f32 %v5021_v26, %v790_v38  ;;  %v792_v55 = vld [vmem:[%s5036_s25 + $0xa8] sm:$0xff]  ;;  %v829_v4 = vmul.f32 %v5021_v26, %v791_v39  ;;  %4352 = vmatmul.mubr.f32.gmra.mrb[8].mxu1 %v1294_v20  ;;  %4586 = vmatprep.subr.bf16.mxu0 %v7341_v3  ;;  %v5455_v17 = vld [vmem:[%s7337_s8 + $0xf8] sm:$0xff] }
  0x43   : > { %v5448_v14 = vld [vmem:[#allocation2 + $0xa8] sm:$0xff]  ;;  %v5450_v15 = vld [vmem:[#allocation2 + $0xb0] sm:$0xff]  ;;  %v927_v29 = vadd.f32 %v895_v51, %v755_v47  ;;  %v928_v30 = vadd.f32 %v896_v52, %v756_v49  ;;  %v865_v32 = vadd.f32 %v5042_v31, %v827_v53  ;;  %4641 = vmatpush1.bf16.msra.mxu1 %v4640_v5  ;;  %4354 = vmatprep.mubr.f32.mxu1 %v1297_v41  ;;  %v5468_v5 = vld [vmem:[#allocation2 + $0xb8] sm:$0x3] }
  0x44   : > { %v1299_v20 = vsel %vm1269_vm0, %v1296_v63, %v1298_v42  ;;  %v1305_v33 = vrot.slane %v5448_v14, 2  ;;  %v1306_v37 = vrot.slane %v5450_v15, 2  ;;  %v757_v38 = vld [vmem:[%s5067_s29 + $0x90] sm:$0xff]  ;;  %v866_v39 = vadd.f32 %v5042_v31, %v828_v2  ;;  %4642 = vmatprep.subr.bf16.mxu1 %v7341_v3  ;;  %v758_v41 = vld [vmem:[%s5067_s29 + $0x98] sm:$0xff]  ;;  %v5497_v56 = vld [vmem:[%s7337_s8 + $0x200] sm:$0xff] }
  0x45   : > { %v793_v46 = vld [vmem:[%s5036_s25 + $0xb0] sm:$0xff]  ;;  %v1302_v47 = vsel %vm1269_vm0, %v1300_v45, %v1301_v50  ;;  %998 = vst [vmem:[#allocation2 + $0xd9] sm:$0xff] %v927_v29  ;;  %999 = vst [vmem:[#allocation2 + $0xe1] sm:$0xff] %v928_v30  ;;  %v897_v49 = vmax.f32 %v865_v32, 0.0  ;;  %v830_v63 = vmul.f32 %v5021_v26, %v792_v55  ;;  %v867_v42 = vadd.f32 %v5042_v31, %v829_v4  ;;  %v794_v51 = vld [vmem:[%s5036_s25 + $0xb8] sm:$0xff] }
  0x46   : > { %4588 = vmatpush1.bf16.msra.mxu0 %v4587_v22  ;;  %v1304_v52 = vsel %vm1269_vm0, %v1301_v50, %v1303_v62  ;;  %v4646_v45 = vpack.c.bf16 %v5437_v0, %v5428_v40  ;;  %v4593_v53 = vpack.c.bf16 %v5455_v17, %v5442_v1  ;;  %v5485_v2 = vld [vmem:[%s7337_s8 + $0x1f0] sm:$0xff]  ;;  %v898_v55 = vmax.f32 %v866_v39, 0.0  ;;  %v759_v4 = vld [vmem:[%s5067_s29 + $0xa0] sm:$0xff]  ;;  %4355 = vmatmul.mubr.f32.gmra.mrb[10].mxu1 %v1299_v20  ;;  %v5492_v48 = vld [vmem:[%s7337_s8 + $0x1f8] sm:$0xff] }
  0x47   : > { %4589 = vmatprep.subr.bf16.mxu0 %v7341_v3  ;;  %v5502_v22 = vld [vmem:[%s7337_s8 + $0x208] sm:$0xff]  ;;  %v929_v50 = vadd.f32 %v897_v49, %v757_v38  ;;  %v868_v40 = vadd.f32 %v5042_v31, %v830_v63  ;;  %v899_v62 = vmax.f32 %v867_v42, 0.0  ;;  %v831_v0 = vmul.f32 %v5021_v26, %v793_v46  ;;  %4644 = vmatpush1.bf16.msra.mxu1 %v4643_v25  ;;  %v795_v38 = vld [vmem:[%s5036_s25 + $0xc0] sm:$0xff]  ;;  %v761_v42 = vld [vmem:[%s5067_s29 + $0xb0] sm:$0xff] }
  0x48   : > { %4357 = vmatprep.mubr.f32.mxu1 %v1302_v47  ;;  %v1307_v1 = vsel %vm1269_vm0, %v1305_v33, %v1306_v37  ;;  %v1308_v17 = vrot.slane %v5468_v5, 2  ;;  %v5513_v29 = vld [vmem:[#allocation2 + $0xc0] sm:$0xff]  ;;  %v930_v30 = vadd.f32 %v898_v55, %v758_v41  ;;  %v760_v32 = vld [vmem:[%s5067_s29 + $0xa8] sm:$0xff]  ;;  %v832_v20 = vmul.f32 %v5021_v26, %v794_v51  ;;  %4645 = vmatprep.subr.bf16.mxu1 %v7341_v3  ;;  %v762_v11 = vld [vmem:[%s5067_s29 + $0xb8] sm:$0xff] }
  0x49   : > { %v5519_v58 = vld [vmem:[#allocation2 + $0xc8] sm:$0xff]  ;;  %v1310_v60 = vrot.slane %v5513_v29, 2  ;;  %v5522_v25 = vld [vmem:[#allocation2 + $0xd0] sm:$0x3]  ;;  %1000 = vst [vmem:[#allocation2 + $0xf1] sm:$0xff] %v929_v50  ;;  %v900_v33 = vmax.f32 %v868_v40, 0.0  ;;  %v931_v39 = vadd.f32 %v899_v62, %v759_v4  ;;  %v869_v46 = vadd.f32 %v5042_v31, %v831_v0 }
  0x4a   : > { %v796_v47 = vld [vmem:[%s5036_s25 + $0xc8] sm:$0xff]  ;;  %4591 = vmatpush1.bf16.msra.mxu0 %v4590_v61  ;;  %v4649_v41 = vpack.c.bf16 %v5492_v48, %v5485_v2  ;;  %v1311_v49 = vrot.slane %v5519_v58, 2  ;;  %v1160_v63 = vrot.slane %v5175_v9, 1  ;;  %1001 = vst [vmem:[#allocation2 + $0xf9] sm:$0xff] %v930_v30  ;;  %v870_v51 = vadd.f32 %v5042_v31, %v832_v20  ;;  %4358 = vmatmul.mubr.f32.gmra.mrb[12].mxu1 %v1304_v52 }
  0x4b   : > { %4592 = vmatprep.subr.bf16.mxu0 %v7341_v3  ;;  %v1313_v55 = vrot.slane %v5522_v25, 2  ;;  %v932_v4 = vadd.f32 %v900_v33, %v760_v32  ;;  %1002 = vst [vmem:[#allocation2 + $0x109] sm:$0xff] %v931_v39  ;;  %v901_v28 = vmax.f32 %v869_v46, 0.0  ;;  %v833_v61 = vmul.f32 %v5021_v26, %v795_v38  ;;  %4647 = vmatpush1.bf16.msra.mxu1 %v4646_v45  ;;  %v5573_v39 = vld [vmem:[%s7337_s8 + $0x218] sm:$0xff] }
  0x4c   : > { %4360 = vmatprep.mubr.f32.mxu1 %v1307_v1  ;;  %v1309_v9 = vsel %vm1269_vm0, %v1306_v37, %v1308_v17  ;;  %v4652_v52 = vpack.c.bf16 %v5502_v22, %v5497_v56  ;;  %v5544_v2 = vld [vmem:[#allocation2 + $0xd8] sm:$0xff]  ;;  %v5546_v48 = vld [vmem:[#allocation2 + $0xe0] sm:$0xff]  ;;  %v5548_v50 = vld [vmem:[#allocation2 + $0xe8] sm:$0x3]  ;;  %v902_v40 = vmax.f32 %v870_v51, 0.0  ;;  %v834_v62 = vmul.f32 %v5021_v26, %v796_v47  ;;  %4648 = vmatprep.subr.bf16.mxu1 %v7341_v3 }
  0x4d   : > { %v1312_v45 = vsel %vm1269_vm0, %v1310_v60, %v1311_v49  ;;  %v1315_v0 = vrot.slane %v5544_v2, 2  ;;  %v1316_v37 = vrot.slane %v5546_v48, 2  ;;  %1003 = vst [vmem:[#allocation2 + $0x111] sm:$0xff] %v932_v4  ;;  %v933_v1 = vadd.f32 %v901_v28, %v761_v42  ;;  %v797_v56 = vld [vmem:[%s5036_s25 + $0xd0] sm:$0xff]  ;;  %v798_v22 = vld [vmem:[%s5036_s25 + $0xd8] sm:$0xff]  ;;  %v763_v47 = vld [vmem:[%s5067_s29 + $0xc0] sm:$0xff] }
  0x4e   : > { %4594 = vmatpush1.bf16.msra.mxu0 %v4593_v53  ;;  %v5560_v17 = vld [vmem:[%s7337_s8 + $0x210] sm:$0xff]  ;;  %v1162_v30 = vrot.slane %v5192_v18, 1  ;;  %v934_v32 = vadd.f32 %v902_v40, %v762_v11  ;;  %v871_v20 = vadd.f32 %v5042_v31, %v833_v61  ;;  %v872_v38 = vadd.f32 %v5042_v31, %v834_v62  ;;  %4361 = vmatmul.mubr.f32.gmra.mrb[14].mxu1 %v1309_v9  ;;  %v764_v42 = vld [vmem:[%s5067_s29 + $0xc8] sm:$0xff]  ;;  %v799_v61 = vld [vmem:[%s5036_s25 + $0xe0] sm:$0xff] }
  0x4f   : > { %v1314_v60 = vsel %vm1269_vm0, %v1311_v49, %v1313_v55  ;;  %v1161_v33 = vsel %vm1156_vm1, %v1158_v16, %v1160_v63  ;;  %v1318_v53 = vrot.slane %v5548_v50, 2  ;;  %v5576_v46 = vrot.slane %v5194_v19, 1  ;;  %1004 = vst [vmem:[#allocation2 + $0x121] sm:$0xff] %v933_v1  ;;  %4650 = vmatpush1.bf16.msra.mxu1 %v4649_v41  ;;  %4363 = vmatprep.mubr.f32.mxu1 %v1312_v45  ;;  %v5604_v62 = vld [vmem:[%s7337_s8 + $0x228] sm:$0xff] }
  0x50   : > { %v5580_v49 = vld [vmem:[#allocation2 + $0xf0] sm:$0xff]  ;;  %1005 = vst [vmem:[#allocation2 + $0x129] sm:$0xff] %v934_v32  ;;  %v903_v16 = vmax.f32 %v871_v20, 0.0  ;;  %v904_v63 = vmax.f32 %v872_v38, 0.0  ;;  %v835_v51 = vmul.f32 %v5021_v26, %v797_v56  ;;  %v836_v55 = vmul.f32 %v5021_v26, %v798_v22  ;;  %4651 = vmatprep.subr.bf16.mxu1 %v7341_v3  ;;  %v800_v20 = vld [vmem:[%s5036_s25 + $0xe8] sm:$0xff]  ;;  %v4086_v38 = vld [vmem:[%s7337_s8 + $0x280] sm:$0xff] }
  0x51   : > { %1495 = vmatmul.mubr.f32.vlgmr.msra.gmra.mrb[0].mxu0 %v5171_v7  ;;  %v1317_v4 = vsel %vm1269_vm0, %v1315_v0, %v1316_v37  ;;  %v5587_v11 = vld [vmem:[#allocation2 + $0xf8] sm:$0xff]  ;;  %v1320_v41 = vrot.slane %v5580_v49, 2  ;;  %v5590_v28 = vld [vmem:[#allocation2 + $0x100] sm:$0x3]  ;;  %v4655_v9 = vpack.c.bf16 %v5573_v39, %v5560_v17  ;;  %v5610_v56 = vsel %vm1156_vm1, %v1162_v30, %v5576_v46 }
  0x52   : > { %1499 = vmatprep.mubr.f32.mxu0 %v1161_v33  ;;  %v1321_v40 = vrot.slane %v5587_v11, 2  ;;  %v5599_v7 = vld [vmem:[%s7337_s8 + $0x220] sm:$0xff]  ;;  %v5606_v45 = vld [vmem:[#allocation2 + $0x108] sm:$0xff]  ;;  %v935_v0 = vadd.f32 %v903_v16, %v763_v47  ;;  %v936_v1 = vadd.f32 %v904_v63, %v764_v42  ;;  %4364 = vmatmul.mubr.f32.gmra.mrb[16].mxu1 %v1314_v60  ;;  %v1165_v22 = vrot.slane %v5205_v24, 1  ;;  %v765_v47 = vld [vmem:[%s5067_s29 + $0xd0] sm:$0xff] }
  0x53   : > { %v873_v17 = vadd.f32 %v5042_v31, %v835_v51  ;;  %v874_v32 = vadd.f32 %v5042_v31, %v836_v55  ;;  %v4087_v60 = vld [vmem:[%s7337_s8 + $0x288] sm:$0xff]  ;;  %4653 = vmatpush1.bf16.msra.mxu1 %v4652_v52  ;;  %4366 = vmatprep.mubr.f32.mxu1 %v1317_v4  ;;  %v1319_v30 = vsel %vm1269_vm0, %v1316_v37, %v1318_v53  ;;  %v1323_v24 = vrot.slane %v5590_v28, 2  ;;  %v766_v53 = vld [vmem:[%s5067_s29 + $0xd8] sm:$0xff] }
  0x54   : > { %v5624_v33 = vld [vmem:[#allocation2 + $0x110] sm:$0xff]  ;;  %v1325_v39 = vrot.slane %v5606_v45, 2  ;;  %1006 = vst [vmem:[#allocation2 + $0x139] sm:$0xff] %v935_v0  ;;  %1007 = vst [vmem:[#allocation2 + $0x141] sm:$0xff] %v936_v1  ;;  %v837_v42 = vmul.f32 %v5021_v26, %v799_v61  ;;  %4654 = vmatprep.subr.bf16.mxu1 %v7341_v3  ;;  %v1322_v52 = vsel %vm1269_vm0, %v1320_v41, %v1321_v40  ;;  %v5633_v37 = vld [vmem:[#allocation2 + $0x118] sm:$0x3] }
  0x55   : > { %1500 = vmatmul.mubr.f32.gmra.mrb[2].mxu0 %v5173_v8  ;;  %v1326_v16 = vrot.slane %v5624_v33, 2  ;;  %v905_v63 = vmax.f32 %v873_v17, 0.0  ;;  %v906_v51 = vmax.f32 %v874_v32, 0.0  ;;  %v4658_v55 = vpack.c.bf16 %v5604_v62, %v5599_v7 }
  0x56   : > { %1504 = vmatprep.mubr.f32.mxu0 %v5610_v56  ;;  %v5639_v4 = vld [vmem:[#allocation2 + $0x120] sm:$0xff]  ;;  %v838_v8 = vmul.f32 %v5021_v26, %v800_v20  ;;  %v875_v61 = vadd.f32 %v5042_v31, %v837_v42  ;;  %v4675_v41 = vpack.c.bf16 %v4087_v60, %v4086_v38  ;;  %4367 = vmatmul.mubr.f32.gmra.mrb[18].mxu1 %v1319_v30  ;;  %v1167_v1 = vrot.slane %v5217_v34, 1  ;;  %v4076_v20 = vld [vmem:[%s7337_s8 + $0x230] sm:$0xff]  ;;  %v768_v42 = vld [vmem:[%s5067_s29 + $0xe8] sm:$0xff] }
  0x57   : > { %v1166_v0 = vsel %vm1156_vm1, %v5576_v46, %v1165_v22  ;;  %v5647_v17 = vrot.slane %v5219_v35, 1  ;;  %v5649_v32 = vld [vmem:[#allocation2 + $0x128] sm:$0xff]  ;;  %v937_v7 = vadd.f32 %v905_v63, %v765_v47  ;;  %4656 = vmatpush1.bf16.msra.mxu1 %v4655_v9  ;;  %4369 = vmatprep.mubr.f32.mxu1 %v1322_v52  ;;  %v1324_v26 = vsel %vm1269_vm0, %v1321_v40, %v1323_v24  ;;  %v4077_v22 = vld [vmem:[%s7337_s8 + $0x238] sm:$0xff]  ;;  %v767_v60 = vld [vmem:[%s5067_s29 + $0xe0] sm:$0xff] }
  0x58   : > { %v1328_v62 = vrot.slane %v5633_v37, 2  ;;  %v938_v38 = vadd.f32 %v906_v51, %v766_v53  ;;  %v876_v30 = vadd.f32 %v5042_v31, %v838_v8  ;;  %4657 = vmatprep.subr.bf16.mxu1 %v7341_v3  ;;  %v1327_v9 = vsel %vm1269_vm0, %v1325_v39, %v1326_v16  ;;  %v5666_v47 = vld [vmem:[#allocation2 + $0x130] sm:$0x3]  ;;  %4676 = vmatprep.subr.bf16.mxu0 %v4675_v41 }
  0x59   : > { %1505 = vmatmul.mubr.f32.gmra.mrb[4].mxu0 %v5192_v18  ;;  %v1330_v40 = vrot.slane %v5639_v4, 2  ;;  %v1331_v24 = vrot.slane %v5649_v32, 2  ;;  %1008 = vst [vmem:[#allocation2 + $0x151] sm:$0xff] %v937_v7  ;;  %v907_v52 = vmax.f32 %v875_v61, 0.0  ;;  %v5671_v31 = vsel %vm1156_vm1, %v1167_v1, %v5647_v17  ;;  %v4088_v1 = vld [vmem:[%s7337_s8 + $0x290] sm:$0xff] }
  0x5a   : > { %1509 = vmatprep.mubr.f32.mxu0 %v1166_v0  ;;  %1009 = vst [vmem:[#allocation2 + $0x159] sm:$0xff] %v938_v38  ;;  %v908_v53 = vmax.f32 %v876_v30, 0.0  ;;  %4370 = vmatmul.mubr.f32.gmra.mrb[20].mxu1 %v1324_v26  ;;  %v1170_v39 = vrot.slane %v5221_v36, 1  ;;  %v1329_v61 = vsel %vm1269_vm0, %v1326_v16, %v1328_v62  ;;  %v4661_v0 = vpack.c.bf16 %v4077_v22, %v4076_v20  ;;  %v4089_v36 = vld [vmem:[%s7337_s8 + $0x298] sm:$0xff]  ;;  %v4078_v16 = vld [vmem:[%s7337_s8 + $0x240] sm:$0xff] }
  0x5b   : > { %v5674_v63 = vld [vmem:[#allocation2 + $0x138] sm:$0xff]  ;;  %v5676_v51 = vld [vmem:[#allocation2 + $0x140] sm:$0xff]  ;;  %v939_v8 = vadd.f32 %v907_v52, %v767_v60  ;;  %4678 = vmatpush3.bf16.msra.mxu0 %v4675_v41  ;;  %4659 = vmatpush1.bf16.msra.mxu1 %v4658_v55  ;;  %v1333_v7 = vrot.slane %v5666_v47, 2  ;;  %v1332_v55 = vsel %vm1269_vm0, %v1330_v40, %v1331_v24  ;;  %v4079_v41 = vld [vmem:[%s7337_s8 + $0x248] sm:$0xff]  ;;  %v1172_v60 = vrot.slane %v5258_v54, 1 }
  0x5c   : > { %4372 = vmatprep.mubr.f32.mxu1 %v1327_v9  ;;  %v940_v26 = vadd.f32 %v908_v53, %v768_v42  ;;  %4660 = vmatprep.subr.bf16.mxu1 %v7341_v3  ;;  %v1335_v62 = vrot.slane %v5674_v63, 2  ;;  %v1336_v20 = vrot.slane %v5676_v51, 2  ;;  %v5697_v22 = vld [vmem:[#allocation2 + $0x148] sm:$0x3]  ;;  %v1171_v38 = vsel %vm1156_vm1, %v5647_v17, %v1170_v39  ;;  %v4080_v53 = vld [vmem:[%s7337_s8 + $0x250] sm:$0xff] }
  0x5d   : > { %1510 = vmatmul.mubr.f32.gmra.mrb[6].mxu0 %v5194_v19  ;;  %1010 = vst [vmem:[#allocation2 + $0x169] sm:$0xff] %v939_v8  ;;  %v5704_v30 = vrot.slane %v5266_v57, 1  ;;  %v4679_v9 = vpack.c.bf16 %v4089_v36, %v4088_v1  ;;  %v1334_v40 = vsel %vm1269_vm0, %v1331_v24, %v1333_v7  ;;  %v4664_v42 = vpack.c.bf16 %v4079_v41, %v4078_v16  ;;  %v4091_v1 = vld [vmem:[%s7337_s8 + $0x2a8] sm:$0xff] }
  0x5e   : > { %1514 = vmatprep.mubr.f32.mxu0 %v5671_v31  ;;  %1011 = vst [vmem:[#allocation2 + $0x171] sm:$0xff] %v940_v26  ;;  %4373 = vmatmul.mubr.f32.gmra.mrb[22].mxu1 %v1329_v61  ;;  %v1338_v52 = vrot.slane %v5697_v22, 2  ;;  %v1337_v39 = vsel %vm1269_vm0, %v1335_v62, %v1336_v20  ;;  %v4081_v61 = vld [vmem:[%s7337_s8 + $0x258] sm:$0xff] }
  0x5f   : > { %4662 = vmatpush1.bf16.msra.mxu1 %v4661_v0  ;;  %4375 = vmatprep.mubr.f32.mxu1 %v1332_v55  ;;  %v5733_v36 = vsel %vm1156_vm1, %v1172_v60, %v5704_v30  ;;  %v1175_v55 = vrot.slane %v5273_v59, 1  ;;  %v4667_v41 = vpack.c.bf16 %v4081_v61, %v4080_v53  ;;  %v7348_v60 = vmov 0.0|0.0  }
  0x60   : > { %v5711_v8 = vld [vmem:[#allocation2 + $0x150] sm:$0xff]  ;;  %4663 = vmatprep.subr.bf16.mxu1 %v7341_v3  ;;  %4680 = vmatprep.subr.bf16.mxu0 %v4679_v9  ;;  %v1339_v16 = vsel %vm1269_vm0, %v1336_v20, %v1338_v52  ;;  %v5760_v61 = vrot.slane %v5297_v13, 1 }
  0x61   : > { %1515 = vmatmul.mubr.f32.gmra.mrb[8].mxu0 %v5217_v34  ;;  %v5719_v24 = vld [vmem:[#allocation2 + $0x158] sm:$0xff]  ;;  %v1340_v0 = vrot.slane %v5711_v8, 2  ;;  %v5722_v7 = vld [vmem:[#allocation2 + $0x160] sm:$0x3] }
  0x62   : > { %1519 = vmatprep.mubr.f32.mxu0 %v1171_v38  ;;  %v1341_v26 = vrot.slane %v5719_v24, 2  ;;  %v4090_v34 = vld [vmem:[%s7337_s8 + $0x2a0] sm:$0xff]  ;;  %4376 = vmatmul.mubr.f32.gmra.mrb[24].mxu1 %v1334_v40  ;;  %v1343_v62 = vrot.slane %v5722_v7, 2 }
  0x63   : > { %4682 = vmatpush3.bf16.msra.mxu0 %v4679_v9  ;;  %4665 = vmatpush1.bf16.msra.mxu1 %v4664_v42  ;;  %v4082_v38 = vld [vmem:[%s7337_s8 + $0x260] sm:$0xff]  ;;  %v4083_v9 = vld [vmem:[%s7337_s8 + $0x268] sm:$0xff]  ;;  %v4683_v52 = vpack.c.bf16 %v4091_v1, %v4090_v34  ;;  %v4093_v34 = vld [vmem:[%s7337_s8 + $0x2b8] sm:$0xff] }
  0x64   : > { %4378 = vmatprep.mubr.f32.mxu1 %v1337_v39  ;;  %v5741_v3 = vld [vmem:[#allocation2 + $0x168] sm:$0xff]  ;;  %4666 = vmatprep.subr.bf16.mxu1 %v7348_v60  ;;  %v1342_v59 = vsel %vm1269_vm0, %v1340_v0, %v1341_v26  ;;  %v1177_v39 = vrot.slane %v5295_v12, 1  ;;  %v4092_v0 = vld [vmem:[%s7337_s8 + $0x2b0] sm:$0xff]  ;;  %v1344_v1 = vsel %vm1269_vm0, %v1341_v26, %v1343_v62  ;;  %v1180_v62 = vrot.slane %v5309_v23, 1  ;;  %v4102_v23 = vld [vmem:[%s7337_s8 + $0x300] sm:$0xff] }
  0x65   : > { %7347 = vst [vmem:[#allocation3_spill] sm:$0xff] %v5741_v3  ;;  %1520 = vmatmul.mubr.f32.gmra.mrb[10].mxu0 %v5219_v35  ;;  %v5749_v20 = vld [vmem:[#allocation2 + $0x170] sm:$0xff]  ;;  %v1345_v40 = vrot.slane %v5741_v3, 2  ;;  %v5752_v42 = vld [vmem:[#allocation2 + $0x178] sm:$0x3]  ;;  %v1176_v35 = vsel %vm1156_vm1, %v5704_v30, %v1175_v55  ;;  %4684 = vmatprep.subr.bf16.mxu0 %v4683_v52  ;;  %v4687_v26 = vpack.c.bf16 %v4093_v34, %v4092_v0 }
  0x66   : > { %7349 = vst [vmem:[#allocation4_spill] sm:$0xff] %v5749_v20  ;;  %1524 = vmatprep.mubr.f32.mxu0 %v5733_v36  ;;  %v1346_v53 = vrot.slane %v5749_v20, 2  ;;  %4379 = vmatmul.mubr.f32.gmra.mrb[26].mxu1 %v1339_v16  ;;  %v4670_v16 = vpack.c.bf16 %v4083_v9, %v4082_v38  ;;  %v1348_v55 = vrot.slane %v5752_v42, 2  ;;  %v4084_v3 = vld [vmem:[%s7337_s8 + $0x270] sm:$0xff]  ;;  %v4094_v38 = vld [vmem:[%s7337_s8 + $0x2c0] sm:$0xff]  ;;  %v4095_v9 = vld [vmem:[%s7337_s8 + $0x2c8] sm:$0xff] }
  0x67   : > { %4668 = vmatpush1.bf16.msra.mxu1 %v4667_v41  ;;  %4381 = vmatprep.mubr.f32.mxu1 %v1342_v59  ;;  %v4085_v41 = vld [vmem:[%s7337_s8 + $0x278] sm:$0xff]  ;;  %v5779_v59 = vld [vmem:[#allocation2 + $0x28] sm:$0x3]  ;;  %v4096_v34 = vld [vmem:[%s7337_s8 + $0x2d0] sm:$0xff] }
  0x68   : > { %4669 = vmatprep.subr.bf16.mxu1 %v7348_v60  ;;  %v1347_v20 = vsel %vm1269_vm0, %v1345_v40, %v1346_v53  ;;  %4686 = vmatpush3.bf16.msra.mxu0 %v4683_v52  ;;  %v1349_v40 = vsel %vm1269_vm0, %v1346_v53, %v1348_v55  ;;  %v4673_v52 = vpack.c.bf16 %v4085_v41, %v4084_v3  ;;  %v5807_v53 = vrot.slane %v5340_v44, 1  ;;  %v4105_v55 = vld [vmem:[%s7337_s8 + $0x318] sm:$0xff]  ;;  %v5826_v41 = vld [vmem:[#allocation2 + $0x40] sm:$0x3] }
  0x69   : > { %1525 = vmatmul.mubr.f32.gmra.mrb[12].mxu0 %v5258_v54  ;;  %v5783_v54 = vsel %vm1156_vm1, %v1177_v39, %v5760_v61  ;;  %v2011_v39 = vrot.slane %v5779_v59, 1  ;;  %4688 = vmatprep.subr.bf16.mxu0 %v4687_v26  ;;  %v1181_v3 = vsel %vm1156_vm1, %v5760_v61, %v1180_v62  ;;  %v4098_v62 = vld [vmem:[%s7337_s8 + $0x2e0] sm:$0xff] }
  0x6a   : > { %1529 = vmatprep.mubr.f32.mxu0 %v1176_v35  ;;  %4382 = vmatmul.mubr.f32.gmra.mrb[28].mxu1 %v1344_v1  ;;  %v4103_v35 = vld [vmem:[%s7337_s8 + $0x308] sm:$0xff]  ;;  %v4097_v1 = vld [vmem:[%s7337_s8 + $0x2d8] sm:$0xff] }
  0x6b   : > { %4671 = vmatpush1.bf16.msra.mxu1 %v4670_v16  ;;  %4384 = vmatprep.mubr.f32.mxu1 %v1347_v20  ;;  %v4691_v20 = vpack.c.bf16 %v4095_v9, %v4094_v38  ;;  %v4708_v0 = vpack.c.bf16 %v4103_v35, %v4102_v23  ;;  %v2012_v16 = vsel %vm1156_vm1, %v5576_v46, %v2011_v39  ;;  %v1185_v46 = vrot.slane %v5385_v6, 1  ;;  %v4099_v38 = vld [vmem:[%s7337_s8 + $0x2e8] sm:$0xff]  ;;  %v4106_v6 = vld [vmem:[%s7337_s8 + $0x320] sm:$0xff]  ;;  %v4100_v39 = vld [vmem:[%s7337_s8 + $0x2f0] sm:$0xff] }
  0x6c   : > { %4672 = vmatprep.subr.bf16.mxu1 %v7348_v60  ;;  %4690 = vmatpush3.bf16.msra.mxu0 %v4687_v26  ;;  %v4695_v26 = vpack.c.bf16 %v4097_v1, %v4096_v34  ;;  %v1187_v23 = vrot.slane %v5387_v10, 1  ;;  %v5855_v35 = vrot.slane %v5401_v27, 1  ;;  %v5874_v34 = vld [vmem:[#allocation2 + $0x58] sm:$0x3]  ;;  %v1190_v1 = vrot.slane %v5410_v21, 1  ;;  %v801_v21 = vld [vmem:[%s5036_s25 + $0xf0] sm:$0xff] }
  0x6d   : > { %1530 = vmatmul.mubr.f32.gmra.mrb[14].mxu0 %v5266_v57  ;;  %v1182_v57 = vrot.slane %v5338_v43, 1  ;;  %4692 = vmatprep.subr.bf16.mxu0 %v4691_v20 }
  0x6e   : > { %1534 = vmatprep.mubr.f32.mxu0 %v5783_v54  ;;  %4385 = vmatmul.mubr.f32.gmra.mrb[30].mxu1 %v1349_v40  ;;  %v4107_v40 = vld [vmem:[%s7337_s8 + $0x328] sm:$0xff] }
  0x6f   : > { %4674 = vmatpush1.bf16.msra.mxu1 %v4673_v52  ;;  %2345 = vmatprep.mubr.f32.mxu1 %v5610_v56  ;;  %v4104_v56 = vld [vmem:[%s7337_s8 + $0x310] sm:$0xff]  ;;  %v4699_v52 = vpack.c.bf16 %v4099_v38, %v4098_v62  ;;  %v5896_v62 = vld [vmem:[#allocation2 + $0x38] sm:$0xff]  ;;  %v1192_v38 = vrot.slane %v5448_v14, 1 }
  0x70   : > { %4707 = vmatprep.subr.bf16.mxu1 %v7348_v60  ;;  %4694 = vmatpush3.bf16.msra.mxu0 %v4691_v20  ;;  %v4711_v9 = vpack.c.bf16 %v4105_v55, %v4104_v56  ;;  %v4101_v20 = vld [vmem:[%s7337_s8 + $0x2f8] sm:$0xff]  ;;  %v2021_v56 = vrot.slane %v5874_v34, 1  ;;  %v4110_v55 = vld [vmem:[%s7337_s8 + $0x340] sm:$0xff] }
  0x71   : > { %1535 = vmatmul.mubr.f32.gmra.mrb[16].mxu0 %v5295_v12  ;;  %v5831_v12 = vsel %vm1156_vm1, %v1182_v57, %v5807_v53  ;;  %4696 = vmatprep.subr.bf16.mxu0 %v4695_v26  ;;  %v4108_v57 = vld [vmem:[%s7337_s8 + $0x330] sm:$0xff] }
  0x72   : > { %1539 = vmatprep.mubr.f32.mxu0 %v1181_v3  ;;  %2346 = vmatmul.mubr.f32.vlgmr.msra.gmra.mrb[32].mxu1 %v5192_v18  ;;  %v2016_v18 = vrot.slane %v5826_v41, 1 }
  0x73   : > { %4709 = vmatpush1.bf16.msra.mxu1 %v4708_v0  ;;  %2350 = vmatprep.mubr.f32.mxu1 %v2012_v16  ;;  %v4109_v0 = vld [vmem:[%s7337_s8 + $0x338] sm:$0xff] }
  0x74   : > { %4710 = vmatprep.subr.bf16.mxu1 %v7348_v60  ;;  %4698 = vmatpush3.bf16.msra.mxu0 %v4695_v26  ;;  %v2017_v3 = vsel %vm1156_vm1, %v5647_v17, %v2016_v18  ;;  %v5881_v17 = vsel %vm1156_vm1, %v1187_v23, %v5855_v35  ;;  %v4717_v16 = vpack.c.bf16 %v4109_v0, %v4108_v57  ;;  %v802_v26 = vld [vmem:[%s5036_s25 + $0xf8] sm:$0xff]  ;;  %v5942_v57 = vld [vmem:[%s7336_s7] ss:$0 sm:$0xff] }
  0x75   : > { %1540 = vmatmul.mubr.f32.gmra.mrb[18].mxu0 %v5297_v13  ;;  %v1186_v13 = vsel %vm1156_vm1, %v5807_v53, %v1185_v46  ;;  %4700 = vmatprep.subr.bf16.mxu0 %v4699_v52  ;;  %v4111_v46 = vld [vmem:[%s7337_s8 + $0x348] sm:$0xff] }
  0x76   : > { %1544 = vmatprep.mubr.f32.mxu0 %v5831_v12  ;;  %2351 = vmatmul.mubr.f32.gmra.mrb[34].mxu1 %v5194_v19  ;;  %v4714_v19 = vpack.c.bf16 %v4107_v40, %v4106_v6  ;;  %v4720_v18 = vpack.c.bf16 %v4111_v46, %v4110_v55  ;;  %v4112_v6 = vld [vmem:[%s7337_s8 + $0x350] sm:$0xff]  ;;  %v2022_v40 = vsel %vm1156_vm1, %v5704_v30, %v2021_v56  ;;  %v4135_v30 = vld [vmem:[%s7337_s8 + $0x408] sm:$0xff]  ;;  %v770_v56 = vld [vmem:[%s5067_s29 + $0xf8] sm:$0xff] }
  0x77   : > { %2355 = vmatprep.mubr.f32.mxu1 %v5671_v31  ;;  %4712 = vmatpush1.bf16.msra.mxu1 %v4711_v9  ;;  %v4703_v31 = vpack.c.bf16 %v4101_v20, %v4100_v39  ;;  %v5903_v9 = vrot.slane %v5450_v15, 1  ;;  %v5929_v39 = vld [vmem:[#allocation2 + $0x70] sm:$0x3]  ;;  %v5931_v20 = vld [vmem:[#allocation2 + $0x48] sm:$0xff]  ;;  %v4114_v46 = vld [vmem:[%s7337_s8 + $0x360] sm:$0xff] }
  0x78   : > { %4713 = vmatprep.subr.bf16.mxu1 %v7348_v60  ;;  %4702 = vmatpush3.bf16.msra.mxu0 %v4699_v52  ;;  %v4113_v52 = vld [vmem:[%s7337_s8 + $0x358] sm:$0xff] }
  0x79   : > { %1545 = vmatmul.mubr.f32.gmra.mrb[20].mxu0 %v5338_v43  ;;  %v5876_v43 = vld [vmem:[#allocation2 + $0x30] sm:$0xff]  ;;  %4704 = vmatprep.subr.bf16.mxu0 %v4703_v31 }
  0x7a   : > { %1549 = vmatprep.mubr.f32.mxu0 %v1186_v13  ;;  %2356 = vmatmul.mubr.f32.gmra.mrb[36].mxu1 %v5876_v43 }
  0x7b   : > { %2360 = vmatprep.mubr.f32.mxu1 %v2017_v3  ;;  %4715 = vmatpush1.bf16.msra.mxu1 %v4714_v19  ;;  %v5936_v19 = vsel %vm1156_vm1, %v1192_v38, %v5903_v9  ;;  %v1195_v3 = vrot.slane %v5468_v5, 1  ;;  %v2026_v5 = vrot.slane %v5929_v39, 1  ;;  %v1197_v38 = vrot.slane %v5513_v29, 1 }
  0x7c   : > { %4716 = vmatprep.subr.bf16.mxu1 %v7348_v60  ;;  %4706 = vmatpush3.bf16.msra.mxu0 %v4703_v31 }
  0x7d   : > { %1550 = vmatmul.mubr.f32.gmra.mrb[22].mxu0 %v5340_v44  ;;  %v1191_v44 = vsel %vm1156_vm1, %v5855_v35, %v1190_v1  ;;  %v4723_v1 = vpack.c.bf16 %v4113_v52, %v4112_v6  ;;  %v5968_v6 = vrot.slane %v5519_v58, 1 }
  0x7e   : > { %1554 = vmatprep.mubr.f32.mxu0 %v5881_v17  ;;  %2361 = vmatmul.mubr.f32.gmra.mrb[38].mxu1 %v5896_v62 }
  0x7f   : > { %2365 = vmatprep.mubr.f32.mxu1 %v5733_v36  ;;  %4718 = vmatpush1.bf16.msra.mxu1 %v4717_v16  ;;  %v5919_v36 = vld [vmem:[%s7335_s6] ss:$0 sm:$0xff]  ;;  %v769_v16 = vld [vmem:[%s5067_s29 + $0xf0] sm:$0xff] }
  0x80   : > { %4719 = vmatprep.subr.bf16.mxu1 %v7348_v60  ;;  %v839_v13 = vmul.f32 %v5919_v36, %v801_v21  ;;  %v840_v23 = vmul.f32 %v5919_v36, %v802_v26  ;;  %v4115_v21 = vld [vmem:[%s7337_s8 + $0x368] sm:$0xff] }
  0x81   : > { %1555 = vmatmul.mubr.f32.gmra.mrb[24].mxu0 %v5387_v10  ;;  %v4134_v10 = vld [vmem:[%s7337_s8 + $0x400] sm:$0xff] }
  0x82   : > { %1559 = vmatprep.mubr.f32.mxu0 %v1191_v44  ;;  %2366 = vmatmul.mubr.f32.gmra.mrb[40].mxu1 %v5931_v20  ;;  %v877_v0 = vadd.f32 %v5942_v57, %v839_v13  ;;  %v878_v31 = vadd.f32 %v5942_v57, %v840_v23  ;;  %v5948_v55 = vpack.c.bf16 %v4135_v30, %v4134_v10  ;;  %v4116_v10 = vld [vmem:[%s7337_s8 + $0x370] sm:$0xff]  ;;  %v4117_v30 = vld [vmem:[%s7337_s8 + $0x378] sm:$0xff] }
  0x83   : > { %2370 = vmatprep.mubr.f32.mxu1 %v2022_v40  ;;  %4721 = vmatpush1.bf16.msra.mxu1 %v4720_v18  ;;  %v1196_v18 = vsel %vm1156_vm1, %v5903_v9, %v1195_v3  ;;  %v4726_v13 = vpack.c.bf16 %v4115_v21, %v4114_v46  ;;  %v2027_v23 = vsel %vm1156_vm1, %v5760_v61, %v2026_v5  ;;  %v5983_v3 = vld [vmem:[#allocation2 + $0x60] sm:$0xff]  ;;  %v1202_v5 = vrot.slane %v5544_v2, 1 }
  0x84   : > { %4722 = vmatprep.subr.bf16.mxu1 %v7348_v60  ;;  %v909_v26 = vmax.f32 %v877_v0, 0.0  ;;  %v910_v44 = vmax.f32 %v878_v31, 0.0  ;;  %4756 = vmatprep.subr.bf16.mxu0 %v5948_v55  ;;  %v5988_v61 = vsel %vm1156_vm1, %v1197_v38, %v5968_v6  ;;  %v1200_v0 = vrot.slane %v5522_v25, 1  ;;  %v6001_v25 = vld [vmem:[#allocation2 + $0x68] sm:$0xff]  ;;  %v4121_v38 = vld [vmem:[%s7337_s8 + $0x398] sm:$0xff] }
  0x85   : > { %1560 = vmatmul.mubr.f32.gmra.mrb[26].mxu0 %v5401_v27  ;;  %v5962_v27 = vld [vmem:[#allocation2 + $0x50] sm:$0xff]  ;;  %v4729_v31 = vpack.c.bf16 %v4117_v30, %v4116_v10  ;;  %v6008_v46 = vrot.slane %v5546_v48, 1  ;;  %v4123_v10 = vld [vmem:[%s7337_s8 + $0x3a8] sm:$0xff] }
  0x86   : > { %1564 = vmatprep.mubr.f32.mxu0 %v5936_v19  ;;  %2371 = vmatmul.mubr.f32.gmra.mrb[42].mxu1 %v5962_v27  ;;  %v941_v40 = vadd.f32 %v909_v26, %v769_v16  ;;  %v942_v52 = vadd.f32 %v910_v44, %v770_v56  ;;  %v4118_v16 = vld [vmem:[%s7337_s8 + $0x380] sm:$0xff]  ;;  %v4119_v56 = vld [vmem:[%s7337_s8 + $0x388] sm:$0xff]  ;;  %v4120_v44 = vld [vmem:[%s7337_s8 + $0x390] sm:$0xff] }
  0x87   : > { %2375 = vmatprep.mubr.f32.mxu1 %v5783_v54  ;;  %4724 = vmatpush1.bf16.msra.mxu1 %v4723_v1  ;;  %v5981_v54 = vld [vmem:[#allocation2 + $0x88] sm:$0x3]  ;;  %v4732_v21 = vpack.c.bf16 %v4119_v56, %v4118_v16  ;;  %v4124_v56 = vld [vmem:[%s7337_s8 + $0x3b0] sm:$0xff] }
  0x88   : > { %4725 = vmatprep.subr.bf16.mxu1 %v7348_v60  ;;  %1012 = vst [vmem:[#allocation2 + $0x181] sm:$0xff] %v941_v40  ;;  %1013 = vst [vmem:[#allocation2 + $0x189] sm:$0xff] %v942_v52  ;;  %v2031_v1 = vrot.slane %v5981_v54, 1  ;;  %v1205_v40 = vrot.slane %v5548_v50, 1  ;;  %v4735_v52 = vpack.c.bf16 %v4121_v38, %v4120_v44  ;;  %v6041_v50 = vld [vmem:[#allocation2 + $0x80] sm:$0xff] }
  0x89   : > { %1565 = vmatmul.mubr.f32.gmra.mrb[28].mxu0 %v5448_v14  ;;  %v4126_v38 = vld [vmem:[%s7337_s8 + $0x3c0] sm:$0xff] }
  0x8a   : > { %1569 = vmatprep.mubr.f32.mxu0 %v1196_v18  ;;  %2376 = vmatmul.mubr.f32.gmra.mrb[44].mxu1 %v5983_v3  ;;  %v2032_v26 = vsel %vm1156_vm1, %v5807_v53, %v2031_v1  ;;  %v6021_v18 = vld [vmem:[#allocation2 + $0xa0] sm:$0x3]  ;;  %v6028_v53 = vsel %vm1156_vm1, %v1202_v5, %v6008_v46  ;;  %v1206_v30 = vsel %vm1156_vm1, %v6008_v46, %v1205_v40  ;;  %v6061_v5 = vld [vmem:[#allocation2 + $0xb8] sm:$0x3]  ;;  %v4127_v40 = vld [vmem:[%s7337_s8 + $0x3c8] sm:$0xff] }
  0x8b   : > { %2380 = vmatprep.mubr.f32.mxu1 %v2027_v23  ;;  %4727 = vmatpush1.bf16.msra.mxu1 %v4726_v13  ;;  %v2036_v13 = vrot.slane %v6021_v18, 1  ;;  %v4122_v23 = vld [vmem:[%s7337_s8 + $0x3a0] sm:$0xff]  ;;  %v2041_v44 = vrot.slane %v6061_v5, 1 }
  0x8c   : > { %4728 = vmatprep.subr.bf16.mxu1 %v7348_v60  ;;  %v4738_v1 = vpack.c.bf16 %v4123_v10, %v4122_v23  ;;  %v6088_v23 = vrot.slane %v5624_v33, 1  ;;  %v4744_v10 = vpack.c.bf16 %v4127_v40, %v4126_v38  ;;  %v6126_v38 = vrot.slane %v5649_v32, 1 }
  0x8d   : > { %1570 = vmatmul.mubr.f32.gmra.mrb[30].mxu0 %v5450_v15  ;;  %v1201_v15 = vsel %vm1156_vm1, %v5968_v6, %v1200_v0  ;;  %v1207_v0 = vrot.slane %v5580_v49, 1  ;;  %v2037_v16 = vsel %vm1156_vm1, %v5855_v35, %v2036_v13  ;;  %v1212_v13 = vrot.slane %v5606_v45, 1 }
  0x8e   : > { %1574 = vmatprep.mubr.f32.mxu0 %v5988_v61  ;;  %2381 = vmatmul.mubr.f32.gmra.mrb[46].mxu1 %v6001_v25 }
  0x8f   : > { %2385 = vmatprep.mubr.f32.mxu1 %v5831_v12  ;;  %4730 = vmatpush1.bf16.msra.mxu1 %v4729_v31  ;;  %v6023_v12 = vld [vmem:[#allocation2 + $0x78] sm:$0xff]  ;;  %v6048_v31 = vrot.slane %v5587_v11, 1 }
  0x90   : > { %4731 = vmatprep.subr.bf16.mxu1 %v7348_v60 }
  0x91   : > { %1575 = vmatmul.mubr.f32.gmra.mrb[32].mxu0 %v5513_v29  ;;  %v6068_v35 = vsel %vm1156_vm1, %v1207_v0, %v6048_v31  ;;  %v4128_v0 = vld [vmem:[%s7337_s8 + $0x3d0] sm:$0xff] }
  0x92   : > { %1579 = vmatprep.mubr.f32.mxu0 %v1201_v15  ;;  %2386 = vmatmul.mubr.f32.gmra.mrb[48].mxu1 %v6023_v12  ;;  %v4125_v15 = vld [vmem:[%s7337_s8 + $0x3b8] sm:$0xff] }
  0x93   : > { %2390 = vmatprep.mubr.f32.mxu1 %v2032_v26  ;;  %4733 = vmatpush1.bf16.msra.mxu1 %v4732_v21  ;;  %v1210_v21 = vrot.slane %v5590_v28, 1  ;;  %v4741_v26 = vpack.c.bf16 %v4125_v15, %v4124_v56  ;;  %v6081_v28 = vld [vmem:[#allocation2 + $0x98] sm:$0xff] }
  0x94   : > { %4734 = vmatprep.subr.bf16.mxu1 %v7348_v60 }
  0x95   : > { %1580 = vmatmul.mubr.f32.gmra.mrb[34].mxu0 %v5519_v58 }
  0x96   : > { %1584 = vmatprep.mubr.f32.mxu0 %v6028_v53  ;;  %2391 = vmatmul.mubr.f32.gmra.mrb[50].mxu1 %v6041_v50 }
  0x97   : > { %2395 = vmatprep.mubr.f32.mxu1 %v5881_v17  ;;  %4736 = vmatpush1.bf16.msra.mxu1 %v4735_v52  ;;  %v6063_v17 = vld [vmem:[#allocation2 + $0x90] sm:$0xff]  ;;  %v1211_v52 = vsel %vm1156_vm1, %v6048_v31, %v1210_v21  ;;  %v4130_v21 = vld [vmem:[%s7337_s8 + $0x3e0] sm:$0xff] }
  0x98   : > { %4737 = vmatprep.subr.bf16.mxu1 %v7348_v60 }
  0x99   : > { %1585 = vmatmul.mubr.f32.gmra.mrb[36].mxu0 %v5544_v2 }
  0x9a   : > { %1589 = vmatprep.mubr.f32.mxu0 %v1206_v30  ;;  %2396 = vmatmul.mubr.f32.gmra.mrb[52].mxu1 %v6063_v17  ;;  %v2042_v30 = vsel %vm1156_vm1, %v5903_v9, %v2041_v44  ;;  %v1215_v9 = vrot.slane %v5633_v37, 1  ;;  %v6119_v37 = vld [vmem:[#allocation2 + $0xb0] sm:$0xff]  ;;  %v1217_v44 = vrot.slane %v5639_v4, 1 }
  0x9b   : > { %2400 = vmatprep.mubr.f32.mxu1 %v2037_v16  ;;  %4739 = vmatpush1.bf16.msra.mxu1 %v4738_v1  ;;  %v4129_v1 = vld [vmem:[%s7337_s8 + $0x3d8] sm:$0xff]  ;;  %v6101_v16 = vld [vmem:[#allocation2 + $0xd0] sm:$0x3] }
  0x9c   : > { %4740 = vmatprep.subr.bf16.mxu1 %v7348_v60  ;;  %v4747_v56 = vpack.c.bf16 %v4129_v1, %v4128_v0  ;;  %v2046_v15 = vrot.slane %v6101_v16, 1 }
  0x9d   : > { %1590 = vmatmul.mubr.f32.gmra.mrb[38].mxu0 %v5546_v48 }
  0x9e   : > { %1594 = vmatprep.mubr.f32.mxu0 %v6068_v35  ;;  %2401 = vmatmul.mubr.f32.gmra.mrb[54].mxu1 %v6081_v28 }
  0x9f   : > { %2405 = vmatprep.mubr.f32.mxu1 %v5936_v19  ;;  %4742 = vmatpush1.bf16.msra.mxu1 %v4741_v26  ;;  %v6106_v19 = vsel %vm1156_vm1, %v1212_v13, %v6088_v23  ;;  %v1216_v26 = vsel %vm1156_vm1, %v6088_v23, %v1215_v9  ;;  %v4132_v13 = vld [vmem:[%s7337_s8 + $0x3f0] sm:$0xff]  ;;  %v1222_v9 = vrot.slane %v5674_v63, 1 }
  0xa0   : > { %4743 = vmatprep.subr.bf16.mxu1 %v7348_v60 }
  0xa1   : > { %1595 = vmatmul.mubr.f32.gmra.mrb[40].mxu0 %v5580_v49 }
  0xa2   : > { %1599 = vmatprep.mubr.f32.mxu0 %v1211_v52  ;;  %2406 = vmatmul.mubr.f32.gmra.mrb[56].mxu1 %v5448_v14  ;;  %v4131_v14 = vld [vmem:[%s7337_s8 + $0x3e8] sm:$0xff]  ;;  %v2047_v52 = vsel %vm1156_vm1, %v5968_v6, %v2046_v15  ;;  %v1220_v6 = vrot.slane %v5666_v47, 1  ;;  %v6156_v47 = vrot.slane %v5676_v51, 1  ;;  %v1225_v15 = vrot.slane %v5697_v22, 1 }
  0xa3   : > { %2410 = vmatprep.mubr.f32.mxu1 %v2042_v30  ;;  %4745 = vmatpush1.bf16.msra.mxu1 %v4744_v10  ;;  %v4750_v40 = vpack.c.bf16 %v4131_v14, %v4130_v21  ;;  %v4133_v10 = vld [vmem:[%s7337_s8 + $0x3f8] sm:$0xff]  ;;  %v6139_v30 = vld [vmem:[#allocation2 + $0xe8] sm:$0x3]  ;;  %v6178_v21 = vrot.slane %v5719_v24, 1 }
  0xa4   : > { %4746 = vmatprep.subr.bf16.mxu1 %v7348_v60  ;;  %v4753_v0 = vpack.c.bf16 %v4133_v10, %v4132_v13  ;;  %v2051_v1 = vrot.slane %v6139_v30, 1  ;;  %v6184_v14 = vld [vmem:[#allocation2 + $0x118] sm:$0x3]  ;;  %v6206_v13 = vld [vmem:[#allocation2 + $0x130] sm:$0x3]  ;;  %v1235_v10 = vrot.slane %v5752_v42, 1 }
  0xa5   : > { %1600 = vmatmul.mubr.f32.gmra.mrb[42].mxu0 %v5587_v11 }
  0xa6   : > { %1604 = vmatprep.mubr.f32.mxu0 %v6106_v19  ;;  %2411 = vmatmul.mubr.f32.gmra.mrb[58].mxu1 %v6119_v37 }
  0xa7   : > { %2415 = vmatprep.mubr.f32.mxu1 %v5988_v61  ;;  %4748 = vmatpush1.bf16.msra.mxu1 %v4747_v56  ;;  %v6144_v61 = vsel %vm1156_vm1, %v1217_v44, %v6126_v38  ;;  %v6162_v56 = vld [vmem:[#allocation2 + $0x100] sm:$0x3]  ;;  %v7350_v44 = vld [vmem:[#allocation3_spill] sm:$0xff] }
  0xa8   : > { %4749 = vmatprep.subr.bf16.mxu1 %v7348_v60 }
  0xa9   : > { %1605 = vmatmul.mubr.f32.gmra.mrb[44].mxu0 %v5606_v45 }
  0xaa   : > { %1609 = vmatprep.mubr.f32.mxu0 %v1216_v26  ;;  %2416 = vmatmul.mubr.f32.gmra.mrb[60].mxu1 %v5513_v29  ;;  %v1221_v29 = vsel %vm1156_vm1, %v6126_v38, %v1220_v6  ;;  %v1230_v26 = vrot.slane %v5722_v7, 1  ;;  %v4826_v6 = vld [vmem:[#allocation2 + $0x18] sm:$0xff] }
  0xab   : > { %2420 = vmatprep.mubr.f32.mxu1 %v2047_v52  ;;  %4751 = vmatpush1.bf16.msra.mxu1 %v4750_v40  ;;  %v7351_v40 = vld [vmem:[#allocation4_spill] sm:$0xff] }
  0xac   : > { %4752 = vmatprep.subr.bf16.mxu1 %v7348_v60  ;;  %v2052_v60 = vsel %vm1156_vm1, %v6008_v46, %v2051_v1  ;;  %v1226_v46 = vsel %vm1156_vm1, %v6156_v47, %v1225_v15  ;;  %v6200_v52 = vrot.slane %v7351_v40, 1  ;;  %v2126_v15 = vrot.slane %v5896_v62, 2 }
  0xad   : > { %1610 = vmatmul.mubr.f32.gmra.mrb[46].mxu0 %v5624_v33 }
  0xae   : > { %1614 = vmatprep.mubr.f32.mxu0 %v6144_v61  ;;  %2421 = vmatmul.mubr.f32.gmra.mrb[62].mxu1 %v5519_v58  ;;  %v6167_v58 = vsel %vm1156_vm1, %v1222_v9, %v6156_v47  ;;  %v6225_v9 = vld [vmem:[#allocation2 + $0x148] sm:$0x3] }
  0xaf   : > { %2425 = vmatprep.mubr.f32.mxu1 %v6028_v53  ;;  %4754 = vmatpush1.bf16.msra.mxu1 %v4753_v0  ;;  %v2056_v53 = vrot.slane %v6162_v56, 1  ;;  %v4827_v0 = vld [vmem:[#allocation2 + $0x20] sm:$0xff] }
  0xb0   : > { %v2121_v1 = vrot.slane %v4827_v0, 2  ;;  %v2141_v0 = vrot.slane %v6041_v50, 2 }
  0xb1   : > { %1615 = vmatmul.mubr.f32.gmra.mrb[48].mxu0 %v5639_v4  ;;  %v2057_v22 = vsel %vm1156_vm1, %v6048_v31, %v2056_v53  ;;  %v1231_v31 = vsel %vm1156_vm1, %v6178_v21, %v1230_v26  ;;  %v2130_v53 = vrot.slane %v5931_v20, 2  ;;  %v6257_v26 = vld [vmem:[#allocation2 + $0x160] sm:$0x3] }
  0xb2   : > { %1619 = vmatprep.mubr.f32.mxu0 %v1221_v29  ;;  %2426 = vmatmul.mubr.f32.gmra.mrb[64].mxu1 %v5544_v2  ;;  %v1227_v2 = vrot.slane %v5711_v8, 1  ;;  %v2123_v29 = vrot.slane %v5779_v59, 2  ;;  %v4137_v59 = vld [vmem:[%s7337_s8 + $0x418] sm:$0xff] }
  0xb3   : > { %2430 = vmatprep.mubr.f32.mxu1 %v2052_v60  ;;  %v2125_v60 = vrot.slane %v5876_v43, 2  ;;  %v2128_v43 = vrot.slane %v5826_v41, 2  ;;  %v4139_v41 = vld [vmem:[%s7337_s8 + $0x428] sm:$0xff] }
  0xb5   : > { %1620 = vmatmul.mubr.f32.gmra.mrb[50].mxu0 %v5649_v32  ;;  %v2127_v62 = vsel %vm1269_vm0, %v2125_v60, %v2126_v15  ;;  %v2129_v20 = vsel %vm1269_vm0, %v2126_v15, %v2128_v43  ;;  %v6302_v60 = vld [vmem:[#allocation2 + $0x178] sm:$0x3] }
  0xb6   : > { %1624 = vmatprep.mubr.f32.mxu0 %v6167_v58  ;;  %2431 = vmatmul.mubr.f32.gmra.mrb[66].mxu1 %v5546_v48  ;;  %v6189_v48 = vsel %vm1156_vm1, %v1227_v2, %v6178_v21  ;;  %v4145_v43 = vld [vmem:[%s7337_s8 + $0x458] sm:$0xff] }
  0xb7   : > { %2435 = vmatprep.mubr.f32.mxu1 %v6068_v35  ;;  %v2061_v35 = vrot.slane %v6184_v14, 1 }
  0xb9   : > { %1625 = vmatmul.mubr.f32.gmra.mrb[52].mxu0 %v5674_v63  ;;  %v2062_v7 = vsel %vm1156_vm1, %v6088_v23, %v2061_v35  ;;  %v1236_v23 = vsel %vm1156_vm1, %v6200_v52, %v1235_v10  ;;  %v2136_v35 = vrot.slane %v6001_v25, 2 }
  0xba   : > { %1629 = vmatprep.mubr.f32.mxu0 %v1226_v46  ;;  %2436 = vmatmul.mubr.f32.gmra.mrb[68].mxu1 %v5580_v49  ;;  %v1232_v49 = vrot.slane %v7350_v44, 1  ;;  %v2131_v46 = vrot.slane %v5962_v27, 2  ;;  %v2133_v27 = vrot.slane %v5874_v34, 2  ;;  %v957_v34 = vld [vmem:[%s669_s15] sm:$0xff] }
  0xbb   : > { %2440 = vmatprep.mubr.f32.mxu1 %v2057_v22  ;;  %v4138_v22 = vld [vmem:[%s7337_s8 + $0x420] sm:$0xff] }
  0xbc   : > { %v2134_v25 = vsel %vm1269_vm0, %v2131_v46, %v2133_v27 }
  0xbd   : > { %1630 = vmatmul.mubr.f32.gmra.mrb[54].mxu0 %v5676_v51 }
  0xbe   : > { %1634 = vmatprep.mubr.f32.mxu0 %v6189_v48  ;;  %2441 = vmatmul.mubr.f32.gmra.mrb[70].mxu1 %v5587_v11  ;;  %v6211_v11 = vsel %vm1156_vm1, %v1232_v49, %v6200_v52  ;;  %v958_v49 = vld [vmem:[%s669_s15 + $0x8] sm:$0xff]  ;;  %s7053_s15 = scalar_lea.vmem %s7339_s10, %s4996_s30  ;;  %s4050_s30 = sshll.u32 %s7373_s17, 1 }
  0xbf   : > { %2445 = vmatprep.mubr.f32.mxu1 %v6106_v19  ;;  %v2066_v19 = vrot.slane %v6206_v13, 1  ;;  %v960_v10 = vmul.f32 %v5919_v36, %v958_v49  ;;  %v4829_v49 = vld [vmem:[#allocation2 + $0xc0] sm:$0xff]  ;;  %s736_s21 = scalar_lea.vmem %s7340_s11, %s4050_s30 }
  0xc1   : > { %1635 = vmatmul.mubr.f32.gmra.mrb[56].mxu0 %v5711_v8  ;;  %v2067_v42 = vsel %vm1156_vm1, %v6126_v38, %v2066_v19  ;;  %v2124_v38 = vsel %vm1269_vm0, %v2121_v1, %v2123_v29  ;;  %v2138_v19 = vrot.slane %v5929_v39, 2  ;;  %v4142_v39 = vld [vmem:[%s7337_s8 + $0x440] sm:$0xff] }
  0xc2   : > { %1639 = vmatprep.mubr.f32.mxu0 %v1231_v31  ;;  %2446 = vmatmul.mubr.f32.gmra.mrb[72].mxu1 %v5606_v45  ;;  %v2120_v45 = vrot.slane %v4826_v6, 2  ;;  %v4763_v31 = vpack.c.bf16 %v4139_v41, %v4138_v22  ;;  %v962_v6 = vadd.f32 %v5942_v57, %v960_v10  ;;  %v4828_v41 = vld [vmem:[#allocation2 + $0xa8] sm:$0xff]  ;;  %v4148_v10 = vld [vmem:[%s7337_s8 + $0x470] sm:$0xff] }
  0xc3   : > { %2450 = vmatprep.mubr.f32.mxu1 %v2062_v7  ;;  %v4141_v7 = vld [vmem:[%s7337_s8 + $0x438] sm:$0xff]  ;;  %v2139_v29 = vsel %vm1269_vm0, %v2136_v35, %v2138_v19  ;;  %v2158_v19 = vrot.slane %v6101_v16, 2 }
  0xc5   : > { %1640 = vmatmul.mubr.f32.gmra.mrb[58].mxu0 %v5719_v24 }
  0xc6   : > { %1644 = vmatprep.mubr.f32.mxu0 %v6211_v11  ;;  %2451 = vmatmul.mubr.f32.gmra.mrb[74].mxu1 %v5624_v33  ;;  %v2122_v33 = vsel %vm1269_vm0, %v2120_v45, %v2121_v1 }
  0xc7   : > { %2455 = vmatprep.mubr.f32.mxu1 %v6144_v61  ;;  %v4136_v61 = vld [vmem:[%s7337_s8 + $0x410] sm:$0xff] }
  0xc8   : > { %v4759_v2 = vpack.c.bf16 %v4137_v59, %v4136_v61 }
  0xc9   : > { %1645 = vmatmul.mubr.f32.gmra.mrb[60].mxu0 %v7350_v44 }
  0xca   : > { %1649 = vmatprep.mubr.f32.mxu0 %v1236_v23  ;;  %2456 = vmatmul.mubr.f32.gmra.mrb[76].mxu1 %v5639_v4  ;;  %v2071_v4 = vrot.slane %v6225_v9, 1 }
  0xcb   : > { %2460 = vmatprep.mubr.f32.mxu1 %v2067_v42  ;;  %v956_v42 = vld [vmem:[%s714_s12 + $0x8] sm:$0xff] }
  0xcd   : > { %1650 = vmatmul.mubr.f32.gmra.mrb[62].mxu0 %v7351_v40 }
  0xce   : > { %4419 = vmatprep.mubr.f32.mxu0 %v2122_v33  ;;  %2461 = vmatmul.mubr.f32.gmra.mrb[78].mxu1 %v5649_v32  ;;  %v2072_v32 = vsel %vm1156_vm1, %v6156_v47, %v2071_v4  ;;  %v2135_v47 = vrot.slane %v5983_v3, 2  ;;  %v2076_v3 = vrot.slane %v6257_v26, 1  ;;  %v2143_v33 = vrot.slane %v5981_v54, 2  ;;  %v4144_v54 = vld [vmem:[%s7337_s8 + $0x450] sm:$0xff] }
  0xcf   : > { %2465 = vmatprep.mubr.f32.mxu1 %v6167_v58  ;;  %v2132_v58 = vsel %vm1269_vm0, %v2130_v53, %v2131_v46  ;;  %v2145_v4 = vrot.slane %v6063_v17, 2  ;;  %v6317_v46 = vld [vmem:[#allocation2 + $0x180] sm:$0xff]  ;;  %v4775_v27 = vpack.c.bf16 %v4145_v43, %v4144_v54  ;;  %v6379_v54 = vld [vmem:[#allocation2 + $0x50] sm:$0xff] }
  0xd0   : > { %v2137_v45 = vsel %vm1269_vm0, %v2135_v47, %v2136_v35  ;;  %v2077_v50 = vsel %vm1156_vm1, %v6178_v21, %v2076_v3  ;;  %v2146_v21 = vrot.slane %v6081_v28, 2  ;;  %v2144_v17 = vsel %vm1269_vm0, %v2141_v0, %v2143_v33 }
  0xd1   : > { %4420 = vmatmul.mubr.f32.vlgmr.msra.gmra.mrb[64].mxu0 %v2124_v38  ;;  %v2148_v28 = vrot.slane %v6021_v18, 2  ;;  %v4146_v18 = vld [vmem:[%s7337_s8 + $0x460] sm:$0xff]  ;;  %v2083_v47 = vrot.slane %v6317_v46, 1  ;;  %v2153_v35 = vrot.slane %v6061_v5, 2  ;;  %v4149_v5 = vld [vmem:[%s7337_s8 + $0x478] sm:$0xff] }
  0xd2   : > { %4422 = vmatprep.mubr.f32.mxu0 %v2127_v62  ;;  %4758 = vmatpush3.bf16.msra.mxu0 %v5948_v55  ;;  %v4140_v55 = vld [vmem:[%s7337_s8 + $0x430] sm:$0xff]  ;;  %v2147_v22 = vsel %vm1269_vm0, %v2145_v4, %v2146_v21 }
  0xd3   : > { %2466 = vmatmul.mubr.f32.gmra.mrb[80].mxu1 %v5674_v63  ;;  %4760 = vmatprep.subr.bf16.mxu0 %v4759_v2  ;;  %v959_v63 = vmul.f32 %v5919_v36, %v957_v34  ;;  %v2140_v36 = vrot.slane %v6023_v12, 2  ;;  %v4767_v1 = vpack.c.bf16 %v4141_v7, %v4140_v55  ;;  %v964_v12 = vmax.f32 %v962_v6, 0.0  ;;  %v6358_v6 = vld [vmem:[#allocation2 + $0x38] sm:$0xff] }
  0xd4   : > { %2470 = vmatprep.mubr.f32.mxu1 %v2072_v32  ;;  %v2150_v32 = vrot.slane %v4828_v41, 2  ;;  %v2155_v55 = vrot.slane %v4829_v49, 2  ;;  %v6396_v49 = vld [vmem:[#allocation2 + $0x60] sm:$0xff] }
  0xd5   : > { %4423 = vmatmul.mubr.f32.gmra.mrb[66].mxu0 %v2129_v20  ;;  %v961_v23 = vadd.f32 %v5942_v57, %v959_v63  ;;  %v4143_v57 = vld [vmem:[%s7337_s8 + $0x448] sm:$0xff]  ;;  %v966_v61 = vadd.f32 %v964_v12, %v956_v42  ;;  %v2142_v59 = vsel %vm1269_vm0, %v2140_v36, %v2141_v0  ;;  %v2151_v20 = vrot.slane %v6119_v37, 2  ;;  %v4831_v36 = vld [vmem:[#allocation2 + $0xd8] sm:$0xff] }
  0xd6   : > { %4425 = vmatprep.mubr.f32.mxu0 %v2132_v58  ;;  %4762 = vmatpush3.bf16.msra.mxu0 %v4759_v2  ;;  %v4771_v38 = vpack.c.bf16 %v4143_v57, %v4142_v39  ;;  %v6319_v2 = vld [vmem:[#allocation2 + $0x188] sm:$0xff]  ;;  %v2160_v0 = vrot.slane %v4831_v36, 2  ;;  %v4783_v57 = vpack.c.bf16 %v4149_v5, %v4148_v10  ;;  %v2861_v12 = vrot.slane %v6358_v6, 1  ;;  %v4840_v10 = vld [vmem:[#allocation2 + $0x140] sm:$0xff]  ;;  %v6407_v36 = vld [vmem:[#allocation2 + $0x70] sm:$0x3] }
  0xd7   : > { %2471 = vmatmul.mubr.f32.gmra.mrb[82].mxu1 %v5676_v51  ;;  %4764 = vmatprep.subr.bf16.mxu0 %v4763_v31  ;;  %v963_v51 = vmax.f32 %v961_v23, 0.0  ;;  %v978_v53 = vmul.f32 0.0, %v966_v61  ;;  %v4147_v58 = vld [vmem:[%s7337_s8 + $0x468] sm:$0xff]  ;;  %v6335_v37 = vrot.slane %v6319_v2, 1  ;;  %v2152_v34 = vsel %vm1269_vm0, %v2150_v32, %v2151_v20  ;;  %v6356_v23 = vld [vmem:[#allocation2 + $0x30] sm:$0xff] }
  0xd8   : > { %2475 = vmatprep.mubr.f32.mxu1 %v6189_v48  ;;  %v955_v48 = vld [vmem:[%s714_s12] sm:$0xff]  ;;  %v4779_v63 = vpack.c.bf16 %v4147_v58, %v4146_v18  ;;  %v2173_v32 = vrot.slane %v6184_v14, 2  ;;  %v2178_v14 = vrot.slane %v6206_v13, 2  ;;  %v2181_v5 = vrot.slane %v4840_v10, 2 }
  0xd9   : > { %4426 = vmatmul.mubr.f32.gmra.mrb[68].mxu0 %v2134_v25  ;;  %v965_v15 = vadd.f32 %v963_v51, %v955_v48  ;;  %1016 = vst [vmem:[#allocation2 + $0x1a1] sm:$0xff] %v978_v53  ;;  %v2154_v25 = vsel %vm1269_vm0, %v2151_v20, %v2153_v35  ;;  %v2860_v51 = vrot.slane %v6356_v23, 1  ;;  %v6369_v48 = vld [vmem:[#allocation2 + $0x40] sm:$0x3]  ;;  %v6388_v20 = vld [vmem:[#allocation2 + $0x58] sm:$0x3] }
  0xda   : > { %4428 = vmatprep.mubr.f32.mxu0 %v2137_v45  ;;  %4766 = vmatpush3.bf16.msra.mxu0 %v4763_v31  ;;  %v6339_v31 = vld [vmem:[#allocation2 + $0x190] sm:$0x3]  ;;  %v2863_v4 = vrot.slane %v6369_v48, 1  ;;  %v4837_v18 = vld [vmem:[#allocation2 + $0x120] sm:$0xff]  ;;  %v2868_v35 = vrot.slane %v6388_v20, 1  ;;  %v2978_v10 = vrot.slane %v6379_v54, 2 }
  0xdb   : > { %2476 = vmatmul.mubr.f32.gmra.mrb[84].mxu1 %v5711_v8  ;;  %4768 = vmatprep.subr.bf16.mxu0 %v4767_v1  ;;  %v977_v62 = vmul.f32 0.0, %v965_v15  ;;  %v2081_v8 = vrot.slane %v6302_v60, 1  ;;  %v2086_v3 = vrot.slane %v6339_v31, 1  ;;  %v4834_v15 = vld [vmem:[#allocation2 + $0xf8] sm:$0xff]  ;;  %v2175_v58 = vrot.slane %v4837_v18, 2 }
  0xdc   : > { %2480 = vmatprep.mubr.f32.mxu1 %v2077_v50  ;;  %v2163_v50 = vrot.slane %v6139_v30, 2  ;;  %v2166_v61 = vrot.slane %v4834_v15, 2 }
  0xdd   : > { %4429 = vmatmul.mubr.f32.gmra.mrb[70].mxu0 %v2139_v29  ;;  %1015 = vst [vmem:[#allocation2 + $0x199] sm:$0xff] %v977_v62  ;;  %v2087_v16 = vsel %vm1156_vm1, %v6335_v37, %v2086_v3  ;;  %v4833_v29 = vld [vmem:[#allocation2 + $0xf0] sm:$0xff]  ;;  %v4835_v62 = vld [vmem:[#allocation2 + $0x108] sm:$0xff] }
  0xde   : > { %4431 = vmatprep.mubr.f32.mxu0 %v2142_v59  ;;  %4770 = vmatpush3.bf16.msra.mxu0 %v4767_v1  ;;  %v4832_v1 = vld [vmem:[#allocation2 + $0xe0] sm:$0xff]  ;;  %v2165_v33 = vrot.slane %v4833_v29, 2  ;;  %v2862_v59 = vsel %vm1156_vm1, %v2860_v51, %v2861_v12  ;;  %v2170_v53 = vrot.slane %v4835_v62, 2  ;;  %v6426_v62 = vld [vmem:[#allocation2 + $0x88] sm:$0x3] }
  0xdf   : > { %2481 = vmatmul.mubr.f32.gmra.mrb[86].mxu1 %v5719_v24  ;;  %4772 = vmatprep.subr.bf16.mxu0 %v4771_v38  ;;  %v2082_v24 = vsel %vm1156_vm1, %v6200_v52, %v2081_v8  ;;  %v4830_v52 = vld [vmem:[#allocation2 + $0xc8] sm:$0xff]  ;;  %v2161_v39 = vrot.slane %v4832_v1, 2  ;;  %v4836_v8 = vld [vmem:[#allocation2 + $0x110] sm:$0xff] }
  0xe0   : > { %2485 = vmatprep.mubr.f32.mxu1 %v6211_v11  ;;  %v2149_v11 = vsel %vm1269_vm0, %v2146_v21, %v2148_v28  ;;  %v2156_v7 = vrot.slane %v4830_v52, 2  ;;  %v2168_v21 = vrot.slane %v6162_v56, 2  ;;  %v2167_v43 = vsel %vm1269_vm0, %v2165_v33, %v2166_v61  ;;  %v4841_v1 = vld [vmem:[#allocation2 + $0x150] sm:$0xff]  ;;  %v4843_v33 = vld [vmem:[#allocation2 + $0x168] sm:$0xff] }
  0xe1   : > { %4432 = vmatmul.mubr.f32.gmra.mrb[72].mxu0 %v2144_v17  ;;  %v2162_v42 = vsel %vm1269_vm0, %v2160_v0, %v2161_v39  ;;  %v2164_v30 = vsel %vm1269_vm0, %v2161_v39, %v2163_v50  ;;  %v2171_v17 = vrot.slane %v4836_v8, 2  ;;  %v2864_v28 = vsel %vm1156_vm1, %v2861_v12, %v2863_v4  ;;  %v6415_v50 = vld [vmem:[#allocation2 + $0x78] sm:$0xff] }
  0xe2   : > { %4434 = vmatprep.mubr.f32.mxu0 %v2147_v22  ;;  %4774 = vmatpush3.bf16.msra.mxu0 %v4771_v38  ;;  %v2157_v45 = vsel %vm1269_vm0, %v2155_v55, %v2156_v7  ;;  %v6377_v38 = vld [vmem:[#allocation2 + $0x48] sm:$0xff]  ;;  %v2866_v56 = vrot.slane %v6379_v54, 1  ;;  %v2169_v41 = vsel %vm1269_vm0, %v2166_v61, %v2168_v21  ;;  %v2185_v39 = vrot.slane %v4841_v1, 2  ;;  %v4844_v61 = vld [vmem:[#allocation2 + $0x170] sm:$0xff] }
  0xe3   : > { %2486 = vmatmul.mubr.f32.gmra.mrb[88].mxu1 %v7350_v44  ;;  %4776 = vmatprep.subr.bf16.mxu0 %v4775_v27  ;;  %v6351_v44 = vsel %vm1156_vm1, %v2083_v47, %v6335_v37  ;;  %v2865_v22 = vrot.slane %v6377_v38, 1  ;;  %v6398_v55 = vld [vmem:[#allocation2 + $0x68] sm:$0xff]  ;;  %v2873_v12 = vrot.slane %v6407_v36, 1  ;;  %v2190_v15 = vrot.slane %v4843_v33, 2 }
  0xe4   : > { %2490 = vmatprep.mubr.f32.mxu1 %v2082_v24  ;;  %v4838_v24 = vld [vmem:[#allocation2 + $0x128] sm:$0xff]  ;;  %v2869_v3 = vsel %vm1156_vm1, %v2866_v56, %v2868_v35  ;;  %v2871_v13 = vrot.slane %v6398_v55, 1  ;;  %v2195_v8 = vrot.slane %v6317_v46, 2  ;;  %v2983_v1 = vrot.slane %v6398_v55, 2 }
  0xe5   : > { %4435 = vmatmul.mubr.f32.gmra.mrb[74].mxu0 %v2149_v11  ;;  %v2176_v47 = vrot.slane %v4838_v24, 2  ;;  %v2867_v11 = vsel %vm1156_vm1, %v2865_v22, %v2866_v56  ;;  %v2878_v22 = vrot.slane %v6426_v62, 1  ;;  %v2972_v24 = vrot.slane %v6356_v23, 2 }
  0xe6   : > { %4437 = vmatprep.mubr.f32.mxu0 %v2152_v34  ;;  %4778 = vmatpush3.bf16.msra.mxu0 %v4775_v27  ;;  %v2172_v27 = vsel %vm1269_vm0, %v2170_v53, %v2171_v17  ;;  %v2174_v34 = vsel %vm1269_vm0, %v2171_v17, %v2173_v32  ;;  %v2874_v4 = vsel %vm1156_vm1, %v2871_v13, %v2873_v12  ;;  %v6432_v17 = vrot.slane %v6319_v2, 2  ;;  %v6440_v32 = vld [vmem:[#allocation2 + $0x90] sm:$0xff] }
  0xe7   : > { %2491 = vmatmul.mubr.f32.gmra.mrb[90].mxu1 %v7351_v40  ;;  %4780 = vmatprep.subr.bf16.mxu0 %v4779_v63  ;;  %v2159_v40 = vsel %vm1269_vm0, %v2156_v7, %v2158_v19  ;;  %v2177_v52 = vsel %vm1269_vm0, %v2175_v58, %v2176_v47  ;;  %v4839_v7 = vld [vmem:[#allocation2 + $0x138] sm:$0xff]  ;;  %v2179_v19 = vsel %vm1269_vm0, %v2176_v47, %v2178_v14  ;;  %v2973_v47 = vrot.slane %v6358_v6, 2 }
  0xe8   : > { %2495 = vmatprep.mubr.f32.mxu1 %v6351_v44  ;;  %v6449_v58 = vsel %vm1269_vm0, %v2195_v8, %v6432_v17  ;;  %v2985_v12 = vrot.slane %v6407_v36, 2 }
  0xe9   : > { %4438 = vmatmul.mubr.f32.gmra.mrb[76].mxu0 %v2154_v25  ;;  %v2870_v25 = vrot.slane %v6396_v49, 1 }
  0xea   : > { %4440 = vmatprep.mubr.f32.mxu0 %v2157_v45  ;;  %4782 = vmatpush3.bf16.msra.mxu0 %v4779_v63  ;;  %v2180_v63 = vrot.slane %v4839_v7, 2  ;;  %v2183_v45 = vrot.slane %v6225_v9, 2  ;;  %v2188_v9 = vrot.slane %v6257_v26, 2  ;;  %v2974_v7 = vsel %vm1269_vm0, %v2972_v24, %v2973_v47 }
  0xeb   : > { %2496 = vmatmul.mubr.f32.gmra.mrb[92].mxu1 %v6317_v46  ;;  %4784 = vmatprep.subr.bf16.mxu0 %v4783_v57  ;;  %v2872_v51 = vsel %vm1156_vm1, %v2870_v25, %v2871_v13  ;;  %v2980_v13 = vrot.slane %v6388_v20, 2  ;;  %v2986_v36 = vsel %vm1269_vm0, %v2983_v1, %v2985_v12  ;;  %v6544_v12 = vld [vmem:[#allocation2 + $0xf0] sm:$0xff] }
  0xec   : > { %2500 = vmatprep.mubr.f32.mxu1 %v2087_v16  ;;  %v2182_v0 = vsel %vm1269_vm0, %v2180_v63, %v2181_v5  ;;  %v2977_v63 = vrot.slane %v6377_v38, 2 }
  0xed   : > { %4441 = vmatmul.mubr.f32.gmra.mrb[78].mxu0 %v2159_v40  ;;  %v2184_v40 = vsel %vm1269_vm0, %v2181_v5, %v2183_v45  ;;  %v6478_v45 = vld [vmem:[#allocation2 + $0xb0] sm:$0xff] }
  0xee   : > { %4443 = vmatprep.mubr.f32.mxu0 %v2162_v42  ;;  %4786 = vmatpush3.bf16.msra.mxu0 %v4783_v57  ;;  %v4842_v57 = vld [vmem:[#allocation2 + $0x158] sm:$0xff]  ;;  %v6417_v42 = vld [vmem:[#allocation2 + $0x80] sm:$0xff]  ;;  %v2998_v24 = vrot.slane %v6478_v45, 2 }
  0xef   : > { %2501 = vmatmul.mubr.f32.gmra.mrb[94].mxu1 %v6319_v2  ;;  %v2186_v16 = vrot.slane %v4842_v57, 2  ;;  %v2876_v26 = vrot.slane %v6417_v42, 1  ;;  %v2886_v57 = vrot.slane %v6478_v45, 1 }
  0xf0   : > { %3197 = vmatprep.mubr.f32.mxu1 %v2862_v59  ;;  %v2191_v59 = vrot.slane %v4844_v61, 2 }
  0xf1   : > { %4444 = vmatmul.mubr.f32.gmra.mrb[80].mxu0 %v2164_v30  ;;  %v2187_v29 = vsel %vm1269_vm0, %v2185_v39, %v2186_v16  ;;  %v2875_v30 = vrot.slane %v6415_v50, 1  ;;  %v2189_v21 = vsel %vm1269_vm0, %v2186_v16, %v2188_v9 }
  0xf2   : > { %4446 = vmatprep.mubr.f32.mxu0 %v2167_v43  ;;  %v2193_v43 = vrot.slane %v6302_v60, 2  ;;  %v2192_v53 = vsel %vm1269_vm0, %v2190_v15, %v2191_v59 }
  0xf3   : > { %3198 = vmatmul.mubr.f32.vlgmr.msra.gmra.mrb[96].mxu1 %v6356_v23  ;;  %v6462_v23 = vld [vmem:[#allocation2 + $0xa0] sm:$0x3] }
  0xf4   : > { %3202 = vmatprep.mubr.f32.mxu1 %v2864_v28  ;;  %v2877_v28 = vsel %vm1156_vm1, %v2875_v30, %v2876_v26  ;;  %v2194_v60 = vsel %vm1269_vm0, %v2191_v59, %v2193_v43  ;;  %v2883_v5 = vrot.slane %v6462_v23, 1  ;;  %v2990_v59 = vrot.slane %v6426_v62, 2  ;;  %v6504_v30 = vld [vmem:[#allocation2 + $0xc8] sm:$0xff] }
  0xf5   : > { %4447 = vmatmul.mubr.f32.gmra.mrb[82].mxu0 %v2169_v41  ;;  %v2198_v41 = vrot.slane %v6339_v31, 2  ;;  %v2879_v31 = vsel %vm1156_vm1, %v2876_v26, %v2878_v22  ;;  %v2891_v62 = vrot.slane %v6504_v30, 1  ;;  %v2995_v22 = vrot.slane %v6462_v23, 2  ;;  %v6528_v23 = vld [vmem:[#allocation2 + $0xe0] sm:$0xff] }
  0xf6   : > { %4449 = vmatprep.mubr.f32.mxu0 %v2172_v27  ;;  %v6442_v27 = vld [vmem:[#allocation2 + $0x98] sm:$0xff] }
  0xf7   : > { %3203 = vmatmul.mubr.f32.gmra.mrb[98].mxu1 %v6358_v6  ;;  %v2881_v35 = vrot.slane %v6442_v27, 1 }
  0xf8   : > { %3207 = vmatprep.mubr.f32.mxu1 %v2867_v11  ;;  %v2880_v11 = vrot.slane %v6440_v32, 1 }
  0xf9   : > { %4450 = vmatmul.mubr.f32.gmra.mrb[84].mxu0 %v2174_v34  ;;  %v2975_v34 = vrot.slane %v6369_v48, 2  ;;  %v2884_v39 = vsel %vm1156_vm1, %v2881_v35, %v2883_v5 }
  0xfa   : > { %4452 = vmatprep.mubr.f32.mxu0 %v2177_v52  ;;  %v2199_v52 = vsel %vm1269_vm0, %v6432_v17, %v2198_v41  ;;  %v2882_v48 = vsel %vm1156_vm1, %v2880_v11, %v2881_v35 }
  0xfb   : > { %3208 = vmatmul.mubr.f32.gmra.mrb[100].mxu1 %v6377_v38  ;;  %v2976_v25 = vsel %vm1269_vm0, %v2973_v47, %v2975_v34 }
  0xfc   : > { %3212 = vmatprep.mubr.f32.mxu1 %v2869_v3 }
  0xfd   : > { %4453 = vmatmul.mubr.f32.gmra.mrb[86].mxu0 %v2179_v19  ;;  %v6476_v19 = vld [vmem:[#allocation2 + $0xa8] sm:$0xff] }
  0xfe   : > { %4455 = vmatprep.mubr.f32.mxu0 %v2182_v0  ;;  %v2982_v0 = vrot.slane %v6396_v49, 2  ;;  %v2885_v20 = vrot.slane %v6476_v19, 1 }
  0xff   : > { %3213 = vmatmul.mubr.f32.gmra.mrb[102].mxu1 %v6379_v54  ;;  %v2979_v54 = vsel %vm1269_vm0, %v2977_v63, %v2978_v10 }
 0x100   : > { %3217 = vmatprep.mubr.f32.mxu1 %v2872_v51  ;;  %v2981_v51 = vsel %vm1269_vm0, %v2978_v10, %v2980_v13  ;;  %v2887_v33 = vsel %vm1156_vm1, %v2885_v20, %v2886_v57  ;;  %v2896_v13 = vrot.slane %v6528_v23, 1 }
 0x101   : > { %4456 = vmatmul.mubr.f32.gmra.mrb[88].mxu0 %v2184_v40  ;;  %v2781_v40 = vld [vmem:[#allocation2 + $0xb8] sm:$0x3] }
 0x102   : > { %4458 = vmatprep.mubr.f32.mxu0 %v2187_v29  ;;  %v2988_v29 = vrot.slane %v6417_v42, 2  ;;  %v2888_v15 = vrot.slane %v2781_v40, 1  ;;  %v3000_v34 = vrot.slane %v2781_v40, 2  ;;  %v6546_v40 = vld [vmem:[#allocation2 + $0xf8] sm:$0xff] }
 0x103   : > { %3218 = vmatmul.mubr.f32.gmra.mrb[104].mxu1 %v6396_v49  ;;  %v2984_v49 = vsel %vm1269_vm0, %v2982_v0, %v2983_v1  ;;  %v2787_v1 = vld [vmem:[#allocation2 + $0xe8] sm:$0x3] }
 0x104   : > { %3222 = vmatprep.mubr.f32.mxu1 %v2874_v4  ;;  %v2782_v4 = vld [vmem:[#allocation2 + $0xc0] sm:$0xff]  ;;  %v2889_v43 = vsel %vm1156_vm1, %v2886_v57, %v2888_v15  ;;  %v3008_v57 = vrot.slane %v6528_v23, 2 }
 0x105   : > { %4459 = vmatmul.mubr.f32.gmra.mrb[90].mxu0 %v2189_v21  ;;  %v6436_v56 = vpop.f32.mrb[0].mxu1  ;;  %v2993_v21 = vrot.slane %v6442_v27, 2  ;;  %v3002_v10 = vrot.slane %v2782_v4, 2 }
 0x106   : > { %4461 = vmatprep.mubr.f32.mxu0 %v2192_v53  ;;  %v6444_v18 = vpop.f32.mrb[1].mxu1  ;;  %v2890_v53 = vrot.slane %v2782_v4, 1 }
 0x107   : > { %3223 = vmatmul.mubr.f32.gmra.mrb[106].mxu1 %v6398_v55  ;;  %v2987_v55 = vrot.slane %v6415_v50, 2  ;;  %v2996_v35 = vsel %vm1269_vm0, %v2993_v21, %v2995_v22 }
 0x108   : > { %3227 = vmatprep.mubr.f32.mxu1 %v2877_v28  ;;  %v2991_v28 = vsel %vm1269_vm0, %v2988_v29, %v2990_v59  ;;  %v2892_v47 = vsel %vm1156_vm1, %v2890_v53, %v2891_v62  ;;  %v3010_v59 = vrot.slane %v2787_v1, 2  ;;  %v6561_v53 = vld [vmem:[#allocation2 + $0x108] sm:$0xff] }
 0x109   : > { %4462 = vmatmul.mubr.f32.gmra.mrb[92].mxu0 %v2194_v60  ;;  %v6457_v14 = vpop.f32.mrb[2].mxu1  ;;  %v2784_v60 = vld [vmem:[#allocation2 + $0xd0] sm:$0x3] }
 0x10a   : > { %4464 = vmatprep.mubr.f32.mxu0 %v6449_v58  ;;  %v6464_v6 = vpop.f32.mrb[3].mxu1  ;;  %v3005_v0 = vrot.slane %v2784_v60, 2 }
 0x10b   : > { %3228 = vmatmul.mubr.f32.gmra.mrb[108].mxu1 %v6415_v50  ;;  %v2989_v50 = vsel %vm1269_vm0, %v2987_v55, %v2988_v29 }
 0x10c   : > { %3232 = vmatprep.mubr.f32.mxu1 %v2879_v31  ;;  %v2893_v31 = vrot.slane %v2784_v60, 1  ;;  %v2900_v60 = vrot.slane %v6544_v12, 1 }
 0x10d   : > { %4465 = vmatmul.mubr.f32.gmra.mrb[94].mxu0 %v2199_v52  ;;  %v6472_v3 = vpop.f32.mrb[4].mxu1  ;;  %v2785_v52 = vld [vmem:[#allocation2 + $0xd8] sm:$0xff] }
 0x10e   : > { %4499 = vmatprep.mubr.f32.mxu0 %v2974_v7  ;;  %v6480_v38 = vpop.f32.mrb[5].mxu1  ;;  %v2894_v5 = vsel %vm1156_vm1, %v2891_v62, %v2893_v31  ;;  %v3007_v20 = vrot.slane %v2785_v52, 2  ;;  %v6563_v62 = vld [vmem:[#allocation2 + $0x110] sm:$0xff] }
 0x10f   : > { %3233 = vmatmul.mubr.f32.gmra.mrb[110].mxu1 %v6417_v42  ;;  %v2992_v42 = vrot.slane %v6440_v32, 2 }
 0x110   : > { %3237 = vmatprep.mubr.f32.mxu1 %v2882_v48  ;;  %v3003_v48 = vrot.slane %v6504_v30, 2 }
 0x111   : > { %4500 = vmatmul.mubr.f32.vlgmr.msra.gmra.mrb[96].mxu0 %v2976_v25  ;;  %v6489_v16 = vpop.f32.mrb[6].mxu1  ;;  %v2895_v25 = vrot.slane %v2785_v52, 1 }
 0x112   : > { %4502 = vmatprep.mubr.f32.mxu0 %v2979_v54  ;;  %v6493_v9 = vpop.f32.mrb[7].mxu1  ;;  %v3001_v54 = vsel %vm1269_vm0, %v2998_v24, %v3000_v34  ;;  %v3018_v34 = vrot.slane %v6563_v62, 2 }
 0x113   : > { %3238 = vmatmul.mubr.f32.gmra.mrb[112].mxu1 %v6440_v32  ;;  %v2994_v32 = vsel %vm1269_vm0, %v2992_v42, %v2993_v21  ;;  %v2897_v29 = vsel %vm1156_vm1, %v2895_v25, %v2896_v13  ;;  %v3013_v42 = vrot.slane %v6546_v40, 2  ;;  %v2790_v21 = vld [vmem:[#allocation2 + $0x100] sm:$0x3] }
 0x114   : > { %3242 = vmatprep.mubr.f32.mxu1 %v2884_v39  ;;  %v3004_v39 = vsel %vm1269_vm0, %v3002_v10, %v3003_v48 }
 0x115   : > { %4503 = vmatmul.mubr.f32.gmra.mrb[98].mxu0 %v2981_v51  ;;  %v6500_v61 = vpop.f32.mrb[8].mxu1 }
 0x116   : > { %4505 = vmatprep.mubr.f32.mxu0 %v2984_v49  ;;  %v6506_v26 = vpop.f32.mrb[9].mxu1 }
 0x117   : > { %3243 = vmatmul.mubr.f32.gmra.mrb[114].mxu1 %v6442_v27  ;;  %v2997_v27 = vrot.slane %v6476_v19, 2 }
 0x118   : > { %3247 = vmatprep.mubr.f32.mxu1 %v2887_v33  ;;  %v2898_v33 = vrot.slane %v2787_v1, 1 }
 0x119   : > { %4506 = vmatmul.mubr.f32.gmra.mrb[100].mxu0 %v2986_v36  ;;  %v6514_v8 = vpop.f32.mrb[10].mxu1  ;;  %v2999_v63 = vsel %vm1269_vm0, %v2997_v27, %v2998_v24  ;;  %v3006_v36 = vsel %vm1269_vm0, %v3003_v48, %v3005_v0  ;;  %v3011_v24 = vsel %vm1269_vm0, %v3008_v57, %v3010_v59  ;;  %v6581_v48 = vld [vmem:[#allocation2 + $0x120] sm:$0xff] }
 0x11a   : > { %4508 = vmatprep.mubr.f32.mxu0 %v2989_v50  ;;  %v6518_v41 = vpop.f32.mrb[11].mxu1  ;;  %v3009_v50 = vsel %vm1269_vm0, %v3007_v20, %v3008_v57 }
 0x11b   : > { %3248 = vmatmul.mubr.f32.gmra.mrb[116].mxu1 %v6476_v19 }
 0x11c   : > { %3252 = vmatprep.mubr.f32.mxu1 %v2889_v43 }
 0x11d   : > { %4509 = vmatmul.mubr.f32.gmra.mrb[102].mxu0 %v2991_v28  ;;  %v6525_v11 = vpop.f32.mrb[12].mxu1 }
 0x11e   : > { %4511 = vmatprep.mubr.f32.mxu0 %v2994_v32  ;;  %v6530_v7 = vpop.f32.mrb[13].mxu1  ;;  %v2901_v32 = vrot.slane %v6546_v40, 1 }
 0x11f   : > { %3253 = vmatmul.mubr.f32.gmra.mrb[118].mxu1 %v6478_v45 }
 0x120   : > { %3257 = vmatprep.mubr.f32.mxu1 %v2892_v47  ;;  %v3015_v47 = vrot.slane %v2790_v21, 2 }
 0x121   : > { %4512 = vmatmul.mubr.f32.gmra.mrb[104].mxu0 %v2996_v35  ;;  %v6537_v19 = vpop.f32.mrb[14].mxu1  ;;  %v3017_v35 = vrot.slane %v6561_v53, 2 }
 0x122   : > { %4514 = vmatprep.mubr.f32.mxu0 %v2999_v63  ;;  %v6540_v45 = vpop.f32.mrb[15].mxu1  ;;  %v6579_v63 = vld [vmem:[#allocation2 + $0x118] sm:$0x3]  ;;  %v3016_v1 = vsel %vm1269_vm0, %v3013_v42, %v3015_v47 }
 0x123   : > { %3258 = vmatmul.mubr.f32.gmra.mrb[120].mxu1 %v2782_v4  ;;  %v3019_v57 = vsel %vm1269_vm0, %v3017_v35, %v3018_v34  ;;  %v6625_v35 = vld [vmem:[#allocation2 + $0x158] sm:$0xff] }
 0x124   : > { %v1496_v51 = vpop.f32.mrb[0].mxu0  ;;  %3262 = vmatprep.mubr.f32.mxu1 %v2894_v5  ;;  %v6583_v5 = vld [vmem:[#allocation2 + $0x128] sm:$0xff] }
 0x125   : > { %v6549_v49 = vadd.f32 %v6444_v18, %v1496_v51  ;;  %4515 = vmatmul.mubr.f32.gmra.mrb[106].mxu0 %v3001_v54  ;;  %v1498_v55 = vpop.f32.mrb[1].mxu0  ;;  %v6552_v15 = vpop.f32.mrb[16].mxu1  ;;  %v3012_v18 = vrot.slane %v6544_v12, 2  ;;  %v2903_v54 = vrot.slane %v2790_v21, 1  ;;  %v3023_v51 = vrot.slane %v6583_v5, 2 }
 0x126   : > { %4517 = vmatprep.mubr.f32.mxu0 %v3004_v39  ;;  %v6555_v4 = vpop.f32.mrb[17].mxu1  ;;  %v3020_v39 = vrot.slane %v6579_v63, 2  ;;  %v6599_v55 = vld [vmem:[#allocation2 + $0x130] sm:$0x3] }
 0x127   : > { %3263 = vmatmul.mubr.f32.gmra.mrb[122].mxu1 %v6504_v30  ;;  %v2899_v30 = vsel %vm1156_vm1, %v2896_v13, %v2898_v33  ;;  %v6601_v33 = vld [vmem:[#allocation2 + $0x138] sm:$0xff] }
 0x128   : > { %v1501_v43 = vpop.f32.mrb[2].mxu0  ;;  %3267 = vmatprep.mubr.f32.mxu1 %v2897_v29 }
 0x129   : > { %v6566_v28 = vadd.f32 %v6436_v56, %v1501_v43  ;;  %4518 = vmatmul.mubr.f32.gmra.mrb[108].mxu0 %v3006_v36  ;;  %v1503_v22 = vpop.f32.mrb[3].mxu0  ;;  %v6571_v27 = vpop.f32.mrb[18].mxu1  ;;  %v3014_v56 = vsel %vm1269_vm0, %v3012_v18, %v3013_v42  ;;  %v6603_v36 = vld [vmem:[#allocation2 + $0x140] sm:$0xff]  ;;  %v2905_v18 = vrot.slane %v6561_v53, 1  ;;  %v2906_v42 = vrot.slane %v6563_v62, 1 }
 0x12a   : > { %4520 = vmatprep.mubr.f32.mxu0 %v3009_v50  ;;  %v6574_v31 = vpop.f32.mrb[19].mxu1  ;;  %v3021_v43 = vsel %vm1269_vm0, %v3018_v34, %v3020_v39  ;;  %v3025_v22 = vrot.slane %v6599_v55, 2 }
 0x12b   : > { %3268 = vmatmul.mubr.f32.gmra.mrb[124].mxu1 %v2785_v52  ;;  %v2902_v52 = vsel %vm1156_vm1, %v2900_v60, %v2901_v32  ;;  %v3027_v60 = vrot.slane %v6601_v33, 2 }
 0x12c   : > { %v1506_v10 = vpop.f32.mrb[4].mxu0  ;;  %3272 = vmatprep.mubr.f32.mxu1 %v2899_v30 }
 0x12d   : > { %v6586_v25 = vadd.f32 %v6464_v6, %v1506_v10  ;;  %4521 = vmatmul.mubr.f32.gmra.mrb[110].mxu0 %v3011_v24  ;;  %v1508_v13 = vpop.f32.mrb[5].mxu0  ;;  %v6589_v0 = vpop.f32.mrb[20].mxu1  ;;  %v3022_v6 = vrot.slane %v6581_v48, 2  ;;  %v6621_v24 = vld [vmem:[#allocation2 + $0x148] sm:$0x3] }
 0x12e   : > { %4523 = vmatprep.mubr.f32.mxu0 %v3014_v56  ;;  %v6593_v20 = vpop.f32.mrb[21].mxu1  ;;  %v6623_v56 = vld [vmem:[#allocation2 + $0x150] sm:$0xff]  ;;  %v2908_v13 = vrot.slane %v6579_v63, 1 }
 0x12f   : > { %3273 = vmatmul.mubr.f32.gmra.mrb[126].mxu1 %v6528_v23  ;;  %v2904_v23 = vsel %vm1156_vm1, %v2901_v32, %v2903_v54  ;;  %v3028_v32 = vrot.slane %v6603_v36, 2  ;;  %v3026_v54 = vsel %vm1269_vm0, %v3023_v51, %v3025_v22  ;;  %v2911_v22 = vrot.slane %v6583_v5, 1 }
 0x130   : > { %v1511_v29 = vpop.f32.mrb[6].mxu0  ;;  %3277 = vmatprep.mubr.f32.mxu1 %v2902_v52 }
 0x131   : > { %v6606_v59 = vadd.f32 %v6457_v14, %v1511_v29  ;;  %4524 = vmatmul.mubr.f32.gmra.mrb[112].mxu0 %v3016_v1  ;;  %v1513_v50 = vpop.f32.mrb[7].mxu0  ;;  %v6611_v21 = vpop.f32.mrb[22].mxu1  ;;  %v3024_v14 = vsel %vm1269_vm0, %v3022_v6, %v3023_v51  ;;  %v3030_v1 = vrot.slane %v6621_v24, 2  ;;  %v3033_v6 = vrot.slane %v6625_v35, 2  ;;  %v6642_v29 = vld [vmem:[#allocation2 + $0x160] sm:$0x3] }
 0x132   : > { %4526 = vmatprep.mubr.f32.mxu0 %v3019_v57  ;;  %v6615_v30 = vpop.f32.mrb[23].mxu1  ;;  %v3032_v57 = vrot.slane %v6623_v56, 2  ;;  %v6644_v50 = vld [vmem:[#allocation2 + $0x168] sm:$0xff] }
 0x133   : > { %3278 = vmatmul.mubr.f32.gmra.mrb[128].mxu1 %v6544_v12  ;;  %v2907_v12 = vsel %vm1156_vm1, %v2905_v18, %v2906_v42 }
 0x134   : > { %v1516_v47 = vpop.f32.mrb[8].mxu0  ;;  %3282 = vmatprep.mubr.f32.mxu1 %v2904_v23  ;;  %v6646_v23 = vld [vmem:[#allocation2 + $0x170] sm:$0xff] }
 0x135   : > { %v6628_v34 = vadd.f32 %v6480_v38, %v1516_v47  ;;  %v1518_v10 = vpop.f32.mrb[9].mxu0  ;;  %4527 = vmatmul.mubr.f32.gmra.mrb[114].mxu0 %v3021_v43  ;;  %v6632_v52 = vpop.f32.mrb[24].mxu1  ;;  %v3029_v38 = vsel %vm1269_vm0, %v3027_v60, %v3028_v32  ;;  %v2910_v43 = vrot.slane %v6581_v48, 1  ;;  %v3031_v60 = vsel %vm1269_vm0, %v3028_v32, %v3030_v1 }
 0x136   : > { %4529 = vmatprep.mubr.f32.mxu0 %v3024_v14  ;;  %v6636_v39 = vpop.f32.mrb[25].mxu1  ;;  %v3035_v47 = vrot.slane %v6642_v29, 2 }
 0x137   : > { %7352 = vst [vmem:[#allocation3_spill] sm:$0xff] %v6628_v34  ;;  %3283 = vmatmul.mubr.f32.gmra.mrb[130].mxu1 %v6546_v40  ;;  %v2909_v40 = vsel %vm1156_vm1, %v2906_v42, %v2908_v13  ;;  %v3037_v42 = vrot.slane %v6644_v50, 2  ;;  %v6664_v13 = vld [vmem:[#allocation2 + $0x178] sm:$0x3]  ;;  %v2912_v1 = vsel %vm1156_vm1, %v2910_v43, %v2911_v22 }
 0x138   : > { %v1521_v63 = vpop.f32.mrb[10].mxu0  ;;  %3287 = vmatprep.mubr.f32.mxu1 %v2907_v12  ;;  %v3038_v12 = vrot.slane %v6646_v23, 2  ;;  %v6681_v43 = vld [vmem:[#allocation2 + $0x198] sm:$0xff] }
 0x139   : > { %v6649_v51 = vadd.f32 %v6472_v3, %v1521_v63  ;;  %v1523_v18 = vpop.f32.mrb[11].mxu0  ;;  %4530 = vmatmul.mubr.f32.gmra.mrb[116].mxu0 %v3026_v54  ;;  %v6654_v14 = vpop.f32.mrb[26].mxu1  ;;  %v3034_v3 = vsel %vm1269_vm0, %v3032_v57, %v3033_v6  ;;  %v2913_v63 = vrot.slane %v6599_v55, 1  ;;  %v3036_v57 = vsel %vm1269_vm0, %v3033_v6, %v3035_v47  ;;  %v6683_v55 = vld [vmem:[#allocation2 + $0x1a0] sm:$0xff] }
 0x13a   : > { %4532 = vmatprep.mubr.f32.mxu0 %v3029_v38  ;;  %v6658_v10 = vpop.f32.mrb[27].mxu1  ;;  %v3040_v18 = vrot.slane %v6664_v13, 2 }
 0x13b   : > { %7353 = vst [vmem:[#allocation4_spill] sm:$0xff] %v6649_v51  ;;  %3288 = vmatmul.mubr.f32.gmra.mrb[132].mxu1 %v6561_v53  ;;  %v2914_v47 = vsel %vm1156_vm1, %v2911_v22, %v2913_v63  ;;  %v3048_v22 = vrot.slane %v6683_v55, 2  ;;  %v6700_v63 = vld [vmem:[#allocation2 + $0x1a8] sm:$0x3] }
 0x13c   : > { %v1526_v54 = vpop.f32.mrb[12].mxu0  ;;  %3292 = vmatprep.mubr.f32.mxu1 %v2909_v40  ;;  %v6679_v40 = vld [vmem:[#allocation2 + $0x190] sm:$0x3] }
 0x13d   : > { %v6667_v38 = vadd.f32 %v6493_v9, %v1526_v54  ;;  %v1528_v32 = vpop.f32.mrb[13].mxu0  ;;  %4533 = vmatmul.mubr.f32.gmra.mrb[118].mxu0 %v3031_v60  ;;  %v6671_v53 = vpop.f32.mrb[28].mxu1  ;;  %v3039_v9 = vsel %vm1269_vm0, %v3037_v42, %v3038_v12 }
 0x13e   : > { %4535 = vmatprep.mubr.f32.mxu0 %v3034_v3  ;;  %v6675_v34 = vpop.f32.mrb[29].mxu1  ;;  %v2915_v3 = vrot.slane %v6601_v33, 1  ;;  %v3041_v32 = vsel %vm1269_vm0, %v3038_v12, %v3040_v18  ;;  %v2918_v18 = vrot.slane %v6621_v24, 1 }
 0x13f   : > { %7354 = vst [vmem:[#allocation5_spill] sm:$0xff] %v6667_v38  ;;  %3293 = vmatmul.mubr.f32.gmra.mrb[134].mxu1 %v6563_v62  ;;  %v2916_v62 = vrot.slane %v6603_v36, 1 }
 0x140   : > { %v1531_v54 = vpop.f32.mrb[14].mxu0  ;;  %3297 = vmatprep.mubr.f32.mxu1 %v2912_v1  ;;  %v3045_v1 = vrot.slane %v6679_v40, 2 }
 0x141   : > { %v6686_v60 = vadd.f32 %v6489_v16, %v1531_v54  ;;  %v1533_v6 = vpop.f32.mrb[15].mxu0  ;;  %4536 = vmatmul.mubr.f32.gmra.mrb[120].mxu0 %v3036_v57  ;;  %v6691_v42 = vpop.f32.mrb[30].mxu1  ;;  %v3047_v16 = vrot.slane %v6681_v43, 2  ;;  %v2917_v12 = vsel %vm1156_vm1, %v2915_v3, %v2916_v62 }
 0x142   : > { %4538 = vmatprep.mubr.f32.mxu0 %v3039_v9  ;;  %v6695_v38 = vpop.f32.mrb[31].mxu1 }
 0x143   : > { %7355 = vst [vmem:[#allocation6_spill] sm:$0xff] %v6686_v60  ;;  %3298 = vmatmul.mubr.f32.gmra.mrb[136].mxu1 %v6581_v48  ;;  %v3046_v48 = vsel %vm1269_vm0, %v6432_v17, %v3045_v1  ;;  %v3050_v60 = vrot.slane %v6700_v63, 2 }
 0x144   : > { %v1536_v54 = vpop.f32.mrb[16].mxu0  ;;  %3302 = vmatprep.mubr.f32.mxu1 %v2914_v47 }
 0x145   : > { %v6703_v57 = vadd.f32 %v6506_v26, %v1536_v54  ;;  %v1538_v9 = vpop.f32.mrb[17].mxu0  ;;  %4539 = vmatmul.mubr.f32.gmra.mrb[122].mxu0 %v3041_v32  ;;  %v6707_v6 = vpop.f32.mrb[32].mxu1  ;;  %v3049_v26 = vsel %vm1269_vm0, %v3047_v16, %v3048_v22  ;;  %v2919_v32 = vsel %vm1156_vm1, %v2916_v62, %v2918_v18  ;;  %v2921_v54 = vrot.slane %v6625_v35, 1 }
 0x146   : > { %4541 = vmatprep.mubr.f32.mxu0 %v6449_v58  ;;  %v2349_v51 = vpop.f32.mrb[33].mxu1  ;;  %v2920_v58 = vrot.slane %v6623_v56, 1  ;;  %v2923_v9 = vrot.slane %v6642_v29, 1 }
 0x147   : > { %3303 = vmatmul.mubr.f32.gmra.mrb[138].mxu1 %v6583_v5  ;;  %v3051_v5 = vsel %vm1269_vm0, %v3048_v22, %v3050_v60 }
 0x148   : > { %v1541_v47 = vpop.f32.mrb[18].mxu0  ;;  %3307 = vmatprep.mubr.f32.mxu1 %v2917_v12  ;;  %v2922_v62 = vsel %vm1156_vm1, %v2920_v58, %v2921_v54  ;;  %v2928_v58 = vrot.slane %v6664_v13, 1 }
 0x149   : > { %v6716_v3 = vadd.f32 %v6500_v61, %v1541_v47  ;;  %v1543_v24 = vpop.f32.mrb[19].mxu0  ;;  %4542 = vmatmul.mubr.f32.gmra.mrb[124].mxu0 %v3046_v48  ;;  %v6721_v17 = vpop.f32.mrb[34].mxu1  ;;  %v2925_v48 = vrot.slane %v6644_v50, 1 }
 0x14a   : > { %4544 = vmatprep.mubr.f32.mxu0 %v3049_v26  ;;  %v2354_v51 = vpop.f32.mrb[35].mxu1  ;;  %v2926_v26 = vrot.slane %v6646_v23, 1 }
 0x14b   : > { %3308 = vmatmul.mubr.f32.gmra.mrb[140].mxu1 %v6601_v33 }
 0x14c   : > { %v1546_v1 = vpop.f32.mrb[20].mxu0  ;;  %3312 = vmatprep.mubr.f32.mxu1 %v2919_v32 }
 0x14d   : > { %v6726_v61 = vadd.f32 %v6518_v41, %v1546_v1  ;;  %v1548_v16 = vpop.f32.mrb[21].mxu0  ;;  %4545 = vmatmul.mubr.f32.gmra.mrb[126].mxu0 %v3051_v5  ;;  %v6730_v12 = vpop.f32.mrb[36].mxu1  ;;  %v2924_v41 = vsel %vm1156_vm1, %v2921_v54, %v2923_v9 }
 0x14e   : > { %v2359_v18 = vpop.f32.mrb[37].mxu1  ;;  %v2929_v16 = vsel %vm1156_vm1, %v2926_v26, %v2928_v58 }
 0x14f   : > { %3313 = vmatmul.mubr.f32.gmra.mrb[142].mxu1 %v6603_v36 }
 0x150   : > { %v1551_v60 = vpop.f32.mrb[22].mxu0  ;;  %3317 = vmatprep.mubr.f32.mxu1 %v2922_v62 }
 0x151   : > { %v6734_v33 = vadd.f32 %v6514_v8, %v1551_v60  ;;  %v1553_v22 = vpop.f32.mrb[23].mxu0  ;;  %v6739_v47 = vpop.f32.mrb[38].mxu1  ;;  %v2927_v8 = vsel %vm1156_vm1, %v2925_v48, %v2926_v26  ;;  %v2936_v26 = vrot.slane %v6683_v55, 1 }
 0x152   : > { %v2364_v29 = vpop.f32.mrb[39].mxu1 }
 0x153   : > { %3318 = vmatmul.mubr.f32.gmra.mrb[144].mxu1 %v6623_v56 }
 0x154   : > { %v1556_v24 = vpop.f32.mrb[24].mxu0  ;;  %3322 = vmatprep.mubr.f32.mxu1 %v2924_v41 }
 0x155   : > { %v6743_v36 = vadd.f32 %v6530_v7, %v1556_v24  ;;  %v1558_v32 = vpop.f32.mrb[25].mxu0  ;;  %v6747_v54 = vpop.f32.mrb[40].mxu1 }
 0x156   : > { %v2369_v5 = vpop.f32.mrb[41].mxu1  ;;  %v2938_v32 = vrot.slane %v6700_v63, 1 }
 0x157   : > { %3323 = vmatmul.mubr.f32.gmra.mrb[146].mxu1 %v6625_v35  ;;  %v2933_v35 = vrot.slane %v6679_v40, 1 }
 0x158   : > { %v1561_v51 = vpop.f32.mrb[26].mxu0  ;;  %3327 = vmatprep.mubr.f32.mxu1 %v2927_v8 }
 0x159   : > { %v6751_v1 = vadd.f32 %v6525_v11, %v1561_v51  ;;  %v1563_v56 = vpop.f32.mrb[27].mxu0  ;;  %v6754_v7 = vpop.f32.mrb[42].mxu1  ;;  %v2934_v48 = vsel %vm1156_vm1, %v6335_v37, %v2933_v35  ;;  %v2939_v51 = vsel %vm1156_vm1, %v2936_v26, %v2938_v32 }
 0x15a   : > { %v2374_v62 = vpop.f32.mrb[43].mxu1 }
 0x15b   : > { %3328 = vmatmul.mubr.f32.gmra.mrb[148].mxu1 %v6644_v50 }
 0x15c   : > { %v1566_v9 = vpop.f32.mrb[28].mxu0  ;;  %3332 = vmatprep.mubr.f32.mxu1 %v2929_v16 }
 0x15d   : > { %v6758_v13 = vadd.f32 %v6540_v45, %v1566_v9  ;;  %v1568_v18 = vpop.f32.mrb[29].mxu0  ;;  %v6761_v60 = vpop.f32.mrb[44].mxu1  ;;  %v2935_v45 = vrot.slane %v6681_v43, 1 }
 0x15e   : > { %v2379_v11 = vpop.f32.mrb[45].mxu1 }
 0x15f   : > { %3333 = vmatmul.mubr.f32.gmra.mrb[150].mxu1 %v6646_v23  ;;  %v2937_v24 = vsel %vm1156_vm1, %v2935_v45, %v2936_v26 }
 0x160   : > { %v1571_v22 = vpop.f32.mrb[30].mxu0  ;;  %3337 = vmatprep.mubr.f32.mxu1 %v6351_v44 }
 0x161   : > { %v6766_v41 = vadd.f32 %v6537_v19, %v1571_v22  ;;  %v1573_v50 = vpop.f32.mrb[31].mxu0  ;;  %v6772_v40 = vpop.f32.mrb[46].mxu1 }
 0x162   : > { %v2384_v29 = vpop.f32.mrb[47].mxu1 }
 0x163   : > { %3338 = vmatmul.mubr.f32.gmra.mrb[152].mxu1 %v6317_v46 }
 0x164   : > { %v1576_v23 = vpop.f32.mrb[32].mxu0  ;;  %3342 = vmatprep.mubr.f32.mxu1 %v2934_v48 }
 0x165   : > { %v6776_v44 = vadd.f32 %v6555_v4, %v1576_v23  ;;  %v1578_v19 = vpop.f32.mrb[33].mxu0  ;;  %v6780_v37 = vpop.f32.mrb[48].mxu1 }
 0x166   : > { %v2389_v8 = vpop.f32.mrb[49].mxu1 }
 0x167   : > { %3343 = vmatmul.mubr.f32.gmra.mrb[154].mxu1 %v6319_v2 }
 0x168   : > { %v1581_v58 = vpop.f32.mrb[34].mxu0  ;;  %3347 = vmatprep.mubr.f32.mxu1 %v2937_v24 }
 0x169   : > { %v6784_v5 = vadd.f32 %v6552_v15, %v1581_v58  ;;  %v1583_v46 = vpop.f32.mrb[35].mxu0  ;;  %v6787_v4 = vpop.f32.mrb[50].mxu1 }
 0x16a   : > { %v2394_v56 = vpop.f32.mrb[51].mxu1 }
 0x16b   : > { %3348 = vmatmul.mubr.f32.gmra.mrb[156].mxu1 %v6681_v43 }
 0x16c   : > { %v1586_v16 = vpop.f32.mrb[36].mxu0  ;;  %3352 = vmatprep.mubr.f32.mxu1 %v2939_v51 }
 0x16d   : > { %v6791_v63 = vadd.f32 %v6574_v31, %v1586_v16  ;;  %v1588_v62 = vpop.f32.mrb[37].mxu0  ;;  %v6793_v2 = vpop.f32.mrb[52].mxu1 }
 0x16e   : > { %v2399_v9 = vpop.f32.mrb[53].mxu1 }
 0x16f   : > { %3353 = vmatmul.mubr.f32.gmra.mrb[158].mxu1 %v6683_v55 }
 0x170   : > { %v1591_v15 = vpop.f32.mrb[38].mxu0 }
 0x171   : > { %v6797_v18 = vadd.f32 %v6571_v27, %v1591_v15  ;;  %v1593_v35 = vpop.f32.mrb[39].mxu0  ;;  %v6799_v11 = vpop.f32.mrb[54].mxu1 }
 0x172   : > { %v2404_v22 = vpop.f32.mrb[55].mxu1 }
 0x174   : > { %v1596_v43 = vpop.f32.mrb[40].mxu0 }
 0x175   : > { %v6802_v50 = vadd.f32 %v6593_v20, %v1596_v43  ;;  %v1598_v31 = vpop.f32.mrb[41].mxu0  ;;  %v6804_v48 = vpop.f32.mrb[56].mxu1 }
 0x176   : > { %v2409_v45 = vpop.f32.mrb[57].mxu1 }
 0x178   : > { %v1601_v26 = vpop.f32.mrb[42].mxu0 }
 0x179   : > { %v6807_v29 = vadd.f32 %v6589_v0, %v1601_v26  ;;  %v1603_v55 = vpop.f32.mrb[43].mxu0  ;;  %v6809_v23 = vpop.f32.mrb[58].mxu1 }
 0x17a   : > { %v2414_v27 = vpop.f32.mrb[59].mxu1 }
 0x17c   : > { %v1606_v19 = vpop.f32.mrb[44].mxu0 }
 0x17d   : > { %v6812_v24 = vadd.f32 %v6615_v30, %v1606_v19  ;;  %v1608_v32 = vpop.f32.mrb[45].mxu0  ;;  %v6814_v8 = vpop.f32.mrb[60].mxu1 }
 0x17e   : > { %v2419_v20 = vpop.f32.mrb[61].mxu1 }
 0x180   : > { %v1611_v58 = vpop.f32.mrb[46].mxu0 }
 0x181   : > { %v6817_v46 = vadd.f32 %v6611_v21, %v1611_v58  ;;  %v1613_v51 = vpop.f32.mrb[47].mxu0  ;;  %v6819_v56 = vpop.f32.mrb[62].mxu1 }
 0x182   : > { %v2424_v0 = vpop.f32.mrb[63].mxu1 }
 0x184   : > { %v1616_v16 = vpop.f32.mrb[48].mxu0 }
 0x185   : > { %v6822_v62 = vadd.f32 %v6636_v39, %v1616_v16  ;;  %v1618_v9 = vpop.f32.mrb[49].mxu0  ;;  %v6824_v15 = vpop.f32.mrb[64].mxu1 }
 0x186   : > { %v2429_v30 = vpop.f32.mrb[65].mxu1 }
 0x188   : > { %v1621_v35 = vpop.f32.mrb[50].mxu0 }
 0x189   : > { %v6827_v22 = vadd.f32 %v6632_v52, %v1621_v35  ;;  %v1623_v43 = vpop.f32.mrb[51].mxu0  ;;  %v6829_v31 = vpop.f32.mrb[66].mxu1 }
 0x18a   : > { %v2434_v21 = vpop.f32.mrb[67].mxu1 }
 0x18c   : > { %v1626_v45 = vpop.f32.mrb[52].mxu0 }
 0x18d   : > { %v6832_v26 = vadd.f32 %v6658_v10, %v1626_v45  ;;  %v1628_v55 = vpop.f32.mrb[53].mxu0  ;;  %v6834_v27 = vpop.f32.mrb[68].mxu1 }
 0x18e   : > { %v2439_v39 = vpop.f32.mrb[69].mxu1 }
 0x190   : > { %v1631_v19 = vpop.f32.mrb[54].mxu0 }
 0x191   : > { %v6837_v32 = vadd.f32 %v6654_v14, %v1631_v19  ;;  %v1633_v20 = vpop.f32.mrb[55].mxu0  ;;  %v6839_v58 = vpop.f32.mrb[70].mxu1 }
 0x192   : > { %v2444_v52 = vpop.f32.mrb[71].mxu1 }
 0x194   : > { %v1636_v51 = vpop.f32.mrb[56].mxu0 }
 0x195   : > { %v6842_v0 = vadd.f32 %v6675_v34, %v1636_v51  ;;  %v1638_v16 = vpop.f32.mrb[57].mxu0  ;;  %v6844_v9 = vpop.f32.mrb[72].mxu1 }
 0x196   : > { %v2449_v10 = vpop.f32.mrb[73].mxu1 }
 0x198   : > { %v1641_v30 = vpop.f32.mrb[58].mxu0 }
 0x199   : > { %v6847_v35 = vadd.f32 %v6671_v53, %v1641_v30  ;;  %v1643_v43 = vpop.f32.mrb[59].mxu0  ;;  %v6849_v21 = vpop.f32.mrb[74].mxu1  ;;  %v6864_v53 = vld [vmem:[%s7338_s9] ss:$0 sm:$0xff] }
 0x19a   : > { %v2454_v14 = vpop.f32.mrb[75].mxu1 }
 0x19c   : > { %v1646_v45 = vpop.f32.mrb[60].mxu0 }
 0x19d   : > { %v6852_v55 = vadd.f32 %v6695_v38, %v1646_v45  ;;  %v1648_v39 = vpop.f32.mrb[61].mxu0  ;;  %v6854_v19 = vpop.f32.mrb[76].mxu1  ;;  %v1881_v38 = vadd.f32 %v6864_v53, %v6566_v28 }
 0x19e   : > { %v2459_v34 = vpop.f32.mrb[77].mxu1 }
 0x19f   : > { %7356 = vst [vmem:[#allocation7_spill] sm:$0xff] %v6852_v55  ;;  %v1883_v55 = vadd.f32 %v6864_v53, %v6606_v59 }
 0x1a0   : > { %v1651_v20 = vpop.f32.mrb[62].mxu0 }
 0x1a1   : > { %v6857_v52 = vadd.f32 %v6691_v42, %v1651_v20  ;;  %v1653_v51 = vpop.f32.mrb[63].mxu0  ;;  %v6859_v16 = vpop.f32.mrb[78].mxu1  ;;  %v1880_v42 = vadd.f32 %v6864_v53, %v6549_v49 }
 0x1a2   : > { %v2464_v10 = vpop.f32.mrb[79].mxu1 }
 0x1a3   : > { %7357 = vst [vmem:[#allocation8_spill] sm:$0xff] %v6857_v52 }
 0x1a4   : > { %v4421_v30 = vpop.f32.mrb[64].mxu0 }
 0x1a5   : > { %v2578_v43 = vadd.f32 %v4421_v30, %v6721_v17  ;;  %v2572_v14 = vpop.f32.mrb[65].mxu0  ;;  %v1882_v30 = vadd.f32 %v6864_v53, %v6586_v25 }
 0x1a6   : > { %v6871_v45 = vpop.f32.mrb[80].mxu1  ;;  %v2573_v39 = vadd.f32 %v2572_v14, %v6707_v6 }
 0x1a7   : > { %v6874_v34 = vadd.f32 %v2578_v43, %v1881_v38  ;;  %v2469_v20 = vpop.f32.mrb[81].mxu1 }
 0x1a8   : > { %v6876_v51 = vadd.f32 %v2573_v39, %v1880_v42  ;;  %v4424_v10 = vpop.f32.mrb[66].mxu0  ;;  %v7360_v42 = vld [vmem:[#allocation4_spill] sm:$0xff]  ;;  %v7361_v20 = vld [vmem:[#allocation3_spill] sm:$0xff] }
 0x1a9   : > { %v2588_v28 = vadd.f32 %v4424_v10, %v6739_v47  ;;  %v2582_v17 = vpop.f32.mrb[67].mxu0  ;;  %v1885_v39 = vadd.f32 %v6864_v53, %v7360_v42  ;;  %v1884_v10 = vadd.f32 %v6864_v53, %v7361_v20 }
 0x1aa   : > { %7358 = vst [vmem:[#allocation9_spill] sm:$0xff] %v6876_v51  ;;  %v6883_v49 = vpop.f32.mrb[82].mxu1  ;;  %v2583_v52 = vadd.f32 %v2582_v17, %v6730_v12  ;;  %v7362_v17 = vld [vmem:[#allocation6_spill] sm:$0xff] }
 0x1ab   : > { %v6886_v6 = vadd.f32 %v2588_v28, %v1883_v55  ;;  %v2474_v38 = vpop.f32.mrb[83].mxu1 }
 0x1ac   : > { %v6888_v43 = vadd.f32 %v2583_v52, %v1882_v30  ;;  %v4427_v14 = vpop.f32.mrb[68].mxu0  ;;  %v1887_v30 = vadd.f32 %v6864_v53, %v7362_v17 }
 0x1ad   : > { %v2598_v59 = vadd.f32 %v4427_v14, %v6754_v7  ;;  %v2592_v47 = vpop.f32.mrb[69].mxu0  ;;  %v7363_v14 = vld [vmem:[#allocation5_spill] sm:$0xff] }
 0x1ae   : > { %7359 = vst [vmem:[#allocation10_spill] sm:$0xff] %v6888_v43  ;;  %v6895_v25 = vpop.f32.mrb[84].mxu1  ;;  %v2593_v51 = vadd.f32 %v2592_v47, %v6747_v54  ;;  %v1886_v42 = vadd.f32 %v6864_v53, %v7363_v14  ;;  %v1889_v47 = vadd.f32 %v6864_v53, %v6716_v3  ;;  %v1890_v14 = vadd.f32 %v6864_v53, %v6726_v61 }
 0x1af   : > { %v6898_v12 = vadd.f32 %v2598_v59, %v1885_v39  ;;  %v2479_v55 = vpop.f32.mrb[85].mxu1 }
 0x1b0   : > { %v6900_v28 = vadd.f32 %v2593_v51, %v1884_v10  ;;  %v4430_v52 = vpop.f32.mrb[70].mxu0  ;;  %v1888_v55 = vadd.f32 %v6864_v53, %v6703_v57 }
 0x1b1   : > { %v2608_v38 = vadd.f32 %v4430_v52, %v6772_v40  ;;  %v2602_v7 = vpop.f32.mrb[71].mxu0 }
 0x1b2   : > { %v6907_v20 = vpop.f32.mrb[86].mxu1  ;;  %v2603_v43 = vadd.f32 %v2602_v7, %v6761_v60  ;;  %v1891_v7 = vadd.f32 %v6864_v53, %v6734_v33 }
 0x1b3   : > { %v6910_v54 = vadd.f32 %v2608_v38, %v1887_v30  ;;  %v2484_v39 = vpop.f32.mrb[87].mxu1 }
 0x1b4   : > { %v6912_v59 = vadd.f32 %v2603_v43, %v1886_v42  ;;  %v4433_v51 = vpop.f32.mrb[72].mxu0 }
 0x1b5   : > { %v2618_v10 = vadd.f32 %v4433_v51, %v6787_v4  ;;  %v2612_v40 = vpop.f32.mrb[73].mxu0 }
 0x1b6   : > { %v6919_v52 = vpop.f32.mrb[88].mxu1  ;;  %v2613_v17 = vadd.f32 %v2612_v40, %v6780_v37  ;;  %v1892_v40 = vadd.f32 %v6864_v53, %v6743_v36 }
 0x1b7   : > { %v6922_v60 = vadd.f32 %v2618_v10, %v1889_v47  ;;  %v2489_v30 = vpop.f32.mrb[89].mxu1  ;;  %v1893_v10 = vadd.f32 %v6864_v53, %v6751_v1 }
 0x1b8   : > { %v6924_v38 = vadd.f32 %v2613_v17, %v1888_v55  ;;  %v4436_v43 = vpop.f32.mrb[74].mxu0 }
 0x1b9   : > { %v2628_v3 = vadd.f32 %v4436_v43, %v6799_v11  ;;  %v2622_v4 = vpop.f32.mrb[75].mxu0 }
 0x1ba   : > { %v6931_v57 = vpop.f32.mrb[90].mxu1  ;;  %v2623_v42 = vadd.f32 %v2622_v4, %v6793_v2 }
 0x1bb   : > { %v6934_v37 = vadd.f32 %v2628_v3, %v1891_v7  ;;  %v2494_v39 = vpop.f32.mrb[91].mxu1  ;;  %v1895_v7 = vadd.f32 %v6864_v53, %v6766_v41  ;;  %v1894_v3 = vadd.f32 %v6864_v53, %v6758_v13 }
 0x1bc   : > { %v6936_v51 = vadd.f32 %v2623_v42, %v1890_v14  ;;  %v4439_v47 = vpop.f32.mrb[76].mxu0 }
 0x1bd   : > { %v2638_v33 = vadd.f32 %v4439_v47, %v6809_v23  ;;  %v2632_v11 = vpop.f32.mrb[77].mxu0  ;;  %v1897_v47 = vadd.f32 %v6864_v53, %v6784_v5 }
 0x1be   : > { %v6943_v61 = vpop.f32.mrb[92].mxu1  ;;  %v2633_v55 = vadd.f32 %v2632_v11, %v6804_v48 }
 0x1bf   : > { %v6946_v2 = vadd.f32 %v2638_v33, %v1893_v10  ;;  %v2499_v17 = vpop.f32.mrb[93].mxu1  ;;  %v1896_v10 = vadd.f32 %v6864_v53, %v6776_v44 }
 0x1c0   : > { %v6948_v30 = vadd.f32 %v2633_v55, %v1892_v40  ;;  %v4442_v43 = vpop.f32.mrb[78].mxu0  ;;  %v1899_v17 = vadd.f32 %v6864_v53, %v6797_v18 }
 0x1c1   : > { %v2648_v1 = vadd.f32 %v4442_v43, %v6819_v56  ;;  %v2642_v23 = vpop.f32.mrb[79].mxu0  ;;  %v1898_v43 = vadd.f32 %v6864_v53, %v6791_v63 }
 0x1c2   : > { %v6955_v36 = vpop.f32.mrb[94].mxu1  ;;  %v2643_v4 = vadd.f32 %v2642_v23, %v6814_v8 }
 0x1c3   : > { %v6958_v48 = vadd.f32 %v2648_v1, %v1895_v7  ;;  %v2504_v14 = vpop.f32.mrb[95].mxu1 }
 0x1c4   : > { %v6960_v42 = vadd.f32 %v2643_v4, %v1894_v3  ;;  %v4445_v39 = vpop.f32.mrb[80].mxu0  ;;  %v1901_v4 = vadd.f32 %v6864_v53, %v6807_v29  ;;  %v1900_v14 = vadd.f32 %v6864_v53, %v6802_v50 }
 0x1c5   : > { %v2658_v41 = vadd.f32 %v4445_v39, %v6829_v31  ;;  %v2652_v56 = vpop.f32.mrb[81].mxu0 }
 0x1c6   : > { %v2653_v13 = vadd.f32 %v2652_v56, %v6824_v15  ;;  %v6968_v33 = vpop.f32.mrb[96].mxu1 }
 0x1c7   : > { %v6970_v8 = vadd.f32 %v2658_v41, %v1897_v47  ;;  %v3201_v11 = vpop.f32.mrb[97].mxu1 }
 0x1c8   : > { %v6972_v40 = vadd.f32 %v2653_v13, %v1896_v10  ;;  %v4448_v55 = vpop.f32.mrb[82].mxu0  ;;  %v1903_v10 = vadd.f32 %v6864_v53, %v6817_v46  ;;  %v1902_v13 = vadd.f32 %v6864_v53, %v6812_v24 }
 0x1c9   : > { %v2668_v5 = vadd.f32 %v4448_v55, %v6839_v58  ;;  %v2662_v31 = vpop.f32.mrb[83].mxu0 }
 0x1ca   : > { %v2663_v44 = vadd.f32 %v2662_v31, %v6834_v27  ;;  %v6980_v15 = vpop.f32.mrb[98].mxu1  ;;  %v1905_v31 = vadd.f32 %v6864_v53, %v6827_v22 }
 0x1cb   : > { %v6982_v7 = vadd.f32 %v2668_v5, %v1899_v17  ;;  %v3206_v1 = vpop.f32.mrb[99].mxu1 }
 0x1cc   : > { %v6984_v23 = vadd.f32 %v2663_v44, %v1898_v43  ;;  %v4451_v3 = vpop.f32.mrb[84].mxu0 }
 0x1cd   : > { %v2678_v18 = vadd.f32 %v4451_v3, %v6849_v21  ;;  %v2672_v58 = vpop.f32.mrb[85].mxu0 }
 0x1ce   : > { %v2673_v63 = vadd.f32 %v2672_v58, %v6844_v9  ;;  %v6992_v27 = vpop.f32.mrb[100].mxu1 }
 0x1cf   : > { %v6994_v39 = vadd.f32 %v2678_v18, %v1901_v4  ;;  %v3211_v47 = vpop.f32.mrb[101].mxu1  ;;  %v1907_v18 = vadd.f32 %v6864_v53, %v6837_v32 }
 0x1d0   : > { %v6996_v41 = vadd.f32 %v2673_v63, %v1900_v14  ;;  %v4454_v56 = vpop.f32.mrb[86].mxu0 }
 0x1d1   : > { %v2688_v29 = vadd.f32 %v4454_v56, %v6859_v16  ;;  %v2682_v21 = vpop.f32.mrb[87].mxu0  ;;  %v1904_v16 = vadd.f32 %v6864_v53, %v6822_v62 }
 0x1d2   : > { %v2683_v50 = vadd.f32 %v2682_v21, %v6854_v19  ;;  %v3214_v9 = vpop.f32.mrb[102].mxu1 }
 0x1d3   : > { %v7004_v11 = vadd.f32 %v2688_v29, %v1903_v10  ;;  %v3216_v55 = vpop.f32.mrb[103].mxu1  ;;  %v1909_v10 = vadd.f32 %v6864_v53, %v6847_v35 }
 0x1d4   : > { %v7006_v17 = vadd.f32 %v2683_v50, %v1902_v13  ;;  %v4457_v5 = vpop.f32.mrb[88].mxu0 }
 0x1d5   : > { %v2698_v46 = vadd.f32 %v4457_v5, %v6883_v49  ;;  %v2692_v43 = vpop.f32.mrb[89].mxu0  ;;  %v1906_v49 = vadd.f32 %v6864_v53, %v6832_v26  ;;  %v7364_v5 = vld [vmem:[#allocation8_spill] sm:$0xff] }
 0x1d6   : > { %v2693_v24 = vadd.f32 %v2692_v43, %v6871_v45  ;;  %v3219_v44 = vpop.f32.mrb[104].mxu1 }
 0x1d7   : > { %v7014_v19 = vadd.f32 %v2698_v46, %v1905_v31  ;;  %v3221_v1 = vpop.f32.mrb[105].mxu1  ;;  %v1911_v31 = vadd.f32 %v6864_v53, %v7364_v5  ;;  %v7365_v46 = vld [vmem:[#allocation7_spill] sm:$0xff] }
 0x1d8   : > { %v7016_v3 = vadd.f32 %v2693_v24, %v1904_v16  ;;  %v4460_v4 = vpop.f32.mrb[90].mxu0  ;;  %v1910_v43 = vadd.f32 %v6864_v53, %v7365_v46 }
 0x1d9   : > { %v2708_v22 = vadd.f32 %v4460_v4, %v6907_v20  ;;  %v2702_v58 = vpop.f32.mrb[91].mxu0  ;;  %v1908_v20 = vadd.f32 %v6864_v53, %v6842_v0 }
 0x1da   : > { %v2703_v62 = vadd.f32 %v2702_v58, %v6895_v25  ;;  %v3224_v14 = vpop.f32.mrb[106].mxu1 }
 0x1db   : > { %v7024_v45 = vadd.f32 %v2708_v22, %v1907_v18  ;;  %v3226_v63 = vpop.f32.mrb[107].mxu1 }
 0x1dc   : > { %v7026_v47 = vadd.f32 %v2703_v62, %v1906_v49  ;;  %v4463_v56 = vpop.f32.mrb[92].mxu0  ;;  %v7366_v49 = vld [vmem:[#allocation9_spill] sm:$0xff] }
 0x1dd   : > { %v2718_v32 = vadd.f32 %v4463_v56, %v6931_v57  ;;  %v2712_v29 = vpop.f32.mrb[93].mxu0 }
 0x1de   : > { %v2713_v26 = vadd.f32 %v2712_v29, %v6919_v52  ;;  %v3229_v21 = vpop.f32.mrb[108].mxu1 }
 0x1df   : > { %v7034_v25 = vadd.f32 %v2718_v32, %v1909_v10  ;;  %v3231_v13 = vpop.f32.mrb[109].mxu1 }
 0x1e0   : > { %v7036_v50 = vadd.f32 %v2713_v26, %v1908_v20  ;;  %v4466_v55 = vpop.f32.mrb[94].mxu0  ;;  %v7367_v20 = vld [vmem:[#allocation10_spill] sm:$0xff] }
 0x1e1   : > { %v2728_v35 = vadd.f32 %v4466_v55, %v6955_v36  ;;  %v2722_v57 = vpop.f32.mrb[95].mxu0 }
 0x1e2   : > { %v2723_v0 = vadd.f32 %v2722_v57, %v6943_v61  ;;  %v3234_v52 = vpop.f32.mrb[110].mxu1 }
 0x1e3   : > { %v7044_v16 = vadd.f32 %v2728_v35, %v1911_v31  ;;  %v3236_v24 = vpop.f32.mrb[111].mxu1 }
 0x1e4   : > { %v7046_v1 = vadd.f32 %v2723_v0, %v1910_v43  ;;  %v4501_v4 = vpop.f32.mrb[96].mxu0 }
 0x1e5   : > { %v3430_v18 = vadd.f32 %v4501_v4, %v6980_v15  ;;  %v3424_v22 = vpop.f32.mrb[97].mxu0 }
 0x1e6   : > { %v3239_v53 = vpop.f32.mrb[112].mxu1  ;;  %v3425_v61 = vadd.f32 %v3424_v22, %v6968_v33 }
 0x1e7   : > { %v7057_v36 = vadd.f32 %v3430_v18, %v6874_v34  ;;  %v3241_v58 = vpop.f32.mrb[113].mxu1 }
 0x1e8   : > { %v7060_v62 = vadd.f32 %v3425_v61, %v7366_v49  ;;  %v4504_v15 = vpop.f32.mrb[98].mxu0 }
 0x1e9   : > { %3616 = vst [vmem:[%s7053_s15 + $0x8] sm:$0xff] %v7057_v36  ;;  %v3440_v63 = vadd.f32 %v4504_v15, %v3214_v9  ;;  %v3434_v56 = vpop.f32.mrb[99].mxu0 }
 0x1ea   : > { %3615 = vst [vmem:[%s7053_s15] sm:$0xff] %v7060_v62  ;;  %v3244_v10 = vpop.f32.mrb[114].mxu1  ;;  %v3435_v32 = vadd.f32 %v3434_v56, %v6992_v27  ;;  %v3647_v29 = vadd.f32 %v7057_v36, %v7060_v62 }
 0x1eb   : > { %v7068_v33 = vadd.f32 %v3440_v63, %v6886_v6  ;;  %v3246_v34 = vpop.f32.mrb[115].mxu1 }
 0x1ec   : > { %v7073_v26 = vadd.f32 %v3435_v32, %v7367_v20  ;;  %v4507_v13 = vpop.f32.mrb[100].mxu0 }
 0x1ed   : > { %3618 = vst [vmem:[%s7053_s15 + $0x18] sm:$0xff] %v7068_v33  ;;  %v3450_v9 = vadd.f32 %v4507_v13, %v3224_v14  ;;  %v3444_v55 = vpop.f32.mrb[101].mxu0 }
 0x1ee   : > { %3617 = vst [vmem:[%s7053_s15 + $0x10] sm:$0xff] %v7073_v26  ;;  %v3648_v27 = vadd.f32 %v3647_v29, %v7073_v26  ;;  %v3249_v6 = vpop.f32.mrb[116].mxu1  ;;  %v3445_v5 = vadd.f32 %v3444_v55, %v3219_v44 }
 0x1ef   : > { %v7081_v31 = vadd.f32 %v3450_v9, %v6898_v12  ;;  %v3251_v35 = vpop.f32.mrb[117].mxu1 }
 0x1f0   : > { %v7084_v57 = vadd.f32 %v3445_v5, %v6900_v28  ;;  %v3649_v46 = vadd.f32 %v3648_v27, %v7068_v33  ;;  %v4510_v43 = vpop.f32.mrb[102].mxu0 }
 0x1f1   : > { %3620 = vst [vmem:[%s7053_s15 + $0x28] sm:$0xff] %v7081_v31  ;;  %v3460_v14 = vadd.f32 %v4510_v43, %v3234_v52  ;;  %v3454_v0 = vpop.f32.mrb[103].mxu0 }
 0x1f2   : > { %3619 = vst [vmem:[%s7053_s15 + $0x20] sm:$0xff] %v7084_v57  ;;  %v3650_v44 = vadd.f32 %v3649_v46, %v7084_v57  ;;  %v3254_v24 = vpop.f32.mrb[118].mxu1  ;;  %v3455_v12 = vadd.f32 %v3454_v0, %v3229_v21 }
 0x1f3   : > { %v7093_v4 = vadd.f32 %v3460_v14, %v6910_v54  ;;  %v3256_v18 = vpop.f32.mrb[119].mxu1 }
 0x1f4   : > { %v7096_v28 = vadd.f32 %v3455_v12, %v6912_v59  ;;  %v3651_v22 = vadd.f32 %v3650_v44, %v7081_v31  ;;  %v4513_v61 = vpop.f32.mrb[104].mxu0 }
 0x1f5   : > { %3622 = vst [vmem:[%s7053_s15 + $0x38] sm:$0xff] %v7093_v4  ;;  %v3470_v52 = vadd.f32 %v4513_v61, %v3244_v10  ;;  %v3464_v58 = vpop.f32.mrb[105].mxu0 }
 0x1f6   : > { %3621 = vst [vmem:[%s7053_s15 + $0x30] sm:$0xff] %v7096_v28  ;;  %v3652_v21 = vadd.f32 %v3651_v22, %v7096_v28  ;;  %v3259_v49 = vpop.f32.mrb[120].mxu1  ;;  %v3465_v54 = vadd.f32 %v3464_v58, %v3239_v53 }
 0x1f7   : > { %v7105_v15 = vadd.f32 %v3470_v52, %v6922_v60  ;;  %v3261_v63 = vpop.f32.mrb[121].mxu1 }
 0x1f8   : > { %v7108_v59 = vadd.f32 %v3465_v54, %v6924_v38  ;;  %v3653_v56 = vadd.f32 %v3652_v21, %v7093_v4  ;;  %v4516_v32 = vpop.f32.mrb[106].mxu0 }
 0x1f9   : > { %3624 = vst [vmem:[%s7053_s15 + $0x48] sm:$0xff] %v7105_v15  ;;  %v3480_v10 = vadd.f32 %v4516_v32, %v3254_v24  ;;  %v3474_v34 = vpop.f32.mrb[107].mxu0 }
 0x1fa   : > { %3623 = vst [vmem:[%s7053_s15 + $0x40] sm:$0xff] %v7108_v59  ;;  %v3654_v53 = vadd.f32 %v3653_v56, %v7108_v59  ;;  %v3264_v29 = vpop.f32.mrb[122].mxu1  ;;  %v3475_v60 = vadd.f32 %v3474_v34, %v3249_v6 }
 0x1fb   : > { %v7117_v20 = vadd.f32 %v3480_v10, %v6934_v37  ;;  %v3266_v38 = vpop.f32.mrb[123].mxu1 }
 0x1fc   : > { %v7120_v13 = vadd.f32 %v3475_v60, %v6936_v51  ;;  %v3655_v9 = vadd.f32 %v3654_v53, %v7105_v15  ;;  %v4519_v55 = vpop.f32.mrb[108].mxu0 }
 0x1fd   : > { %3626 = vst [vmem:[%s7053_s15 + $0x58] sm:$0xff] %v7117_v20  ;;  %v3490_v27 = vadd.f32 %v4519_v55, %v3264_v29  ;;  %v3484_v5 = vpop.f32.mrb[109].mxu0 }
 0x1fe   : > { %3625 = vst [vmem:[%s7053_s15 + $0x50] sm:$0xff] %v7120_v13  ;;  %v3269_v35 = vpop.f32.mrb[124].mxu1  ;;  %v3485_v6 = vadd.f32 %v3484_v5, %v3259_v49  ;;  %v3656_v37 = vadd.f32 %v3655_v9, %v7120_v13 }
 0x1ff   : > { %v7129_v46 = vadd.f32 %v3490_v27, %v6946_v2  ;;  %v3271_v51 = vpop.f32.mrb[125].mxu1 }
 0x200   : > { %v7132_v43 = vadd.f32 %v3485_v6, %v6948_v30  ;;  %v4522_v14 = vpop.f32.mrb[110].mxu0  ;;  %v3657_v12 = vadd.f32 %v3656_v37, %v7117_v20 }
 0x201   : > { %3628 = vst [vmem:[%s7053_s15 + $0x68] sm:$0xff] %v7129_v46  ;;  %v3494_v0 = vpop.f32.mrb[111].mxu0 }
 0x202   : > { %3627 = vst [vmem:[%s7053_s15 + $0x60] sm:$0xff] %v7132_v43  ;;  %v3274_v44 = vpop.f32.mrb[126].mxu1  ;;  %v3495_v24 = vadd.f32 %v3494_v0, %v3269_v35  ;;  %v3658_v21 = vadd.f32 %v3657_v12, %v7132_v43 }
 0x203   : > { %v3500_v18 = vadd.f32 %v4522_v14, %v3274_v44  ;;  %v3276_v22 = vpop.f32.mrb[127].mxu1 }
 0x204   : > { %v7140_v2 = vadd.f32 %v3495_v24, %v6960_v42  ;;  %v4525_v61 = vpop.f32.mrb[112].mxu0 }
 0x205   : > { %v7143_v30 = vadd.f32 %v3500_v18, %v6958_v48  ;;  %v3504_v52 = vpop.f32.mrb[113].mxu0  ;;  %v3659_v48 = vadd.f32 %v3658_v21, %v7129_v46 }
 0x206   : > { %3629 = vst [vmem:[%s7053_s15 + $0x70] sm:$0xff] %v7140_v2  ;;  %v3279_v58 = vpop.f32.mrb[128].mxu1 }
 0x207   : > { %3630 = vst [vmem:[%s7053_s15 + $0x78] sm:$0xff] %v7143_v30  ;;  %v3505_v49 = vadd.f32 %v3504_v52, %v3279_v58  ;;  %v3281_v54 = vpop.f32.mrb[129].mxu1  ;;  %v3660_v9 = vadd.f32 %v3659_v48, %v7140_v2 }
 0x208   : > { %v4528_v63 = vpop.f32.mrb[114].mxu0 }
 0x209   : > { %v7151_v56 = vadd.f32 %v3505_v49, %v6972_v40  ;;  %v3514_v42 = vpop.f32.mrb[115].mxu0  ;;  %v3661_v37 = vadd.f32 %v3660_v9, %v7143_v30 }
 0x20a   : > { %v3284_v32 = vpop.f32.mrb[130].mxu1 }
 0x20b   : > { %3631 = vst [vmem:[%s7053_s15 + $0x80] sm:$0xff] %v7151_v56  ;;  %v3510_v10 = vadd.f32 %v4525_v61, %v3284_v32  ;;  %v3286_v34 = vpop.f32.mrb[131].mxu1  ;;  %v3662_v12 = vadd.f32 %v3661_v37, %v7151_v56 }
 0x20c   : > { %v4531_v53 = vpop.f32.mrb[116].mxu0 }
 0x20d   : > { %v7157_v29 = vadd.f32 %v3510_v10, %v6970_v8  ;;  %v3524_v60 = vpop.f32.mrb[117].mxu0 }
 0x20e   : > { %v3289_v38 = vpop.f32.mrb[132].mxu1 }
 0x20f   : > { %3632 = vst [vmem:[%s7053_s15 + $0x88] sm:$0xff] %v7157_v29  ;;  %v3515_v40 = vadd.f32 %v3514_v42, %v3289_v38  ;;  %v3291_v55 = vpop.f32.mrb[133].mxu1  ;;  %v3663_v61 = vadd.f32 %v3662_v12, %v7157_v29 }
 0x210   : > { %v4534_v27 = vpop.f32.mrb[118].mxu0 }
 0x211   : > { %v7163_v5 = vadd.f32 %v3515_v40, %v6984_v23  ;;  %v3534_v35 = vpop.f32.mrb[119].mxu0 }
 0x212   : > { %v3294_v6 = vpop.f32.mrb[134].mxu1 }
 0x213   : > { %3633 = vst [vmem:[%s7053_s15 + $0x90] sm:$0xff] %v7163_v5  ;;  %v3520_v8 = vadd.f32 %v4528_v63, %v3294_v6  ;;  %v3296_v51 = vpop.f32.mrb[135].mxu1 }
 0x214   : > { %v4537_v14 = vpop.f32.mrb[120].mxu0 }
 0x215   : > { %v7169_v0 = vadd.f32 %v3520_v8, %v6982_v7  ;;  %v3544_v44 = vpop.f32.mrb[121].mxu0  ;;  %v3664_v7 = vadd.f32 %v3663_v61, %v7163_v5 }
 0x216   : > { %v3299_v24 = vpop.f32.mrb[136].mxu1 }
 0x217   : > { %3634 = vst [vmem:[%s7053_s15 + $0x98] sm:$0xff] %v7169_v0  ;;  %v3525_v23 = vadd.f32 %v3524_v60, %v3299_v24  ;;  %v3301_v18 = vpop.f32.mrb[137].mxu1  ;;  %v3665_v42 = vadd.f32 %v3664_v7, %v7169_v0 }
 0x218   : > { %v4540_v22 = vpop.f32.mrb[122].mxu0 }
 0x219   : > { %v7176_v52 = vadd.f32 %v3525_v23, %v6996_v41  ;;  %v3554_v58 = vpop.f32.mrb[123].mxu0 }
 0x21a   : > { %v3304_v21 = vpop.f32.mrb[138].mxu1 }
 0x21b   : > { %3635 = vst [vmem:[%s7053_s15 + $0xa0] sm:$0xff] %v7176_v52  ;;  %v3530_v49 = vadd.f32 %v4531_v53, %v3304_v21  ;;  %v3306_v54 = vpop.f32.mrb[139].mxu1  ;;  %v3666_v41 = vadd.f32 %v3665_v42, %v7176_v52 }
 0x21c   : > { %v4543_v63 = vpop.f32.mrb[124].mxu0 }
 0x21d   : > { %v7183_v32 = vadd.f32 %v3530_v49, %v6994_v39  ;;  %v3564_v48 = vpop.f32.mrb[125].mxu0 }
 0x21e   : > { %v3309_v10 = vpop.f32.mrb[140].mxu1 }
 0x21f   : > { %3636 = vst [vmem:[%s7053_s15 + $0xa8] sm:$0xff] %v7183_v32  ;;  %v3535_v34 = vadd.f32 %v3534_v35, %v3309_v10  ;;  %v3311_v60 = vpop.f32.mrb[141].mxu1  ;;  %v3667_v53 = vadd.f32 %v3666_v41, %v7183_v32 }
 0x220   : > { %v4546_v38 = vpop.f32.mrb[126].mxu0 }
 0x221   : > { %v7190_v9 = vadd.f32 %v3535_v34, %v7006_v17  ;;  %v3574_v40 = vpop.f32.mrb[127].mxu0 }
 0x222   : > { %v3314_v55 = vpop.f32.mrb[142].mxu1 }
 0x223   : > { %3637 = vst [vmem:[%s7053_s15 + $0xb0] sm:$0xff] %v7190_v9  ;;  %v3668_v39 = vadd.f32 %v3667_v53, %v7190_v9  ;;  %v3540_v6 = vadd.f32 %v4534_v27, %v3314_v55  ;;  %v3316_v37 = vpop.f32.mrb[143].mxu1 }
 0x225   : > { %v7196_v8 = vadd.f32 %v3540_v6, %v7004_v11 }
 0x226   : > { %v3319_v35 = vpop.f32.mrb[144].mxu1 }
 0x227   : > { %3638 = vst [vmem:[%s7053_s15 + $0xb8] sm:$0xff] %v7196_v8  ;;  %v3669_v51 = vadd.f32 %v3668_v39, %v7196_v8  ;;  %v3545_v24 = vadd.f32 %v3544_v44, %v3319_v35  ;;  %v3321_v17 = vpop.f32.mrb[145].mxu1 }
 0x229   : > { %v7202_v12 = vadd.f32 %v3545_v24, %v7016_v3 }
 0x22a   : > { %v3324_v23 = vpop.f32.mrb[146].mxu1 }
 0x22b   : > { %3639 = vst [vmem:[%s7053_s15 + $0xc0] sm:$0xff] %v7202_v12  ;;  %v3670_v27 = vadd.f32 %v3669_v51, %v7202_v12  ;;  %v3550_v18 = vadd.f32 %v4537_v14, %v3324_v23  ;;  %v3326_v11 = vpop.f32.mrb[147].mxu1 }
 0x22d   : > { %v7208_v61 = vadd.f32 %v3550_v18, %v7014_v19 }
 0x22e   : > { %v3329_v21 = vpop.f32.mrb[148].mxu1 }
 0x22f   : > { %3640 = vst [vmem:[%s7053_s15 + $0xc8] sm:$0xff] %v7208_v61  ;;  %v3671_v44 = vadd.f32 %v3670_v27, %v7208_v61  ;;  %v3555_v7 = vadd.f32 %v3554_v58, %v3329_v21  ;;  %v3331_v3 = vpop.f32.mrb[149].mxu1 }
 0x231   : > { %v7214_v49 = vadd.f32 %v3555_v7, %v7026_v47 }
 0x232   : > { %v3334_v54 = vpop.f32.mrb[150].mxu1 }
 0x233   : > { %3641 = vst [vmem:[%s7053_s15 + $0xd0] sm:$0xff] %v7214_v49  ;;  %v3672_v14 = vadd.f32 %v3671_v44, %v7214_v49  ;;  %v3560_v42 = vadd.f32 %v4540_v22, %v3334_v54  ;;  %v3336_v19 = vpop.f32.mrb[151].mxu1 }
 0x235   : > { %v7220_v10 = vadd.f32 %v3560_v42, %v7024_v45 }
 0x236   : > { %v3339_v41 = vpop.f32.mrb[152].mxu1 }
 0x237   : > { %3642 = vst [vmem:[%s7053_s15 + $0xd8] sm:$0xff] %v7220_v10  ;;  %v3673_v58 = vadd.f32 %v3672_v14, %v7220_v10  ;;  %v3565_v34 = vadd.f32 %v3564_v48, %v3339_v41  ;;  %v3341_v47 = vpop.f32.mrb[153].mxu1 }
 0x239   : > { %v7226_v60 = vadd.f32 %v3565_v34, %v7036_v50 }
 0x23a   : > { %v3344_v53 = vpop.f32.mrb[154].mxu1 }
 0x23b   : > { %3643 = vst [vmem:[%s7053_s15 + $0xe0] sm:$0xff] %v7226_v60  ;;  %v3674_v22 = vadd.f32 %v3673_v58, %v7226_v60  ;;  %v3570_v55 = vadd.f32 %v4543_v63, %v3344_v53  ;;  %v3346_v45 = vpop.f32.mrb[155].mxu1 }
 0x23d   : > { %v7232_v39 = vadd.f32 %v3570_v55, %v7034_v25 }
 0x23e   : > { %v3349_v6 = vpop.f32.mrb[156].mxu1 }
 0x23f   : > { %3644 = vst [vmem:[%s7053_s15 + $0xe8] sm:$0xff] %v7232_v39  ;;  %v3675_v48 = vadd.f32 %v3674_v22, %v7232_v39  ;;  %v3575_v37 = vadd.f32 %v3574_v40, %v3349_v6  ;;  %v3351_v35 = vpop.f32.mrb[157].mxu1 }
 0x241   : > { %v7238_v50 = vadd.f32 %v3575_v37, %v7046_v1 }
 0x242   : > { %v3354_v51 = vpop.f32.mrb[158].mxu1 }
 0x243   : > { %3645 = vst [vmem:[%s7053_s15 + $0xf0] sm:$0xff] %v7238_v50  ;;  %v3676_v24 = vadd.f32 %v3675_v48, %v7238_v50  ;;  %v3580_v63 = vadd.f32 %v4546_v38, %v3354_v51  ;;  %v3356_v17 = vpop.f32.mrb[159].mxu1 }
 0x245   : > { %v7244_v25 = vadd.f32 %v3580_v63, %v7044_v16 }
 0x247   : > { %3646 = vst [vmem:[%s7053_s15 + $0xf8] sm:$0xff] %v7244_v25  ;;  %v3677_v23 = vadd.f32 %v3676_v24, %v7244_v25 }
 0x249   : > { %v3678_v27 = vrot.slane %v3677_v23, 4 }
 0x24b   : > { %v3679_v40 = vadd.f32 %v3678_v27, %v3677_v23 }
 0x24d   : > { %v3680_v18 = vrot.slane %v3679_v40, 2 }
 0x24f   : > { %v3681_v11 = vadd.f32 %v3680_v18, %v3679_v40 }
 0x251   : > { %v3682_v1 = vrot.slane %v3681_v11, 1 }
 0x253   : > { %v3683_v21 = vadd.f32 %v3682_v1, %v3681_v11 }
 0x255   : > { %v7249_v44 = vmul.f32 0.00390625, %v3683_v21 }
 0x257   : > { %v3685_v7 = vsub.f32 %v7060_v62, %v7249_v44  ;;  %v3686_v38 = vsub.f32 %v7057_v36, %v7249_v44  ;;  %v3687_v16 = vsub.f32 %v7073_v26, %v7249_v44  ;;  %v3688_v14 = vsub.f32 %v7068_v33, %v7249_v44 }
 0x258   : > { %v3689_v42 = vsub.f32 %v7084_v57, %v7249_v44  ;;  %v3690_v58 = vsub.f32 %v7081_v31, %v7249_v44  ;;  %v3691_v36 = vsub.f32 %v7096_v28, %v7249_v44  ;;  %v3692_v53 = vsub.f32 %v7093_v4, %v7249_v44 }
 0x259   : > { %v3717_v3 = vmul.f32 %v3685_v7, %v3685_v7  ;;  %v3718_v54 = vmul.f32 %v3686_v38, %v3686_v38  ;;  %v3719_v19 = vmul.f32 %v3687_v16, %v3687_v16  ;;  %v3720_v62 = vmul.f32 %v3688_v14, %v3688_v14 }
 0x25a   : > { %v3721_v47 = vmul.f32 %v3689_v42, %v3689_v42  ;;  %v3722_v22 = vmul.f32 %v3690_v58, %v3690_v58  ;;  %v3693_v57 = vsub.f32 %v7108_v59, %v7249_v44  ;;  %v3723_v55 = vmul.f32 %v3691_v36, %v3691_v36 }
 0x25b   : > { %v3749_v41 = vadd.f32 %v3718_v54, %v3717_v3  ;;  %v3694_v31 = vsub.f32 %v7105_v15, %v7249_v44  ;;  %v3724_v6 = vmul.f32 %v3692_v53, %v3692_v53  ;;  %v3695_v28 = vsub.f32 %v7120_v13, %v7249_v44 }
 0x25c   : > { %v3725_v37 = vmul.f32 %v3693_v57, %v3693_v57  ;;  %v3696_v4 = vsub.f32 %v7117_v20, %v7249_v44  ;;  %v3697_v59 = vsub.f32 %v7132_v43, %v7249_v44  ;;  %v3698_v15 = vsub.f32 %v7129_v46, %v7249_v44 }
 0x25d   : > { %v3750_v34 = vadd.f32 %v3749_v41, %v3719_v19  ;;  %v3726_v51 = vmul.f32 %v3694_v31, %v3694_v31  ;;  %v3727_v63 = vmul.f32 %v3695_v28, %v3695_v28  ;;  %v3699_v13 = vsub.f32 %v7140_v2, %v7249_v44 }
 0x25e   : > { %v3728_v23 = vmul.f32 %v3696_v4, %v3696_v4  ;;  %v3729_v40 = vmul.f32 %v3697_v59, %v3697_v59  ;;  %v3700_v20 = vsub.f32 %v7143_v30, %v7249_v44  ;;  %v3730_v11 = vmul.f32 %v3698_v15, %v3698_v15 }
 0x25f   : > { %v3751_v26 = vadd.f32 %v3750_v34, %v3720_v62  ;;  %v3701_v43 = vsub.f32 %v7151_v56, %v7249_v44  ;;  %v3731_v21 = vmul.f32 %v3699_v13, %v3699_v13  ;;  %v3702_v46 = vsub.f32 %v7157_v29, %v7249_v44 }
 0x260   : > { %v3732_v38 = vmul.f32 %v3700_v20, %v3700_v20  ;;  %v3703_v2 = vsub.f32 %v7163_v5, %v7249_v44  ;;  %v3704_v30 = vsub.f32 %v7169_v0, %v7249_v44  ;;  %v3705_v56 = vsub.f32 %v7176_v52, %v7249_v44 }
 0x261   : > { %v3752_v33 = vadd.f32 %v3751_v26, %v3721_v47  ;;  %v3733_v3 = vmul.f32 %v3701_v43, %v3701_v43  ;;  %v3734_v14 = vmul.f32 %v3702_v46, %v3702_v46  ;;  %v3706_v29 = vsub.f32 %v7183_v32, %v7249_v44 }
 0x262   : > { %v3735_v19 = vmul.f32 %v3703_v2, %v3703_v2  ;;  %v3736_v58 = vmul.f32 %v3704_v30, %v3704_v30  ;;  %v3707_v5 = vsub.f32 %v7190_v9, %v7249_v44  ;;  %v3737_v34 = vmul.f32 %v3705_v56, %v3705_v56 }
 0x263   : > { %v3753_v45 = vadd.f32 %v3752_v33, %v3722_v22  ;;  %v3708_v0 = vsub.f32 %v7196_v8, %v7249_v44  ;;  %v3738_v47 = vmul.f32 %v3706_v29, %v3706_v29  ;;  %v3709_v52 = vsub.f32 %v7202_v12, %v7249_v44 }
 0x264   : > { %v3739_v53 = vmul.f32 %v3707_v5, %v3707_v5  ;;  %v3710_v32 = vsub.f32 %v7208_v61, %v7249_v44  ;;  %v3711_v9 = vsub.f32 %v7214_v49, %v7249_v44  ;;  %v3712_v8 = vsub.f32 %v7220_v10, %v7249_v44 }
 0x265   : > { %v3754_v48 = vadd.f32 %v3753_v45, %v3723_v55  ;;  %v3740_v33 = vmul.f32 %v3708_v0, %v3708_v0  ;;  %v3741_v55 = vmul.f32 %v3709_v52, %v3709_v52  ;;  %v3713_v12 = vsub.f32 %v7226_v60, %v7249_v44 }
 0x266   : > { %v3742_v31 = vmul.f32 %v3710_v32, %v3710_v32  ;;  %v3714_v61 = vsub.f32 %v7232_v39, %v7249_v44  ;;  %v3715_v49 = vsub.f32 %v7238_v50, %v7249_v44  ;;  %v3716_v10 = vsub.f32 %v7244_v25, %v7249_v44 }
 0x267   : > { %v3755_v35 = vadd.f32 %v3754_v48, %v3724_v6  ;;  %v3743_v48 = vmul.f32 %v3711_v9, %v3711_v9  ;;  %v3745_v4 = vmul.f32 %v3713_v12, %v3713_v12 }
 0x269   : > { %v3756_v24 = vadd.f32 %v3755_v35, %v3725_v37  ;;  %v3744_v37 = vmul.f32 %v3712_v8, %v3712_v8 }
 0x26b   : > { %v3757_v17 = vadd.f32 %v3756_v24, %v3726_v51  ;;  %v3746_v24 = vmul.f32 %v3714_v61, %v3714_v61 }
 0x26d   : > { %v3758_v27 = vadd.f32 %v3757_v17, %v3727_v63  ;;  %v3747_v63 = vmul.f32 %v3715_v49, %v3715_v49  ;;  %v3748_v17 = vmul.f32 %v3716_v10, %v3716_v10 }
 0x26f   : > { %v3759_v18 = vadd.f32 %v3758_v27, %v3728_v23 }
 0x271   : > { %v3760_v1 = vadd.f32 %v3759_v18, %v3729_v40 }
 0x273   : > { %v3761_v7 = vadd.f32 %v3760_v1, %v3730_v11 }
 0x275   : > { %v3762_v16 = vadd.f32 %v3761_v7, %v3731_v21 }
 0x277   : > { %v3763_v54 = vadd.f32 %v3762_v16, %v3732_v38 }
 0x279   : > { %v3764_v42 = vadd.f32 %v3763_v54, %v3733_v3 }
 0x27b   : > { %v3765_v41 = vadd.f32 %v3764_v42, %v3734_v14 }
 0x27d   : > { %v3766_v62 = vadd.f32 %v3765_v41, %v3735_v19 }
 0x27f   : > { %v3767_v36 = vadd.f32 %v3766_v62, %v3736_v58 }
 0x281   : > { %v3768_v26 = vadd.f32 %v3767_v36, %v3737_v34 }
 0x283   : > { %v3769_v22 = vadd.f32 %v3768_v26, %v3738_v47 }
 0x285   : > { %v3770_v57 = vadd.f32 %v3769_v22, %v3739_v53 }
 0x287   : > { %v3771_v45 = vadd.f32 %v3770_v57, %v3740_v33 }
 0x289   : > { %v3772_v6 = vadd.f32 %v3771_v45, %v3741_v55 }
 0x28b   : > { %v3773_v28 = vadd.f32 %v3772_v6, %v3742_v31 }
 0x28d   : > { %v3774_v35 = vadd.f32 %v3773_v28, %v3743_v48 }
 0x28f   : > { %v3775_v51 = vadd.f32 %v3774_v35, %v3744_v37 }
 0x291   : > { %v3776_v59 = vadd.f32 %v3775_v51, %v3745_v4 }
 0x293   : > { %v3777_v60 = vadd.f32 %v3776_v59, %v3746_v24 }
 0x295   : > { %v3778_v15 = vadd.f32 %v3777_v60, %v3747_v63 }
 0x297   : > { %v3779_v23 = vadd.f32 %v3778_v15, %v3748_v17 }
 0x299   : > { %v3780_v27 = vrot.slane %v3779_v23, 4 }
 0x29b   : > { %v3781_v39 = vadd.f32 %v3780_v27, %v3779_v23 }
 0x29d   : > { %v3782_v13 = vrot.slane %v3781_v39, 2 }
 0x29f   : > { %v3783_v40 = vadd.f32 %v3782_v13, %v3781_v39 }
 0x2a1   : > { %v3784_v18 = vrot.slane %v3783_v40, 1 }
 0x2a3   : > { %v3785_v50 = vadd.f32 %v3784_v18, %v3783_v40 }
 0x2a5   : > { %v3787_v25 = vsel %vm3786_vm2, %v7249_v44, %v3785_v50 }
 0x2a6   : > { %3788 = vst [vmem:[%s736_s21] sm:$0x3] %v3787_v25 }
 0x2a7 PF: > { %s22_s19 = sadd.s32 1, %s4867_s19   ;;  %s7368_s17 = smov %s4863_s18 }
 0x2a8   : > { %p19_p5 = scmp.ge.s32.totalorder %s22_s19, 4   ;;  %s7369_s18 = smov %s7371_s20 }
 0x2aa   :  { %21 = sbr.rel (!%p19_p5) target bundleno = 2 (0x2), region = 122 }

</bundles_post_ra>
